<compile_context>
chip_gen: v7x
topology: tpu7x:2x2x1
jax: 0.10.0
libtpu: 0.0.40
codegen_flags: <defaults>
</compile_context>

<pallas_src>
import functools
import math

import jax
import jax.numpy as jnp
from jax.experimental import pallas as pl
from jax.experimental.pallas import tpu as pltpu


# ----------------------------------------------------------------------------
# Kernel 1: fused CNN front-end (all 3 conv stages + adaptive average pool)
# ----------------------------------------------------------------------------

def _cnn_frontend_kernel(x_ref, w1_ref, b1_ref, w2_ref, b2_ref, w3_ref, b3_ref,
                         o_ref, s1, s2, s3, s4, *, B, L, T, C1, C2, C3):
    L1, L2, L3 = L // 2, L // 4, L // 8

    # ---- stage 1: Cin=1 -> C1, k=5, pad=2 (VPU broadcast taps; input pre-padded) ----
    for b in range(B):
        xp = x_ref[b]                                        # (L+4, 1)
        acc = jnp.zeros((L, C1), jnp.float32)
        for i in range(5):                                   # static tap loop
            acc = acc + xp[i:i + L, :] * w1_ref[i]           # (L,1)*(1,C1) outer product
        s1[pl.ds(b * L, L), :] = jnp.maximum(acc + b1_ref[...], 0.0)
    # MaxPool(2,2): stride-2 sublane reads (batch segments have even length)
    h1 = jnp.maximum(s1[pl.ds(0, B * L1, stride=2), :],
                     s1[pl.ds(1, B * L1, stride=2), :])      # (B*L1, C1)

    # ---- stage 2: C1 -> C2, k=3, pad=1 (single patch-slab matmul, K = 3*C1) ----
    z2 = jnp.zeros((1, C1), jnp.float32)
    for b in range(B):
        hb = h1[b * L1:(b + 1) * L1, :]
        hp = jnp.concatenate([z2, hb, z2], axis=0)           # (L1+2, C1) padded
        patch = jnp.concatenate([hp[0:L1, :], hp[1:L1 + 1, :], hp[2:L1 + 2, :]], axis=1)
        acc = jnp.dot(patch, w2_ref[...], preferred_element_type=jnp.float32) + b2_ref[...]
        s2[pl.ds(b * L1, L1), :] = jnp.maximum(acc, 0.0)
    h2 = jnp.maximum(s2[pl.ds(0, B * L2, stride=2), :],
                     s2[pl.ds(1, B * L2, stride=2), :])      # (B*L2, C2)

    # ---- stage 3: C2 -> C3, k=3, pad=1 ----
    z3 = jnp.zeros((1, C2), jnp.float32)
    for b in range(B):
        hb = h2[b * L2:(b + 1) * L2, :]
        hp = jnp.concatenate([z3, hb, z3], axis=0)
        patch = jnp.concatenate([hp[0:L2, :], hp[1:L2 + 1, :], hp[2:L2 + 2, :]], axis=1)
        acc = jnp.dot(patch, w3_ref[...], preferred_element_type=jnp.float32) + b3_ref[...]
        s3[pl.ds(b * L2, L2), :] = jnp.maximum(acc, 0.0)
    s4[...] = jnp.maximum(s3[pl.ds(0, B * L3, stride=2), :],
                          s3[pl.ds(1, B * L3, stride=2), :])  # (B*L3, C3)

    # ---- AdaptiveAvgPool1d(T) with equal windows (L3 % T == 0) + permute(0,2,1) ----
    # Output rows are b*T + t, lane-dense C3 columns; feeds the LSTM kernel directly.
    win = L3 // T
    acc = s4[pl.ds(0, B * T, stride=win), :]
    for j in range(1, win):
        acc = acc + s4[pl.ds(j, B * T, stride=win), :]
    o_ref[...] = (acc * (1.0 / win)).astype(o_ref.dtype)


def pallas_cnn_frontend(x_pad, conv_params, T):
    """x_pad: (B, L+4, 1) channels-last, zero-padded for the k=5 first conv.
    Returns (B*T, C3) with rows ordered b*T + t."""
    B, Lp, _ = x_pad.shape
    L = Lp - 4
    (w1, b1), (w2, b2), (w3, b3) = conv_params
    C1, C2, C3 = b1.shape[1], b2.shape[1], b3.shape[1]
    L1, L2, L3 = L // 2, L // 4, L // 8
    return pl.pallas_call(
        functools.partial(_cnn_frontend_kernel, B=B, L=L, T=T, C1=C1, C2=C2, C3=C3),
        out_shape=jax.ShapeDtypeStruct((B * T, C3), jnp.float32),
        in_specs=[pl.BlockSpec(memory_space=pltpu.MemorySpace.VMEM)] * 7,
        out_specs=pl.BlockSpec(memory_space=pltpu.MemorySpace.VMEM),
        scratch_shapes=[pltpu.VMEM((B * L, C1), jnp.float32),
                        pltpu.VMEM((B * L1, C2), jnp.float32),
                        pltpu.VMEM((B * L2, C3), jnp.float32),
                        pltpu.VMEM((B * L3, C3), jnp.float32)],
    )(x_pad, w1, b1, w2, b2, w3, b3)


# ----------------------------------------------------------------------------
# Kernel 2: fused bidirectional LSTM (input projection + unrolled recurrence)
# ----------------------------------------------------------------------------

def _bilstm_kernel(x_ref, wih_ref, bih_ref, whh_ref, o_ref, *, B, T, H):
    """x_ref: (B*T, C) with rows b*T+t; wih_ref: (C, 8H) = [W_ih_fwd | W_ih_bwd];
    bih_ref: (1, 8H) = b_ih + b_hh for both directions; whh_ref: (2, H, 4H).
    Gate order i,f,g,o (torch.nn.LSTM). Writes (B*T, 2H) = [h_fwd | h_bwd] per row."""
    G = 4 * H
    # hoisted input projection for BOTH directions, kept VMEM/vreg resident
    pre = (jnp.dot(x_ref[...], wih_ref[...], preferred_element_type=jnp.float32)
           + bih_ref[...])                                   # (B*T, 8H)
    whh_f = whh_ref[0]
    whh_b = whh_ref[1]
    h = jnp.zeros((2 * B, H), jnp.float32)                   # rows: [fwd b0..bB-1 | bwd b0..]
    c = jnp.zeros((2 * B, H), jnp.float32)
    for t in range(T):                                       # fully unrolled (straight-line)
        tb = T - 1 - t                                       # backward-stream time index
        pre_t = jnp.concatenate(
            [pre[b * T + t:b * T + t + 1, 0:G] for b in range(B)]
            + [pre[b * T + tb:b * T + tb + 1, G:2 * G] for b in range(B)], axis=0)
        gh = jnp.concatenate(
            [jnp.dot(h[:B], whh_f, preferred_element_type=jnp.float32),
             jnp.dot(h[B:], whh_b, preferred_element_type=jnp.float32)], axis=0)
        gates = pre_t + gh                                   # (2B, 4H)
        i_g = jax.nn.sigmoid(gates[:, 0:H])
        f_g = jax.nn.sigmoid(gates[:, H:2 * H])
        g_g = jnp.tanh(gates[:, 2 * H:3 * H])
        o_g = jax.nn.sigmoid(gates[:, 3 * H:4 * H])
        c = f_g * c + i_g * g_g
        h = o_g * jnp.tanh(c)
        for b in range(B):                                   # write (B*T, 2H) layout directly
            o_ref[pl.ds(b * T + t, 1), 0:H] = h[b:b + 1, :]
            o_ref[pl.ds(b * T + tb, 1), H:2 * H] = h[B + b:B + b + 1, :]


def pallas_bilstm(x_flat, w_cat, b_cat, w_hh, B, T):
    H = w_hh.shape[1]
    return pl.pallas_call(
        functools.partial(_bilstm_kernel, B=B, T=T, H=H),
        out_shape=jax.ShapeDtypeStruct((B * T, 2 * H), jnp.float32),
        in_specs=[pl.BlockSpec(memory_space=pltpu.MemorySpace.VMEM)] * 4,
        out_specs=pl.BlockSpec(memory_space=pltpu.MemorySpace.VMEM),
    )(x_flat, w_cat, b_cat, w_hh)


# ----------------------------------------------------------------------------
# Kernel 3: head-major attention + residual + LayerNorm + seq-mean + MLP head
# ----------------------------------------------------------------------------

def _attn_ln_mlp_kernel(x_ref, wq_ref, bq_ref, wk_ref, bk_ref, wv_ref, bv_ref,
                        wo_ref, bo_ref, g_ref, be_ref,
                        w1_ref, b1_ref, w2_ref, b2_ref, w3_ref, b3_ref, o_ref,
                        *, B, T, D, nH):
    x = x_ref[...]                                           # (B*T, D) = lstm_out flattened
    hd = D // nH
    scale = 1.0 / math.sqrt(hd)
    attn = jnp.zeros((B * T, D), jnp.float32)
    for hh in range(nH):                                     # head-major weights: no lane slicing
        q = jnp.dot(x, wq_ref[hh], preferred_element_type=jnp.float32) + bq_ref[hh]
        k = jnp.dot(x, wk_ref[hh], preferred_element_type=jnp.float32) + bk_ref[hh]
        v = jnp.dot(x, wv_ref[hh], preferred_element_type=jnp.float32) + bv_ref[hh]
        ctx = []
        for b in range(B):                                   # tiny static batch loop
            qb = q[b * T:(b + 1) * T, :]
            kb = k[b * T:(b + 1) * T, :]
            vb = v[b * T:(b + 1) * T, :]
            s = jnp.dot(qb, kb.T, preferred_element_type=jnp.float32) * scale
            s = s - jnp.max(s, axis=-1, keepdims=True)
            p = jnp.exp(s)
            p = p * pl.reciprocal(jnp.sum(p, axis=-1, keepdims=True), approx=True)
            ctx.append(jnp.dot(p, vb, preferred_element_type=jnp.float32))
        ctx_h = jnp.concatenate(ctx, axis=0)                 # (B*T, hd)
        # out-projection accumulated per head: ctx @ Wo = sum_h ctx_h @ Wo[h]
        attn = attn + jnp.dot(ctx_h, wo_ref[hh], preferred_element_type=jnp.float32)
    attn = attn + bo_ref[...]
    # residual + LayerNorm (eps=1e-5, biased variance)
    y = attn + x
    mu = jnp.mean(y, axis=-1, keepdims=True)
    var = jnp.mean(jnp.square(y - mu), axis=-1, keepdims=True)
    y = (y - mu) * jax.lax.rsqrt(var + 1e-5) * g_ref[...] + be_ref[...]
    # mean over the sequence axis per batch element, then classifier MLP (eval dropout = id)
    pooled = jnp.concatenate(
        [jnp.mean(y[b * T:(b + 1) * T, :], axis=0, keepdims=True) for b in range(B)],
        axis=0)                                              # (B, D)
    h1 = jnp.maximum(jnp.dot(pooled, w1_ref[...], preferred_element_type=jnp.float32)
                     + b1_ref[...], 0.0)
    h2 = jnp.maximum(jnp.dot(h1, w2_ref[...], preferred_element_type=jnp.float32)
                     + b2_ref[...], 0.0)
    o_ref[...] = (jnp.dot(h2, w3_ref[...], preferred_element_type=jnp.float32)
                  + b3_ref[...]).astype(o_ref.dtype)


def pallas_attn_ln_mlp(x_flat, ap, ln_g, ln_b, cls, B, T):
    D = x_flat.shape[1]
    (w1, b1), (w2, b2), (w3, b3) = cls
    C = w3.shape[1]
    args = [x_flat, ap["wq"], ap["bq"], ap["wk"], ap["bk"], ap["wv"], ap["bv"],
            ap["wo"], ap["bo"], ln_g, ln_b, w1, b1, w2, b2, w3, b3]
    return pl.pallas_call(
        functools.partial(_attn_ln_mlp_kernel, B=B, T=T, D=D, nH=ap["num_heads"]),
        out_shape=jax.ShapeDtypeStruct((B, C), jnp.float32),
        in_specs=[pl.BlockSpec(memory_space=pltpu.MemorySpace.VMEM)] * len(args),
        out_specs=pl.BlockSpec(memory_space=pltpu.MemorySpace.VMEM),
    )(*args)


# ----------------------------------------------------------------------------
# Model glue (only a tiny reshape + pad in XLA; everything else is 3 kernels)
# ----------------------------------------------------------------------------

def forward(params, x):
    """x: (B, 1, L) -> logits (B, num_classes)."""
    B, _, L = x.shape
    T = params["target_length"]
    assert L % 8 == 0 and (L // 8) % T == 0   # equal adaptive-pool windows
    x_pad = jnp.pad(x.reshape(B, L, 1), ((0, 0), (2, 2), (0, 0)))     # pad for k=5 conv
    h = pallas_cnn_frontend(x_pad, params["conv"], T)                 # (B*T, C3)
    for layer in range(params["num_layers"]):
        w_cat, b_cat, w_hh = params["lstm"][layer]
        h = pallas_bilstm(h, w_cat, b_cat, w_hh, B, T)                # (B*T, 2H)
        # inter-layer dropout is identity in eval mode
    return pallas_attn_ln_mlp(h, params["attn"], params["ln_g"], params["ln_b"],
                              params["cls"], B, T)


# ----------------------------------------------------------------------------
# Deterministic synthetic parameter init (BN folded, fused / head-major layouts)
# ----------------------------------------------------------------------------

def init_params(key, *, hidden_dim, num_layers, num_classes, target_length,
                num_heads, cycle_num):
    keys = iter(jax.random.split(key, 64))
    nxt = lambda: next(keys)
    unif = lambda k, shape, s: jax.random.uniform(k, shape, jnp.float32, -s, s)

    params = {"target_length": target_length, "num_layers": num_layers,
              "attn": {"num_heads": num_heads}}

    # Conv + BatchNorm(eval) folded. Stage 1 stored tap-major (k, 1, Cout) for the VPU
    # path; stages 2/3 stored as patch slabs (k*Cin, Cout) for one MXU matmul per batch.
    conv_defs = [(1, 32 * cycle_num, 5),
                 (32 * cycle_num, 64 * cycle_num, 3),
                 (64 * cycle_num, 128 * cycle_num, 3)]
    convs = []
    for idx, (cin, cout, k) in enumerate(conv_defs):
        s = 1.0 / math.sqrt(cin * k)
        w = unif(nxt(), (cout, cin, k), s)
        b = unif(nxt(), (cout,), s)
        gamma = 1.0 + 0.1 * jax.random.normal(nxt(), (cout,), jnp.float32)
        beta = 0.1 * jax.random.normal(nxt(), (cout,), jnp.float32)
        rmean = 0.1 * jax.random.normal(nxt(), (cout,), jnp.float32)
        rvar = jax.random.uniform(nxt(), (cout,), jnp.float32, 0.5, 1.5)
        scale = gamma / jnp.sqrt(rvar + 1e-5)
        w_folded = w * scale[:, None, None]                       # (Cout, Cin, k)
        b_folded = (b - rmean) * scale + beta
        w_t = jnp.transpose(w_folded, (2, 1, 0))                  # (k, Cin, Cout)
        w_store = w_t if idx == 0 else w_t.reshape(k * cin, cout)
        convs.append((w_store, b_folded.reshape(1, cout)))
    params["conv"] = convs

    # Bidirectional LSTM, fused layouts. Gate order i,f,g,o; bias = b_ih + b_hh.
    D_in = 128 * cycle_num
    H = hidden_dim
    lstm = []
    for layer in range(num_layers):
        in_sz = D_in if layer == 0 else 2 * H
        s = 1.0 / math.sqrt(H)
        per_dir = []
        for _d in range(2):
            w_ih = unif(nxt(), (in_sz, 4 * H), s)
            w_hh = unif(nxt(), (H, 4 * H), s)
            b_ih = unif(nxt(), (4 * H,), s)
            b_hh = unif(nxt(), (4 * H,), s)
            per_dir.append((w_ih, w_hh, (b_ih + b_hh).reshape(1, 4 * H)))
        w_cat = jnp.concatenate([per_dir[0][0], per_dir[1][0]], axis=1)   # (in, 8H)
        b_cat = jnp.concatenate([per_dir[0][2], per_dir[1][2]], axis=1)   # (1, 8H)
        w_hh_s = jnp.stack([per_dir[0][1], per_dir[1][1]], axis=0)        # (2, H, 4H)
        lstm.append((w_cat, b_cat, w_hh_s))
    params["lstm"] = lstm

    # Multi-head self-attention: weights pre-split head-major (zero runtime cost).
    D = 2 * H
    hd = D // num_heads
    s = 1.0 / math.sqrt(D)

    def split_cols(w):   # (D, D) -> (nH, D, hd)
        return jnp.stack([w[:, h * hd:(h + 1) * hd] for h in range(num_heads)], axis=0)

    def split_bias(b):   # (D,) -> (nH, 1, hd)
        return jnp.stack([b[h * hd:(h + 1) * hd].reshape(1, hd) for h in range(num_heads)],
                         axis=0)

    wq = unif(nxt(), (D, D), s); bq = unif(nxt(), (D,), s)
    wk = unif(nxt(), (D, D), s); bk = unif(nxt(), (D,), s)
    wv = unif(nxt(), (D, D), s); bv = unif(nxt(), (D,), s)
    wo = unif(nxt(), (D, D), s); bo = unif(nxt(), (D,), s)
    params["attn"].update(
        wq=split_cols(wq), bq=split_bias(bq),
        wk=split_cols(wk), bk=split_bias(bk),
        wv=split_cols(wv), bv=split_bias(bv),
        wo=jnp.stack([wo[h * hd:(h + 1) * hd, :] for h in range(num_heads)], axis=0),
        bo=bo.reshape(1, D))

    # LayerNorm.
    params["ln_g"] = jnp.ones((1, D), jnp.float32)
    params["ln_b"] = jnp.zeros((1, D), jnp.float32)

    # Classifier MLP.
    dims = [D, 256 * cycle_num, 128 * cycle_num, num_classes]
    cls = []
    for i in range(3):
        s = 1.0 / math.sqrt(dims[i])
        cls.append((unif(nxt(), (dims[i], dims[i + 1]), s),
                    unif(nxt(), (dims[i + 1],), s).reshape(1, dims[i + 1])))
    params["cls"] = cls
    return params


# ----------------------------------------------------------------------------
# Driver
# ----------------------------------------------------------------------------

if __name__ == "__main__":
    B, L = 2, 128                      # (B, 1, L); L/8 = 16 is a multiple of target_length
    hidden_dim = 32
    num_layers = 1
    num_classes = 5
    target_length = 8
    num_heads = 4
    cycle_num = 1

    key = jax.random.PRNGKey(0)
    kx, kp = jax.random.split(key)
    x = jax.random.normal(kx, (B, 1, L), jnp.float32)

    params = init_params(kp, hidden_dim=hidden_dim, num_layers=num_layers,
                         num_classes=num_classes, target_length=target_length,
                         num_heads=num_heads, cycle_num=cycle_num)

    fwd = jax.jit(lambda xx: forward(params, xx))
    logits = jax.block_until_ready(fwd(x))
    assert logits.shape == (B, num_classes), logits.shape
    assert bool(jnp.all(jnp.isfinite(logits)))
    print("KERNEL_OK")
</pallas_src>

<mosaic_0001>
module attributes {stable_mosaic.version = 11 : i64} {
  func.func @_cnn_frontend_kernel(%arg0: memref<2x132x1xf32, #tpu.memory_space<vmem>>, %arg1: memref<5x1x32xf32, #tpu.memory_space<vmem>>, %arg2: memref<1x32xf32, #tpu.memory_space<vmem>>, %arg3: memref<96x64xf32, #tpu.memory_space<vmem>>, %arg4: memref<1x64xf32, #tpu.memory_space<vmem>>, %arg5: memref<192x128xf32, #tpu.memory_space<vmem>>, %arg6: memref<1x128xf32, #tpu.memory_space<vmem>>, %arg7: memref<16x128xf32, #tpu.memory_space<vmem>>, %arg8: memref<256x32xf32, #tpu.memory_space<vmem>>, %arg9: memref<128x64xf32, #tpu.memory_space<vmem>>, %arg10: memref<64x128xf32, #tpu.memory_space<vmem>>, %arg11: memref<32x128xf32, #tpu.memory_space<vmem>>) attributes {dimension_semantics = [], scalar_prefetch = 0 : i64, scratch_operands = 4 : i64, tpu.core_type = #tpu.core_type<tc>} {
    %c0 = arith.constant 0 : index
    %c0_0 = arith.constant 0 : index
    %c0_1 = arith.constant 0 : index
    %0 = vector.load %arg0[%c0, %c0_0, %c0_1] : memref<2x132x1xf32, #tpu.memory_space<vmem>>, vector<1x132x1xf32>
    %1 = vector.shape_cast %0 : vector<1x132x1xf32> to vector<132x1xf32>
    %cst = arith.constant 0.000000e+00 : f32
    %2 = vector.broadcast %cst : f32 to vector<128x32xf32>
    %3 = vector.extract_strided_slice %1 {offsets = [0, 0], sizes = [128, 1], strides = [1, 1]} : vector<132x1xf32> to vector<128x1xf32>
    %c0_2 = arith.constant 0 : index
    %c0_3 = arith.constant 0 : index
    %c0_4 = arith.constant 0 : index
    %4 = vector.load %arg1[%c0_2, %c0_3, %c0_4] : memref<5x1x32xf32, #tpu.memory_space<vmem>>, vector<1x1x32xf32>
    %5 = vector.shape_cast %4 : vector<1x1x32xf32> to vector<1x32xf32>
    %6 = vector.broadcast %3 : vector<128x1xf32> to vector<128x32xf32>
    %7 = vector.broadcast %5 : vector<1x32xf32> to vector<128x32xf32>
    %8 = arith.mulf %6, %7 : vector<128x32xf32>
    %9 = arith.addf %2, %8 : vector<128x32xf32>
    %10 = vector.extract_strided_slice %1 {offsets = [1, 0], sizes = [128, 1], strides = [1, 1]} : vector<132x1xf32> to vector<128x1xf32>
    %c1 = arith.constant 1 : index
    %c0_5 = arith.constant 0 : index
    %c0_6 = arith.constant 0 : index
    %11 = vector.load %arg1[%c1, %c0_5, %c0_6] : memref<5x1x32xf32, #tpu.memory_space<vmem>>, vector<1x1x32xf32>
    %12 = vector.shape_cast %11 : vector<1x1x32xf32> to vector<1x32xf32>
    %13 = vector.broadcast %10 : vector<128x1xf32> to vector<128x32xf32>
    %14 = vector.broadcast %12 : vector<1x32xf32> to vector<128x32xf32>
    %15 = arith.mulf %13, %14 : vector<128x32xf32>
    %16 = arith.addf %9, %15 : vector<128x32xf32>
    %17 = vector.extract_strided_slice %1 {offsets = [2, 0], sizes = [128, 1], strides = [1, 1]} : vector<132x1xf32> to vector<128x1xf32>
    %c2 = arith.constant 2 : index
    %c0_7 = arith.constant 0 : index
    %c0_8 = arith.constant 0 : index
    %18 = vector.load %arg1[%c2, %c0_7, %c0_8] : memref<5x1x32xf32, #tpu.memory_space<vmem>>, vector<1x1x32xf32>
    %19 = vector.shape_cast %18 : vector<1x1x32xf32> to vector<1x32xf32>
    %20 = vector.broadcast %17 : vector<128x1xf32> to vector<128x32xf32>
    %21 = vector.broadcast %19 : vector<1x32xf32> to vector<128x32xf32>
    %22 = arith.mulf %20, %21 : vector<128x32xf32>
    %23 = arith.addf %16, %22 : vector<128x32xf32>
    %24 = vector.extract_strided_slice %1 {offsets = [3, 0], sizes = [128, 1], strides = [1, 1]} : vector<132x1xf32> to vector<128x1xf32>
    %c3 = arith.constant 3 : index
    %c0_9 = arith.constant 0 : index
    %c0_10 = arith.constant 0 : index
    %25 = vector.load %arg1[%c3, %c0_9, %c0_10] : memref<5x1x32xf32, #tpu.memory_space<vmem>>, vector<1x1x32xf32>
    %26 = vector.shape_cast %25 : vector<1x1x32xf32> to vector<1x32xf32>
    %27 = vector.broadcast %24 : vector<128x1xf32> to vector<128x32xf32>
    %28 = vector.broadcast %26 : vector<1x32xf32> to vector<128x32xf32>
    %29 = arith.mulf %27, %28 : vector<128x32xf32>
    %30 = arith.addf %23, %29 : vector<128x32xf32>
    %31 = vector.extract_strided_slice %1 {offsets = [4, 0], sizes = [128, 1], strides = [1, 1]} : vector<132x1xf32> to vector<128x1xf32>
    %c4 = arith.constant 4 : index
    %c0_11 = arith.constant 0 : index
    %c0_12 = arith.constant 0 : index
    %32 = vector.load %arg1[%c4, %c0_11, %c0_12] : memref<5x1x32xf32, #tpu.memory_space<vmem>>, vector<1x1x32xf32>
    %33 = vector.shape_cast %32 : vector<1x1x32xf32> to vector<1x32xf32>
    %34 = vector.broadcast %31 : vector<128x1xf32> to vector<128x32xf32>
    %35 = vector.broadcast %33 : vector<1x32xf32> to vector<128x32xf32>
    %36 = arith.mulf %34, %35 : vector<128x32xf32>
    %37 = arith.addf %30, %36 : vector<128x32xf32>
    %c0_13 = arith.constant 0 : index
    %c0_14 = arith.constant 0 : index
    %38 = vector.load %arg2[%c0_13, %c0_14] : memref<1x32xf32, #tpu.memory_space<vmem>>, vector<1x32xf32>
    %39 = vector.broadcast %38 : vector<1x32xf32> to vector<128x32xf32>
    %40 = arith.addf %37, %39 : vector<128x32xf32>
    %cst_15 = arith.constant 0.000000e+00 : f32
    %41 = vector.broadcast %cst_15 : f32 to vector<128x32xf32>
    %42 = arith.maximumf %40, %41 : vector<128x32xf32>
    %c0_16 = arith.constant 0 : index
    %c0_17 = arith.constant 0 : index
    %43 = vector.load %arg8[%c0_16, %c0_17] : memref<256x32xf32, #tpu.memory_space<vmem>>, vector<128x32xf32>
    tpu.vector_store %arg8[%c0_16, %c0_17], %42 {strides = array<i32>} : memref<256x32xf32, #tpu.memory_space<vmem>>, vector<128x32xf32>,
    %c1_18 = arith.constant 1 : index
    %c0_19 = arith.constant 0 : index
    %c0_20 = arith.constant 0 : index
    %44 = vector.load %arg0[%c1_18, %c0_19, %c0_20] : memref<2x132x1xf32, #tpu.memory_space<vmem>>, vector<1x132x1xf32>
    %45 = vector.shape_cast %44 : vector<1x132x1xf32> to vector<132x1xf32>
    %cst_21 = arith.constant 0.000000e+00 : f32
    %46 = vector.broadcast %cst_21 : f32 to vector<128x32xf32>
    %47 = vector.extract_strided_slice %45 {offsets = [0, 0], sizes = [128, 1], strides = [1, 1]} : vector<132x1xf32> to vector<128x1xf32>
    %c0_22 = arith.constant 0 : index
    %c0_23 = arith.constant 0 : index
    %c0_24 = arith.constant 0 : index
    %48 = vector.load %arg1[%c0_22, %c0_23, %c0_24] : memref<5x1x32xf32, #tpu.memory_space<vmem>>, vector<1x1x32xf32>
    %49 = vector.shape_cast %48 : vector<1x1x32xf32> to vector<1x32xf32>
    %50 = vector.broadcast %47 : vector<128x1xf32> to vector<128x32xf32>
    %51 = vector.broadcast %49 : vector<1x32xf32> to vector<128x32xf32>
    %52 = arith.mulf %50, %51 : vector<128x32xf32>
    %53 = arith.addf %46, %52 : vector<128x32xf32>
    %54 = vector.extract_strided_slice %45 {offsets = [1, 0], sizes = [128, 1], strides = [1, 1]} : vector<132x1xf32> to vector<128x1xf32>
    %c1_25 = arith.constant 1 : index
    %c0_26 = arith.constant 0 : index
    %c0_27 = arith.constant 0 : index
    %55 = vector.load %arg1[%c1_25, %c0_26, %c0_27] : memref<5x1x32xf32, #tpu.memory_space<vmem>>, vector<1x1x32xf32>
    %56 = vector.shape_cast %55 : vector<1x1x32xf32> to vector<1x32xf32>
    %57 = vector.broadcast %54 : vector<128x1xf32> to vector<128x32xf32>
    %58 = vector.broadcast %56 : vector<1x32xf32> to vector<128x32xf32>
    %59 = arith.mulf %57, %58 : vector<128x32xf32>
    %60 = arith.addf %53, %59 : vector<128x32xf32>
    %61 = vector.extract_strided_slice %45 {offsets = [2, 0], sizes = [128, 1], strides = [1, 1]} : vector<132x1xf32> to vector<128x1xf32>
    %c2_28 = arith.constant 2 : index
    %c0_29 = arith.constant 0 : index
    %c0_30 = arith.constant 0 : index
    %62 = vector.load %arg1[%c2_28, %c0_29, %c0_30] : memref<5x1x32xf32, #tpu.memory_space<vmem>>, vector<1x1x32xf32>
    %63 = vector.shape_cast %62 : vector<1x1x32xf32> to vector<1x32xf32>
    %64 = vector.broadcast %61 : vector<128x1xf32> to vector<128x32xf32>
    %65 = vector.broadcast %63 : vector<1x32xf32> to vector<128x32xf32>
    %66 = arith.mulf %64, %65 : vector<128x32xf32>
    %67 = arith.addf %60, %66 : vector<128x32xf32>
    %68 = vector.extract_strided_slice %45 {offsets = [3, 0], sizes = [128, 1], strides = [1, 1]} : vector<132x1xf32> to vector<128x1xf32>
    %c3_31 = arith.constant 3 : index
    %c0_32 = arith.constant 0 : index
    %c0_33 = arith.constant 0 : index
    %69 = vector.load %arg1[%c3_31, %c0_32, %c0_33] : memref<5x1x32xf32, #tpu.memory_space<vmem>>, vector<1x1x32xf32>
    %70 = vector.shape_cast %69 : vector<1x1x32xf32> to vector<1x32xf32>
    %71 = vector.broadcast %68 : vector<128x1xf32> to vector<128x32xf32>
    %72 = vector.broadcast %70 : vector<1x32xf32> to vector<128x32xf32>
    %73 = arith.mulf %71, %72 : vector<128x32xf32>
    %74 = arith.addf %67, %73 : vector<128x32xf32>
    %75 = vector.extract_strided_slice %45 {offsets = [4, 0], sizes = [128, 1], strides = [1, 1]} : vector<132x1xf32> to vector<128x1xf32>
    %c4_34 = arith.constant 4 : index
    %c0_35 = arith.constant 0 : index
    %c0_36 = arith.constant 0 : index
    %76 = vector.load %arg1[%c4_34, %c0_35, %c0_36] : memref<5x1x32xf32, #tpu.memory_space<vmem>>, vector<1x1x32xf32>
    %77 = vector.shape_cast %76 : vector<1x1x32xf32> to vector<1x32xf32>
    %78 = vector.broadcast %75 : vector<128x1xf32> to vector<128x32xf32>
    %79 = vector.broadcast %77 : vector<1x32xf32> to vector<128x32xf32>
    %80 = arith.mulf %78, %79 : vector<128x32xf32>
    %81 = arith.addf %74, %80 : vector<128x32xf32>
    %c0_37 = arith.constant 0 : index
    %c0_38 = arith.constant 0 : index
    %82 = vector.load %arg2[%c0_37, %c0_38] : memref<1x32xf32, #tpu.memory_space<vmem>>, vector<1x32xf32>
    %83 = vector.broadcast %82 : vector<1x32xf32> to vector<128x32xf32>
    %84 = arith.addf %81, %83 : vector<128x32xf32>
    %cst_39 = arith.constant 0.000000e+00 : f32
    %85 = vector.broadcast %cst_39 : f32 to vector<128x32xf32>
    %86 = arith.maximumf %84, %85 : vector<128x32xf32>
    %c128 = arith.constant 128 : index
    %c0_40 = arith.constant 0 : index
    %87 = vector.load %arg8[%c128, %c0_40] : memref<256x32xf32, #tpu.memory_space<vmem>>, vector<128x32xf32>
    tpu.vector_store %arg8[%c128, %c0_40], %86 {strides = array<i32>} : memref<256x32xf32, #tpu.memory_space<vmem>>, vector<128x32xf32>,
    %c0_41 = arith.constant 0 : index
    %c0_42 = arith.constant 0 : index
    %88 = tpu.strided_load %arg8[%c0_41, %c0_42] {strides = array<i32: 2, 1>} : memref<256x32xf32, #tpu.memory_space<vmem>>, vector<128x32xf32>
    %c1_43 = arith.constant 1 : index
    %c0_44 = arith.constant 0 : index
    %89 = tpu.strided_load %arg8[%c1_43, %c0_44] {strides = array<i32: 2, 1>} : memref<256x32xf32, #tpu.memory_space<vmem>>, vector<128x32xf32>
    %90 = arith.maximumf %88, %89 : vector<128x32xf32>
    %cst_45 = arith.constant 0.000000e+00 : f32
    %91 = vector.broadcast %cst_45 : f32 to vector<1x32xf32>
    %92 = vector.extract_strided_slice %90 {offsets = [0, 0], sizes = [64, 32], strides = [1, 1]} : vector<128x32xf32> to vector<64x32xf32>
    %93 = tpu.concatenate %91, %92, %91 in 0 : vector<1x32xf32>, vector<64x32xf32>, vector<1x32xf32> -> vector<66x32xf32>
    %94 = vector.extract_strided_slice %93 {offsets = [0, 0], sizes = [64, 32], strides = [1, 1]} : vector<66x32xf32> to vector<64x32xf32>
    %95 = vector.extract_strided_slice %93 {offsets = [1, 0], sizes = [64, 32], strides = [1, 1]} : vector<66x32xf32> to vector<64x32xf32>
    %96 = vector.extract_strided_slice %93 {offsets = [2, 0], sizes = [64, 32], strides = [1, 1]} : vector<66x32xf32> to vector<64x32xf32>
    %97 = tpu.concatenate %94, %95, %96 in 1 : vector<64x32xf32>, vector<64x32xf32>, vector<64x32xf32> -> vector<64x96xf32>
    %c0_46 = arith.constant 0 : index
    %c0_47 = arith.constant 0 : index
    %98 = vector.load %arg3[%c0_46, %c0_47] : memref<96x64xf32, #tpu.memory_space<vmem>>, vector<96x64xf32>
    %cst_48 = arith.constant dense<0.000000e+00> : vector<64x64xf32>
    %99 = tpu.matmul %97, %98, %cst_48 {dimension_numbers = #tpu.dot_dimension_numbers<[1], [0], [0], [1], [0, 0, 1, 1], [], []>} : vector<64x96xf32>, vector<96x64xf32>, vector<64x64xf32> -> vector<64x64xf32>
    %c0_49 = arith.constant 0 : index
    %c0_50 = arith.constant 0 : index
    %100 = vector.load %arg4[%c0_49, %c0_50] : memref<1x64xf32, #tpu.memory_space<vmem>>, vector<1x64xf32>
    %101 = vector.broadcast %100 : vector<1x64xf32> to vector<64x64xf32>
    %102 = arith.addf %99, %101 : vector<64x64xf32>
    %cst_51 = arith.constant 0.000000e+00 : f32
    %103 = vector.broadcast %cst_51 : f32 to vector<64x64xf32>
    %104 = arith.maximumf %102, %103 : vector<64x64xf32>
    %c0_52 = arith.constant 0 : index
    %c0_53 = arith.constant 0 : index
    %105 = vector.load %arg9[%c0_52, %c0_53] : memref<128x64xf32, #tpu.memory_space<vmem>>, vector<64x64xf32>
    tpu.vector_store %arg9[%c0_52, %c0_53], %104 {strides = array<i32>} : memref<128x64xf32, #tpu.memory_space<vmem>>, vector<64x64xf32>,
    %106 = vector.extract_strided_slice %90 {offsets = [64, 0], sizes = [64, 32], strides = [1, 1]} : vector<128x32xf32> to vector<64x32xf32>
    %107 = tpu.concatenate %91, %106, %91 in 0 : vector<1x32xf32>, vector<64x32xf32>, vector<1x32xf32> -> vector<66x32xf32>
    %108 = vector.extract_strided_slice %107 {offsets = [0, 0], sizes = [64, 32], strides = [1, 1]} : vector<66x32xf32> to vector<64x32xf32>
    %109 = vector.extract_strided_slice %107 {offsets = [1, 0], sizes = [64, 32], strides = [1, 1]} : vector<66x32xf32> to vector<64x32xf32>
    %110 = vector.extract_strided_slice %107 {offsets = [2, 0], sizes = [64, 32], strides = [1, 1]} : vector<66x32xf32> to vector<64x32xf32>
    %111 = tpu.concatenate %108, %109, %110 in 1 : vector<64x32xf32>, vector<64x32xf32>, vector<64x32xf32> -> vector<64x96xf32>
    %c0_54 = arith.constant 0 : index
    %c0_55 = arith.constant 0 : index
    %112 = vector.load %arg3[%c0_54, %c0_55] : memref<96x64xf32, #tpu.memory_space<vmem>>, vector<96x64xf32>
    %cst_56 = arith.constant dense<0.000000e+00> : vector<64x64xf32>
    %113 = tpu.matmul %111, %112, %cst_56 {dimension_numbers = #tpu.dot_dimension_numbers<[1], [0], [0], [1], [0, 0, 1, 1], [], []>} : vector<64x96xf32>, vector<96x64xf32>, vector<64x64xf32> -> vector<64x64xf32>
    %c0_57 = arith.constant 0 : index
    %c0_58 = arith.constant 0 : index
    %114 = vector.load %arg4[%c0_57, %c0_58] : memref<1x64xf32, #tpu.memory_space<vmem>>, vector<1x64xf32>
    %115 = vector.broadcast %114 : vector<1x64xf32> to vector<64x64xf32>
    %116 = arith.addf %113, %115 : vector<64x64xf32>
    %cst_59 = arith.constant 0.000000e+00 : f32
    %117 = vector.broadcast %cst_59 : f32 to vector<64x64xf32>
    %118 = arith.maximumf %116, %117 : vector<64x64xf32>
    %c64 = arith.constant 64 : index
    %c0_60 = arith.constant 0 : index
    %119 = vector.load %arg9[%c64, %c0_60] : memref<128x64xf32, #tpu.memory_space<vmem>>, vector<64x64xf32>
    tpu.vector_store %arg9[%c64, %c0_60], %118 {strides = array<i32>} : memref<128x64xf32, #tpu.memory_space<vmem>>, vector<64x64xf32>,
    %c0_61 = arith.constant 0 : index
    %c0_62 = arith.constant 0 : index
    %120 = tpu.strided_load %arg9[%c0_61, %c0_62] {strides = array<i32: 2, 1>} : memref<128x64xf32, #tpu.memory_space<vmem>>, vector<64x64xf32>
    %c1_63 = arith.constant 1 : index
    %c0_64 = arith.constant 0 : index
    %121 = tpu.strided_load %arg9[%c1_63, %c0_64] {strides = array<i32: 2, 1>} : memref<128x64xf32, #tpu.memory_space<vmem>>, vector<64x64xf32>
    %122 = arith.maximumf %120, %121 : vector<64x64xf32>
    %cst_65 = arith.constant 0.000000e+00 : f32
    %123 = vector.broadcast %cst_65 : f32 to vector<1x64xf32>
    %124 = vector.extract_strided_slice %122 {offsets = [0, 0], sizes = [32, 64], strides = [1, 1]} : vector<64x64xf32> to vector<32x64xf32>
    %125 = tpu.concatenate %123, %124, %123 in 0 : vector<1x64xf32>, vector<32x64xf32>, vector<1x64xf32> -> vector<34x64xf32>
    %126 = vector.extract_strided_slice %125 {offsets = [0, 0], sizes = [32, 64], strides = [1, 1]} : vector<34x64xf32> to vector<32x64xf32>
    %127 = vector.extract_strided_slice %125 {offsets = [1, 0], sizes = [32, 64], strides = [1, 1]} : vector<34x64xf32> to vector<32x64xf32>
    %128 = vector.extract_strided_slice %125 {offsets = [2, 0], sizes = [32, 64], strides = [1, 1]} : vector<34x64xf32> to vector<32x64xf32>
    %129 = tpu.concatenate %126, %127, %128 in 1 : vector<32x64xf32>, vector<32x64xf32>, vector<32x64xf32> -> vector<32x192xf32>
    %c0_66 = arith.constant 0 : index
    %c0_67 = arith.constant 0 : index
    %130 = vector.load %arg5[%c0_66, %c0_67] : memref<192x128xf32, #tpu.memory_space<vmem>>, vector<192x128xf32>
    %cst_68 = arith.constant dense<0.000000e+00> : vector<32x128xf32>
    %131 = tpu.matmul %129, %130, %cst_68 {dimension_numbers = #tpu.dot_dimension_numbers<[1], [0], [0], [1], [0, 0, 1, 1], [], []>} : vector<32x192xf32>, vector<192x128xf32>, vector<32x128xf32> -> vector<32x128xf32>
    %c0_69 = arith.constant 0 : index
    %c0_70 = arith.constant 0 : index
    %132 = vector.load %arg6[%c0_69, %c0_70] : memref<1x128xf32, #tpu.memory_space<vmem>>, vector<1x128xf32>
    %133 = vector.broadcast %132 : vector<1x128xf32> to vector<32x128xf32>
    %134 = arith.addf %131, %133 : vector<32x128xf32>
    %cst_71 = arith.constant 0.000000e+00 : f32
    %135 = vector.broadcast %cst_71 : f32 to vector<32x128xf32>
    %136 = arith.maximumf %134, %135 : vector<32x128xf32>
    %c0_72 = arith.constant 0 : index
    %c0_73 = arith.constant 0 : index
    %137 = vector.load %arg10[%c0_72, %c0_73] : memref<64x128xf32, #tpu.memory_space<vmem>>, vector<32x128xf32>
    tpu.vector_store %arg10[%c0_72, %c0_73], %136 {strides = array<i32>} : memref<64x128xf32, #tpu.memory_space<vmem>>, vector<32x128xf32>,
    %138 = vector.extract_strided_slice %122 {offsets = [32, 0], sizes = [32, 64], strides = [1, 1]} : vector<64x64xf32> to vector<32x64xf32>
    %139 = tpu.concatenate %123, %138, %123 in 0 : vector<1x64xf32>, vector<32x64xf32>, vector<1x64xf32> -> vector<34x64xf32>
    %140 = vector.extract_strided_slice %139 {offsets = [0, 0], sizes = [32, 64], strides = [1, 1]} : vector<34x64xf32> to vector<32x64xf32>
    %141 = vector.extract_strided_slice %139 {offsets = [1, 0], sizes = [32, 64], strides = [1, 1]} : vector<34x64xf32> to vector<32x64xf32>
    %142 = vector.extract_strided_slice %139 {offsets = [2, 0], sizes = [32, 64], strides = [1, 1]} : vector<34x64xf32> to vector<32x64xf32>
    %143 = tpu.concatenate %140, %141, %142 in 1 : vector<32x64xf32>, vector<32x64xf32>, vector<32x64xf32> -> vector<32x192xf32>
    %c0_74 = arith.constant 0 : index
    %c0_75 = arith.constant 0 : index
    %144 = vector.load %arg5[%c0_74, %c0_75] : memref<192x128xf32, #tpu.memory_space<vmem>>, vector<192x128xf32>
    %cst_76 = arith.constant dense<0.000000e+00> : vector<32x128xf32>
    %145 = tpu.matmul %143, %144, %cst_76 {dimension_numbers = #tpu.dot_dimension_numbers<[1], [0], [0], [1], [0, 0, 1, 1], [], []>} : vector<32x192xf32>, vector<192x128xf32>, vector<32x128xf32> -> vector<32x128xf32>
    %c0_77 = arith.constant 0 : index
    %c0_78 = arith.constant 0 : index
    %146 = vector.load %arg6[%c0_77, %c0_78] : memref<1x128xf32, #tpu.memory_space<vmem>>, vector<1x128xf32>
    %147 = vector.broadcast %146 : vector<1x128xf32> to vector<32x128xf32>
    %148 = arith.addf %145, %147 : vector<32x128xf32>
    %cst_79 = arith.constant 0.000000e+00 : f32
    %149 = vector.broadcast %cst_79 : f32 to vector<32x128xf32>
    %150 = arith.maximumf %148, %149 : vector<32x128xf32>
    %c32 = arith.constant 32 : index
    %c0_80 = arith.constant 0 : index
    %151 = vector.load %arg10[%c32, %c0_80] : memref<64x128xf32, #tpu.memory_space<vmem>>, vector<32x128xf32>
    tpu.vector_store %arg10[%c32, %c0_80], %150 {strides = array<i32>} : memref<64x128xf32, #tpu.memory_space<vmem>>, vector<32x128xf32>,
    %c0_81 = arith.constant 0 : index
    %c0_82 = arith.constant 0 : index
    %152 = tpu.strided_load %arg10[%c0_81, %c0_82] {strides = array<i32: 2, 1>} : memref<64x128xf32, #tpu.memory_space<vmem>>, vector<32x128xf32>
    %c1_83 = arith.constant 1 : index
    %c0_84 = arith.constant 0 : index
    %153 = tpu.strided_load %arg10[%c1_83, %c0_84] {strides = array<i32: 2, 1>} : memref<64x128xf32, #tpu.memory_space<vmem>>, vector<32x128xf32>
    %154 = arith.maximumf %152, %153 : vector<32x128xf32>
    %c0_85 = arith.constant 0 : index
    %c0_86 = arith.constant 0 : index
    %155 = vector.load %arg11[%c0_85, %c0_86] : memref<32x128xf32, #tpu.memory_space<vmem>>, vector<32x128xf32>
    tpu.vector_store %arg11[%c0_85, %c0_86], %154 {strides = array<i32>} : memref<32x128xf32, #tpu.memory_space<vmem>>, vector<32x128xf32>,
    %c0_87 = arith.constant 0 : index
    %c0_88 = arith.constant 0 : index
    %156 = tpu.strided_load %arg11[%c0_87, %c0_88] {strides = array<i32: 2, 1>} : memref<32x128xf32, #tpu.memory_space<vmem>>, vector<16x128xf32>
    %c1_89 = arith.constant 1 : index
    %c0_90 = arith.constant 0 : index
    %157 = tpu.strided_load %arg11[%c1_89, %c0_90] {strides = array<i32: 2, 1>} : memref<32x128xf32, #tpu.memory_space<vmem>>, vector<16x128xf32>
    %158 = arith.addf %156, %157 : vector<16x128xf32>
    %cst_91 = arith.constant 5.000000e-01 : f32
    %159 = vector.broadcast %cst_91 : f32 to vector<16x128xf32>
    %160 = arith.mulf %158, %159 : vector<16x128xf32>
    %c0_92 = arith.constant 0 : index
    %c0_93 = arith.constant 0 : index
    %161 = vector.load %arg7[%c0_92, %c0_93] : memref<16x128xf32, #tpu.memory_space<vmem>>, vector<16x128xf32>
    tpu.vector_store %arg7[%c0_92, %c0_93], %160 {strides = array<i32>} : memref<16x128xf32, #tpu.memory_space<vmem>>, vector<16x128xf32>,
    return
  }
}

module attributes {stable_mosaic.version = 11 : i64} {
  func.func @_bilstm_kernel(%arg0: memref<16x128xf32, #tpu.memory_space<vmem>>, %arg1: memref<128x256xf32, #tpu.memory_space<vmem>>, %arg2: memref<1x256xf32, #tpu.memory_space<vmem>>, %arg3: memref<2x32x128xf32, #tpu.memory_space<vmem>>, %arg4: memref<16x64xf32, #tpu.memory_space<vmem>>) attributes {dimension_semantics = [], scalar_prefetch = 0 : i64, scratch_operands = 0 : i64, tpu.core_type = #tpu.core_type<tc>} {
    %c0 = arith.constant 0 : index
    %c0_0 = arith.constant 0 : index
    %0 = vector.load %arg0[%c0, %c0_0] : memref<16x128xf32, #tpu.memory_space<vmem>>, vector<16x128xf32>
    %c0_1 = arith.constant 0 : index
    %c0_2 = arith.constant 0 : index
    %1 = vector.load %arg1[%c0_1, %c0_2] : memref<128x256xf32, #tpu.memory_space<vmem>>, vector<128x256xf32>
    %cst = arith.constant dense<0.000000e+00> : vector<16x256xf32>
    %2 = tpu.matmul %0, %1, %cst {dimension_numbers = #tpu.dot_dimension_numbers<[1], [0], [0], [1], [0, 0, 1, 1], [], []>} : vector<16x128xf32>, vector<128x256xf32>, vector<16x256xf32> -> vector<16x256xf32>
    %c0_3 = arith.constant 0 : index
    %c0_4 = arith.constant 0 : index
    %3 = vector.load %arg2[%c0_3, %c0_4] : memref<1x256xf32, #tpu.memory_space<vmem>>, vector<1x256xf32>
    %4 = vector.broadcast %3 : vector<1x256xf32> to vector<16x256xf32>
    %5 = arith.addf %2, %4 : vector<16x256xf32>
    %c0_5 = arith.constant 0 : index
    %c0_6 = arith.constant 0 : index
    %c0_7 = arith.constant 0 : index
    %6 = vector.load %arg3[%c0_5, %c0_6, %c0_7] : memref<2x32x128xf32, #tpu.memory_space<vmem>>, vector<1x32x128xf32>
    %7 = vector.shape_cast %6 : vector<1x32x128xf32> to vector<32x128xf32>
    %c1 = arith.constant 1 : index
    %c0_8 = arith.constant 0 : index
    %c0_9 = arith.constant 0 : index
    %8 = vector.load %arg3[%c1, %c0_8, %c0_9] : memref<2x32x128xf32, #tpu.memory_space<vmem>>, vector<1x32x128xf32>
    %9 = vector.shape_cast %8 : vector<1x32x128xf32> to vector<32x128xf32>
    %cst_10 = arith.constant 0.000000e+00 : f32
    %10 = vector.broadcast %cst_10 : f32 to vector<4x32xf32>
    %cst_11 = arith.constant 0.000000e+00 : f32
    %11 = vector.broadcast %cst_11 : f32 to vector<4x32xf32>
    %12 = vector.extract_strided_slice %5 {offsets = [0, 0], sizes = [1, 128], strides = [1, 1]} : vector<16x256xf32> to vector<1x128xf32>
    %13 = vector.extract_strided_slice %5 {offsets = [8, 0], sizes = [1, 128], strides = [1, 1]} : vector<16x256xf32> to vector<1x128xf32>
    %14 = vector.extract_strided_slice %5 {offsets = [7, 128], sizes = [1, 128], strides = [1, 1]} : vector<16x256xf32> to vector<1x128xf32>
    %15 = vector.extract_strided_slice %5 {offsets = [15, 128], sizes = [1, 128], strides = [1, 1]} : vector<16x256xf32> to vector<1x128xf32>
    %16 = tpu.concatenate %12, %13, %14, %15 in 0 : vector<1x128xf32>, vector<1x128xf32>, vector<1x128xf32>, vector<1x128xf32> -> vector<4x128xf32>
    %17 = vector.extract_strided_slice %10 {offsets = [0, 0], sizes = [2, 32], strides = [1, 1]} : vector<4x32xf32> to vector<2x32xf32>
    %cst_12 = arith.constant dense<0.000000e+00> : vector<2x128xf32>
    %18 = tpu.matmul %17, %7, %cst_12 {dimension_numbers = #tpu.dot_dimension_numbers<[1], [0], [0], [1], [0, 0, 1, 1], [], []>} : vector<2x32xf32>, vector<32x128xf32>, vector<2x128xf32> -> vector<2x128xf32>
    %19 = vector.extract_strided_slice %10 {offsets = [2, 0], sizes = [2, 32], strides = [1, 1]} : vector<4x32xf32> to vector<2x32xf32>
    %cst_13 = arith.constant dense<0.000000e+00> : vector<2x128xf32>
    %20 = tpu.matmul %19, %9, %cst_13 {dimension_numbers = #tpu.dot_dimension_numbers<[1], [0], [0], [1], [0, 0, 1, 1], [], []>} : vector<2x32xf32>, vector<32x128xf32>, vector<2x128xf32> -> vector<2x128xf32>
    %21 = tpu.concatenate %18, %20 in 0 : vector<2x128xf32>, vector<2x128xf32> -> vector<4x128xf32>
    %22 = arith.addf %16, %21 : vector<4x128xf32>
    %23 = vector.extract_strided_slice %22 {offsets = [0, 0], sizes = [4, 32], strides = [1, 1]} : vector<4x128xf32> to vector<4x32xf32>
    %24 = arith.negf %23 : vector<4x32xf32>
    %25 = math.exp %24 : vector<4x32xf32>
    %cst_14 = arith.constant 1.000000e+00 : f32
    %26 = vector.broadcast %cst_14 : f32 to vector<4x32xf32>
    %27 = arith.addf %26, %25 : vector<4x32xf32>
    %28 = arith.divf %26, %27 : vector<4x32xf32>
    %29 = vector.extract_strided_slice %22 {offsets = [0, 32], sizes = [4, 32], strides = [1, 1]} : vector<4x128xf32> to vector<4x32xf32>
    %30 = arith.negf %29 : vector<4x32xf32>
    %31 = math.exp %30 : vector<4x32xf32>
    %cst_15 = arith.constant 1.000000e+00 : f32
    %32 = vector.broadcast %cst_15 : f32 to vector<4x32xf32>
    %33 = arith.addf %32, %31 : vector<4x32xf32>
    %34 = arith.divf %32, %33 : vector<4x32xf32>
    %35 = vector.extract_strided_slice %22 {offsets = [0, 64], sizes = [4, 32], strides = [1, 1]} : vector<4x128xf32> to vector<4x32xf32>
    %36 = math.tanh %35 : vector<4x32xf32>
    %37 = vector.extract_strided_slice %22 {offsets = [0, 96], sizes = [4, 32], strides = [1, 1]} : vector<4x128xf32> to vector<4x32xf32>
    %38 = arith.negf %37 : vector<4x32xf32>
    %39 = math.exp %38 : vector<4x32xf32>
    %cst_16 = arith.constant 1.000000e+00 : f32
    %40 = vector.broadcast %cst_16 : f32 to vector<4x32xf32>
    %41 = arith.addf %40, %39 : vector<4x32xf32>
    %42 = arith.divf %40, %41 : vector<4x32xf32>
    %43 = arith.mulf %34, %11 : vector<4x32xf32>
    %44 = arith.mulf %28, %36 : vector<4x32xf32>
    %45 = arith.addf %43, %44 : vector<4x32xf32>
    %46 = math.tanh %45 : vector<4x32xf32>
    %47 = arith.mulf %42, %46 : vector<4x32xf32>
    %48 = vector.extract_strided_slice %47 {offsets = [0, 0], sizes = [1, 32], strides = [1, 1]} : vector<4x32xf32> to vector<1x32xf32>
    %c0_17 = arith.constant 0 : index
    %c0_18 = arith.constant 0 : index
    %49 = vector.load %arg4[%c0_17, %c0_18] : memref<16x64xf32, #tpu.memory_space<vmem>>, vector<1x32xf32>
    tpu.vector_store %arg4[%c0_17, %c0_18], %48 {strides = array<i32>} : memref<16x64xf32, #tpu.memory_space<vmem>>, vector<1x32xf32>,
    %50 = vector.extract_strided_slice %47 {offsets = [2, 0], sizes = [1, 32], strides = [1, 1]} : vector<4x32xf32> to vector<1x32xf32>
    %c7 = arith.constant 7 : index
    %c32 = arith.constant 32 : index
    %51 = vector.load %arg4[%c7, %c32] : memref<16x64xf32, #tpu.memory_space<vmem>>, vector<1x32xf32>
    tpu.vector_store %arg4[%c7, %c32], %50 {strides = array<i32>} : memref<16x64xf32, #tpu.memory_space<vmem>>, vector<1x32xf32>,
    %52 = vector.extract_strided_slice %47 {offsets = [1, 0], sizes = [1, 32], strides = [1, 1]} : vector<4x32xf32> to vector<1x32xf32>
    %c8 = arith.constant 8 : index
    %c0_19 = arith.constant 0 : index
    %53 = vector.load %arg4[%c8, %c0_19] : memref<16x64xf32, #tpu.memory_space<vmem>>, vector<1x32xf32>
    tpu.vector_store %arg4[%c8, %c0_19], %52 {strides = array<i32>} : memref<16x64xf32, #tpu.memory_space<vmem>>, vector<1x32xf32>,
    %54 = vector.extract_strided_slice %47 {offsets = [3, 0], sizes = [1, 32], strides = [1, 1]} : vector<4x32xf32> to vector<1x32xf32>
    %c15 = arith.constant 15 : index
    %c32_20 = arith.constant 32 : index
    %55 = vector.load %arg4[%c15, %c32_20] : memref<16x64xf32, #tpu.memory_space<vmem>>, vector<1x32xf32>
    tpu.vector_store %arg4[%c15, %c32_20], %54 {strides = array<i32>} : memref<16x64xf32, #tpu.memory_space<vmem>>, vector<1x32xf32>,
    %56 = vector.extract_strided_slice %5 {offsets = [1, 0], sizes = [1, 128], strides = [1, 1]} : vector<16x256xf32> to vector<1x128xf32>
    %57 = vector.extract_strided_slice %5 {offsets = [9, 0], sizes = [1, 128], strides = [1, 1]} : vector<16x256xf32> to vector<1x128xf32>
    %58 = vector.extract_strided_slice %5 {offsets = [6, 128], sizes = [1, 128], strides = [1, 1]} : vector<16x256xf32> to vector<1x128xf32>
    %59 = vector.extract_strided_slice %5 {offsets = [14, 128], sizes = [1, 128], strides = [1, 1]} : vector<16x256xf32> to vector<1x128xf32>
    %60 = tpu.concatenate %56, %57, %58, %59 in 0 : vector<1x128xf32>, vector<1x128xf32>, vector<1x128xf32>, vector<1x128xf32> -> vector<4x128xf32>
    %61 = vector.extract_strided_slice %47 {offsets = [0, 0], sizes = [2, 32], strides = [1, 1]} : vector<4x32xf32> to vector<2x32xf32>
    %cst_21 = arith.constant dense<0.000000e+00> : vector<2x128xf32>
    %62 = tpu.matmul %61, %7, %cst_21 {dimension_numbers = #tpu.dot_dimension_numbers<[1], [0], [0], [1], [0, 0, 1, 1], [], []>} : vector<2x32xf32>, vector<32x128xf32>, vector<2x128xf32> -> vector<2x128xf32>
    %63 = vector.extract_strided_slice %47 {offsets = [2, 0], sizes = [2, 32], strides = [1, 1]} : vector<4x32xf32> to vector<2x32xf32>
    %cst_22 = arith.constant dense<0.000000e+00> : vector<2x128xf32>
    %64 = tpu.matmul %63, %9, %cst_22 {dimension_numbers = #tpu.dot_dimension_numbers<[1], [0], [0], [1], [0, 0, 1, 1], [], []>} : vector<2x32xf32>, vector<32x128xf32>, vector<2x128xf32> -> vector<2x128xf32>
    %65 = tpu.concatenate %62, %64 in 0 : vector<2x128xf32>, vector<2x128xf32> -> vector<4x128xf32>
    %66 = arith.addf %60, %65 : vector<4x128xf32>
    %67 = vector.extract_strided_slice %66 {offsets = [0, 0], sizes = [4, 32], strides = [1, 1]} : vector<4x128xf32> to vector<4x32xf32>
    %68 = arith.negf %67 : vector<4x32xf32>
    %69 = math.exp %68 : vector<4x32xf32>
    %cst_23 = arith.constant 1.000000e+00 : f32
    %70 = vector.broadcast %cst_23 : f32 to vector<4x32xf32>
    %71 = arith.addf %70, %69 : vector<4x32xf32>
    %72 = arith.divf %70, %71 : vector<4x32xf32>
    %73 = vector.extract_strided_slice %66 {offsets = [0, 32], sizes = [4, 32], strides = [1, 1]} : vector<4x128xf32> to vector<4x32xf32>
    %74 = arith.negf %73 : vector<4x32xf32>
    %75 = math.exp %74 : vector<4x32xf32>
    %cst_24 = arith.constant 1.000000e+00 : f32
    %76 = vector.broadcast %cst_24 : f32 to vector<4x32xf32>
    %77 = arith.addf %76, %75 : vector<4x32xf32>
    %78 = arith.divf %76, %77 : vector<4x32xf32>
    %79 = vector.extract_strided_slice %66 {offsets = [0, 64], sizes = [4, 32], strides = [1, 1]} : vector<4x128xf32> to vector<4x32xf32>
    %80 = math.tanh %79 : vector<4x32xf32>
    %81 = vector.extract_strided_slice %66 {offsets = [0, 96], sizes = [4, 32], strides = [1, 1]} : vector<4x128xf32> to vector<4x32xf32>
    %82 = arith.negf %81 : vector<4x32xf32>
    %83 = math.exp %82 : vector<4x32xf32>
    %cst_25 = arith.constant 1.000000e+00 : f32
    %84 = vector.broadcast %cst_25 : f32 to vector<4x32xf32>
    %85 = arith.addf %84, %83 : vector<4x32xf32>
    %86 = arith.divf %84, %85 : vector<4x32xf32>
    %87 = arith.mulf %78, %45 : vector<4x32xf32>
    %88 = arith.mulf %72, %80 : vector<4x32xf32>
    %89 = arith.addf %87, %88 : vector<4x32xf32>
    %90 = math.tanh %89 : vector<4x32xf32>
    %91 = arith.mulf %86, %90 : vector<4x32xf32>
    %92 = vector.extract_strided_slice %91 {offsets = [0, 0], sizes = [1, 32], strides = [1, 1]} : vector<4x32xf32> to vector<1x32xf32>
    %c1_26 = arith.constant 1 : index
    %c0_27 = arith.constant 0 : index
    %93 = vector.load %arg4[%c1_26, %c0_27] : memref<16x64xf32, #tpu.memory_space<vmem>>, vector<1x32xf32>
    tpu.vector_store %arg4[%c1_26, %c0_27], %92 {strides = array<i32>} : memref<16x64xf32, #tpu.memory_space<vmem>>, vector<1x32xf32>,
    %94 = vector.extract_strided_slice %91 {offsets = [2, 0], sizes = [1, 32], strides = [1, 1]} : vector<4x32xf32> to vector<1x32xf32>
    %c6 = arith.constant 6 : index
    %c32_28 = arith.constant 32 : index
    %95 = vector.load %arg4[%c6, %c32_28] : memref<16x64xf32, #tpu.memory_space<vmem>>, vector<1x32xf32>
    tpu.vector_store %arg4[%c6, %c32_28], %94 {strides = array<i32>} : memref<16x64xf32, #tpu.memory_space<vmem>>, vector<1x32xf32>,
    %96 = vector.extract_strided_slice %91 {offsets = [1, 0], sizes = [1, 32], strides = [1, 1]} : vector<4x32xf32> to vector<1x32xf32>
    %c9 = arith.constant 9 : index
    %c0_29 = arith.constant 0 : index
    %97 = vector.load %arg4[%c9, %c0_29] : memref<16x64xf32, #tpu.memory_space<vmem>>, vector<1x32xf32>
    tpu.vector_store %arg4[%c9, %c0_29], %96 {strides = array<i32>} : memref<16x64xf32, #tpu.memory_space<vmem>>, vector<1x32xf32>,
    %98 = vector.extract_strided_slice %91 {offsets = [3, 0], sizes = [1, 32], strides = [1, 1]} : vector<4x32xf32> to vector<1x32xf32>
    %c14 = arith.constant 14 : index
    %c32_30 = arith.constant 32 : index
    %99 = vector.load %arg4[%c14, %c32_30] : memref<16x64xf32, #tpu.memory_space<vmem>>, vector<1x32xf32>
    tpu.vector_store %arg4[%c14, %c32_30], %98 {strides = array<i32>} : memref<16x64xf32, #tpu.memory_space<vmem>>, vector<1x32xf32>,
    %100 = vector.extract_strided_slice %5 {offsets = [2, 0], sizes = [1, 128], strides = [1, 1]} : vector<16x256xf32> to vector<1x128xf32>
    %101 = vector.extract_strided_slice %5 {offsets = [10, 0], sizes = [1, 128], strides = [1, 1]} : vector<16x256xf32> to vector<1x128xf32>
    %102 = vector.extract_strided_slice %5 {offsets = [5, 128], sizes = [1, 128], strides = [1, 1]} : vector<16x256xf32> to vector<1x128xf32>
    %103 = vector.extract_strided_slice %5 {offsets = [13, 128], sizes = [1, 128], strides = [1, 1]} : vector<16x256xf32> to vector<1x128xf32>
    %104 = tpu.concatenate %100, %101, %102, %103 in 0 : vector<1x128xf32>, vector<1x128xf32>, vector<1x128xf32>, vector<1x128xf32> -> vector<4x128xf32>
    %105 = vector.extract_strided_slice %91 {offsets = [0, 0], sizes = [2, 32], strides = [1, 1]} : vector<4x32xf32> to vector<2x32xf32>
    %cst_31 = arith.constant dense<0.000000e+00> : vector<2x128xf32>
    %106 = tpu.matmul %105, %7, %cst_31 {dimension_numbers = #tpu.dot_dimension_numbers<[1], [0], [0], [1], [0, 0, 1, 1], [], []>} : vector<2x32xf32>, vector<32x128xf32>, vector<2x128xf32> -> vector<2x128xf32>
    %107 = vector.extract_strided_slice %91 {offsets = [2, 0], sizes = [2, 32], strides = [1, 1]} : vector<4x32xf32> to vector<2x32xf32>
    %cst_32 = arith.constant dense<0.000000e+00> : vector<2x128xf32>
    %108 = tpu.matmul %107, %9, %cst_32 {dimension_numbers = #tpu.dot_dimension_numbers<[1], [0], [0], [1], [0, 0, 1, 1], [], []>} : vector<2x32xf32>, vector<32x128xf32>, vector<2x128xf32> -> vector<2x128xf32>
    %109 = tpu.concatenate %106, %108 in 0 : vector<2x128xf32>, vector<2x128xf32> -> vector<4x128xf32>
    %110 = arith.addf %104, %109 : vector<4x128xf32>
    %111 = vector.extract_strided_slice %110 {offsets = [0, 0], sizes = [4, 32], strides = [1, 1]} : vector<4x128xf32> to vector<4x32xf32>
    %112 = arith.negf %111 : vector<4x32xf32>
    %113 = math.exp %112 : vector<4x32xf32>
    %cst_33 = arith.constant 1.000000e+00 : f32
    %114 = vector.broadcast %cst_33 : f32 to vector<4x32xf32>
    %115 = arith.addf %114, %113 : vector<4x32xf32>
    %116 = arith.divf %114, %115 : vector<4x32xf32>
    %117 = vector.extract_strided_slice %110 {offsets = [0, 32], sizes = [4, 32], strides = [1, 1]} : vector<4x128xf32> to vector<4x32xf32>
    %118 = arith.negf %117 : vector<4x32xf32>
    %119 = math.exp %118 : vector<4x32xf32>
    %cst_34 = arith.constant 1.000000e+00 : f32
    %120 = vector.broadcast %cst_34 : f32 to vector<4x32xf32>
    %121 = arith.addf %120, %119 : vector<4x32xf32>
    %122 = arith.divf %120, %121 : vector<4x32xf32>
    %123 = vector.extract_strided_slice %110 {offsets = [0, 64], sizes = [4, 32], strides = [1, 1]} : vector<4x128xf32> to vector<4x32xf32>
    %124 = math.tanh %123 : vector<4x32xf32>
    %125 = vector.extract_strided_slice %110 {offsets = [0, 96], sizes = [4, 32], strides = [1, 1]} : vector<4x128xf32> to vector<4x32xf32>
    %126 = arith.negf %125 : vector<4x32xf32>
    %127 = math.exp %126 : vector<4x32xf32>
    %cst_35 = arith.constant 1.000000e+00 : f32
    %128 = vector.broadcast %cst_35 : f32 to vector<4x32xf32>
    %129 = arith.addf %128, %127 : vector<4x32xf32>
    %130 = arith.divf %128, %129 : vector<4x32xf32>
    %131 = arith.mulf %122, %89 : vector<4x32xf32>
    %132 = arith.mulf %116, %124 : vector<4x32xf32>
    %133 = arith.addf %131, %132 : vector<4x32xf32>
    %134 = math.tanh %133 : vector<4x32xf32>
    %135 = arith.mulf %130, %134 : vector<4x32xf32>
    %136 = vector.extract_strided_slice %135 {offsets = [0, 0], sizes = [1, 32], strides = [1, 1]} : vector<4x32xf32> to vector<1x32xf32>
    %c2 = arith.constant 2 : index
    %c0_36 = arith.constant 0 : index
    %137 = vector.load %arg4[%c2, %c0_36] : memref<16x64xf32, #tpu.memory_space<vmem>>, vector<1x32xf32>
    tpu.vector_store %arg4[%c2, %c0_36], %136 {strides = array<i32>} : memref<16x64xf32, #tpu.memory_space<vmem>>, vector<1x32xf32>,
    %138 = vector.extract_strided_slice %135 {offsets = [2, 0], sizes = [1, 32], strides = [1, 1]} : vector<4x32xf32> to vector<1x32xf32>
    %c5 = arith.constant 5 : index
    %c32_37 = arith.constant 32 : index
    %139 = vector.load %arg4[%c5, %c32_37] : memref<16x64xf32, #tpu.memory_space<vmem>>, vector<1x32xf32>
    tpu.vector_store %arg4[%c5, %c32_37], %138 {strides = array<i32>} : memref<16x64xf32, #tpu.memory_space<vmem>>, vector<1x32xf32>,
    %140 = vector.extract_strided_slice %135 {offsets = [1, 0], sizes = [1, 32], strides = [1, 1]} : vector<4x32xf32> to vector<1x32xf32>
    %c10 = arith.constant 10 : index
    %c0_38 = arith.constant 0 : index
    %141 = vector.load %arg4[%c10, %c0_38] : memref<16x64xf32, #tpu.memory_space<vmem>>, vector<1x32xf32>
    tpu.vector_store %arg4[%c10, %c0_38], %140 {strides = array<i32>} : memref<16x64xf32, #tpu.memory_space<vmem>>, vector<1x32xf32>,
    %142 = vector.extract_strided_slice %135 {offsets = [3, 0], sizes = [1, 32], strides = [1, 1]} : vector<4x32xf32> to vector<1x32xf32>
    %c13 = arith.constant 13 : index
    %c32_39 = arith.constant 32 : index
    %143 = vector.load %arg4[%c13, %c32_39] : memref<16x64xf32, #tpu.memory_space<vmem>>, vector<1x32xf32>
    tpu.vector_store %arg4[%c13, %c32_39], %142 {strides = array<i32>} : memref<16x64xf32, #tpu.memory_space<vmem>>, vector<1x32xf32>,
    %144 = vector.extract_strided_slice %5 {offsets = [3, 0], sizes = [1, 128], strides = [1, 1]} : vector<16x256xf32> to vector<1x128xf32>
    %145 = vector.extract_strided_slice %5 {offsets = [11, 0], sizes = [1, 128], strides = [1, 1]} : vector<16x256xf32> to vector<1x128xf32>
    %146 = vector.extract_strided_slice %5 {offsets = [4, 128], sizes = [1, 128], strides = [1, 1]} : vector<16x256xf32> to vector<1x128xf32>
    %147 = vector.extract_strided_slice %5 {offsets = [12, 128], sizes = [1, 128], strides = [1, 1]} : vector<16x256xf32> to vector<1x128xf32>
    %148 = tpu.concatenate %144, %145, %146, %147 in 0 : vector<1x128xf32>, vector<1x128xf32>, vector<1x128xf32>, vector<1x128xf32> -> vector<4x128xf32>
    %149 = vector.extract_strided_slice %135 {offsets = [0, 0], sizes = [2, 32], strides = [1, 1]} : vector<4x32xf32> to vector<2x32xf32>
    %cst_40 = arith.constant dense<0.000000e+00> : vector<2x128xf32>
    %150 = tpu.matmul %149, %7, %cst_40 {dimension_numbers = #tpu.dot_dimension_numbers<[1], [0], [0], [1], [0, 0, 1, 1], [], []>} : vector<2x32xf32>, vector<32x128xf32>, vector<2x128xf32> -> vector<2x128xf32>
    %151 = vector.extract_strided_slice %135 {offsets = [2, 0], sizes = [2, 32], strides = [1, 1]} : vector<4x32xf32> to vector<2x32xf32>
    %cst_41 = arith.constant dense<0.000000e+00> : vector<2x128xf32>
    %152 = tpu.matmul %151, %9, %cst_41 {dimension_numbers = #tpu.dot_dimension_numbers<[1], [0], [0], [1], [0, 0, 1, 1], [], []>} : vector<2x32xf32>, vector<32x128xf32>, vector<2x128xf32> -> vector<2x128xf32>
    %153 = tpu.concatenate %150, %152 in 0 : vector<2x128xf32>, vector<2x128xf32> -> vector<4x128xf32>
    %154 = arith.addf %148, %153 : vector<4x128xf32>
    %155 = vector.extract_strided_slice %154 {offsets = [0, 0], sizes = [4, 32], strides = [1, 1]} : vector<4x128xf32> to vector<4x32xf32>
    %156 = arith.negf %155 : vector<4x32xf32>
    %157 = math.exp %156 : vector<4x32xf32>
    %cst_42 = arith.constant 1.000000e+00 : f32
    %158 = vector.broadcast %cst_42 : f32 to vector<4x32xf32>
    %159 = arith.addf %158, %157 : vector<4x32xf32>
    %160 = arith.divf %158, %159 : vector<4x32xf32>
    %161 = vector.extract_strided_slice %154 {offsets = [0, 32], sizes = [4, 32], strides = [1, 1]} : vector<4x128xf32> to vector<4x32xf32>
    %162 = arith.negf %161 : vector<4x32xf32>
    %163 = math.exp %162 : vector<4x32xf32>
    %cst_43 = arith.constant 1.000000e+00 : f32
    %164 = vector.broadcast %cst_43 : f32 to vector<4x32xf32>
    %165 = arith.addf %164, %163 : vector<4x32xf32>
    %166 = arith.divf %164, %165 : vector<4x32xf32>
    %167 = vector.extract_strided_slice %154 {offsets = [0, 64], sizes = [4, 32], strides = [1, 1]} : vector<4x128xf32> to vector<4x32xf32>
    %168 = math.tanh %167 : vector<4x32xf32>
    %169 = vector.extract_strided_slice %154 {offsets = [0, 96], sizes = [4, 32], strides = [1, 1]} : vector<4x128xf32> to vector<4x32xf32>
    %170 = arith.negf %169 : vector<4x32xf32>
    %171 = math.exp %170 : vector<4x32xf32>
    %cst_44 = arith.constant 1.000000e+00 : f32
    %172 = vector.broadcast %cst_44 : f32 to vector<4x32xf32>
    %173 = arith.addf %172, %171 : vector<4x32xf32>
    %174 = arith.divf %172, %173 : vector<4x32xf32>
    %175 = arith.mulf %166, %133 : vector<4x32xf32>
    %176 = arith.mulf %160, %168 : vector<4x32xf32>
    %177 = arith.addf %175, %176 : vector<4x32xf32>
    %178 = math.tanh %177 : vector<4x32xf32>
    %179 = arith.mulf %174, %178 : vector<4x32xf32>
    %180 = vector.extract_strided_slice %179 {offsets = [0, 0], sizes = [1, 32], strides = [1, 1]} : vector<4x32xf32> to vector<1x32xf32>
    %c3 = arith.constant 3 : index
    %c0_45 = arith.constant 0 : index
    %181 = vector.load %arg4[%c3, %c0_45] : memref<16x64xf32, #tpu.memory_space<vmem>>, vector<1x32xf32>
    tpu.vector_store %arg4[%c3, %c0_45], %180 {strides = array<i32>} : memref<16x64xf32, #tpu.memory_space<vmem>>, vector<1x32xf32>,
    %182 = vector.extract_strided_slice %179 {offsets = [2, 0], sizes = [1, 32], strides = [1, 1]} : vector<4x32xf32> to vector<1x32xf32>
    %c4 = arith.constant 4 : index
    %c32_46 = arith.constant 32 : index
    %183 = vector.load %arg4[%c4, %c32_46] : memref<16x64xf32, #tpu.memory_space<vmem>>, vector<1x32xf32>
    tpu.vector_store %arg4[%c4, %c32_46], %182 {strides = array<i32>} : memref<16x64xf32, #tpu.memory_space<vmem>>, vector<1x32xf32>,
    %184 = vector.extract_strided_slice %179 {offsets = [1, 0], sizes = [1, 32], strides = [1, 1]} : vector<4x32xf32> to vector<1x32xf32>
    %c11 = arith.constant 11 : index
    %c0_47 = arith.constant 0 : index
    %185 = vector.load %arg4[%c11, %c0_47] : memref<16x64xf32, #tpu.memory_space<vmem>>, vector<1x32xf32>
    tpu.vector_store %arg4[%c11, %c0_47], %184 {strides = array<i32>} : memref<16x64xf32, #tpu.memory_space<vmem>>, vector<1x32xf32>,
    %186 = vector.extract_strided_slice %179 {offsets = [3, 0], sizes = [1, 32], strides = [1, 1]} : vector<4x32xf32> to vector<1x32xf32>
    %c12 = arith.constant 12 : index
    %c32_48 = arith.constant 32 : index
    %187 = vector.load %arg4[%c12, %c32_48] : memref<16x64xf32, #tpu.memory_space<vmem>>, vector<1x32xf32>
    tpu.vector_store %arg4[%c12, %c32_48], %186 {strides = array<i32>} : memref<16x64xf32, #tpu.memory_space<vmem>>, vector<1x32xf32>,
    %188 = vector.extract_strided_slice %5 {offsets = [4, 0], sizes = [1, 128], strides = [1, 1]} : vector<16x256xf32> to vector<1x128xf32>
    %189 = vector.extract_strided_slice %5 {offsets = [12, 0], sizes = [1, 128], strides = [1, 1]} : vector<16x256xf32> to vector<1x128xf32>
    %190 = vector.extract_strided_slice %5 {offsets = [3, 128], sizes = [1, 128], strides = [1, 1]} : vector<16x256xf32> to vector<1x128xf32>
    %191 = vector.extract_strided_slice %5 {offsets = [11, 128], sizes = [1, 128], strides = [1, 1]} : vector<16x256xf32> to vector<1x128xf32>
    %192 = tpu.concatenate %188, %189, %190, %191 in 0 : vector<1x128xf32>, vector<1x128xf32>, vector<1x128xf32>, vector<1x128xf32> -> vector<4x128xf32>
    %193 = vector.extract_strided_slice %179 {offsets = [0, 0], sizes = [2, 32], strides = [1, 1]} : vector<4x32xf32> to vector<2x32xf32>
    %cst_49 = arith.constant dense<0.000000e+00> : vector<2x128xf32>
    %194 = tpu.matmul %193, %7, %cst_49 {dimension_numbers = #tpu.dot_dimension_numbers<[1], [0], [0], [1], [0, 0, 1, 1], [], []>} : vector<2x32xf32>, vector<32x128xf32>, vector<2x128xf32> -> vector<2x128xf32>
    %195 = vector.extract_strided_slice %179 {offsets = [2, 0], sizes = [2, 32], strides = [1, 1]} : vector<4x32xf32> to vector<2x32xf32>
    %cst_50 = arith.constant dense<0.000000e+00> : vector<2x128xf32>
    %196 = tpu.matmul %195, %9, %cst_50 {dimension_numbers = #tpu.dot_dimension_numbers<[1], [0], [0], [1], [0, 0, 1, 1], [], []>} : vector<2x32xf32>, vector<32x128xf32>, vector<2x128xf32> -> vector<2x128xf32>
    %197 = tpu.concatenate %194, %196 in 0 : vector<2x128xf32>, vector<2x128xf32> -> vector<4x128xf32>
    %198 = arith.addf %192, %197 : vector<4x128xf32>
    %199 = vector.extract_strided_slice %198 {offsets = [0, 0], sizes = [4, 32], strides = [1, 1]} : vector<4x128xf32> to vector<4x32xf32>
    %200 = arith.negf %199 : vector<4x32xf32>
    %201 = math.exp %200 : vector<4x32xf32>
    %cst_51 = arith.constant 1.000000e+00 : f32
    %202 = vector.broadcast %cst_51 : f32 to vector<4x32xf32>
    %203 = arith.addf %202, %201 : vector<4x32xf32>
    %204 = arith.divf %202, %203 : vector<4x32xf32>
    %205 = vector.extract_strided_slice %198 {offsets = [0, 32], sizes = [4, 32], strides = [1, 1]} : vector<4x128xf32> to vector<4x32xf32>
    %206 = arith.negf %205 : vector<4x32xf32>
    %207 = math.exp %206 : vector<4x32xf32>
    %cst_52 = arith.constant 1.000000e+00 : f32
    %208 = vector.broadcast %cst_52 : f32 to vector<4x32xf32>
    %209 = arith.addf %208, %207 : vector<4x32xf32>
    %210 = arith.divf %208, %209 : vector<4x32xf32>
    %211 = vector.extract_strided_slice %198 {offsets = [0, 64], sizes = [4, 32], strides = [1, 1]} : vector<4x128xf32> to vector<4x32xf32>
    %212 = math.tanh %211 : vector<4x32xf32>
    %213 = vector.extract_strided_slice %198 {offsets = [0, 96], sizes = [4, 32], strides = [1, 1]} : vector<4x128xf32> to vector<4x32xf32>
    %214 = arith.negf %213 : vector<4x32xf32>
    %215 = math.exp %214 : vector<4x32xf32>
    %cst_53 = arith.constant 1.000000e+00 : f32
    %216 = vector.broadcast %cst_53 : f32 to vector<4x32xf32>
    %217 = arith.addf %216, %215 : vector<4x32xf32>
    %218 = arith.divf %216, %217 : vector<4x32xf32>
    %219 = arith.mulf %210, %177 : vector<4x32xf32>
    %220 = arith.mulf %204, %212 : vector<4x32xf32>
    %221 = arith.addf %219, %220 : vector<4x32xf32>
    %222 = math.tanh %221 : vector<4x32xf32>
    %223 = arith.mulf %218, %222 : vector<4x32xf32>
    %224 = vector.extract_strided_slice %223 {offsets = [0, 0], sizes = [1, 32], strides = [1, 1]} : vector<4x32xf32> to vector<1x32xf32>
    %c4_54 = arith.constant 4 : index
    %c0_55 = arith.constant 0 : index
    %225 = vector.load %arg4[%c4_54, %c0_55] : memref<16x64xf32, #tpu.memory_space<vmem>>, vector<1x32xf32>
    tpu.vector_store %arg4[%c4_54, %c0_55], %224 {strides = array<i32>} : memref<16x64xf32, #tpu.memory_space<vmem>>, vector<1x32xf32>,
    %226 = vector.extract_strided_slice %223 {offsets = [2, 0], sizes = [1, 32], strides = [1, 1]} : vector<4x32xf32> to vector<1x32xf32>
    %c3_56 = arith.constant 3 : index
    %c32_57 = arith.constant 32 : index
    %227 = vector.load %arg4[%c3_56, %c32_57] : memref<16x64xf32, #tpu.memory_space<vmem>>, vector<1x32xf32>
    tpu.vector_store %arg4[%c3_56, %c32_57], %226 {strides = array<i32>} : memref<16x64xf32, #tpu.memory_space<vmem>>, vector<1x32xf32>,
    %228 = vector.extract_strided_slice %223 {offsets = [1, 0], sizes = [1, 32], strides = [1, 1]} : vector<4x32xf32> to vector<1x32xf32>
    %c12_58 = arith.constant 12 : index
    %c0_59 = arith.constant 0 : index
    %229 = vector.load %arg4[%c12_58, %c0_59] : memref<16x64xf32, #tpu.memory_space<vmem>>, vector<1x32xf32>
    tpu.vector_store %arg4[%c12_58, %c0_59], %228 {strides = array<i32>} : memref<16x64xf32, #tpu.memory_space<vmem>>, vector<1x32xf32>,
    %230 = vector.extract_strided_slice %223 {offsets = [3, 0], sizes = [1, 32], strides = [1, 1]} : vector<4x32xf32> to vector<1x32xf32>
    %c11_60 = arith.constant 11 : index
    %c32_61 = arith.constant 32 : index
    %231 = vector.load %arg4[%c11_60, %c32_61] : memref<16x64xf32, #tpu.memory_space<vmem>>, vector<1x32xf32>
    tpu.vector_store %arg4[%c11_60, %c32_61], %230 {strides = array<i32>} : memref<16x64xf32, #tpu.memory_space<vmem>>, vector<1x32xf32>,
    %232 = vector.extract_strided_slice %5 {offsets = [5, 0], sizes = [1, 128], strides = [1, 1]} : vector<16x256xf32> to vector<1x128xf32>
    %233 = vector.extract_strided_slice %5 {offsets = [13, 0], sizes = [1, 128], strides = [1, 1]} : vector<16x256xf32> to vector<1x128xf32>
    %234 = vector.extract_strided_slice %5 {offsets = [2, 128], sizes = [1, 128], strides = [1, 1]} : vector<16x256xf32> to vector<1x128xf32>
    %235 = vector.extract_strided_slice %5 {offsets = [10, 128], sizes = [1, 128], strides = [1, 1]} : vector<16x256xf32> to vector<1x128xf32>
    %236 = tpu.concatenate %232, %233, %234, %235 in 0 : vector<1x128xf32>, vector<1x128xf32>, vector<1x128xf32>, vector<1x128xf32> -> vector<4x128xf32>
    %237 = vector.extract_strided_slice %223 {offsets = [0, 0], sizes = [2, 32], strides = [1, 1]} : vector<4x32xf32> to vector<2x32xf32>
    %cst_62 = arith.constant dense<0.000000e+00> : vector<2x128xf32>
    %238 = tpu.matmul %237, %7, %cst_62 {dimension_numbers = #tpu.dot_dimension_numbers<[1], [0], [0], [1], [0, 0, 1, 1], [], []>} : vector<2x32xf32>, vector<32x128xf32>, vector<2x128xf32> -> vector<2x128xf32>
    %239 = vector.extract_strided_slice %223 {offsets = [2, 0], sizes = [2, 32], strides = [1, 1]} : vector<4x32xf32> to vector<2x32xf32>
    %cst_63 = arith.constant dense<0.000000e+00> : vector<2x128xf32>
    %240 = tpu.matmul %239, %9, %cst_63 {dimension_numbers = #tpu.dot_dimension_numbers<[1], [0], [0], [1], [0, 0, 1, 1], [], []>} : vector<2x32xf32>, vector<32x128xf32>, vector<2x128xf32> -> vector<2x128xf32>
    %241 = tpu.concatenate %238, %240 in 0 : vector<2x128xf32>, vector<2x128xf32> -> vector<4x128xf32>
    %242 = arith.addf %236, %241 : vector<4x128xf32>
    %243 = vector.extract_strided_slice %242 {offsets = [0, 0], sizes = [4, 32], strides = [1, 1]} : vector<4x128xf32> to vector<4x32xf32>
    %244 = arith.negf %243 : vector<4x32xf32>
    %245 = math.exp %244 : vector<4x32xf32>
    %cst_64 = arith.constant 1.000000e+00 : f32
    %246 = vector.broadcast %cst_64 : f32 to vector<4x32xf32>
    %247 = arith.addf %246, %245 : vector<4x32xf32>
    %248 = arith.divf %246, %247 : vector<4x32xf32>
    %249 = vector.extract_strided_slice %242 {offsets = [0, 32], sizes = [4, 32], strides = [1, 1]} : vector<4x128xf32> to vector<4x32xf32>
    %250 = arith.negf %249 : vector<4x32xf32>
    %251 = math.exp %250 : vector<4x32xf32>
    %cst_65 = arith.constant 1.000000e+00 : f32
    %252 = vector.broadcast %cst_65 : f32 to vector<4x32xf32>
    %253 = arith.addf %252, %251 : vector<4x32xf32>
    %254 = arith.divf %252, %253 : vector<4x32xf32>
    %255 = vector.extract_strided_slice %242 {offsets = [0, 64], sizes = [4, 32], strides = [1, 1]} : vector<4x128xf32> to vector<4x32xf32>
    %256 = math.tanh %255 : vector<4x32xf32>
    %257 = vector.extract_strided_slice %242 {offsets = [0, 96], sizes = [4, 32], strides = [1, 1]} : vector<4x128xf32> to vector<4x32xf32>
    %258 = arith.negf %257 : vector<4x32xf32>
    %259 = math.exp %258 : vector<4x32xf32>
    %cst_66 = arith.constant 1.000000e+00 : f32
    %260 = vector.broadcast %cst_66 : f32 to vector<4x32xf32>
    %261 = arith.addf %260, %259 : vector<4x32xf32>
    %262 = arith.divf %260, %261 : vector<4x32xf32>
    %263 = arith.mulf %254, %221 : vector<4x32xf32>
    %264 = arith.mulf %248, %256 : vector<4x32xf32>
    %265 = arith.addf %263, %264 : vector<4x32xf32>
    %266 = math.tanh %265 : vector<4x32xf32>
    %267 = arith.mulf %262, %266 : vector<4x32xf32>
    %268 = vector.extract_strided_slice %267 {offsets = [0, 0], sizes = [1, 32], strides = [1, 1]} : vector<4x32xf32> to vector<1x32xf32>
    %c5_67 = arith.constant 5 : index
    %c0_68 = arith.constant 0 : index
    %269 = vector.load %arg4[%c5_67, %c0_68] : memref<16x64xf32, #tpu.memory_space<vmem>>, vector<1x32xf32>
    tpu.vector_store %arg4[%c5_67, %c0_68], %268 {strides = array<i32>} : memref<16x64xf32, #tpu.memory_space<vmem>>, vector<1x32xf32>,
    %270 = vector.extract_strided_slice %267 {offsets = [2, 0], sizes = [1, 32], strides = [1, 1]} : vector<4x32xf32> to vector<1x32xf32>
    %c2_69 = arith.constant 2 : index
    %c32_70 = arith.constant 32 : index
    %271 = vector.load %arg4[%c2_69, %c32_70] : memref<16x64xf32, #tpu.memory_space<vmem>>, vector<1x32xf32>
    tpu.vector_store %arg4[%c2_69, %c32_70], %270 {strides = array<i32>} : memref<16x64xf32, #tpu.memory_space<vmem>>, vector<1x32xf32>,
    %272 = vector.extract_strided_slice %267 {offsets = [1, 0], sizes = [1, 32], strides = [1, 1]} : vector<4x32xf32> to vector<1x32xf32>
    %c13_71 = arith.constant 13 : index
    %c0_72 = arith.constant 0 : index
    %273 = vector.load %arg4[%c13_71, %c0_72] : memref<16x64xf32, #tpu.memory_space<vmem>>, vector<1x32xf32>
    tpu.vector_store %arg4[%c13_71, %c0_72], %272 {strides = array<i32>} : memref<16x64xf32, #tpu.memory_space<vmem>>, vector<1x32xf32>,
    %274 = vector.extract_strided_slice %267 {offsets = [3, 0], sizes = [1, 32], strides = [1, 1]} : vector<4x32xf32> to vector<1x32xf32>
    %c10_73 = arith.constant 10 : index
    %c32_74 = arith.constant 32 : index
    %275 = vector.load %arg4[%c10_73, %c32_74] : memref<16x64xf32, #tpu.memory_space<vmem>>, vector<1x32xf32>
    tpu.vector_store %arg4[%c10_73, %c32_74], %274 {strides = array<i32>} : memref<16x64xf32, #tpu.memory_space<vmem>>, vector<1x32xf32>,
    %276 = vector.extract_strided_slice %5 {offsets = [6, 0], sizes = [1, 128], strides = [1, 1]} : vector<16x256xf32> to vector<1x128xf32>
    %277 = vector.extract_strided_slice %5 {offsets = [14, 0], sizes = [1, 128], strides = [1, 1]} : vector<16x256xf32> to vector<1x128xf32>
    %278 = vector.extract_strided_slice %5 {offsets = [1, 128], sizes = [1, 128], strides = [1, 1]} : vector<16x256xf32> to vector<1x128xf32>
    %279 = vector.extract_strided_slice %5 {offsets = [9, 128], sizes = [1, 128], strides = [1, 1]} : vector<16x256xf32> to vector<1x128xf32>
    %280 = tpu.concatenate %276, %277, %278, %279 in 0 : vector<1x128xf32>, vector<1x128xf32>, vector<1x128xf32>, vector<1x128xf32> -> vector<4x128xf32>
    %281 = vector.extract_strided_slice %267 {offsets = [0, 0], sizes = [2, 32], strides = [1, 1]} : vector<4x32xf32> to vector<2x32xf32>
    %cst_75 = arith.constant dense<0.000000e+00> : vector<2x128xf32>
    %282 = tpu.matmul %281, %7, %cst_75 {dimension_numbers = #tpu.dot_dimension_numbers<[1], [0], [0], [1], [0, 0, 1, 1], [], []>} : vector<2x32xf32>, vector<32x128xf32>, vector<2x128xf32> -> vector<2x128xf32>
    %283 = vector.extract_strided_slice %267 {offsets = [2, 0], sizes = [2, 32], strides = [1, 1]} : vector<4x32xf32> to vector<2x32xf32>
    %cst_76 = arith.constant dense<0.000000e+00> : vector<2x128xf32>
    %284 = tpu.matmul %283, %9, %cst_76 {dimension_numbers = #tpu.dot_dimension_numbers<[1], [0], [0], [1], [0, 0, 1, 1], [], []>} : vector<2x32xf32>, vector<32x128xf32>, vector<2x128xf32> -> vector<2x128xf32>
    %285 = tpu.concatenate %282, %284 in 0 : vector<2x128xf32>, vector<2x128xf32> -> vector<4x128xf32>
    %286 = arith.addf %280, %285 : vector<4x128xf32>
    %287 = vector.extract_strided_slice %286 {offsets = [0, 0], sizes = [4, 32], strides = [1, 1]} : vector<4x128xf32> to vector<4x32xf32>
    %288 = arith.negf %287 : vector<4x32xf32>
    %289 = math.exp %288 : vector<4x32xf32>
    %cst_77 = arith.constant 1.000000e+00 : f32
    %290 = vector.broadcast %cst_77 : f32 to vector<4x32xf32>
    %291 = arith.addf %290, %289 : vector<4x32xf32>
    %292 = arith.divf %290, %291 : vector<4x32xf32>
    %293 = vector.extract_strided_slice %286 {offsets = [0, 32], sizes = [4, 32], strides = [1, 1]} : vector<4x128xf32> to vector<4x32xf32>
    %294 = arith.negf %293 : vector<4x32xf32>
    %295 = math.exp %294 : vector<4x32xf32>
    %cst_78 = arith.constant 1.000000e+00 : f32
    %296 = vector.broadcast %cst_78 : f32 to vector<4x32xf32>
    %297 = arith.addf %296, %295 : vector<4x32xf32>
    %298 = arith.divf %296, %297 : vector<4x32xf32>
    %299 = vector.extract_strided_slice %286 {offsets = [0, 64], sizes = [4, 32], strides = [1, 1]} : vector<4x128xf32> to vector<4x32xf32>
    %300 = math.tanh %299 : vector<4x32xf32>
    %301 = vector.extract_strided_slice %286 {offsets = [0, 96], sizes = [4, 32], strides = [1, 1]} : vector<4x128xf32> to vector<4x32xf32>
    %302 = arith.negf %301 : vector<4x32xf32>
    %303 = math.exp %302 : vector<4x32xf32>
    %cst_79 = arith.constant 1.000000e+00 : f32
    %304 = vector.broadcast %cst_79 : f32 to vector<4x32xf32>
    %305 = arith.addf %304, %303 : vector<4x32xf32>
    %306 = arith.divf %304, %305 : vector<4x32xf32>
    %307 = arith.mulf %298, %265 : vector<4x32xf32>
    %308 = arith.mulf %292, %300 : vector<4x32xf32>
    %309 = arith.addf %307, %308 : vector<4x32xf32>
    %310 = math.tanh %309 : vector<4x32xf32>
    %311 = arith.mulf %306, %310 : vector<4x32xf32>
    %312 = vector.extract_strided_slice %311 {offsets = [0, 0], sizes = [1, 32], strides = [1, 1]} : vector<4x32xf32> to vector<1x32xf32>
    %c6_80 = arith.constant 6 : index
    %c0_81 = arith.constant 0 : index
    %313 = vector.load %arg4[%c6_80, %c0_81] : memref<16x64xf32, #tpu.memory_space<vmem>>, vector<1x32xf32>
    tpu.vector_store %arg4[%c6_80, %c0_81], %312 {strides = array<i32>} : memref<16x64xf32, #tpu.memory_space<vmem>>, vector<1x32xf32>,
    %314 = vector.extract_strided_slice %311 {offsets = [2, 0], sizes = [1, 32], strides = [1, 1]} : vector<4x32xf32> to vector<1x32xf32>
    %c1_82 = arith.constant 1 : index
    %c32_83 = arith.constant 32 : index
    %315 = vector.load %arg4[%c1_82, %c32_83] : memref<16x64xf32, #tpu.memory_space<vmem>>, vector<1x32xf32>
    tpu.vector_store %arg4[%c1_82, %c32_83], %314 {strides = array<i32>} : memref<16x64xf32, #tpu.memory_space<vmem>>, vector<1x32xf32>,
    %316 = vector.extract_strided_slice %311 {offsets = [1, 0], sizes = [1, 32], strides = [1, 1]} : vector<4x32xf32> to vector<1x32xf32>
    %c14_84 = arith.constant 14 : index
    %c0_85 = arith.constant 0 : index
    %317 = vector.load %arg4[%c14_84, %c0_85] : memref<16x64xf32, #tpu.memory_space<vmem>>, vector<1x32xf32>
    tpu.vector_store %arg4[%c14_84, %c0_85], %316 {strides = array<i32>} : memref<16x64xf32, #tpu.memory_space<vmem>>, vector<1x32xf32>,
    %318 = vector.extract_strided_slice %311 {offsets = [3, 0], sizes = [1, 32], strides = [1, 1]} : vector<4x32xf32> to vector<1x32xf32>
    %c9_86 = arith.constant 9 : index
    %c32_87 = arith.constant 32 : index
    %319 = vector.load %arg4[%c9_86, %c32_87] : memref<16x64xf32, #tpu.memory_space<vmem>>, vector<1x32xf32>
    tpu.vector_store %arg4[%c9_86, %c32_87], %318 {strides = array<i32>} : memref<16x64xf32, #tpu.memory_space<vmem>>, vector<1x32xf32>,
    %320 = vector.extract_strided_slice %5 {offsets = [7, 0], sizes = [1, 128], strides = [1, 1]} : vector<16x256xf32> to vector<1x128xf32>
    %321 = vector.extract_strided_slice %5 {offsets = [15, 0], sizes = [1, 128], strides = [1, 1]} : vector<16x256xf32> to vector<1x128xf32>
    %322 = vector.extract_strided_slice %5 {offsets = [0, 128], sizes = [1, 128], strides = [1, 1]} : vector<16x256xf32> to vector<1x128xf32>
    %323 = vector.extract_strided_slice %5 {offsets = [8, 128], sizes = [1, 128], strides = [1, 1]} : vector<16x256xf32> to vector<1x128xf32>
    %324 = tpu.concatenate %320, %321, %322, %323 in 0 : vector<1x128xf32>, vector<1x128xf32>, vector<1x128xf32>, vector<1x128xf32> -> vector<4x128xf32>
    %325 = vector.extract_strided_slice %311 {offsets = [0, 0], sizes = [2, 32], strides = [1, 1]} : vector<4x32xf32> to vector<2x32xf32>
    %cst_88 = arith.constant dense<0.000000e+00> : vector<2x128xf32>
    %326 = tpu.matmul %325, %7, %cst_88 {dimension_numbers = #tpu.dot_dimension_numbers<[1], [0], [0], [1], [0, 0, 1, 1], [], []>} : vector<2x32xf32>, vector<32x128xf32>, vector<2x128xf32> -> vector<2x128xf32>
    %327 = vector.extract_strided_slice %311 {offsets = [2, 0], sizes = [2, 32], strides = [1, 1]} : vector<4x32xf32> to vector<2x32xf32>
    %cst_89 = arith.constant dense<0.000000e+00> : vector<2x128xf32>
    %328 = tpu.matmul %327, %9, %cst_89 {dimension_numbers = #tpu.dot_dimension_numbers<[1], [0], [0], [1], [0, 0, 1, 1], [], []>} : vector<2x32xf32>, vector<32x128xf32>, vector<2x128xf32> -> vector<2x128xf32>
    %329 = tpu.concatenate %326, %328 in 0 : vector<2x128xf32>, vector<2x128xf32> -> vector<4x128xf32>
    %330 = arith.addf %324, %329 : vector<4x128xf32>
    %331 = vector.extract_strided_slice %330 {offsets = [0, 0], sizes = [4, 32], strides = [1, 1]} : vector<4x128xf32> to vector<4x32xf32>
    %332 = arith.negf %331 : vector<4x32xf32>
    %333 = math.exp %332 : vector<4x32xf32>
    %cst_90 = arith.constant 1.000000e+00 : f32
    %334 = vector.broadcast %cst_90 : f32 to vector<4x32xf32>
    %335 = arith.addf %334, %333 : vector<4x32xf32>
    %336 = arith.divf %334, %335 : vector<4x32xf32>
    %337 = vector.extract_strided_slice %330 {offsets = [0, 32], sizes = [4, 32], strides = [1, 1]} : vector<4x128xf32> to vector<4x32xf32>
    %338 = arith.negf %337 : vector<4x32xf32>
    %339 = math.exp %338 : vector<4x32xf32>
    %cst_91 = arith.constant 1.000000e+00 : f32
    %340 = vector.broadcast %cst_91 : f32 to vector<4x32xf32>
    %341 = arith.addf %340, %339 : vector<4x32xf32>
    %342 = arith.divf %340, %341 : vector<4x32xf32>
    %343 = vector.extract_strided_slice %330 {offsets = [0, 64], sizes = [4, 32], strides = [1, 1]} : vector<4x128xf32> to vector<4x32xf32>
    %344 = math.tanh %343 : vector<4x32xf32>
    %345 = vector.extract_strided_slice %330 {offsets = [0, 96], sizes = [4, 32], strides = [1, 1]} : vector<4x128xf32> to vector<4x32xf32>
    %346 = arith.negf %345 : vector<4x32xf32>
    %347 = math.exp %346 : vector<4x32xf32>
    %cst_92 = arith.constant 1.000000e+00 : f32
    %348 = vector.broadcast %cst_92 : f32 to vector<4x32xf32>
    %349 = arith.addf %348, %347 : vector<4x32xf32>
    %350 = arith.divf %348, %349 : vector<4x32xf32>
    %351 = arith.mulf %342, %309 : vector<4x32xf32>
    %352 = arith.mulf %336, %344 : vector<4x32xf32>
    %353 = arith.addf %351, %352 : vector<4x32xf32>
    %354 = math.tanh %353 : vector<4x32xf32>
    %355 = arith.mulf %350, %354 : vector<4x32xf32>
    %356 = vector.extract_strided_slice %355 {offsets = [0, 0], sizes = [1, 32], strides = [1, 1]} : vector<4x32xf32> to vector<1x32xf32>
    %c7_93 = arith.constant 7 : index
    %c0_94 = arith.constant 0 : index
    %357 = vector.load %arg4[%c7_93, %c0_94] : memref<16x64xf32, #tpu.memory_space<vmem>>, vector<1x32xf32>
    tpu.vector_store %arg4[%c7_93, %c0_94], %356 {strides = array<i32>} : memref<16x64xf32, #tpu.memory_space<vmem>>, vector<1x32xf32>,
    %358 = vector.extract_strided_slice %355 {offsets = [2, 0], sizes = [1, 32], strides = [1, 1]} : vector<4x32xf32> to vector<1x32xf32>
    %c0_95 = arith.constant 0 : index
    %c32_96 = arith.constant 32 : index
    %359 = vector.load %arg4[%c0_95, %c32_96] : memref<16x64xf32, #tpu.memory_space<vmem>>, vector<1x32xf32>
    tpu.vector_store %arg4[%c0_95, %c32_96], %358 {strides = array<i32>} : memref<16x64xf32, #tpu.memory_space<vmem>>, vector<1x32xf32>,
    %360 = vector.extract_strided_slice %355 {offsets = [1, 0], sizes = [1, 32], strides = [1, 1]} : vector<4x32xf32> to vector<1x32xf32>
    %c15_97 = arith.constant 15 : index
    %c0_98 = arith.constant 0 : index
    %361 = vector.load %arg4[%c15_97, %c0_98] : memref<16x64xf32, #tpu.memory_space<vmem>>, vector<1x32xf32>
    tpu.vector_store %arg4[%c15_97, %c0_98], %360 {strides = array<i32>} : memref<16x64xf32, #tpu.memory_space<vmem>>, vector<1x32xf32>,
    %362 = vector.extract_strided_slice %355 {offsets = [3, 0], sizes = [1, 32], strides = [1, 1]} : vector<4x32xf32> to vector<1x32xf32>
    %c8_99 = arith.constant 8 : index
    %c32_100 = arith.constant 32 : index
    %363 = vector.load %arg4[%c8_99, %c32_100] : memref<16x64xf32, #tpu.memory_space<vmem>>, vector<1x32xf32>
    tpu.vector_store %arg4[%c8_99, %c32_100], %362 {strides = array<i32>} : memref<16x64xf32, #tpu.memory_space<vmem>>, vector<1x32xf32>,
    return
  }
}

module attributes {stable_mosaic.version = 11 : i64} {
  func.func @_attn_ln_mlp_kernel(%arg0: memref<16x64xf32, #tpu.memory_space<vmem>>, %arg1: memref<4x64x16xf32, #tpu.memory_space<vmem>>, %arg2: memref<4x1x16xf32, #tpu.memory_space<vmem>>, %arg3: memref<4x64x16xf32, #tpu.memory_space<vmem>>, %arg4: memref<4x1x16xf32, #tpu.memory_space<vmem>>, %arg5: memref<4x64x16xf32, #tpu.memory_space<vmem>>, %arg6: memref<4x1x16xf32, #tpu.memory_space<vmem>>, %arg7: memref<4x16x64xf32, #tpu.memory_space<vmem>>, %arg8: memref<1x64xf32, #tpu.memory_space<vmem>>, %arg9: memref<1x64xf32, #tpu.memory_space<vmem>>, %arg10: memref<1x64xf32, #tpu.memory_space<vmem>>, %arg11: memref<64x256xf32, #tpu.memory_space<vmem>>, %arg12: memref<1x256xf32, #tpu.memory_space<vmem>>, %arg13: memref<256x128xf32, #tpu.memory_space<vmem>>, %arg14: memref<1x128xf32, #tpu.memory_space<vmem>>, %arg15: memref<128x5xf32, #tpu.memory_space<vmem>>, %arg16: memref<1x5xf32, #tpu.memory_space<vmem>>, %arg17: memref<2x5xf32, #tpu.memory_space<vmem>>) attributes {dimension_semantics = [], scalar_prefetch = 0 : i64, scratch_operands = 0 : i64, tpu.core_type = #tpu.core_type<tc>} {
    %c0 = arith.constant 0 : index
    %c0_0 = arith.constant 0 : index
    %0 = vector.load %arg0[%c0, %c0_0] : memref<16x64xf32, #tpu.memory_space<vmem>>, vector<16x64xf32>
    %cst = arith.constant 0.000000e+00 : f32
    %1 = vector.broadcast %cst : f32 to vector<16x64xf32>
    %c0_1 = arith.constant 0 : index
    %c0_2 = arith.constant 0 : index
    %c0_3 = arith.constant 0 : index
    %2 = vector.load %arg1[%c0_1, %c0_2, %c0_3] : memref<4x64x16xf32, #tpu.memory_space<vmem>>, vector<1x64x16xf32>
    %3 = vector.shape_cast %2 : vector<1x64x16xf32> to vector<64x16xf32>
    %cst_4 = arith.constant dense<0.000000e+00> : vector<16x16xf32>
    %4 = tpu.matmul %0, %3, %cst_4 {dimension_numbers = #tpu.dot_dimension_numbers<[1], [0], [0], [1], [0, 0, 1, 1], [], []>} : vector<16x64xf32>, vector<64x16xf32>, vector<16x16xf32> -> vector<16x16xf32>
    %c0_5 = arith.constant 0 : index
    %c0_6 = arith.constant 0 : index
    %c0_7 = arith.constant 0 : index
    %5 = vector.load %arg2[%c0_5, %c0_6, %c0_7] : memref<4x1x16xf32, #tpu.memory_space<vmem>>, vector<1x1x16xf32>
    %6 = vector.shape_cast %5 : vector<1x1x16xf32> to vector<1x16xf32>
    %7 = vector.broadcast %6 : vector<1x16xf32> to vector<16x16xf32>
    %8 = arith.addf %4, %7 : vector<16x16xf32>
    %c0_8 = arith.constant 0 : index
    %c0_9 = arith.constant 0 : index
    %c0_10 = arith.constant 0 : index
    %9 = vector.load %arg3[%c0_8, %c0_9, %c0_10] : memref<4x64x16xf32, #tpu.memory_space<vmem>>, vector<1x64x16xf32>
    %10 = vector.shape_cast %9 : vector<1x64x16xf32> to vector<64x16xf32>
    %cst_11 = arith.constant dense<0.000000e+00> : vector<16x16xf32>
    %11 = tpu.matmul %0, %10, %cst_11 {dimension_numbers = #tpu.dot_dimension_numbers<[1], [0], [0], [1], [0, 0, 1, 1], [], []>} : vector<16x64xf32>, vector<64x16xf32>, vector<16x16xf32> -> vector<16x16xf32>
    %c0_12 = arith.constant 0 : index
    %c0_13 = arith.constant 0 : index
    %c0_14 = arith.constant 0 : index
    %12 = vector.load %arg4[%c0_12, %c0_13, %c0_14] : memref<4x1x16xf32, #tpu.memory_space<vmem>>, vector<1x1x16xf32>
    %13 = vector.shape_cast %12 : vector<1x1x16xf32> to vector<1x16xf32>
    %14 = vector.broadcast %13 : vector<1x16xf32> to vector<16x16xf32>
    %15 = arith.addf %11, %14 : vector<16x16xf32>
    %c0_15 = arith.constant 0 : index
    %c0_16 = arith.constant 0 : index
    %c0_17 = arith.constant 0 : index
    %16 = vector.load %arg5[%c0_15, %c0_16, %c0_17] : memref<4x64x16xf32, #tpu.memory_space<vmem>>, vector<1x64x16xf32>
    %17 = vector.shape_cast %16 : vector<1x64x16xf32> to vector<64x16xf32>
    %cst_18 = arith.constant dense<0.000000e+00> : vector<16x16xf32>
    %18 = tpu.matmul %0, %17, %cst_18 {dimension_numbers = #tpu.dot_dimension_numbers<[1], [0], [0], [1], [0, 0, 1, 1], [], []>} : vector<16x64xf32>, vector<64x16xf32>, vector<16x16xf32> -> vector<16x16xf32>
    %c0_19 = arith.constant 0 : index
    %c0_20 = arith.constant 0 : index
    %c0_21 = arith.constant 0 : index
    %19 = vector.load %arg6[%c0_19, %c0_20, %c0_21] : memref<4x1x16xf32, #tpu.memory_space<vmem>>, vector<1x1x16xf32>
    %20 = vector.shape_cast %19 : vector<1x1x16xf32> to vector<1x16xf32>
    %21 = vector.broadcast %20 : vector<1x16xf32> to vector<16x16xf32>
    %22 = arith.addf %18, %21 : vector<16x16xf32>
    %23 = vector.extract_strided_slice %8 {offsets = [0, 0], sizes = [8, 16], strides = [1, 1]} : vector<16x16xf32> to vector<8x16xf32>
    %24 = vector.extract_strided_slice %15 {offsets = [0, 0], sizes = [8, 16], strides = [1, 1]} : vector<16x16xf32> to vector<8x16xf32>
    %25 = vector.extract_strided_slice %22 {offsets = [0, 0], sizes = [8, 16], strides = [1, 1]} : vector<16x16xf32> to vector<8x16xf32>
    %26 = tpu.transpose %24, [1, 0] : vector<8x16xf32> -> vector<16x8xf32>
    %cst_22 = arith.constant dense<0.000000e+00> : vector<8x8xf32>
    %27 = tpu.matmul %23, %26, %cst_22 {dimension_numbers = #tpu.dot_dimension_numbers<[1], [0], [0], [1], [0, 0, 1, 1], [], []>} : vector<8x16xf32>, vector<16x8xf32>, vector<8x8xf32> -> vector<8x8xf32>
    %cst_23 = arith.constant 2.500000e-01 : f32
    %28 = vector.broadcast %cst_23 : f32 to vector<8x8xf32>
    %29 = arith.mulf %27, %28 : vector<8x8xf32>
    %cst_24 = arith.constant dense<0xFF800000> : vector<8xf32>
    %30 = vector.multi_reduction <maximumf>, %29, %cst_24 [1] : vector<8x8xf32> to vector<8xf32>
    %31 = vector.shape_cast %30 : vector<8xf32> to vector<8x1xf32>
    %32 = vector.broadcast %31 : vector<8x1xf32> to vector<8x8xf32>
    %33 = arith.subf %29, %32 : vector<8x8xf32>
    %34 = math.exp %33 : vector<8x8xf32>
    %cst_25 = arith.constant dense<0.000000e+00> : vector<8xf32>
    %35 = vector.multi_reduction <add>, %34, %cst_25 [1] : vector<8x8xf32> to vector<8xf32>
    %36 = vector.shape_cast %35 : vector<8xf32> to vector<8x1xf32>
    %37 = tpu.reciprocal %36 {approx = true} : vector<8x1xf32> -> vector<8x1xf32>
    %38 = vector.broadcast %37 : vector<8x1xf32> to vector<8x8xf32>
    %39 = arith.mulf %34, %38 : vector<8x8xf32>
    %cst_26 = arith.constant dense<0.000000e+00> : vector<8x16xf32>
    %40 = tpu.matmul %39, %25, %cst_26 {dimension_numbers = #tpu.dot_dimension_numbers<[1], [0], [0], [1], [0, 0, 1, 1], [], []>} : vector<8x8xf32>, vector<8x16xf32>, vector<8x16xf32> -> vector<8x16xf32>
    %41 = vector.extract_strided_slice %8 {offsets = [8, 0], sizes = [8, 16], strides = [1, 1]} : vector<16x16xf32> to vector<8x16xf32>
    %42 = vector.extract_strided_slice %15 {offsets = [8, 0], sizes = [8, 16], strides = [1, 1]} : vector<16x16xf32> to vector<8x16xf32>
    %43 = vector.extract_strided_slice %22 {offsets = [8, 0], sizes = [8, 16], strides = [1, 1]} : vector<16x16xf32> to vector<8x16xf32>
    %44 = tpu.transpose %42, [1, 0] : vector<8x16xf32> -> vector<16x8xf32>
    %cst_27 = arith.constant dense<0.000000e+00> : vector<8x8xf32>
    %45 = tpu.matmul %41, %44, %cst_27 {dimension_numbers = #tpu.dot_dimension_numbers<[1], [0], [0], [1], [0, 0, 1, 1], [], []>} : vector<8x16xf32>, vector<16x8xf32>, vector<8x8xf32> -> vector<8x8xf32>
    %cst_28 = arith.constant 2.500000e-01 : f32
    %46 = vector.broadcast %cst_28 : f32 to vector<8x8xf32>
    %47 = arith.mulf %45, %46 : vector<8x8xf32>
    %cst_29 = arith.constant dense<0xFF800000> : vector<8xf32>
    %48 = vector.multi_reduction <maximumf>, %47, %cst_29 [1] : vector<8x8xf32> to vector<8xf32>
    %49 = vector.shape_cast %48 : vector<8xf32> to vector<8x1xf32>
    %50 = vector.broadcast %49 : vector<8x1xf32> to vector<8x8xf32>
    %51 = arith.subf %47, %50 : vector<8x8xf32>
    %52 = math.exp %51 : vector<8x8xf32>
    %cst_30 = arith.constant dense<0.000000e+00> : vector<8xf32>
    %53 = vector.multi_reduction <add>, %52, %cst_30 [1] : vector<8x8xf32> to vector<8xf32>
    %54 = vector.shape_cast %53 : vector<8xf32> to vector<8x1xf32>
    %55 = tpu.reciprocal %54 {approx = true} : vector<8x1xf32> -> vector<8x1xf32>
    %56 = vector.broadcast %55 : vector<8x1xf32> to vector<8x8xf32>
    %57 = arith.mulf %52, %56 : vector<8x8xf32>
    %cst_31 = arith.constant dense<0.000000e+00> : vector<8x16xf32>
    %58 = tpu.matmul %57, %43, %cst_31 {dimension_numbers = #tpu.dot_dimension_numbers<[1], [0], [0], [1], [0, 0, 1, 1], [], []>} : vector<8x8xf32>, vector<8x16xf32>, vector<8x16xf32> -> vector<8x16xf32>
    %59 = tpu.concatenate %40, %58 in 0 : vector<8x16xf32>, vector<8x16xf32> -> vector<16x16xf32>
    %c0_32 = arith.constant 0 : index
    %c0_33 = arith.constant 0 : index
    %c0_34 = arith.constant 0 : index
    %60 = vector.load %arg7[%c0_32, %c0_33, %c0_34] : memref<4x16x64xf32, #tpu.memory_space<vmem>>, vector<1x16x64xf32>
    %61 = vector.shape_cast %60 : vector<1x16x64xf32> to vector<16x64xf32>
    %cst_35 = arith.constant dense<0.000000e+00> : vector<16x64xf32>
    %62 = tpu.matmul %59, %61, %cst_35 {dimension_numbers = #tpu.dot_dimension_numbers<[1], [0], [0], [1], [0, 0, 1, 1], [], []>} : vector<16x16xf32>, vector<16x64xf32>, vector<16x64xf32> -> vector<16x64xf32>
    %63 = arith.addf %1, %62 : vector<16x64xf32>
    %c1 = arith.constant 1 : index
    %c0_36 = arith.constant 0 : index
    %c0_37 = arith.constant 0 : index
    %64 = vector.load %arg1[%c1, %c0_36, %c0_37] : memref<4x64x16xf32, #tpu.memory_space<vmem>>, vector<1x64x16xf32>
    %65 = vector.shape_cast %64 : vector<1x64x16xf32> to vector<64x16xf32>
    %cst_38 = arith.constant dense<0.000000e+00> : vector<16x16xf32>
    %66 = tpu.matmul %0, %65, %cst_38 {dimension_numbers = #tpu.dot_dimension_numbers<[1], [0], [0], [1], [0, 0, 1, 1], [], []>} : vector<16x64xf32>, vector<64x16xf32>, vector<16x16xf32> -> vector<16x16xf32>
    %c1_39 = arith.constant 1 : index
    %c0_40 = arith.constant 0 : index
    %c0_41 = arith.constant 0 : index
    %67 = vector.load %arg2[%c1_39, %c0_40, %c0_41] : memref<4x1x16xf32, #tpu.memory_space<vmem>>, vector<1x1x16xf32>
    %68 = vector.shape_cast %67 : vector<1x1x16xf32> to vector<1x16xf32>
    %69 = vector.broadcast %68 : vector<1x16xf32> to vector<16x16xf32>
    %70 = arith.addf %66, %69 : vector<16x16xf32>
    %c1_42 = arith.constant 1 : index
    %c0_43 = arith.constant 0 : index
    %c0_44 = arith.constant 0 : index
    %71 = vector.load %arg3[%c1_42, %c0_43, %c0_44] : memref<4x64x16xf32, #tpu.memory_space<vmem>>, vector<1x64x16xf32>
    %72 = vector.shape_cast %71 : vector<1x64x16xf32> to vector<64x16xf32>
    %cst_45 = arith.constant dense<0.000000e+00> : vector<16x16xf32>
    %73 = tpu.matmul %0, %72, %cst_45 {dimension_numbers = #tpu.dot_dimension_numbers<[1], [0], [0], [1], [0, 0, 1, 1], [], []>} : vector<16x64xf32>, vector<64x16xf32>, vector<16x16xf32> -> vector<16x16xf32>
    %c1_46 = arith.constant 1 : index
    %c0_47 = arith.constant 0 : index
    %c0_48 = arith.constant 0 : index
    %74 = vector.load %arg4[%c1_46, %c0_47, %c0_48] : memref<4x1x16xf32, #tpu.memory_space<vmem>>, vector<1x1x16xf32>
    %75 = vector.shape_cast %74 : vector<1x1x16xf32> to vector<1x16xf32>
    %76 = vector.broadcast %75 : vector<1x16xf32> to vector<16x16xf32>
    %77 = arith.addf %73, %76 : vector<16x16xf32>
    %c1_49 = arith.constant 1 : index
    %c0_50 = arith.constant 0 : index
    %c0_51 = arith.constant 0 : index
    %78 = vector.load %arg5[%c1_49, %c0_50, %c0_51] : memref<4x64x16xf32, #tpu.memory_space<vmem>>, vector<1x64x16xf32>
    %79 = vector.shape_cast %78 : vector<1x64x16xf32> to vector<64x16xf32>
    %cst_52 = arith.constant dense<0.000000e+00> : vector<16x16xf32>
    %80 = tpu.matmul %0, %79, %cst_52 {dimension_numbers = #tpu.dot_dimension_numbers<[1], [0], [0], [1], [0, 0, 1, 1], [], []>} : vector<16x64xf32>, vector<64x16xf32>, vector<16x16xf32> -> vector<16x16xf32>
    %c1_53 = arith.constant 1 : index
    %c0_54 = arith.constant 0 : index
    %c0_55 = arith.constant 0 : index
    %81 = vector.load %arg6[%c1_53, %c0_54, %c0_55] : memref<4x1x16xf32, #tpu.memory_space<vmem>>, vector<1x1x16xf32>
    %82 = vector.shape_cast %81 : vector<1x1x16xf32> to vector<1x16xf32>
    %83 = vector.broadcast %82 : vector<1x16xf32> to vector<16x16xf32>
    %84 = arith.addf %80, %83 : vector<16x16xf32>
    %85 = vector.extract_strided_slice %70 {offsets = [0, 0], sizes = [8, 16], strides = [1, 1]} : vector<16x16xf32> to vector<8x16xf32>
    %86 = vector.extract_strided_slice %77 {offsets = [0, 0], sizes = [8, 16], strides = [1, 1]} : vector<16x16xf32> to vector<8x16xf32>
    %87 = vector.extract_strided_slice %84 {offsets = [0, 0], sizes = [8, 16], strides = [1, 1]} : vector<16x16xf32> to vector<8x16xf32>
    %88 = tpu.transpose %86, [1, 0] : vector<8x16xf32> -> vector<16x8xf32>
    %cst_56 = arith.constant dense<0.000000e+00> : vector<8x8xf32>
    %89 = tpu.matmul %85, %88, %cst_56 {dimension_numbers = #tpu.dot_dimension_numbers<[1], [0], [0], [1], [0, 0, 1, 1], [], []>} : vector<8x16xf32>, vector<16x8xf32>, vector<8x8xf32> -> vector<8x8xf32>
    %cst_57 = arith.constant 2.500000e-01 : f32
    %90 = vector.broadcast %cst_57 : f32 to vector<8x8xf32>
    %91 = arith.mulf %89, %90 : vector<8x8xf32>
    %cst_58 = arith.constant dense<0xFF800000> : vector<8xf32>
    %92 = vector.multi_reduction <maximumf>, %91, %cst_58 [1] : vector<8x8xf32> to vector<8xf32>
    %93 = vector.shape_cast %92 : vector<8xf32> to vector<8x1xf32>
    %94 = vector.broadcast %93 : vector<8x1xf32> to vector<8x8xf32>
    %95 = arith.subf %91, %94 : vector<8x8xf32>
    %96 = math.exp %95 : vector<8x8xf32>
    %cst_59 = arith.constant dense<0.000000e+00> : vector<8xf32>
    %97 = vector.multi_reduction <add>, %96, %cst_59 [1] : vector<8x8xf32> to vector<8xf32>
    %98 = vector.shape_cast %97 : vector<8xf32> to vector<8x1xf32>
    %99 = tpu.reciprocal %98 {approx = true} : vector<8x1xf32> -> vector<8x1xf32>
    %100 = vector.broadcast %99 : vector<8x1xf32> to vector<8x8xf32>
    %101 = arith.mulf %96, %100 : vector<8x8xf32>
    %cst_60 = arith.constant dense<0.000000e+00> : vector<8x16xf32>
    %102 = tpu.matmul %101, %87, %cst_60 {dimension_numbers = #tpu.dot_dimension_numbers<[1], [0], [0], [1], [0, 0, 1, 1], [], []>} : vector<8x8xf32>, vector<8x16xf32>, vector<8x16xf32> -> vector<8x16xf32>
    %103 = vector.extract_strided_slice %70 {offsets = [8, 0], sizes = [8, 16], strides = [1, 1]} : vector<16x16xf32> to vector<8x16xf32>
    %104 = vector.extract_strided_slice %77 {offsets = [8, 0], sizes = [8, 16], strides = [1, 1]} : vector<16x16xf32> to vector<8x16xf32>
    %105 = vector.extract_strided_slice %84 {offsets = [8, 0], sizes = [8, 16], strides = [1, 1]} : vector<16x16xf32> to vector<8x16xf32>
    %106 = tpu.transpose %104, [1, 0] : vector<8x16xf32> -> vector<16x8xf32>
    %cst_61 = arith.constant dense<0.000000e+00> : vector<8x8xf32>
    %107 = tpu.matmul %103, %106, %cst_61 {dimension_numbers = #tpu.dot_dimension_numbers<[1], [0], [0], [1], [0, 0, 1, 1], [], []>} : vector<8x16xf32>, vector<16x8xf32>, vector<8x8xf32> -> vector<8x8xf32>
    %cst_62 = arith.constant 2.500000e-01 : f32
    %108 = vector.broadcast %cst_62 : f32 to vector<8x8xf32>
    %109 = arith.mulf %107, %108 : vector<8x8xf32>
    %cst_63 = arith.constant dense<0xFF800000> : vector<8xf32>
    %110 = vector.multi_reduction <maximumf>, %109, %cst_63 [1] : vector<8x8xf32> to vector<8xf32>
    %111 = vector.shape_cast %110 : vector<8xf32> to vector<8x1xf32>
    %112 = vector.broadcast %111 : vector<8x1xf32> to vector<8x8xf32>
    %113 = arith.subf %109, %112 : vector<8x8xf32>
    %114 = math.exp %113 : vector<8x8xf32>
    %cst_64 = arith.constant dense<0.000000e+00> : vector<8xf32>
    %115 = vector.multi_reduction <add>, %114, %cst_64 [1] : vector<8x8xf32> to vector<8xf32>
    %116 = vector.shape_cast %115 : vector<8xf32> to vector<8x1xf32>
    %117 = tpu.reciprocal %116 {approx = true} : vector<8x1xf32> -> vector<8x1xf32>
    %118 = vector.broadcast %117 : vector<8x1xf32> to vector<8x8xf32>
    %119 = arith.mulf %114, %118 : vector<8x8xf32>
    %cst_65 = arith.constant dense<0.000000e+00> : vector<8x16xf32>
    %120 = tpu.matmul %119, %105, %cst_65 {dimension_numbers = #tpu.dot_dimension_numbers<[1], [0], [0], [1], [0, 0, 1, 1], [], []>} : vector<8x8xf32>, vector<8x16xf32>, vector<8x16xf32> -> vector<8x16xf32>
    %121 = tpu.concatenate %102, %120 in 0 : vector<8x16xf32>, vector<8x16xf32> -> vector<16x16xf32>
    %c1_66 = arith.constant 1 : index
    %c0_67 = arith.constant 0 : index
    %c0_68 = arith.constant 0 : index
    %122 = vector.load %arg7[%c1_66, %c0_67, %c0_68] : memref<4x16x64xf32, #tpu.memory_space<vmem>>, vector<1x16x64xf32>
    %123 = vector.shape_cast %122 : vector<1x16x64xf32> to vector<16x64xf32>
    %cst_69 = arith.constant dense<0.000000e+00> : vector<16x64xf32>
    %124 = tpu.matmul %121, %123, %cst_69 {dimension_numbers = #tpu.dot_dimension_numbers<[1], [0], [0], [1], [0, 0, 1, 1], [], []>} : vector<16x16xf32>, vector<16x64xf32>, vector<16x64xf32> -> vector<16x64xf32>
    %125 = arith.addf %63, %124 : vector<16x64xf32>
    %c2 = arith.constant 2 : index
    %c0_70 = arith.constant 0 : index
    %c0_71 = arith.constant 0 : index
    %126 = vector.load %arg1[%c2, %c0_70, %c0_71] : memref<4x64x16xf32, #tpu.memory_space<vmem>>, vector<1x64x16xf32>
    %127 = vector.shape_cast %126 : vector<1x64x16xf32> to vector<64x16xf32>
    %cst_72 = arith.constant dense<0.000000e+00> : vector<16x16xf32>
    %128 = tpu.matmul %0, %127, %cst_72 {dimension_numbers = #tpu.dot_dimension_numbers<[1], [0], [0], [1], [0, 0, 1, 1], [], []>} : vector<16x64xf32>, vector<64x16xf32>, vector<16x16xf32> -> vector<16x16xf32>
    %c2_73 = arith.constant 2 : index
    %c0_74 = arith.constant 0 : index
    %c0_75 = arith.constant 0 : index
    %129 = vector.load %arg2[%c2_73, %c0_74, %c0_75] : memref<4x1x16xf32, #tpu.memory_space<vmem>>, vector<1x1x16xf32>
    %130 = vector.shape_cast %129 : vector<1x1x16xf32> to vector<1x16xf32>
    %131 = vector.broadcast %130 : vector<1x16xf32> to vector<16x16xf32>
    %132 = arith.addf %128, %131 : vector<16x16xf32>
    %c2_76 = arith.constant 2 : index
    %c0_77 = arith.constant 0 : index
    %c0_78 = arith.constant 0 : index
    %133 = vector.load %arg3[%c2_76, %c0_77, %c0_78] : memref<4x64x16xf32, #tpu.memory_space<vmem>>, vector<1x64x16xf32>
    %134 = vector.shape_cast %133 : vector<1x64x16xf32> to vector<64x16xf32>
    %cst_79 = arith.constant dense<0.000000e+00> : vector<16x16xf32>
    %135 = tpu.matmul %0, %134, %cst_79 {dimension_numbers = #tpu.dot_dimension_numbers<[1], [0], [0], [1], [0, 0, 1, 1], [], []>} : vector<16x64xf32>, vector<64x16xf32>, vector<16x16xf32> -> vector<16x16xf32>
    %c2_80 = arith.constant 2 : index
    %c0_81 = arith.constant 0 : index
    %c0_82 = arith.constant 0 : index
    %136 = vector.load %arg4[%c2_80, %c0_81, %c0_82] : memref<4x1x16xf32, #tpu.memory_space<vmem>>, vector<1x1x16xf32>
    %137 = vector.shape_cast %136 : vector<1x1x16xf32> to vector<1x16xf32>
    %138 = vector.broadcast %137 : vector<1x16xf32> to vector<16x16xf32>
    %139 = arith.addf %135, %138 : vector<16x16xf32>
    %c2_83 = arith.constant 2 : index
    %c0_84 = arith.constant 0 : index
    %c0_85 = arith.constant 0 : index
    %140 = vector.load %arg5[%c2_83, %c0_84, %c0_85] : memref<4x64x16xf32, #tpu.memory_space<vmem>>, vector<1x64x16xf32>
    %141 = vector.shape_cast %140 : vector<1x64x16xf32> to vector<64x16xf32>
    %cst_86 = arith.constant dense<0.000000e+00> : vector<16x16xf32>
    %142 = tpu.matmul %0, %141, %cst_86 {dimension_numbers = #tpu.dot_dimension_numbers<[1], [0], [0], [1], [0, 0, 1, 1], [], []>} : vector<16x64xf32>, vector<64x16xf32>, vector<16x16xf32> -> vector<16x16xf32>
    %c2_87 = arith.constant 2 : index
    %c0_88 = arith.constant 0 : index
    %c0_89 = arith.constant 0 : index
    %143 = vector.load %arg6[%c2_87, %c0_88, %c0_89] : memref<4x1x16xf32, #tpu.memory_space<vmem>>, vector<1x1x16xf32>
    %144 = vector.shape_cast %143 : vector<1x1x16xf32> to vector<1x16xf32>
    %145 = vector.broadcast %144 : vector<1x16xf32> to vector<16x16xf32>
    %146 = arith.addf %142, %145 : vector<16x16xf32>
    %147 = vector.extract_strided_slice %132 {offsets = [0, 0], sizes = [8, 16], strides = [1, 1]} : vector<16x16xf32> to vector<8x16xf32>
    %148 = vector.extract_strided_slice %139 {offsets = [0, 0], sizes = [8, 16], strides = [1, 1]} : vector<16x16xf32> to vector<8x16xf32>
    %149 = vector.extract_strided_slice %146 {offsets = [0, 0], sizes = [8, 16], strides = [1, 1]} : vector<16x16xf32> to vector<8x16xf32>
    %150 = tpu.transpose %148, [1, 0] : vector<8x16xf32> -> vector<16x8xf32>
    %cst_90 = arith.constant dense<0.000000e+00> : vector<8x8xf32>
    %151 = tpu.matmul %147, %150, %cst_90 {dimension_numbers = #tpu.dot_dimension_numbers<[1], [0], [0], [1], [0, 0, 1, 1], [], []>} : vector<8x16xf32>, vector<16x8xf32>, vector<8x8xf32> -> vector<8x8xf32>
    %cst_91 = arith.constant 2.500000e-01 : f32
    %152 = vector.broadcast %cst_91 : f32 to vector<8x8xf32>
    %153 = arith.mulf %151, %152 : vector<8x8xf32>
    %cst_92 = arith.constant dense<0xFF800000> : vector<8xf32>
    %154 = vector.multi_reduction <maximumf>, %153, %cst_92 [1] : vector<8x8xf32> to vector<8xf32>
    %155 = vector.shape_cast %154 : vector<8xf32> to vector<8x1xf32>
    %156 = vector.broadcast %155 : vector<8x1xf32> to vector<8x8xf32>
    %157 = arith.subf %153, %156 : vector<8x8xf32>
    %158 = math.exp %157 : vector<8x8xf32>
    %cst_93 = arith.constant dense<0.000000e+00> : vector<8xf32>
    %159 = vector.multi_reduction <add>, %158, %cst_93 [1] : vector<8x8xf32> to vector<8xf32>
    %160 = vector.shape_cast %159 : vector<8xf32> to vector<8x1xf32>
    %161 = tpu.reciprocal %160 {approx = true} : vector<8x1xf32> -> vector<8x1xf32>
    %162 = vector.broadcast %161 : vector<8x1xf32> to vector<8x8xf32>
    %163 = arith.mulf %158, %162 : vector<8x8xf32>
    %cst_94 = arith.constant dense<0.000000e+00> : vector<8x16xf32>
    %164 = tpu.matmul %163, %149, %cst_94 {dimension_numbers = #tpu.dot_dimension_numbers<[1], [0], [0], [1], [0, 0, 1, 1], [], []>} : vector<8x8xf32>, vector<8x16xf32>, vector<8x16xf32> -> vector<8x16xf32>
    %165 = vector.extract_strided_slice %132 {offsets = [8, 0], sizes = [8, 16], strides = [1, 1]} : vector<16x16xf32> to vector<8x16xf32>
    %166 = vector.extract_strided_slice %139 {offsets = [8, 0], sizes = [8, 16], strides = [1, 1]} : vector<16x16xf32> to vector<8x16xf32>
    %167 = vector.extract_strided_slice %146 {offsets = [8, 0], sizes = [8, 16], strides = [1, 1]} : vector<16x16xf32> to vector<8x16xf32>
    %168 = tpu.transpose %166, [1, 0] : vector<8x16xf32> -> vector<16x8xf32>
    %cst_95 = arith.constant dense<0.000000e+00> : vector<8x8xf32>
    %169 = tpu.matmul %165, %168, %cst_95 {dimension_numbers = #tpu.dot_dimension_numbers<[1], [0], [0], [1], [0, 0, 1, 1], [], []>} : vector<8x16xf32>, vector<16x8xf32>, vector<8x8xf32> -> vector<8x8xf32>
    %cst_96 = arith.constant 2.500000e-01 : f32
    %170 = vector.broadcast %cst_96 : f32 to vector<8x8xf32>
    %171 = arith.mulf %169, %170 : vector<8x8xf32>
    %cst_97 = arith.constant dense<0xFF800000> : vector<8xf32>
    %172 = vector.multi_reduction <maximumf>, %171, %cst_97 [1] : vector<8x8xf32> to vector<8xf32>
    %173 = vector.shape_cast %172 : vector<8xf32> to vector<8x1xf32>
    %174 = vector.broadcast %173 : vector<8x1xf32> to vector<8x8xf32>
    %175 = arith.subf %171, %174 : vector<8x8xf32>
    %176 = math.exp %175 : vector<8x8xf32>
    %cst_98 = arith.constant dense<0.000000e+00> : vector<8xf32>
    %177 = vector.multi_reduction <add>, %176, %cst_98 [1] : vector<8x8xf32> to vector<8xf32>
    %178 = vector.shape_cast %177 : vector<8xf32> to vector<8x1xf32>
    %179 = tpu.reciprocal %178 {approx = true} : vector<8x1xf32> -> vector<8x1xf32>
    %180 = vector.broadcast %179 : vector<8x1xf32> to vector<8x8xf32>
    %181 = arith.mulf %176, %180 : vector<8x8xf32>
    %cst_99 = arith.constant dense<0.000000e+00> : vector<8x16xf32>
    %182 = tpu.matmul %181, %167, %cst_99 {dimension_numbers = #tpu.dot_dimension_numbers<[1], [0], [0], [1], [0, 0, 1, 1], [], []>} : vector<8x8xf32>, vector<8x16xf32>, vector<8x16xf32> -> vector<8x16xf32>
    %183 = tpu.concatenate %164, %182 in 0 : vector<8x16xf32>, vector<8x16xf32> -> vector<16x16xf32>
    %c2_100 = arith.constant 2 : index
    %c0_101 = arith.constant 0 : index
    %c0_102 = arith.constant 0 : index
    %184 = vector.load %arg7[%c2_100, %c0_101, %c0_102] : memref<4x16x64xf32, #tpu.memory_space<vmem>>, vector<1x16x64xf32>
    %185 = vector.shape_cast %184 : vector<1x16x64xf32> to vector<16x64xf32>
    %cst_103 = arith.constant dense<0.000000e+00> : vector<16x64xf32>
    %186 = tpu.matmul %183, %185, %cst_103 {dimension_numbers = #tpu.dot_dimension_numbers<[1], [0], [0], [1], [0, 0, 1, 1], [], []>} : vector<16x16xf32>, vector<16x64xf32>, vector<16x64xf32> -> vector<16x64xf32>
    %187 = arith.addf %125, %186 : vector<16x64xf32>
    %c3 = arith.constant 3 : index
    %c0_104 = arith.constant 0 : index
    %c0_105 = arith.constant 0 : index
    %188 = vector.load %arg1[%c3, %c0_104, %c0_105] : memref<4x64x16xf32, #tpu.memory_space<vmem>>, vector<1x64x16xf32>
    %189 = vector.shape_cast %188 : vector<1x64x16xf32> to vector<64x16xf32>
    %cst_106 = arith.constant dense<0.000000e+00> : vector<16x16xf32>
    %190 = tpu.matmul %0, %189, %cst_106 {dimension_numbers = #tpu.dot_dimension_numbers<[1], [0], [0], [1], [0, 0, 1, 1], [], []>} : vector<16x64xf32>, vector<64x16xf32>, vector<16x16xf32> -> vector<16x16xf32>
    %c3_107 = arith.constant 3 : index
    %c0_108 = arith.constant 0 : index
    %c0_109 = arith.constant 0 : index
    %191 = vector.load %arg2[%c3_107, %c0_108, %c0_109] : memref<4x1x16xf32, #tpu.memory_space<vmem>>, vector<1x1x16xf32>
    %192 = vector.shape_cast %191 : vector<1x1x16xf32> to vector<1x16xf32>
    %193 = vector.broadcast %192 : vector<1x16xf32> to vector<16x16xf32>
    %194 = arith.addf %190, %193 : vector<16x16xf32>
    %c3_110 = arith.constant 3 : index
    %c0_111 = arith.constant 0 : index
    %c0_112 = arith.constant 0 : index
    %195 = vector.load %arg3[%c3_110, %c0_111, %c0_112] : memref<4x64x16xf32, #tpu.memory_space<vmem>>, vector<1x64x16xf32>
    %196 = vector.shape_cast %195 : vector<1x64x16xf32> to vector<64x16xf32>
    %cst_113 = arith.constant dense<0.000000e+00> : vector<16x16xf32>
    %197 = tpu.matmul %0, %196, %cst_113 {dimension_numbers = #tpu.dot_dimension_numbers<[1], [0], [0], [1], [0, 0, 1, 1], [], []>} : vector<16x64xf32>, vector<64x16xf32>, vector<16x16xf32> -> vector<16x16xf32>
    %c3_114 = arith.constant 3 : index
    %c0_115 = arith.constant 0 : index
    %c0_116 = arith.constant 0 : index
    %198 = vector.load %arg4[%c3_114, %c0_115, %c0_116] : memref<4x1x16xf32, #tpu.memory_space<vmem>>, vector<1x1x16xf32>
    %199 = vector.shape_cast %198 : vector<1x1x16xf32> to vector<1x16xf32>
    %200 = vector.broadcast %199 : vector<1x16xf32> to vector<16x16xf32>
    %201 = arith.addf %197, %200 : vector<16x16xf32>
    %c3_117 = arith.constant 3 : index
    %c0_118 = arith.constant 0 : index
    %c0_119 = arith.constant 0 : index
    %202 = vector.load %arg5[%c3_117, %c0_118, %c0_119] : memref<4x64x16xf32, #tpu.memory_space<vmem>>, vector<1x64x16xf32>
    %203 = vector.shape_cast %202 : vector<1x64x16xf32> to vector<64x16xf32>
    %cst_120 = arith.constant dense<0.000000e+00> : vector<16x16xf32>
    %204 = tpu.matmul %0, %203, %cst_120 {dimension_numbers = #tpu.dot_dimension_numbers<[1], [0], [0], [1], [0, 0, 1, 1], [], []>} : vector<16x64xf32>, vector<64x16xf32>, vector<16x16xf32> -> vector<16x16xf32>
    %c3_121 = arith.constant 3 : index
    %c0_122 = arith.constant 0 : index
    %c0_123 = arith.constant 0 : index
    %205 = vector.load %arg6[%c3_121, %c0_122, %c0_123] : memref<4x1x16xf32, #tpu.memory_space<vmem>>, vector<1x1x16xf32>
    %206 = vector.shape_cast %205 : vector<1x1x16xf32> to vector<1x16xf32>
    %207 = vector.broadcast %206 : vector<1x16xf32> to vector<16x16xf32>
    %208 = arith.addf %204, %207 : vector<16x16xf32>
    %209 = vector.extract_strided_slice %194 {offsets = [0, 0], sizes = [8, 16], strides = [1, 1]} : vector<16x16xf32> to vector<8x16xf32>
    %210 = vector.extract_strided_slice %201 {offsets = [0, 0], sizes = [8, 16], strides = [1, 1]} : vector<16x16xf32> to vector<8x16xf32>
    %211 = vector.extract_strided_slice %208 {offsets = [0, 0], sizes = [8, 16], strides = [1, 1]} : vector<16x16xf32> to vector<8x16xf32>
    %212 = tpu.transpose %210, [1, 0] : vector<8x16xf32> -> vector<16x8xf32>
    %cst_124 = arith.constant dense<0.000000e+00> : vector<8x8xf32>
    %213 = tpu.matmul %209, %212, %cst_124 {dimension_numbers = #tpu.dot_dimension_numbers<[1], [0], [0], [1], [0, 0, 1, 1], [], []>} : vector<8x16xf32>, vector<16x8xf32>, vector<8x8xf32> -> vector<8x8xf32>
    %cst_125 = arith.constant 2.500000e-01 : f32
    %214 = vector.broadcast %cst_125 : f32 to vector<8x8xf32>
    %215 = arith.mulf %213, %214 : vector<8x8xf32>
    %cst_126 = arith.constant dense<0xFF800000> : vector<8xf32>
    %216 = vector.multi_reduction <maximumf>, %215, %cst_126 [1] : vector<8x8xf32> to vector<8xf32>
    %217 = vector.shape_cast %216 : vector<8xf32> to vector<8x1xf32>
    %218 = vector.broadcast %217 : vector<8x1xf32> to vector<8x8xf32>
    %219 = arith.subf %215, %218 : vector<8x8xf32>
    %220 = math.exp %219 : vector<8x8xf32>
    %cst_127 = arith.constant dense<0.000000e+00> : vector<8xf32>
    %221 = vector.multi_reduction <add>, %220, %cst_127 [1] : vector<8x8xf32> to vector<8xf32>
    %222 = vector.shape_cast %221 : vector<8xf32> to vector<8x1xf32>
    %223 = tpu.reciprocal %222 {approx = true} : vector<8x1xf32> -> vector<8x1xf32>
    %224 = vector.broadcast %223 : vector<8x1xf32> to vector<8x8xf32>
    %225 = arith.mulf %220, %224 : vector<8x8xf32>
    %cst_128 = arith.constant dense<0.000000e+00> : vector<8x16xf32>
    %226 = tpu.matmul %225, %211, %cst_128 {dimension_numbers = #tpu.dot_dimension_numbers<[1], [0], [0], [1], [0, 0, 1, 1], [], []>} : vector<8x8xf32>, vector<8x16xf32>, vector<8x16xf32> -> vector<8x16xf32>
    %227 = vector.extract_strided_slice %194 {offsets = [8, 0], sizes = [8, 16], strides = [1, 1]} : vector<16x16xf32> to vector<8x16xf32>
    %228 = vector.extract_strided_slice %201 {offsets = [8, 0], sizes = [8, 16], strides = [1, 1]} : vector<16x16xf32> to vector<8x16xf32>
    %229 = vector.extract_strided_slice %208 {offsets = [8, 0], sizes = [8, 16], strides = [1, 1]} : vector<16x16xf32> to vector<8x16xf32>
    %230 = tpu.transpose %228, [1, 0] : vector<8x16xf32> -> vector<16x8xf32>
    %cst_129 = arith.constant dense<0.000000e+00> : vector<8x8xf32>
    %231 = tpu.matmul %227, %230, %cst_129 {dimension_numbers = #tpu.dot_dimension_numbers<[1], [0], [0], [1], [0, 0, 1, 1], [], []>} : vector<8x16xf32>, vector<16x8xf32>, vector<8x8xf32> -> vector<8x8xf32>
    %cst_130 = arith.constant 2.500000e-01 : f32
    %232 = vector.broadcast %cst_130 : f32 to vector<8x8xf32>
    %233 = arith.mulf %231, %232 : vector<8x8xf32>
    %cst_131 = arith.constant dense<0xFF800000> : vector<8xf32>
    %234 = vector.multi_reduction <maximumf>, %233, %cst_131 [1] : vector<8x8xf32> to vector<8xf32>
    %235 = vector.shape_cast %234 : vector<8xf32> to vector<8x1xf32>
    %236 = vector.broadcast %235 : vector<8x1xf32> to vector<8x8xf32>
    %237 = arith.subf %233, %236 : vector<8x8xf32>
    %238 = math.exp %237 : vector<8x8xf32>
    %cst_132 = arith.constant dense<0.000000e+00> : vector<8xf32>
    %239 = vector.multi_reduction <add>, %238, %cst_132 [1] : vector<8x8xf32> to vector<8xf32>
    %240 = vector.shape_cast %239 : vector<8xf32> to vector<8x1xf32>
    %241 = tpu.reciprocal %240 {approx = true} : vector<8x1xf32> -> vector<8x1xf32>
    %242 = vector.broadcast %241 : vector<8x1xf32> to vector<8x8xf32>
    %243 = arith.mulf %238, %242 : vector<8x8xf32>
    %cst_133 = arith.constant dense<0.000000e+00> : vector<8x16xf32>
    %244 = tpu.matmul %243, %229, %cst_133 {dimension_numbers = #tpu.dot_dimension_numbers<[1], [0], [0], [1], [0, 0, 1, 1], [], []>} : vector<8x8xf32>, vector<8x16xf32>, vector<8x16xf32> -> vector<8x16xf32>
    %245 = tpu.concatenate %226, %244 in 0 : vector<8x16xf32>, vector<8x16xf32> -> vector<16x16xf32>
    %c3_134 = arith.constant 3 : index
    %c0_135 = arith.constant 0 : index
    %c0_136 = arith.constant 0 : index
    %246 = vector.load %arg7[%c3_134, %c0_135, %c0_136] : memref<4x16x64xf32, #tpu.memory_space<vmem>>, vector<1x16x64xf32>
    %247 = vector.shape_cast %246 : vector<1x16x64xf32> to vector<16x64xf32>
    %cst_137 = arith.constant dense<0.000000e+00> : vector<16x64xf32>
    %248 = tpu.matmul %245, %247, %cst_137 {dimension_numbers = #tpu.dot_dimension_numbers<[1], [0], [0], [1], [0, 0, 1, 1], [], []>} : vector<16x16xf32>, vector<16x64xf32>, vector<16x64xf32> -> vector<16x64xf32>
    %249 = arith.addf %187, %248 : vector<16x64xf32>
    %c0_138 = arith.constant 0 : index
    %c0_139 = arith.constant 0 : index
    %250 = vector.load %arg8[%c0_138, %c0_139] : memref<1x64xf32, #tpu.memory_space<vmem>>, vector<1x64xf32>
    %251 = vector.broadcast %250 : vector<1x64xf32> to vector<16x64xf32>
    %252 = arith.addf %249, %251 : vector<16x64xf32>
    %253 = arith.addf %252, %0 : vector<16x64xf32>
    %cst_140 = arith.constant dense<0.000000e+00> : vector<16xf32>
    %254 = vector.multi_reduction <add>, %253, %cst_140 [1] : vector<16x64xf32> to vector<16xf32>
    %255 = vector.shape_cast %254 : vector<16xf32> to vector<16x1xf32>
    %cst_141 = arith.constant 6.400000e+01 : f32
    %256 = vector.broadcast %cst_141 : f32 to vector<16x1xf32>
    %257 = arith.divf %255, %256 : vector<16x1xf32>
    %258 = vector.broadcast %257 : vector<16x1xf32> to vector<16x64xf32>
    %259 = arith.subf %253, %258 : vector<16x64xf32>
    %260 = arith.mulf %259, %259 : vector<16x64xf32>
    %cst_142 = arith.constant dense<0.000000e+00> : vector<16xf32>
    %261 = vector.multi_reduction <add>, %260, %cst_142 [1] : vector<16x64xf32> to vector<16xf32>
    %262 = vector.shape_cast %261 : vector<16xf32> to vector<16x1xf32>
    %cst_143 = arith.constant 6.400000e+01 : f32
    %263 = vector.broadcast %cst_143 : f32 to vector<16x1xf32>
    %264 = arith.divf %262, %263 : vector<16x1xf32>
    %265 = vector.broadcast %257 : vector<16x1xf32> to vector<16x64xf32>
    %266 = arith.subf %253, %265 : vector<16x64xf32>
    %cst_144 = arith.constant 9.99999974E-6 : f32
    %267 = vector.broadcast %cst_144 : f32 to vector<16x1xf32>
    %268 = arith.addf %264, %267 : vector<16x1xf32>
    %269 = math.rsqrt %268 : vector<16x1xf32>
    %270 = vector.broadcast %269 : vector<16x1xf32> to vector<16x64xf32>
    %271 = arith.mulf %266, %270 : vector<16x64xf32>
    %c0_145 = arith.constant 0 : index
    %c0_146 = arith.constant 0 : index
    %272 = vector.load %arg9[%c0_145, %c0_146] : memref<1x64xf32, #tpu.memory_space<vmem>>, vector<1x64xf32>
    %273 = vector.broadcast %272 : vector<1x64xf32> to vector<16x64xf32>
    %274 = arith.mulf %271, %273 : vector<16x64xf32>
    %c0_147 = arith.constant 0 : index
    %c0_148 = arith.constant 0 : index
    %275 = vector.load %arg10[%c0_147, %c0_148] : memref<1x64xf32, #tpu.memory_space<vmem>>, vector<1x64xf32>
    %276 = vector.broadcast %275 : vector<1x64xf32> to vector<16x64xf32>
    %277 = arith.addf %274, %276 : vector<16x64xf32>
    %278 = vector.extract_strided_slice %277 {offsets = [0, 0], sizes = [8, 64], strides = [1, 1]} : vector<16x64xf32> to vector<8x64xf32>
    %cst_149 = arith.constant dense<0.000000e+00> : vector<64xf32>
    %279 = vector.multi_reduction <add>, %278, %cst_149 [0] : vector<8x64xf32> to vector<64xf32>
    %280 = vector.shape_cast %279 : vector<64xf32> to vector<1x64xf32>
    %cst_150 = arith.constant 8.000000e+00 : f32
    %281 = vector.broadcast %cst_150 : f32 to vector<1x64xf32>
    %282 = arith.divf %280, %281 : vector<1x64xf32>
    %283 = vector.extract_strided_slice %277 {offsets = [8, 0], sizes = [8, 64], strides = [1, 1]} : vector<16x64xf32> to vector<8x64xf32>
    %cst_151 = arith.constant dense<0.000000e+00> : vector<64xf32>
    %284 = vector.multi_reduction <add>, %283, %cst_151 [0] : vector<8x64xf32> to vector<64xf32>
    %285 = vector.shape_cast %284 : vector<64xf32> to vector<1x64xf32>
    %cst_152 = arith.constant 8.000000e+00 : f32
    %286 = vector.broadcast %cst_152 : f32 to vector<1x64xf32>
    %287 = arith.divf %285, %286 : vector<1x64xf32>
    %288 = tpu.concatenate %282, %287 in 0 : vector<1x64xf32>, vector<1x64xf32> -> vector<2x64xf32>
    %c0_153 = arith.constant 0 : index
    %c0_154 = arith.constant 0 : index
    %289 = vector.load %arg11[%c0_153, %c0_154] : memref<64x256xf32, #tpu.memory_space<vmem>>, vector<64x256xf32>
    %cst_155 = arith.constant dense<0.000000e+00> : vector<2x256xf32>
    %290 = tpu.matmul %288, %289, %cst_155 {dimension_numbers = #tpu.dot_dimension_numbers<[1], [0], [0], [1], [0, 0, 1, 1], [], []>} : vector<2x64xf32>, vector<64x256xf32>, vector<2x256xf32> -> vector<2x256xf32>
    %c0_156 = arith.constant 0 : index
    %c0_157 = arith.constant 0 : index
    %291 = vector.load %arg12[%c0_156, %c0_157] : memref<1x256xf32, #tpu.memory_space<vmem>>, vector<1x256xf32>
    %292 = vector.broadcast %291 : vector<1x256xf32> to vector<2x256xf32>
    %293 = arith.addf %290, %292 : vector<2x256xf32>
    %cst_158 = arith.constant 0.000000e+00 : f32
    %294 = vector.broadcast %cst_158 : f32 to vector<2x256xf32>
    %295 = arith.maximumf %293, %294 : vector<2x256xf32>
    %c0_159 = arith.constant 0 : index
    %c0_160 = arith.constant 0 : index
    %296 = vector.load %arg13[%c0_159, %c0_160] : memref<256x128xf32, #tpu.memory_space<vmem>>, vector<256x128xf32>
    %cst_161 = arith.constant dense<0.000000e+00> : vector<2x128xf32>
    %297 = tpu.matmul %295, %296, %cst_161 {dimension_numbers = #tpu.dot_dimension_numbers<[1], [0], [0], [1], [0, 0, 1, 1], [], []>} : vector<2x256xf32>, vector<256x128xf32>, vector<2x128xf32> -> vector<2x128xf32>
    %c0_162 = arith.constant 0 : index
    %c0_163 = arith.constant 0 : index
    %298 = vector.load %arg14[%c0_162, %c0_163] : memref<1x128xf32, #tpu.memory_space<vmem>>, vector<1x128xf32>
    %299 = vector.broadcast %298 : vector<1x128xf32> to vector<2x128xf32>
    %300 = arith.addf %297, %299 : vector<2x128xf32>
    %cst_164 = arith.constant 0.000000e+00 : f32
    %301 = vector.broadcast %cst_164 : f32 to vector<2x128xf32>
    %302 = arith.maximumf %300, %301 : vector<2x128xf32>
    %c0_165 = arith.constant 0 : index
    %c0_166 = arith.constant 0 : index
    %303 = vector.load %arg15[%c0_165, %c0_166] : memref<128x5xf32, #tpu.memory_space<vmem>>, vector<128x5xf32>
    %cst_167 = arith.constant dense<0.000000e+00> : vector<2x5xf32>
    %304 = tpu.matmul %302, %303, %cst_167 {dimension_numbers = #tpu.dot_dimension_numbers<[1], [0], [0], [1], [0, 0, 1, 1], [], []>} : vector<2x128xf32>, vector<128x5xf32>, vector<2x5xf32> -> vector<2x5xf32>
    %c0_168 = arith.constant 0 : index
    %c0_169 = arith.constant 0 : index
    %305 = vector.load %arg16[%c0_168, %c0_169] : memref<1x5xf32, #tpu.memory_space<vmem>>, vector<1x5xf32>
    %306 = vector.broadcast %305 : vector<1x5xf32> to vector<2x5xf32>
    %307 = arith.addf %304, %306 : vector<2x5xf32>
    %c0_170 = arith.constant 0 : index
    %c0_171 = arith.constant 0 : index
    %308 = vector.load %arg17[%c0_170, %c0_171] : memref<2x5xf32, #tpu.memory_space<vmem>>, vector<2x5xf32>
    tpu.vector_store %arg17[%c0_170, %c0_171], %307 {strides = array<i32>} : memref<2x5xf32, #tpu.memory_space<vmem>>, vector<2x5xf32>,
    return
  }
}

</mosaic_0001>

<bundles_post_ra>
// kernel: _lambda_.4
= control target key start
LH: loop header
LB: loop body
LE: loop exit
PB: predicated region body
PF: predicated region fallthrough
CT: control target
= control target key end

     0   :  { %9 = vsyncpa [#allocation3], 0  ;;  %s2254_s15 = smov [#allocation2]   ;;  %s2813_s0 = inlined_call_operand.vmem [shape: f32[16,128], index: 0, kind: input, shape index: {}]   ;;  %s2814_s1 = inlined_call_operand.vmem [shape: f32[128,256], index: 1, kind: input, shape index: {}]   ;;  %s2815_s2 = inlined_call_operand.hbm [shape: f32[1,256], index: 2, kind: input, shape index: {}]   ;;  %s2816_s3 = inlined_call_operand.vmem [shape: f32[2,32,128], index: 3, kind: input, shape index: {}]   ;;  %s2817_s4 = inlined_call_operand.vmem [shape: f32[16,64], index: 4, kind: output, shape index: {}]  }
   0x1   :  { %s20_s16 = sshll.u32 %s2254_s15, 4  ;;  %s2230_s19 = scalar_lea.hbm %s2815_s2, 32  ;;  %s21_s16 = int_to_ptr.vmem [resolvable:$true] %s20_s16 }
   0x2   :  { %p2231_p0 = scmp.ne.s32.totalorder %s2815_s2, %s2230_s19  ;;  %p2234_p1 = scmp.lt.u32.totalorder %s2230_s19, %s2815_s2 }
   0x4   :  { %p2236_p2 = pnand %p2234_p1, %p2231_p0 }
   0x6   :  { %2239 = shalt.err (!%p2236_p2)
}
   0x7   :  { %s2240_s24 = scalar_lea.vmem %s21_s16, 32  ;;  %p2245_p4 = scmp.lt.s32.totalorder %s21_s16, %s21_s16 }
   0x8   :  { %p2241_p3 = scmp.ne.s32.totalorder %s21_s16, %s2240_s24  ;;  %p2246_p5 = scmp.lt.s32.totalorder %s2240_s24, %s2240_s24 }
   0xa   :  { %p2247_p6 = por %p2246_p5, %p2245_p4 }
   0xc   :  { %p2248_p7 = pnand %p2247_p6, %p2241_p3 }
   0xe   :  { %2251 = shalt.err (!%p2248_p7)
}
   0xf   :  { %23 = dma.hbm_to_vmem [thread:$0]  %s2815_s2, 32, %s21_s16, [#allocation3]  }
  0x10   :  { %2252 = dma.done.wait [#allocation3], 32  }
  0x11   :  { %2253 = vsyncadd [#allocation3], 4294967264  ;;  %v2255_v0 = vmov 0.0|0.0   ;;  %vm2256_vm0 = vmmov 0   ;;  %v2257_v1 = vmov 0.0   ;;  %v32_v2 = vld [vmem:[%s2814_s1 + $0x8] sm:$0xff] }
  0x12   :  { %2064 = vmatprep.subr.bf16.mxu1 %v2255_v0  ;;  %1864 = vmatprep.mubr.msk.f32.mxu1 %vm2256_vm0, %v2257_v1  ;;  %v34_v3 = vld [vmem:[%s2814_s1 + $0x18] sm:$0xff]  ;;  %v31_v4 = vld [vmem:[%s2814_s1] sm:$0xff]  ;;  %v33_v6 = vld [vmem:[%s2814_s1 + $0x10] sm:$0xff]  ;;  %vm172_vm1 = vcmask 1041408   ;;  %vm170_vm2 = vcmask 1040384   ;;  %vm174_vm3 = vcmask 1042432  }
  0x13   :  { %139 = vmatprep.mubr.f32.mxu0 %v2257_v1  ;;  %v2032_v5 = vpack.c.bf16 %v34_v3, %v32_v2  ;;  %v36_v7 = vld [vmem:[%s2814_s1 + $0x28] sm:$0xff]  ;;  %v38_v8 = vld [vmem:[%s2814_s1 + $0x38] sm:$0xff]  ;;  %v2034_v9 = vpack.c.bf16 %v33_v6, %v31_v4  ;;  %v35_v11 = vld [vmem:[%s2814_s1 + $0x20] sm:$0xff]  ;;  %v65_v4 = vlaneseq  ;;  %s2259_s28 = smov 32   ;;  %vm353_vm4 = vcmask 253952  }
  0x14   :  { %v2036_v10 = vpack.c.bf16 %v38_v8, %v36_v7  ;;  %v37_v12 = vld [vmem:[%s2814_s1 + $0x30] sm:$0xff]  ;;  %v40_v13 = vld [vmem:[%s2814_s1 + $0x48] sm:$0xff]  ;;  %v42_v14 = vld [vmem:[%s2814_s1 + $0x58] sm:$0xff]  ;;  %vm360_vm5 = vcmask 254977   ;;  %vm176_vm6 = vcmask 261120   ;;  %vm358_vm7 = vcmask 518402  }
  0x15   :  { %2033 = vmatprep.subr.bf16.mxu0 %v2032_v5  ;;  %v2038_v15 = vpack.c.bf16 %v37_v12, %v35_v11  ;;  %v2040_v16 = vpack.c.bf16 %v42_v14, %v40_v13  ;;  %v39_v17 = vld [vmem:[%s2814_s1 + $0x40] sm:$0xff]  ;;  %v41_v18 = vld [vmem:[%s2814_s1 + $0x50] sm:$0xff]  ;;  %v44_v19 = vld [vmem:[%s2814_s1 + $0x68] sm:$0xff]  ;;  %v66_v6 = vshrl.u32 %v65_v4, 7  ;;  %vm362_vm8 = vcmask 519427  }
  0x16   :  { %2035 = vmatpush1.bf16.msra.mxu0 %v2034_v9  ;;  %v46_v20 = vld [vmem:[%s2814_s1 + $0x78] sm:$0xff]  ;;  %v152_v21 = vld [vmem:[%s2816_s3] sm:$0xff]  ;;  %v153_v22 = vld [vmem:[%s2816_s3 + $0x8] sm:$0xff]  ;;  %v2042_v24 = vpack.c.bf16 %v41_v18, %v39_v17 }
  0x17   :  { %2037 = vmatprep.subr.bf16.mxu0 %v2036_v10  ;;  %v2349_v23 = vpack.c.bf16 %v153_v22, %v152_v21  ;;  %v154_v25 = vld [vmem:[%s2816_s3 + $0x10] sm:$0xff]  ;;  %v155_v26 = vld [vmem:[%s2816_s3 + $0x18] sm:$0xff]  ;;  %v2044_v27 = vpack.c.bf16 %v46_v20, %v44_v19  ;;  %v43_v28 = vld [vmem:[%s2814_s1 + $0x60] sm:$0xff]  ;;  %v67_v10 = vsub.s32 0, %v66_v6  ;;  %v71_v12 = vsub.s32 1, %v66_v6 }
  0x18   :  { %v45_v29 = vld [vmem:[%s2814_s1 + $0x70] sm:$0xff]  ;;  %v48_v30 = vld [vmem:[%s2814_s1 + $0x88] sm:$0xff]  ;;  %v2367_v31 = vpack.c.bf16 %v155_v26, %v154_v25  ;;  %v50_v32 = vld [vmem:[%s2814_s1 + $0x98] sm:$0xff] }
  0x19   :  { %2066 = vmatpush3.bf16.msra.mxu1 %v2349_v23  ;;  %v1750_v33 = vld [vmem:[%s2816_s3 + $0x20] sm:$0xff]  ;;  %v1751_v34 = vld [vmem:[%s2816_s3 + $0x28] sm:$0xff]  ;;  %v2046_v35 = vpack.c.bf16 %v45_v29, %v43_v28  ;;  %v2048_v36 = vpack.c.bf16 %v50_v32, %v48_v30  ;;  %v49_v38 = vld [vmem:[%s2814_s1 + $0x90] sm:$0xff] }
  0x1a   :  { %2039 = vmatpush1.bf16.msra.mxu0 %v2038_v15  ;;  %2067 = vmatprep.subr.bf16.mxu1 %v2255_v0  ;;  %v47_v37 = vld [vmem:[%s2814_s1 + $0x80] sm:$0xff]  ;;  %v52_v39 = vld [vmem:[%s2814_s1 + $0xa8] sm:$0xff]  ;;  %v2389_v40 = vpack.c.bf16 %v1751_v34, %v1750_v33  ;;  %v54_v41 = vld [vmem:[%s2814_s1 + $0xb8] sm:$0xff] }
  0x1b   :  { %2041 = vmatprep.subr.bf16.mxu0 %v2040_v16  ;;  %v1752_v42 = vld [vmem:[%s2816_s3 + $0x30] sm:$0xff]  ;;  %v1753_v43 = vld [vmem:[%s2816_s3 + $0x38] sm:$0xff]  ;;  %v2050_v44 = vpack.c.bf16 %v49_v38, %v47_v37  ;;  %v2052_v45 = vpack.c.bf16 %v54_v41, %v52_v39  ;;  %v51_v46 = vld [vmem:[%s2814_s1 + $0xa0] sm:$0xff] }
  0x1c   :  { %v53_v47 = vld [vmem:[%s2814_s1 + $0xb0] sm:$0xff]  ;;  %v2409_v48 = vpack.c.bf16 %v1753_v43, %v1752_v42  ;;  %v56_v49 = vld [vmem:[%s2814_s1 + $0xc8] sm:$0xff]  ;;  %v58_v50 = vld [vmem:[%s2814_s1 + $0xd8] sm:$0xff] }
  0x1d   :  { %2069 = vmatpush3.bf16.msra.mxu1 %v2367_v31  ;;  %v2054_v51 = vpack.c.bf16 %v53_v47, %v51_v46  ;;  %v2056_v52 = vpack.c.bf16 %v58_v50, %v56_v49  ;;  %v55_v53 = vld [vmem:[%s2814_s1 + $0xc0] sm:$0xff]  ;;  %v57_v54 = vld [vmem:[%s2814_s1 + $0xd0] sm:$0xff]  ;;  %v60_v55 = vld [vmem:[%s2814_s1 + $0xe8] sm:$0xff] }
  0x1e   :  { %2043 = vmatpush1.bf16.msra.mxu0 %v2042_v24  ;;  %2070 = vmatprep.subr.bf16.mxu1 %v2255_v0  ;;  %v62_v56 = vld [vmem:[%s2814_s1 + $0xf8] sm:$0xff]  ;;  %v2058_v57 = vpack.c.bf16 %v57_v54, %v55_v53  ;;  %v59_v59 = vld [vmem:[%s2814_s1 + $0xe0] sm:$0xff]  ;;  %v61_v60 = vld [vmem:[%s2814_s1 + $0xf0] sm:$0xff] }
  0x1f   :  { %2045 = vmatprep.subr.bf16.mxu0 %v2044_v27  ;;  %v2060_v58 = vpack.c.bf16 %v62_v56, %v60_v55  ;;  %v2062_v61 = vpack.c.bf16 %v61_v60, %v59_v59  ;;  %v29_v62 = vld [vmem:[%s2813_s0] sm:$0xff]  ;;  %v30_v63 = vld [vmem:[%s2813_s0 + $0x8] sm:$0xff]  ;;  %s2258_s0 = smov 64  }
  0x20   :  { %1865 = vmatmul.mubr.f32.vlgmr.msra.gmra.mrb[0].mxu1 %v2257_v1  ;;  %v63_v11 = vld [vmem:[#allocation2] sm:$0x3] }
  0x21   :  { %2072 = vmatpush3.bf16.msra.mxu1 %v2389_v40  ;;  %1875 = vmatprep.mubr.msk.f32.mxu1 %vm2256_vm0, %v2257_v1  ;;  %v68_v13 = vrot.slane %v63_v11, %v67_v10  ;;  %v72_v14 = vrot.slane %v63_v11, %v71_v12 }
  0x22   :  { %2047 = vmatpush1.bf16.msra.mxu0 %v2046_v35  ;;  %2073 = vmatprep.subr.bf16.mxu1 %v2255_v0 }
  0x23   :  { %2049 = vmatprep.subr.bf16.mxu0 %v2048_v36 }
  0x25   :  { %2075 = vmatpush3.bf16.msra.mxu1 %v2409_v48 }
  0x26   :  { %2051 = vmatpush1.bf16.msra.mxu0 %v2050_v44  ;;  %2076 = vmatprep.subr.bf16.mxu1 %v2255_v0 }
  0x27   :  { %2053 = vmatprep.subr.bf16.mxu0 %v2052_v45 }
  0x28   :  { %1876 = vmatmul.mubr.f32.vlgmr.msra.gmra.mrb[2].mxu1 %v2257_v1 }
  0x29   :  { %2078 = vmatpush3.bf16.msra.mxu1 %v2349_v23  ;;  %1886 = vmatprep.mubr.msk.f32.mxu1 %vm2256_vm0, %v2257_v1 }
  0x2a   :  { %2055 = vmatpush1.bf16.msra.mxu0 %v2054_v51  ;;  %2079 = vmatprep.subr.bf16.mxu1 %v2255_v0 }
  0x2b   :  { %2057 = vmatprep.subr.bf16.mxu0 %v2056_v52 }
  0x2d   :  { %2081 = vmatpush3.bf16.msra.mxu1 %v2367_v31 }
  0x2e   :  { %2059 = vmatpush1.bf16.msra.mxu0 %v2058_v57  ;;  %2082 = vmatprep.subr.bf16.mxu1 %v2255_v0 }
  0x2f   :  { %2061 = vmatprep.subr.bf16.mxu0 %v2060_v58 }
  0x32   :  { %2063 = vmatpush1.bf16.msra.mxu0 %v2062_v61 }
  0x33   :  { %2088 = vmatprep.subr.bf16.mxu0 %v2255_v0 }
  0x35   :  { %140 = vmatmul.mubr.f32.vlgmr.msra.gmra.mrb[0].mxu0 %v29_v62 }
  0x36   :  { %145 = vmatprep.mubr.f32.mxu0 %v2257_v1  ;;  %2090 = vmatpush3.bf16.msra.mxu0 %v2349_v23 }
  0x37   :  { %2091 = vmatprep.subr.bf16.mxu0 %v2255_v0 }
  0x39   :  { %146 = vmatmul.mubr.f32.gmra.mrb[2].mxu0 %v30_v63 }
  0x3a   :  { %2093 = vmatpush3.bf16.msra.mxu0 %v2367_v31  ;;  %1908 = vmatprep.mubr.msk.f32.mxu0 %vm2256_vm0, %v2257_v1 }
  0x3b   :  { %2100 = vmatprep.subr.bf16.mxu0 %v2255_v0 }
  0xf3   :  { %v246_v2 = vpop.f32.mrb[0].mxu1 }
  0xf4   :  { %v1866_v3 = vpop.f32.mrb[1].mxu1 }
  0xfb   :  { %v316_v5 = vpop.f32.mrb[2].mxu1 }
  0xfc   :  { %v321_v7 = vrot.slane %v316_v5, 6  ;;  %v1877_v8 = vpop.f32.mrb[3].mxu1 }
  0xfe   :  { %v323_v9 = vsel %vm172_vm1, %v246_v2, %v321_v7 }
 0x108   :  { %v141_v15 = vpop.f32.mrb[0].mxu0 }
 0x109   :  { %v142_v16 = vadd.f32 %v141_v15, %v68_v13  ;;  %v143_v17 = vpop.f32.mrb[1].mxu0 }
 0x10a   :  { %v144_v18 = vadd.f32 %v143_v17, %v72_v14 }
 0x10b   :  { %v365_v19 = vrot.slane %v142_v16, 1  ;;  %v561_v20 = vrot.slane %v142_v16, 2  ;;  %v759_v21 = vrot.slane %v142_v16, 3  ;;  %v957_v27 = vrot.slane %v142_v16, 4 }
 0x10c   :  { %v147_v22 = vpop.f32.mrb[2].mxu0  ;;  %v165_v24 = vrot.slane %v144_v18, 5  ;;  %v367_v25 = vrot.slane %v144_v18, 4  ;;  %v565_v26 = vrot.slane %v144_v18, 3  ;;  %v763_v30 = vrot.slane %v144_v18, 2 }
 0x10d   :  { %v148_v28 = vadd.f32 %v147_v22, %v68_v13  ;;  %v149_v29 = vpop.f32.mrb[3].mxu0  ;;  %v961_v32 = vrot.slane %v144_v18, 1  ;;  %v1153_v33 = vrot.slane %v142_v16, 5  ;;  %v1349_v35 = vrot.slane %v142_v16, 6 }
 0x10e   :  { %v150_v34 = vadd.f32 %v149_v29, %v72_v14  ;;  %v1353_v36 = vrot.slane %v144_v18, 7  ;;  %v1547_v37 = vrot.slane %v142_v16, 7  ;;  %v1551_v8 = vrot.slane %v144_v18, 6 }
 0x10f   :  { %v162_v38 = vrot.slane %v148_v28, 7  ;;  %v371_v39 = vsel %vm170_vm2, %v365_v19, %v148_v28  ;;  %v563_v41 = vrot.slane %v148_v28, 1  ;;  %v761_v42 = vrot.slane %v148_v28, 2 }
 0x110   :  { %v168_v43 = vrot.slane %v150_v34, 4  ;;  %v369_v44 = vrot.slane %v150_v34, 3  ;;  %v372_v45 = vsel %vm172_vm1, %v371_v39, %v367_v25  ;;  %v567_v46 = vrot.slane %v150_v34, 2 }
 0x111   :  { %v171_v47 = vsel %vm170_vm2, %v142_v16, %v162_v38  ;;  %v569_v49 = vsel %vm170_vm2, %v561_v20, %v563_v41  ;;  %v765_v50 = vrot.slane %v150_v34, 1  ;;  %v767_v51 = vsel %vm170_vm2, %v759_v21, %v761_v42 }
 0x112   :  { %v173_v52 = vsel %vm172_vm1, %v171_v47, %v165_v24  ;;  %v2469_v53 = vsel %vm174_vm3, %v372_v45, %v369_v44  ;;  %v570_v54 = vsel %vm172_vm1, %v569_v49, %v565_v26  ;;  %v768_v55 = vsel %vm172_vm1, %v767_v51, %v763_v30 }
 0x113   :  { %v175_v56 = vsel %vm174_vm3, %v173_v52, %v168_v43  ;;  %v2475_v57 = vsel %vm174_vm3, %v570_v54, %v567_v46  ;;  %v2478_v58 = vsel %vm174_vm3, %v768_v55, %v765_v50  ;;  %v959_v59 = vrot.slane %v148_v28, 3 }
 0x114   :  { %v324_v60 = vadd.f32 %v323_v9, %v175_v56  ;;  %v1155_v61 = vrot.slane %v148_v28, 4  ;;  %v1157_v62 = vrot.slane %v150_v34, 7  ;;  %v1351_v63 = vrot.slane %v148_v28, 5 }
 0x115   :  { %v963_v2 = vsel %vm170_vm2, %v957_v27, %v959_v59  ;;  %v1355_v3 = vrot.slane %v150_v34, 6  ;;  %v1549_v4 = vrot.slane %v148_v28, 6  ;;  %v1553_v5 = vrot.slane %v150_v34, 5 }
 0x116   :  { %2166 = vtanh.f32 %v324_v60  ;;  %v964_v6 = vsel %vm172_vm1, %v963_v2, %v961_v32  ;;  %v1159_v7 = vsel %vm170_vm2, %v1153_v33, %v1155_v61  ;;  %v1357_v9 = vsel %vm170_vm2, %v1349_v35, %v1351_v63 }
 0x117   :  { %v2484_v10 = vsel %vm174_vm3, %v964_v6, %v150_v34  ;;  %v1160_v11 = vsel %vm172_vm1, %v1159_v7, %v144_v18  ;;  %v1555_v12 = vsel %vm170_vm2, %v1547_v37, %v1549_v4  ;;  %v1358_v14 = vsel %vm172_vm1, %v1357_v9, %v1353_v36 }
 0x118   :  { %v2490_v13 = vsel %vm174_vm3, %v1160_v11, %v1157_v62  ;;  %v1556_v15 = vsel %vm172_vm1, %v1555_v12, %v1551_v8  ;;  %v2495_v16 = vsel %vm174_vm3, %v1358_v14, %v1355_v3  ;;  %v1754_v18 = vmul.f32 -1.442695, %v324_v60 }
 0x119   :  { %v2498_v17 = vsel %vm174_vm3, %v1556_v15, %v1553_v5 }
 0x11a   :  { %2168 = vpow2.f32 %v1754_v18 }
 0x120   :  { %v2167_v19 = vpop.eup %2166 }
 0x121   :  { %334 = vrot.lane.b32.xlu0 %v2167_v19, %s2258_s0 }
 0x124   :  { %v2169_v20 = vpop.eup %2168 }
 0x125   :  { %v328_v21 = vadd.f32 1.0, %v2169_v20 }
 0x127   :  { %2170 = vrcp.f32 %v328_v21 }
 0x131   :  { %v2171_v22 = vpop.eup %2170 }
 0x132   :  { %v332_v26 = vmul.f32 0.0, %v2171_v22 }
 0x193   :  { %v335_v24 = vpop.permute.xlu0 %334 }
 0x194   :  { %v337_v25 = vmul.f32 %v2171_v22, %v335_v24 }
 0x196   :  { %339 = vrot.lane.b32.xlu0 %v337_v25, %s2259_s28 }
 0x208   :  { %v340_v27 = vpop.permute.xlu0 %339 }
 0x209   :  { %v342_v28 = vadd.f32 %v340_v27, %v332_v26 }
 0x20b   :  { %2172 = vtanh.f32 %v342_v28 }
 0x215   :  { %v2173_v29 = vpop.eup %2172 }
 0x216   :  { %345 = vrot.lane.b32.xlu1 %v2173_v29, %s2258_s0 }
 0x288   :  { %v346_v30 = vpop.permute.xlu1 %345 }
 0x289   :  { %v2503_v32 = vmul.f32 %v2171_v22, %v346_v30 }
 0x28b   :  { %350 = vrot.lane.b32.xlu1 %v2503_v32, %s2259_s28  ;;  %v446_v33 = vrot.slane %v2503_v32, 2 }
 0x28d   :  { %447 = vrot.lane.b32.xlu0 %v446_v33, %s2259_s28 }
 0x2fd   :  { %v351_v34 = vpop.permute.xlu1 %350 }
 0x2fe   :  { %354 = vst.msk [vmem:[%s2817_s4] sm:$0x1] %vm353_vm4, %v351_v34  ;;  %1887 = vmatmul.mubr.msk.f32.vlgmr.msra.gmra.mrb[4].mxu1 %vm176_vm6, %v351_v34 }
 0x2ff   :  { %361 = vst.msk [vmem:[%s2817_s4 + $0x7] sm:$0x2] %vm360_vm5, %v351_v34  ;;  %2084 = vmatpush3.bf16.msra.mxu1 %v2389_v40  ;;  %1897 = vmatprep.mubr.msk.f32.mxu1 %vm2256_vm0, %v2257_v1  ;;  %v448_v35 = vpop.permute.xlu0 %447 }
 0x300   :  { %2085 = vmatprep.subr.bf16.mxu1 %v2255_v0 }
 0x303   :  { %2087 = vmatpush3.bf16.msra.mxu1 %v2409_v48 }
 0x304   :  { %2094 = vmatprep.subr.bf16.mxu1 %v2255_v0 }
 0x306   :  { %1898 = vmatmul.mubr.msk.f32.vlgmr.msra.gmra.mrb[6].mxu1 %vm176_vm6, %v448_v35 }
 0x307   :  { %2096 = vmatpush3.bf16.msra.mxu1 %v2389_v40  ;;  %1919 = vmatprep.mubr.msk.f32.mxu1 %vm2256_vm0, %v2257_v1 }
 0x308   :  { %2097 = vmatprep.subr.bf16.mxu1 %v2255_v0 }
 0x30b   :  { %2099 = vmatpush3.bf16.msra.mxu1 %v2409_v48 }
 0x30c   :  { %2106 = vmatprep.subr.bf16.mxu1 %v2255_v0 }
 0x3d1   :  { %v442_v36 = vpop.f32.mrb[4].mxu1 }
 0x3d2   :  { %v1888_v37 = vpop.f32.mrb[5].mxu1 }
 0x3d9   :  { %v517_v38 = vpop.f32.mrb[6].mxu1 }
 0x3da   :  { %v522_v39 = vrot.slane %v517_v38, 6  ;;  %v1899_v41 = vpop.f32.mrb[7].mxu1 }
 0x3dc   :  { %v524_v42 = vsel %vm172_vm1, %v442_v36, %v522_v39 }
 0x3dd   :  { %v525_v43 = vadd.f32 %v524_v42, %v2469_v53 }
 0x3df   :  { %2174 = vtanh.f32 %v525_v43  ;;  %v1757_v45 = vmul.f32 -1.442695, %v525_v43 }
 0x3e1   :  { %2176 = vpow2.f32 %v1757_v45 }
 0x3e9   :  { %v2175_v44 = vpop.eup %2174 }
 0x3ea   :  { %535 = vrot.lane.b32.xlu1 %v2175_v44, %s2258_s0 }
 0x3eb   :  { %v2177_v46 = vpop.eup %2176 }
 0x3ec   :  { %v529_v47 = vadd.f32 1.0, %v2177_v46 }
 0x3ee   :  { %2178 = vrcp.f32 %v529_v47 }
 0x3f8   :  { %v2179_v49 = vpop.eup %2178 }
 0x3f9   :  { %v533_v52 = vmul.f32 %v2179_v49, %v342_v28 }
 0x45c   :  { %v536_v50 = vpop.permute.xlu1 %535 }
 0x45d   :  { %v538_v51 = vmul.f32 %v2179_v49, %v536_v50 }
 0x45f   :  { %540 = vrot.lane.b32.xlu0 %v538_v51, %s2259_s28 }
 0x4d1   :  { %v541_v54 = vpop.permute.xlu0 %540 }
 0x4d2   :  { %v543_v55 = vadd.f32 %v541_v54, %v533_v52 }
 0x4d4   :  { %2180 = vtanh.f32 %v543_v55 }
 0x4de   :  { %v2181_v56 = vpop.eup %2180 }
 0x4df   :  { %546 = vrot.lane.b32.xlu1 %v2181_v56, %s2258_s0 }
 0x551   :  { %v547_v53 = vpop.permute.xlu1 %546 }
 0x552   :  { %v2536_v59 = vmul.f32 %v2179_v49, %v547_v53 }
 0x554   :  { %551 = vrot.lane.b32.xlu1 %v2536_v59, %s2259_s28  ;;  %v644_v60 = vrot.slane %v2536_v59, 2 }
 0x556   :  { %645 = vrot.lane.b32.xlu0 %v644_v60, %s2259_s28 }
 0x5c6   :  { %v552_v61 = vpop.permute.xlu1 %551 }
 0x5c7   :  { %554 = vst.msk [vmem:[%s2817_s4 + $0x1] sm:$0x1] %vm353_vm4, %v552_v61  ;;  %1909 = vmatmul.mubr.msk.f32.vlgmr.msra.gmra.mrb[4].mxu0 %vm176_vm6, %v552_v61 }
 0x5c8   :  { %559 = vst.msk [vmem:[%s2817_s4 + $0x8] sm:$0x2] %vm360_vm5, %v552_v61  ;;  %v646_v62 = vpop.permute.xlu0 %645  ;;  %2102 = vmatpush3.bf16.msra.mxu0 %v2349_v23  ;;  %1930 = vmatprep.mubr.msk.f32.mxu0 %vm2256_vm0, %v2257_v1 }
 0x5c9   :  { %1920 = vmatmul.mubr.msk.f32.vlgmr.msra.gmra.mrb[8].mxu1 %vm176_vm6, %v646_v62  ;;  %2103 = vmatprep.subr.bf16.mxu0 %v2255_v0 }
 0x5ca   :  { %2108 = vmatpush3.bf16.msra.mxu1 %v2389_v40  ;;  %1941 = vmatprep.mubr.msk.f32.mxu1 %vm2256_vm0, %v2257_v1 }
 0x5cb   :  { %2109 = vmatprep.subr.bf16.mxu1 %v2255_v0 }
 0x5cc   :  { %2105 = vmatpush3.bf16.msra.mxu0 %v2367_v31 }
 0x5cd   :  { %2112 = vmatprep.subr.bf16.mxu0 %v2255_v0 }
 0x5ce   :  { %2111 = vmatpush3.bf16.msra.mxu1 %v2409_v48 }
 0x5cf   :  { %2118 = vmatprep.subr.bf16.mxu1 %v2255_v0 }
 0x69a   :  { %v640_v63 = vpop.f32.mrb[4].mxu0 }
 0x69b   :  { %v1910_v2 = vpop.f32.mrb[5].mxu0 }
 0x69c   :  { %v715_v3 = vpop.f32.mrb[8].mxu1 }
 0x69d   :  { %v720_v4 = vrot.slane %v715_v3, 6  ;;  %v1921_v5 = vpop.f32.mrb[9].mxu1 }
 0x69f   :  { %v722_v6 = vsel %vm172_vm1, %v640_v63, %v720_v4 }
 0x6a0   :  { %v723_v7 = vadd.f32 %v722_v6, %v2475_v57 }
 0x6a2   :  { %2182 = vtanh.f32 %v723_v7  ;;  %v1760_v11 = vmul.f32 -1.442695, %v723_v7 }
 0x6a4   :  { %2184 = vpow2.f32 %v1760_v11 }
 0x6ac   :  { %v2183_v8 = vpop.eup %2182 }
 0x6ad   :  { %733 = vrot.lane.b32.xlu0 %v2183_v8, %s2258_s0 }
 0x6ae   :  { %v2185_v9 = vpop.eup %2184 }
 0x6af   :  { %v727_v12 = vadd.f32 1.0, %v2185_v9 }
 0x6b1   :  { %2186 = vrcp.f32 %v727_v12 }
 0x6bb   :  { %v2187_v14 = vpop.eup %2186 }
 0x6bc   :  { %v731_v18 = vmul.f32 %v2187_v14, %v543_v55 }
 0x71f   :  { %v734_v15 = vpop.permute.xlu0 %733 }
 0x720   :  { %v736_v19 = vmul.f32 %v2187_v14, %v734_v15 }
 0x722   :  { %738 = vrot.lane.b32.xlu1 %v736_v19, %s2259_s28 }
 0x794   :  { %v739_v20 = vpop.permute.xlu1 %738 }
 0x795   :  { %v741_v21 = vadd.f32 %v739_v20, %v731_v18 }
 0x797   :  { %2188 = vtanh.f32 %v741_v21 }
 0x7a1   :  { %v2189_v22 = vpop.eup %2188 }
 0x7a2   :  { %744 = vrot.lane.b32.xlu0 %v2189_v22, %s2258_s0 }
 0x814   :  { %v745_v57 = vpop.permute.xlu0 %744 }
 0x815   :  { %v2569_v24 = vmul.f32 %v2187_v14, %v745_v57 }
 0x817   :  { %749 = vrot.lane.b32.xlu0 %v2569_v24, %s2259_s28  ;;  %v842_v25 = vrot.slane %v2569_v24, 2 }
 0x819   :  { %843 = vrot.lane.b32.xlu1 %v842_v25, %s2259_s28 }
 0x889   :  { %v750_v26 = vpop.permute.xlu0 %749 }
 0x88a   :  { %752 = vst.msk [vmem:[%s2817_s4 + $0x2] sm:$0x1] %vm353_vm4, %v750_v26  ;;  %1931 = vmatmul.mubr.msk.f32.vlgmr.msra.gmra.mrb[6].mxu0 %vm176_vm6, %v750_v26 }
 0x88b   :  { %757 = vst.msk [vmem:[%s2817_s4 + $0x9] sm:$0x2] %vm360_vm5, %v750_v26  ;;  %v844_v27 = vpop.permute.xlu1 %843  ;;  %2114 = vmatpush3.bf16.msra.mxu0 %v2349_v23  ;;  %1952 = vmatprep.mubr.msk.f32.mxu0 %vm2256_vm0, %v2257_v1 }
 0x88c   :  { %1942 = vmatmul.mubr.msk.f32.vlgmr.msra.gmra.mrb[10].mxu1 %vm176_vm6, %v844_v27  ;;  %2115 = vmatprep.subr.bf16.mxu0 %v2255_v0 }
 0x88d   :  { %2120 = vmatpush3.bf16.msra.mxu1 %v2389_v40  ;;  %1963 = vmatprep.mubr.msk.f32.mxu1 %vm2256_vm0, %v2257_v1 }
 0x88e   :  { %2121 = vmatprep.subr.bf16.mxu1 %v2255_v0 }
 0x88f   :  { %2117 = vmatpush3.bf16.msra.mxu0 %v2367_v31 }
 0x890   :  { %2124 = vmatprep.subr.bf16.mxu0 %v2255_v0 }
 0x891   :  { %2123 = vmatpush3.bf16.msra.mxu1 %v2409_v48 }
 0x892   :  { %2130 = vmatprep.subr.bf16.mxu1 %v2255_v0 }
 0x95d   :  { %v838_v28 = vpop.f32.mrb[6].mxu0 }
 0x95e   :  { %v1932_v29 = vpop.f32.mrb[7].mxu0 }
 0x95f   :  { %v913_v30 = vpop.f32.mrb[10].mxu1 }
 0x960   :  { %v918_v33 = vrot.slane %v913_v30, 6  ;;  %v1943_v34 = vpop.f32.mrb[11].mxu1 }
 0x962   :  { %v920_v35 = vsel %vm172_vm1, %v838_v28, %v918_v33 }
 0x963   :  { %v921_v36 = vadd.f32 %v920_v35, %v2478_v58 }
 0x965   :  { %2190 = vtanh.f32 %v921_v36  ;;  %v1763_v38 = vmul.f32 -1.442695, %v921_v36 }
 0x967   :  { %2192 = vpow2.f32 %v1763_v38 }
 0x96f   :  { %v2191_v37 = vpop.eup %2190 }
 0x970   :  { %931 = vrot.lane.b32.xlu1 %v2191_v37, %s2258_s0 }
 0x971   :  { %v2193_v39 = vpop.eup %2192 }
 0x972   :  { %v925_v41 = vadd.f32 1.0, %v2193_v39 }
 0x974   :  { %2194 = vrcp.f32 %v925_v41 }
 0x97e   :  { %v2195_v42 = vpop.eup %2194 }
 0x97f   :  { %v929_v45 = vmul.f32 %v2195_v42, %v741_v21 }
 0x9e2   :  { %v932_v43 = vpop.permute.xlu1 %931 }
 0x9e3   :  { %v934_v44 = vmul.f32 %v2195_v42, %v932_v43 }
 0x9e5   :  { %936 = vrot.lane.b32.xlu0 %v934_v44, %s2259_s28 }
 0xa57   :  { %v937_v46 = vpop.permute.xlu0 %936 }
 0xa58   :  { %v939_v47 = vadd.f32 %v937_v46, %v929_v45 }
 0xa5a   :  { %2196 = vtanh.f32 %v939_v47 }
 0xa64   :  { %v2197_v49 = vpop.eup %2196 }
 0xa65   :  { %942 = vrot.lane.b32.xlu1 %v2197_v49, %s2258_s0 }
 0xad7   :  { %v943_v58 = vpop.permute.xlu1 %942 }
 0xad8   :  { %v2602_v50 = vmul.f32 %v2195_v42, %v943_v58 }
 0xada   :  { %947 = vrot.lane.b32.xlu1 %v2602_v50, %s2259_s28  ;;  %v1038_v51 = vrot.slane %v2602_v50, 2 }
 0xadc   :  { %1039 = vrot.lane.b32.xlu0 %v1038_v51, %s2259_s28 }
 0xb4c   :  { %v948_v52 = vpop.permute.xlu1 %947 }
 0xb4d   :  { %950 = vst.msk [vmem:[%s2817_s4 + $0x3] sm:$0x1] %vm353_vm4, %v948_v52  ;;  %1953 = vmatmul.mubr.msk.f32.vlgmr.msra.gmra.mrb[8].mxu0 %vm176_vm6, %v948_v52 }
 0xb4e   :  { %955 = vst.msk [vmem:[%s2817_s4 + $0xa] sm:$0x2] %vm360_vm5, %v948_v52  ;;  %v1040_v54 = vpop.permute.xlu0 %1039  ;;  %2126 = vmatpush3.bf16.msra.mxu0 %v2349_v23  ;;  %1974 = vmatprep.mubr.msk.f32.mxu0 %vm2256_vm0, %v2257_v1 }
 0xb4f   :  { %1964 = vmatmul.mubr.msk.f32.vlgmr.msra.gmra.mrb[12].mxu1 %vm176_vm6, %v1040_v54  ;;  %2127 = vmatprep.subr.bf16.mxu0 %v2255_v0 }
 0xb50   :  { %2132 = vmatpush3.bf16.msra.mxu1 %v2389_v40  ;;  %1985 = vmatprep.mubr.msk.f32.mxu1 %vm2256_vm0, %v2257_v1 }
 0xb51   :  { %2133 = vmatprep.subr.bf16.mxu1 %v2255_v0 }
 0xb52   :  { %2129 = vmatpush3.bf16.msra.mxu0 %v2367_v31 }
 0xb53   :  { %2136 = vmatprep.subr.bf16.mxu0 %v2255_v0 }
 0xb54   :  { %2135 = vmatpush3.bf16.msra.mxu1 %v2409_v48 }
 0xb55   :  { %2142 = vmatprep.subr.bf16.mxu1 %v2255_v0 }
 0xc20   :  { %v1034_v55 = vpop.f32.mrb[8].mxu0 }
 0xc21   :  { %v1954_v56 = vpop.f32.mrb[9].mxu0 }
 0xc22   :  { %v1109_v53 = vpop.f32.mrb[12].mxu1 }
 0xc23   :  { %v1114_v60 = vrot.slane %v1109_v53, 6  ;;  %v1965_v61 = vpop.f32.mrb[13].mxu1 }
 0xc25   :  { %v1116_v62 = vsel %vm172_vm1, %v1034_v55, %v1114_v60 }
 0xc26   :  { %v1117_v63 = vadd.f32 %v1116_v62, %v2484_v10 }
 0xc28   :  { %2198 = vtanh.f32 %v1117_v63  ;;  %v1766_v3 = vmul.f32 -1.442695, %v1117_v63 }
 0xc2a   :  { %2200 = vpow2.f32 %v1766_v3 }
 0xc32   :  { %v2199_v2 = vpop.eup %2198 }
 0xc33   :  { %1127 = vrot.lane.b32.xlu0 %v2199_v2, %s2258_s0 }
 0xc34   :  { %v2201_v4 = vpop.eup %2200 }
 0xc35   :  { %v1121_v5 = vadd.f32 1.0, %v2201_v4 }
 0xc37   :  { %2202 = vrcp.f32 %v1121_v5 }
 0xc41   :  { %v2203_v6 = vpop.eup %2202 }
 0xc42   :  { %v1125_v11 = vmul.f32 %v2203_v6, %v939_v47 }
 0xca5   :  { %v1128_v7 = vpop.permute.xlu0 %1127 }
 0xca6   :  { %v1130_v8 = vmul.f32 %v2203_v6, %v1128_v7 }
 0xca8   :  { %1132 = vrot.lane.b32.xlu1 %v1130_v8, %s2259_s28 }
 0xd1a   :  { %v1133_v9 = vpop.permute.xlu1 %1132 }
 0xd1b   :  { %v1135_v12 = vadd.f32 %v1133_v9, %v1125_v11 }
 0xd1d   :  { %2204 = vtanh.f32 %v1135_v12 }
 0xd27   :  { %v2205_v14 = vpop.eup %2204 }
 0xd28   :  { %1138 = vrot.lane.b32.xlu0 %v2205_v14, %s2258_s0 }
 0xd9a   :  { %v1139_v10 = vpop.permute.xlu0 %1138 }
 0xd9b   :  { %v2635_v15 = vmul.f32 %v2203_v6, %v1139_v10 }
 0xd9d   :  { %1143 = vrot.lane.b32.xlu0 %v2635_v15, %s2259_s28  ;;  %v1234_v19 = vrot.slane %v2635_v15, 2 }
 0xd9f   :  { %1235 = vrot.lane.b32.xlu1 %v1234_v19, %s2259_s28 }
 0xe0f   :  { %v2641_v18 = vpop.permute.xlu0 %1143 }
 0xe10   :  { %1975 = vmatmul.mubr.msk.f32.vlgmr.msra.gmra.mrb[10].mxu0 %vm176_vm6, %v2641_v18 }
 0xe11   :  { %v1236_v20 = vpop.permute.xlu1 %1235  ;;  %2138 = vmatpush3.bf16.msra.mxu0 %v2349_v23  ;;  %1996 = vmatprep.mubr.msk.f32.mxu0 %vm2256_vm0, %v2257_v1 }
 0xe12   :  { %1986 = vmatmul.mubr.msk.f32.vlgmr.msra.gmra.mrb[14].mxu1 %vm176_vm6, %v1236_v20  ;;  %2139 = vmatprep.subr.bf16.mxu0 %v2255_v0 }
 0xe13   :  { %2144 = vmatpush3.bf16.msra.mxu1 %v2389_v40  ;;  %2007 = vmatprep.mubr.msk.f32.mxu1 %vm2256_vm0, %v2257_v1 }
 0xe14   :  { %2145 = vmatprep.subr.bf16.mxu1 %v2255_v0 }
 0xe15   :  { %2141 = vmatpush3.bf16.msra.mxu0 %v2367_v31 }
 0xe16   :  { %2148 = vmatprep.subr.bf16.mxu0 %v2255_v0 }
 0xe17   :  { %2147 = vmatpush3.bf16.msra.mxu1 %v2409_v48 }
 0xe18   :  { %2154 = vmatprep.subr.bf16.mxu1 %v2255_v0 }
 0xee3   :  { %v1230_v21 = vpop.f32.mrb[10].mxu0 }
 0xee4   :  { %v1976_v22 = vpop.f32.mrb[11].mxu0 }
 0xee5   :  { %v1305_v57 = vpop.f32.mrb[14].mxu1 }
 0xee6   :  { %v1310_v25 = vrot.slane %v1305_v57, 6  ;;  %v1987_v26 = vpop.f32.mrb[15].mxu1 }
 0xee8   :  { %v1312_v27 = vsel %vm172_vm1, %v1230_v21, %v1310_v25 }
 0xee9   :  { %v1313_v28 = vadd.f32 %v1312_v27, %v2490_v13 }
 0xeeb   :  { %2206 = vtanh.f32 %v1313_v28  ;;  %v1769_v30 = vmul.f32 -1.442695, %v1313_v28 }
 0xeed   :  { %2208 = vpow2.f32 %v1769_v30 }
 0xef5   :  { %v2207_v29 = vpop.eup %2206 }
 0xef6   :  { %1323 = vrot.lane.b32.xlu1 %v2207_v29, %s2258_s0 }
 0xef7   :  { %v2209_v33 = vpop.eup %2208 }
 0xef8   :  { %v1317_v34 = vadd.f32 1.0, %v2209_v33 }
 0xefa   :  { %2210 = vrcp.f32 %v1317_v34 }
 0xf04   :  { %v2211_v35 = vpop.eup %2210 }
 0xf05   :  { %v1321_v38 = vmul.f32 %v2211_v35, %v1135_v12 }
 0xf68   :  { %v1324_v36 = vpop.permute.xlu1 %1323 }
 0xf69   :  { %v1326_v37 = vmul.f32 %v2211_v35, %v1324_v36 }
 0xf6b   :  { %1328 = vrot.lane.b32.xlu0 %v1326_v37, %s2259_s28 }
 0xfdd   :  { %v1329_v39 = vpop.permute.xlu0 %1328 }
 0xfde   :  { %v1331_v41 = vadd.f32 %v1329_v39, %v1321_v38 }
 0xfe0   :  { %2212 = vtanh.f32 %v1331_v41 }
 0xfea   :  { %v2213_v42 = vpop.eup %2212 }
 0xfeb   :  { %1334 = vrot.lane.b32.xlu1 %v2213_v42, %s2258_s0 }
0x105d   :  { %v1335_v13 = vpop.permute.xlu1 %1334 }
0x105e   :  { %v2663_v43 = vmul.f32 %v2211_v35, %v1335_v13 }
0x1060   :  { %1339 = vrot.lane.b32.xlu1 %v2663_v43, %s2259_s28  ;;  %v1432_v44 = vrot.slane %v2663_v43, 2 }
0x1062   :  { %1433 = vrot.lane.b32.xlu0 %v1432_v44, %s2259_s28 }
0x10d2   :  { %v2669_v45 = vpop.permute.xlu1 %1339 }
0x10d3   :  { %1997 = vmatmul.mubr.msk.f32.vlgmr.msra.gmra.mrb[12].mxu0 %vm176_vm6, %v2669_v45 }
0x10d4   :  { %v1434_v46 = vpop.permute.xlu0 %1433  ;;  %2150 = vmatpush3.bf16.msra.mxu0 %v2349_v23  ;;  %2018 = vmatprep.mubr.msk.f32.mxu0 %vm2256_vm0, %v2257_v1 }
0x10d5   :  { %2008 = vmatmul.mubr.msk.f32.vlgmr.msra.gmra.mrb[16].mxu1 %vm176_vm6, %v1434_v46  ;;  %2151 = vmatprep.subr.bf16.mxu0 %v2255_v0 }
0x10d6   :  { %2156 = vmatpush3.bf16.msra.mxu1 %v2389_v40  ;;  %2029 = vmatprep.mubr.msk.f32.mxu1 %vm2256_vm0, %v2257_v1 }
0x10d7   :  { %2157 = vmatprep.subr.bf16.mxu1 %v2255_v0 }
0x10d8   :  { %2153 = vmatpush3.bf16.msra.mxu0 %v2367_v31 }
0x10da   :  { %2159 = vmatpush3.bf16.msra.mxu1 %v2409_v48 }
0x11a6   :  { %v1428_v47 = vpop.f32.mrb[12].mxu0 }
0x11a7   :  { %v1998_v23 = vpop.f32.mrb[13].mxu0 }
0x11a8   :  { %v1503_v49 = vpop.f32.mrb[16].mxu1 }
0x11a9   :  { %v1508_v58 = vrot.slane %v1503_v49, 6  ;;  %v2009_v51 = vpop.f32.mrb[17].mxu1 }
0x11ab   :  { %v1510_v52 = vsel %vm172_vm1, %v1428_v47, %v1508_v58 }
0x11ac   :  { %v1511_v54 = vadd.f32 %v1510_v52, %v2495_v16 }
0x11ae   :  { %2214 = vtanh.f32 %v1511_v54  ;;  %v1772_v1 = vmul.f32 -1.442695, %v1511_v54 }
0x11b0   :  { %2216 = vpow2.f32 %v1772_v1 }
0x11b8   :  { %v2215_v40 = vpop.eup %2214 }
0x11b9   :  { %1521 = vrot.lane.b32.xlu0 %v2215_v40, %s2258_s0 }
0x11ba   :  { %v2217_v0 = vpop.eup %2216 }
0x11bb   :  { %v1515_v55 = vadd.f32 1.0, %v2217_v0 }
0x11bd   :  { %2218 = vrcp.f32 %v1515_v55 }
0x11c7   :  { %v2219_v31 = vpop.eup %2218 }
0x11c8   :  { %v1519_v53 = vmul.f32 %v2219_v31, %v1331_v41 }
0x122b   :  { %v1522_v48 = vpop.permute.xlu0 %1521 }
0x122c   :  { %v1524_v56 = vmul.f32 %v2219_v31, %v1522_v48 }
0x122e   :  { %1526 = vrot.lane.b32.xlu1 %v1524_v56, %s2259_s28 }
0x12a0   :  { %v1527_v60 = vpop.permute.xlu1 %1526 }
0x12a1   :  { %v1529_v61 = vadd.f32 %v1527_v60, %v1519_v53 }
0x12a3   :  { %2220 = vtanh.f32 %v1529_v61 }
0x12ad   :  { %v2221_v62 = vpop.eup %2220 }
0x12ae   :  { %1532 = vrot.lane.b32.xlu0 %v2221_v62, %s2258_s0 }
0x1320   :  { %v1533_v16 = vpop.permute.xlu0 %1532 }
0x1321   :  { %v1535_v63 = vmul.f32 %v2219_v31, %v1533_v16 }
0x1323   :  { %1537 = vrot.lane.b32.xlu0 %v1535_v63, %s2259_s28  ;;  %v1630_v2 = vrot.slane %v1535_v63, 2 }
0x1325   :  { %1631 = vrot.lane.b32.xlu1 %v1630_v2, %s2259_s28 }
0x1395   :  { %v1538_v3 = vpop.permute.xlu0 %1537 }
0x1396   :  { %2019 = vmatmul.mubr.msk.f32.vlgmr.msra.gmra.mrb[14].mxu0 %vm176_vm6, %v1538_v3 }
0x1397   :  { %v1632_v4 = vpop.permute.xlu1 %1631 }
0x1398   :  { %2030 = vmatmul.mubr.msk.f32.vlgmr.msra.gmra.mrb[18].mxu1 %vm176_vm6, %v1632_v4 }
0x1469   :  { %v1626_v5 = vpop.f32.mrb[14].mxu0 }
0x146a   :  { %v2020_v6 = vpop.f32.mrb[15].mxu0 }
0x146b   :  { %v1701_v7 = vpop.f32.mrb[18].mxu1 }
0x146c   :  { %v1706_v8 = vrot.slane %v1701_v7, 6  ;;  %v2031_v11 = vpop.f32.mrb[19].mxu1 }
0x146e   :  { %v1708_v9 = vsel %vm172_vm1, %v1626_v5, %v1706_v8 }
0x146f   :  { %v1709_v12 = vadd.f32 %v1708_v9, %v2498_v17 }
0x1471   :  { %2222 = vtanh.f32 %v1709_v12  ;;  %v1775_v10 = vmul.f32 -1.442695, %v1709_v12 }
0x1473   :  { %2224 = vpow2.f32 %v1775_v10 }
0x147b   :  { %v2223_v14 = vpop.eup %2222 }
0x147c   :  { %1719 = vrot.lane.b32.xlu1 %v2223_v14, %s2258_s0 }
0x147d   :  { %v2225_v19 = vpop.eup %2224 }
0x147e   :  { %v1713_v20 = vadd.f32 1.0, %v2225_v19 }
0x1480   :  { %2226 = vrcp.f32 %v1713_v20 }
0x148a   :  { %v2227_v21 = vpop.eup %2226 }
0x148b   :  { %v1717_v17 = vmul.f32 %v2227_v21, %v1529_v61 }
0x14ee   :  { %v1720_v22 = vpop.permute.xlu1 %1719 }
0x14ef   :  { %v1722_v57 = vmul.f32 %v2227_v21, %v1720_v22 }
0x14f1   :  { %1724 = vrot.lane.b32.xlu0 %v1722_v57, %s2259_s28 }
0x14f5   :  { %355 = vrot.lane.b32.xlu0 %v2503_v32, %s2258_s0 }
0x14f9   :  { %753 = vrot.lane.b32.xlu0 %v2569_v24, %s2258_s0 }
0x14fd   :  { %1147 = vrot.lane.b32.xlu0 %v2635_v15, %s2258_s0 }
0x1501   :  { %1541 = vrot.lane.b32.xlu0 %v1535_v63, %s2258_s0 }
0x1563   :  { %v1725_v25 = vpop.permute.xlu0 %1724 }
0x1564   :  { %v1727_v26 = vadd.f32 %v1725_v25, %v1717_v17 }
0x1566   :  { %2228 = vtanh.f32 %v1727_v26 }
0x1567   :  { %v356_v27 = vpop.permute.xlu0 %355 }
0x1568   :  { %359 = vst.msk [vmem:[%s2817_s4 + $0x5] sm:$0x4] %vm358_vm7, %v356_v27 }
0x1569   :  { %363 = vst.msk [vmem:[%s2817_s4 + $0xc] sm:$0x8] %vm362_vm8, %v356_v27 }
0x156b   :  { %v754_v32 = vpop.permute.xlu0 %753 }
0x156c   :  { %756 = vst.msk [vmem:[%s2817_s4 + $0x3] sm:$0x4] %vm358_vm7, %v754_v32 }
0x156d   :  { %758 = vst.msk [vmem:[%s2817_s4 + $0xa] sm:$0x8] %vm362_vm8, %v754_v32 }
0x156e   :  { %1342 = vst.msk [vmem:[%s2817_s4 + $0x5] sm:$0x1] %vm353_vm4, %v2669_v45 }
0x156f   :  { %1347 = vst.msk [vmem:[%s2817_s4 + $0xc] sm:$0x2] %vm360_vm5, %v2669_v45  ;;  %v1148_v24 = vpop.permute.xlu0 %1147 }
0x1570   :  { %v2229_v15 = vpop.eup %2228  ;;  %1150 = vst.msk [vmem:[%s2817_s4 + $0x1] sm:$0x4] %vm358_vm7, %v1148_v24 }
0x1571   :  { %1152 = vst.msk [vmem:[%s2817_s4 + $0x8] sm:$0x8] %vm362_vm8, %v1148_v24  ;;  %1730 = vrot.lane.b32.xlu1 %v2229_v15, %s2258_s0 }
0x1573   :  { %v1542_v28 = vpop.permute.xlu0 %1541 }
0x1574   :  { %1544 = vst.msk [vmem:[%s2817_s4 - $0x1] sm:$0x4] %vm358_vm7, %v1542_v28 }
0x1575   :  { %1546 = vst.msk [vmem:[%s2817_s4 + $0x6] sm:$0x8] %vm362_vm8, %v1542_v28  ;;  %555 = vrot.lane.b32.xlu1 %v2536_v59, %s2258_s0 }
0x1579   :  { %951 = vrot.lane.b32.xlu1 %v2602_v50, %s2258_s0 }
0x157d   :  { %1343 = vrot.lane.b32.xlu1 %v2663_v43, %s2258_s0 }
0x15e3   :  { %v1731_v29 = vpop.permute.xlu1 %1730 }
0x15e4   :  { %v1733_v30 = vmul.f32 %v2227_v21, %v1731_v29 }
0x15e6   :  { %1739 = vrot.lane.b32.xlu0 %v1733_v30, %s2258_s0  ;;  %1735 = vrot.lane.b32.xlu1 %v1733_v30, %s2259_s28 }
0x15e7   :  { %v556_v33 = vpop.permute.xlu1 %555 }
0x15e8   :  { %558 = vst.msk [vmem:[%s2817_s4 + $0x4] sm:$0x4] %vm358_vm7, %v556_v33 }
0x15e9   :  { %560 = vst.msk [vmem:[%s2817_s4 + $0xb] sm:$0x8] %vm362_vm8, %v556_v33 }
0x15ea   :  { %1540 = vst.msk [vmem:[%s2817_s4 + $0x6] sm:$0x1] %vm353_vm4, %v1538_v3 }
0x15eb   :  { %1545 = vst.msk [vmem:[%s2817_s4 + $0xd] sm:$0x2] %vm360_vm5, %v1538_v3  ;;  %v952_v59 = vpop.permute.xlu1 %951 }
0x15ec   :  { %954 = vst.msk [vmem:[%s2817_s4 + $0x2] sm:$0x4] %vm358_vm7, %v952_v59 }
0x15ed   :  { %956 = vst.msk [vmem:[%s2817_s4 + $0x9] sm:$0x8] %vm362_vm8, %v952_v59 }
0x15ee   :  { %1146 = vst.msk [vmem:[%s2817_s4 + $0x4] sm:$0x1] %vm353_vm4, %v2641_v18 }
0x15ef   :  { %1151 = vst.msk [vmem:[%s2817_s4 + $0xb] sm:$0x2] %vm360_vm5, %v2641_v18  ;;  %v1344_v50 = vpop.permute.xlu1 %1343 }
0x15f0   :  { %1346 = vst.msk [vmem:[%s2817_s4] sm:$0x4] %vm358_vm7, %v1344_v50 }
0x15f1   :  { %1348 = vst.msk [vmem:[%s2817_s4 + $0x7] sm:$0x8] %vm362_vm8, %v1344_v50 }
0x1658   :  { %v1740_v34 = vpop.permute.xlu0 %1739  ;;  %v1736_v35 = vpop.permute.xlu1 %1735 }
0x1659   :  { %1742 = vst.msk [vmem:[%s2817_s4 - $0x2] sm:$0x4] %vm358_vm7, %v1740_v34 }
0x165a   :  { %1744 = vst.msk [vmem:[%s2817_s4 + $0x5] sm:$0x8] %vm362_vm8, %v1740_v34 }
0x165b   :  { %1738 = vst.msk [vmem:[%s2817_s4 + $0x7] sm:$0x1] %vm353_vm4, %v1736_v35 }
0x165c   :  { %1743 = vst.msk [vmem:[%s2817_s4 + $0xe] sm:$0x2] %vm360_vm5, %v1736_v35 }
0x165d   :  { %1749 = vsyncpa [#allocation3], 1 }

// kernel: _lambda_.3
= control target key start
LH: loop header
LB: loop body
LE: loop exit
PB: predicated region body
PF: predicated region fallthrough
CT: control target
= control target key end

     0   :  { %12 = vsyncpa [#allocation7], 0  ;;  %s4342_s0 = inlined_call_operand.vmem [shape: f32[2,132,1], index: 0, kind: input, shape index: {}]   ;;  %s4343_s1 = inlined_call_operand.vmem [shape: f32[5,1,32], index: 1, kind: input, shape index: {}]   ;;  %s4344_s2 = inlined_call_operand.vmem [shape: f32[1,32], index: 2, kind: input, shape index: {}]   ;;  %s4345_s3 = inlined_call_operand.hbm [shape: f32[96,64], index: 3, kind: input, shape index: {}]   ;;  %s4346_s4 = inlined_call_operand.vmem [shape: f32[1,64], index: 4, kind: input, shape index: {}]   ;;  %s4347_s5 = inlined_call_operand.vmem [shape: f32[192,128], index: 5, kind: input, shape index: {}]   ;;  %s4348_s6 = inlined_call_operand.hbm [shape: f32[1,128], index: 6, kind: input, shape index: {}]   ;;  %s4349_s7 = inlined_call_operand.vmem [shape: f32[16,128], index: 7, kind: output, shape index: {}]  }
   0x1   :  { %13 = vsyncpa [#allocation9], 0  ;;  %s2814_s24 = smov [#allocation6]   ;;  %s2766_s28 = scalar_lea.hbm %s4345_s3, 1536 }
   0x2   :  { %s25_s25 = sshll.u32 %s2814_s24, 4  ;;  %p2767_p0 = scmp.ne.s32.totalorder %s4345_s3, %s2766_s28  ;;  %s26_s25 = int_to_ptr.vmem [resolvable:$true] %s25_s25 }
   0x3   :  { %p2770_p1 = scmp.lt.u32.totalorder %s2766_s28, %s4345_s3 }
   0x5   :  { %p2772_p2 = pnand %p2770_p1, %p2767_p0 }
   0x7   :  { %2775 = shalt.err (!%p2772_p2)
}
   0x8   :  { %s2776_s10 = scalar_lea.vmem %s26_s25, 1536  ;;  %p2781_p4 = scmp.lt.s32.totalorder %s26_s25, %s26_s25 }
   0x9   :  { %p2777_p3 = scmp.ne.s32.totalorder %s26_s25, %s2776_s10  ;;  %p2782_p5 = scmp.lt.s32.totalorder %s2776_s10, %s2776_s10 }
   0xb   :  { %p2783_p6 = por %p2782_p5, %p2781_p4 }
   0xd   :  { %p2784_p7 = pnand %p2783_p6, %p2777_p3 }
   0xf   :  { %2787 = shalt.err (!%p2784_p7)
}
  0x10   :  { %s2815_s11 = smov 128   ;;  %s2816_s12 = smov 8  }
  0x11   :  { %31 = dma.hbm_to_vmem [thread:$0]  %s4345_s3, 1536, %s26_s25, [#allocation7], %s2815_s11, %s2815_s11, %s2816_s12  }
  0x12   :  { %s2817_s15 = smov [#allocation8]   ;;  %s2788_s19 = scalar_lea.hbm %s4348_s6, 16 }
  0x13   :  { %s42_s16 = sshll.u32 %s2817_s15, 4  ;;  %p2789_p8 = scmp.ne.s32.totalorder %s4348_s6, %s2788_s19  ;;  %s43_s16 = int_to_ptr.vmem [resolvable:$true] %s42_s16 }
  0x14   :  { %p2792_p9 = scmp.lt.u32.totalorder %s2788_s19, %s4348_s6 }
  0x16   :  { %p2794_p10 = pnand %p2792_p9, %p2789_p8 }
  0x18   :  { %2797 = shalt.err (!%p2794_p10)
}
  0x19   :  { %s2798_s24 = scalar_lea.vmem %s43_s16, 16  ;;  %s2802_s3 = scalar_lea.vmem %s43_s16, 32 }
  0x1a   :  { %p2799_p11 = scmp.ne.s32.totalorder %s43_s16, %s2798_s24  ;;  %p2803_p12 = scmp.lt.s32.totalorder %s43_s16, %s43_s16 }
  0x1b   :  { %p2804_p13 = scmp.lt.s32.totalorder %s2802_s3, %s2798_s24 }
  0x1d   :  { %p2805_p0 = por %p2804_p13, %p2803_p12 }
  0x1f   :  { %p2806_p1 = pnand %p2805_p0, %p2799_p11 }
  0x21   :  { %2809 = shalt.err (!%p2806_p1)
}
  0x22   :  { %45 = dma.hbm_to_vmem [thread:$0]  %s4348_s6, 16, %s43_s16, [#allocation9]  }
  0x23   :  { %2810 = dma.done.wait [#allocation7], 1536  }
  0x24   :  { %2811 = vsyncadd [#allocation7], 4294965760 }
  0x25   :  { %2812 = dma.done.wait [#allocation9], 16  }
  0x26   :  { %2813 = vsyncadd [#allocation9], 4294967280  ;;  %v2818_v0 = vmov 0   ;;  %v54_v1 = vld [vmem:[%s4342_s0 + $0x10] sm:$0xff]  ;;  %v52_v2 = vld [vmem:[%s4342_s0] sm:$0xff]  ;;  %vm235_vm0 = vcmask 1046528  }
  0x27   :  { %2739 = vset.pattern.permute.xlu1 %v2818_v0  ;;  %2738 = vset.pattern.permute.xlu0 %v2818_v0  ;;  %v55_v3 = vld [vmem:[%s4342_s0 + $0x18] sm:$0xff]  ;;  %v53_v4 = vld [vmem:[%s4342_s0 + $0x8] sm:$0xff]  ;;  %v56_v6 = vld [vmem:[%s4342_s0 + $0x20] sm:$0xff]  ;;  %vm343_vm1 = vcmask 1045504   ;;  %vm451_vm2 = vcmask 1044480   ;;  %vm559_vm3 = vcmask 1043456  }
  0x28   :  { %82 = vperm.xlu1 %2739, %v54_v1   ;;  %72 = vperm.xlu0 %2738, %v52_v2   ;;  %v2443_v5 = vld [vmem:[%s4342_s0 + $0x88] sm:$0xff]  ;;  %v2445_v7 = vld [vmem:[%s4342_s0 + $0x98] sm:$0xff]  ;;  %v2444_v8 = vld [vmem:[%s4342_s0 + $0x90] sm:$0xff]  ;;  %vm664_vm4 = vcmask 261120   ;;  %vm1389_vm5 = vcmask 1040384   ;;  %s2819_s8 = smov 32  }
  0x29   :  { %v2447_v9 = vld [vmem:[%s4342_s0 + $0xa8] sm:$0xff]  ;;  %v2446_v10 = vld [vmem:[%s4342_s0 + $0xa0] sm:$0xff]  ;;  %v58_v11 = vld [vmem:[%s4342_s0 + $0x30] sm:$0xff]  ;;  %vm1508_vm6 = vcmask 523264   ;;  %vm1536_vm7 = vcmask 785408  }
  0x2a   :  { %v57_v12 = vld [vmem:[%s4342_s0 + $0x28] sm:$0xff]  ;;  %v2449_v13 = vld [vmem:[%s4342_s0 + $0xb8] sm:$0xff]  ;;  %v2448_v14 = vld [vmem:[%s4342_s0 + $0xb0] sm:$0xff] }
  0x2b   :  { %v60_v15 = vld [vmem:[%s4342_s0 + $0x40] sm:$0xff]  ;;  %v59_v16 = vld [vmem:[%s4342_s0 + $0x38] sm:$0xff]  ;;  %v2451_v17 = vld [vmem:[%s4342_s0 + $0xc8] sm:$0xff] }
  0x2c   :  { %87 = vperm.xlu1 %2739, %v55_v3   ;;  %77 = vperm.xlu0 %2738, %v53_v4   ;;  %v2450_v18 = vld [vmem:[%s4342_s0 + $0xc0] sm:$0xff]  ;;  %v62_v19 = vld [vmem:[%s4342_s0 + $0x50] sm:$0xff]  ;;  %v61_v20 = vld [vmem:[%s4342_s0 + $0x48] sm:$0xff] }
  0x2d   :  { %v2453_v21 = vld [vmem:[%s4342_s0 + $0xd8] sm:$0xff]  ;;  %v2452_v22 = vld [vmem:[%s4342_s0 + $0xd0] sm:$0xff]  ;;  %v64_v23 = vld [vmem:[%s4342_s0 + $0x60] sm:$0xff] }
  0x2e   :  { %v63_v24 = vld [vmem:[%s4342_s0 + $0x58] sm:$0xff]  ;;  %v2455_v25 = vld [vmem:[%s4342_s0 + $0xe8] sm:$0xff]  ;;  %v2454_v26 = vld [vmem:[%s4342_s0 + $0xe0] sm:$0xff] }
  0x2f   :  { %v66_v27 = vld [vmem:[%s4342_s0 + $0x70] sm:$0xff]  ;;  %v65_v28 = vld [vmem:[%s4342_s0 + $0x68] sm:$0xff]  ;;  %v2457_v29 = vld [vmem:[%s4342_s0 + $0xf8] sm:$0xff] }
  0x30   :  { %702 = vperm.xlu1 %2739, %v2443_v5   ;;  %92 = vperm.xlu0 %2738, %v56_v6   ;;  %v2456_v30 = vld [vmem:[%s4342_s0 + $0xf0] sm:$0xff]  ;;  %v68_v31 = vld [vmem:[%s4342_s0 + $0x80] sm:$0xf]  ;;  %v67_v32 = vld [vmem:[%s4342_s0 + $0x78] sm:$0xff] }
  0x31   :  { %v2459_v33 = vld [vmem:[%s4342_s0 + $0x108] sm:$0xf]  ;;  %v2458_v34 = vld [vmem:[%s4342_s0 + $0x100] sm:$0xff] }
  0x32   :  { %v2991_v35 = vld [vmem:[%s4343_s1 + $0x1] ss:$0 sm:$0xff]  ;;  %v2996_v36 = vld [vmem:[%s4343_s1 + $0x2] ss:$0 sm:$0xff]  ;;  %v3001_v37 = vld [vmem:[%s4343_s1 + $0x3] ss:$0 sm:$0xff] }
  0x33   :  { %v3006_v38 = vld [vmem:[%s4343_s1] ss:$0 sm:$0xff]  ;;  %v3011_v39 = vld [vmem:[%s4343_s1 + $0x4] ss:$0 sm:$0xff] }
  0x34   :  { %712 = vperm.xlu1 %2739, %v2445_v7   ;;  %707 = vperm.xlu0 %2738, %v2444_v8  }
  0x38   :  { %722 = vperm.xlu1 %2739, %v2447_v9   ;;  %717 = vperm.xlu0 %2738, %v2446_v10  }
  0x3c   :  { %102 = vperm.xlu1 %2739, %v58_v11   ;;  %97 = vperm.xlu0 %2738, %v57_v12  }
  0x40   :  { %732 = vperm.xlu1 %2739, %v2449_v13   ;;  %727 = vperm.xlu0 %2738, %v2448_v14  }
  0x44   :  { %112 = vperm.xlu1 %2739, %v60_v15   ;;  %107 = vperm.xlu0 %2738, %v59_v16  }
  0x48   :  { %742 = vperm.xlu1 %2739, %v2451_v17   ;;  %737 = vperm.xlu0 %2738, %v2450_v18  }
  0x4c   :  { %122 = vperm.xlu1 %2739, %v62_v19   ;;  %117 = vperm.xlu0 %2738, %v61_v20  }
  0x50   :  { %752 = vperm.xlu1 %2739, %v2453_v21   ;;  %747 = vperm.xlu0 %2738, %v2452_v22  }
  0x54   :  { %132 = vperm.xlu1 %2739, %v64_v23   ;;  %127 = vperm.xlu0 %2738, %v63_v24  }
  0x58   :  { %762 = vperm.xlu1 %2739, %v2455_v25   ;;  %757 = vperm.xlu0 %2738, %v2454_v26  }
  0x5c   :  { %142 = vperm.xlu1 %2739, %v66_v27   ;;  %137 = vperm.xlu0 %2738, %v65_v28  }
  0x60   :  { %772 = vperm.xlu1 %2739, %v2457_v29   ;;  %767 = vperm.xlu0 %2738, %v2456_v30  }
  0x64   :  { %192 = vperm.xlu1 %2739, %v68_v31   ;;  %147 = vperm.xlu0 %2738, %v67_v32  }
  0x68   :  { %821 = vperm.xlu1 %2739, %v2459_v33   ;;  %777 = vperm.xlu0 %2738, %v2458_v34  }
  0xa7   :  { %v83_v40 = vpop.permute.xlu1 %82  ;;  %v73_v41 = vpop.permute.xlu0 %72 }
  0xa8   :  { %v203_v42 = vmul.f32 %v2991_v35, %v83_v40  ;;  %v311_v43 = vmul.f32 %v2996_v36, %v83_v40  ;;  %v419_v44 = vmul.f32 %v3001_v37, %v83_v40  ;;  %v158_v45 = vmul.f32 %v3006_v38, %v83_v40 }
  0xa9   :  { %v527_v46 = vmul.f32 %v3011_v39, %v83_v40  ;;  %v201_v47 = vmul.f32 %v2991_v35, %v73_v41  ;;  %v309_v48 = vmul.f32 %v2996_v36, %v73_v41  ;;  %v156_v51 = vmul.f32 %v3006_v38, %v73_v41 }
  0xaa   :  { %v239_v49 = vrot.slane %v203_v42, 1  ;;  %v347_v50 = vrot.slane %v311_v43, 2  ;;  %v417_v52 = vmul.f32 %v3001_v37, %v73_v41  ;;  %v455_v53 = vrot.slane %v419_v44, 3  ;;  %v3074_v42 = vld [vmem:[%s4344_s2] ss:$0 sm:$0xff] }
  0xab   :  { %v563_v54 = vrot.slane %v527_v46, 4  ;;  %v236_v55 = vrot.slane %v201_v47, 1  ;;  %v525_v56 = vmul.f32 %v3011_v39, %v73_v41  ;;  %v88_v57 = vpop.permute.xlu1 %87  ;;  %v78_v58 = vpop.permute.xlu0 %77  ;;  %v344_v59 = vrot.slane %v309_v48, 2 }
  0xac   :  { %v452_v60 = vrot.slane %v417_v52, 3  ;;  %v3024_v61 = vmul.f32 %v2991_v35, %v88_v57  ;;  %v3027_v62 = vmul.f32 %v2996_v36, %v88_v57  ;;  %v3030_v0 = vmul.f32 %v3006_v38, %v88_v57 }
  0xad   :  { %v560_v63 = vrot.slane %v525_v56, 4  ;;  %v3033_v1 = vmul.f32 %v3001_v37, %v88_v57  ;;  %v3036_v2 = vmul.f32 %v3011_v39, %v88_v57  ;;  %v202_v5 = vmul.f32 %v2991_v35, %v78_v58 }
  0xae   :  { %v241_v3 = vrot.slane %v3024_v61, 1  ;;  %v349_v4 = vrot.slane %v3027_v62, 2  ;;  %v310_v6 = vmul.f32 %v2996_v36, %v78_v58  ;;  %v157_v9 = vmul.f32 %v3006_v38, %v78_v58 }
  0xaf   :  { %v457_v7 = vrot.slane %v3033_v1, 3  ;;  %v565_v8 = vrot.slane %v3036_v2, 4  ;;  %v418_v10 = vmul.f32 %v3001_v37, %v78_v58  ;;  %v237_v12 = vrot.slane %v202_v5, 1  ;;  %v703_v19 = vpop.permute.xlu1 %702  ;;  %v93_v41 = vpop.permute.xlu0 %92 }
  0xb0   :  { %v242_v11 = vsel %vm235_vm0, %v239_v49, %v241_v3  ;;  %v345_v13 = vrot.slane %v310_v6, 2  ;;  %v526_v14 = vmul.f32 %v3011_v39, %v78_v58  ;;  %v350_v16 = vsel %vm343_vm1, %v347_v50, %v349_v4 }
  0xb1   :  { %v287_v15 = vadd.f32 %v242_v11, %v158_v45  ;;  %v458_v17 = vsel %vm451_vm2, %v455_v53, %v457_v7  ;;  %v453_v18 = vrot.slane %v418_v10, 3  ;;  %v566_v20 = vsel %vm559_vm3, %v563_v54, %v565_v8 }
  0xb2   :  { %v238_v21 = vsel %vm235_vm0, %v236_v55, %v237_v12  ;;  %v240_v22 = vsel %vm235_vm0, %v237_v12, %v239_v49  ;;  %v346_v23 = vsel %vm343_vm1, %v344_v59, %v345_v13  ;;  %v348_v27 = vsel %vm343_vm1, %v345_v13, %v347_v50 }
  0xb3   :  { %v395_v24 = vadd.f32 %v350_v16, %v287_v15  ;;  %v285_v25 = vadd.f32 %v238_v21, %v156_v51  ;;  %v286_v26 = vadd.f32 %v240_v22, %v157_v9  ;;  %v454_v28 = vsel %vm451_vm2, %v452_v60, %v453_v18  ;;  %v713_v6 = vpop.permute.xlu1 %712  ;;  %v708_v21 = vpop.permute.xlu0 %707 }
  0xb4   :  { %v456_v29 = vsel %vm451_vm2, %v453_v18, %v455_v53  ;;  %v561_v30 = vrot.slane %v526_v14, 4  ;;  %v3066_v31 = vmul.f32 %v2991_v35, %v703_v19  ;;  %v3069_v40 = vmul.f32 %v2996_v36, %v703_v19 }
  0xb5   :  { %v503_v32 = vadd.f32 %v458_v17, %v395_v24  ;;  %v393_v33 = vadd.f32 %v346_v23, %v285_v25  ;;  %v394_v34 = vadd.f32 %v348_v27, %v286_v26  ;;  %v3079_v45 = vmul.f32 %v3006_v38, %v703_v19 }
  0xb6   :  { %v562_v43 = vsel %vm559_vm3, %v560_v63, %v561_v30  ;;  %v564_v44 = vsel %vm559_vm3, %v561_v30, %v563_v54  ;;  %v3082_v46 = vmul.f32 %v3001_v37, %v703_v19  ;;  %v864_v50 = vrot.slane %v3066_v31, 1 }
  0xb7   :  { %v611_v47 = vadd.f32 %v566_v20, %v503_v32  ;;  %v501_v48 = vadd.f32 %v454_v28, %v393_v33  ;;  %v502_v49 = vadd.f32 %v456_v29, %v394_v34  ;;  %v970_v51 = vrot.slane %v3069_v40, 2  ;;  %v723_v27 = vpop.permute.xlu1 %722 }
  0xb8   :  { %v1076_v52 = vrot.slane %v3082_v46, 3  ;;  %v3088_v53 = vmul.f32 %v3011_v39, %v703_v19  ;;  %v3091_v54 = vmul.f32 %v2991_v35, %v93_v41  ;;  %v3095_v58 = vmul.f32 %v2996_v36, %v93_v41 }
  0xb9   :  { %v634_v55 = vadd.f32 %v3074_v42, %v611_v47  ;;  %v609_v56 = vadd.f32 %v562_v43, %v501_v48  ;;  %v610_v57 = vadd.f32 %v564_v44, %v502_v49  ;;  %v3098_v59 = vmul.f32 %v3006_v38, %v93_v41 }
  0xba   :  { %v243_v60 = vrot.slane %v3091_v54, 1  ;;  %v3102_v63 = vmul.f32 %v3001_v37, %v93_v41  ;;  %v3105_v5 = vmul.f32 %v3011_v39, %v93_v41  ;;  %v351_v12 = vrot.slane %v3095_v58, 2 }
  0xbb   :  { %v650_v9 = vmax.f32 %v634_v55, 0.0  ;;  %v632_v10 = vadd.f32 %v3074_v42, %v609_v56  ;;  %v633_v11 = vadd.f32 %v3074_v42, %v610_v57  ;;  %v1182_v13 = vrot.slane %v3088_v53, 4 }
  0xbc   :  { %v244_v14 = vsel %vm235_vm0, %v241_v3, %v243_v60  ;;  %v459_v15 = vrot.slane %v3102_v63, 3  ;;  %v567_v16 = vrot.slane %v3105_v5, 4  ;;  %v3121_v20 = vmul.f32 %v3006_v38, %v713_v6 }
  0xbd   :  { %667 = vst.msk [vmem:[#allocation2 + $0x10] sm:$0xff] %vm664_vm4, %v650_v9  ;;  %v648_v17 = vmax.f32 %v632_v10, 0.0  ;;  %v649_v18 = vmax.f32 %v633_v11, 0.0  ;;  %v288_v19 = vadd.f32 %v244_v14, %v3030_v0  ;;  %v352_v61 = vsel %vm343_vm1, %v349_v4, %v351_v12  ;;  %v718_v10 = vpop.permute.xlu0 %717 }
  0xbe   :  { %v460_v3 = vsel %vm451_vm2, %v457_v7, %v459_v15  ;;  %v3134_v22 = vmul.f32 %v2991_v35, %v713_v6  ;;  %v3137_v0 = vmul.f32 %v2996_v36, %v713_v6  ;;  %v568_v62 = vsel %vm559_vm3, %v565_v8, %v567_v16 }
  0xbf   :  { %665 = vst.msk [vmem:[#allocation2] sm:$0xff] %vm664_vm4, %v648_v17  ;;  %666 = vst.msk [vmem:[#allocation2 + $0x8] sm:$0xff] %vm664_vm4, %v649_v18  ;;  %v396_v23 = vadd.f32 %v352_v61, %v288_v19  ;;  %v3147_v1 = vmul.f32 %v3001_v37, %v713_v6  ;;  %v3150_v4 = vmul.f32 %v3011_v39, %v713_v6 }
  0xc0   :  { %v867_v7 = vrot.slane %v3134_v22, 1  ;;  %v787_v24 = vmul.f32 %v3006_v38, %v708_v21  ;;  %v831_v25 = vmul.f32 %v2991_v35, %v708_v21  ;;  %v937_v26 = vmul.f32 %v2996_v36, %v708_v21 }
  0xc1   :  { %v504_v28 = vadd.f32 %v460_v3, %v396_v23  ;;  %v973_v2 = vrot.slane %v3137_v0, 2  ;;  %v1079_v8 = vrot.slane %v3147_v1, 3  ;;  %v1043_v29 = vmul.f32 %v3001_v37, %v708_v21  ;;  %v103_v0 = vpop.permute.xlu1 %102 }
  0xc2   :  { %v1185_v30 = vrot.slane %v3150_v4, 4  ;;  %v865_v31 = vrot.slane %v831_v25, 1  ;;  %v971_v32 = vrot.slane %v937_v26, 2  ;;  %v1149_v33 = vmul.f32 %v3011_v39, %v708_v21 }
  0xc3   :  { %v612_v34 = vadd.f32 %v568_v62, %v504_v28  ;;  %v1077_v40 = vrot.slane %v1043_v29, 3  ;;  %v3162_v41 = vmul.f32 %v3006_v38, %v723_v27  ;;  %v3165_v43 = vmul.f32 %v2991_v35, %v723_v27 }
  0xc4   :  { %v866_v44 = vsel %vm235_vm0, %v864_v50, %v865_v31  ;;  %v868_v46 = vsel %vm235_vm0, %v865_v31, %v867_v7  ;;  %v972_v47 = vsel %vm343_vm1, %v970_v51, %v971_v32  ;;  %v3171_v48 = vmul.f32 %v2996_v36, %v723_v27 }
  0xc5   :  { %v635_v49 = vadd.f32 %v3074_v42, %v612_v34  ;;  %v913_v53 = vadd.f32 %v866_v44, %v3079_v45  ;;  %v914_v55 = vadd.f32 %v868_v46, %v787_v24  ;;  %v974_v56 = vsel %vm343_vm1, %v971_v32, %v973_v2 }
  0xc6   :  { %v1078_v57 = vsel %vm451_vm2, %v1076_v52, %v1077_v40  ;;  %v1080_v6 = vsel %vm451_vm2, %v1077_v40, %v1079_v8  ;;  %v1183_v9 = vrot.slane %v1149_v33, 4  ;;  %v871_v50 = vrot.slane %v3165_v43, 1 }
  0xc7   :  { %v651_v11 = vmax.f32 %v635_v49, 0.0  ;;  %v1019_v51 = vadd.f32 %v972_v47, %v913_v53  ;;  %v1020_v14 = vadd.f32 %v974_v56, %v914_v55  ;;  %v3180_v17 = vmul.f32 %v3001_v37, %v723_v27 }
  0xc8   :  { %v1184_v18 = vsel %vm559_vm3, %v1182_v13, %v1183_v9  ;;  %v1186_v45 = vsel %vm559_vm3, %v1183_v9, %v1185_v30  ;;  %v977_v52 = vrot.slane %v3171_v48, 2  ;;  %v3188_v19 = vmul.f32 %v3011_v39, %v723_v27 }
  0xc9   :  { %668 = vst.msk [vmem:[#allocation2 + $0x18] sm:$0xff] %vm664_vm4, %v651_v11  ;;  %v1125_v21 = vadd.f32 %v1078_v57, %v1019_v51  ;;  %v1126_v61 = vadd.f32 %v1080_v6, %v1020_v14  ;;  %v789_v3 = vmul.f32 %v3006_v38, %v718_v10  ;;  %v833_v22 = vmul.f32 %v2991_v35, %v718_v10  ;;  %v98_v6 = vpop.permute.xlu0 %97 }
  0xca   :  { %v1083_v13 = vrot.slane %v3180_v17, 3  ;;  %v939_v23 = vmul.f32 %v2996_v36, %v718_v10  ;;  %v1045_v62 = vmul.f32 %v3001_v37, %v718_v10  ;;  %v1151_v1 = vmul.f32 %v3011_v39, %v718_v10 }
  0xcb   :  { %v1231_v24 = vadd.f32 %v1184_v18, %v1125_v21  ;;  %v1232_v25 = vadd.f32 %v1186_v45, %v1126_v61  ;;  %v1189_v26 = vrot.slane %v3188_v19, 4  ;;  %v869_v27 = vrot.slane %v833_v22, 1  ;;  %v733_v21 = vpop.permute.xlu1 %732 }
  0xcc   :  { %v975_v28 = vrot.slane %v939_v23, 2  ;;  %v1081_v29 = vrot.slane %v1045_v62, 3  ;;  %v1187_v31 = vrot.slane %v1151_v1, 4  ;;  %v3199_v32 = vmul.f32 %v3006_v38, %v103_v0 }
  0xcd   :  { %v1254_v33 = vadd.f32 %v3074_v42, %v1231_v24  ;;  %v1255_v34 = vadd.f32 %v3074_v42, %v1232_v25  ;;  %v870_v40 = vsel %vm235_vm0, %v867_v7, %v869_v27  ;;  %v872_v44 = vsel %vm235_vm0, %v869_v27, %v871_v50 }
  0xce   :  { %v915_v46 = vadd.f32 %v870_v40, %v3121_v20  ;;  %v916_v47 = vadd.f32 %v872_v44, %v789_v3  ;;  %v976_v49 = vsel %vm343_vm1, %v973_v2, %v975_v28  ;;  %v3210_v53 = vmul.f32 %v2991_v35, %v103_v0 }
  0xcf   :  { %v1270_v55 = vmax.f32 %v1254_v33, 0.0  ;;  %v1271_v56 = vmax.f32 %v1255_v34, 0.0  ;;  %v978_v57 = vsel %vm343_vm1, %v975_v28, %v977_v52  ;;  %v1082_v7 = vsel %vm451_vm2, %v1079_v8, %v1081_v29 }
  0xd0   :  { %v1021_v9 = vadd.f32 %v976_v49, %v915_v46  ;;  %v1022_v10 = vadd.f32 %v978_v57, %v916_v47  ;;  %v1084_v20 = vsel %vm451_vm2, %v1081_v29, %v1083_v13  ;;  %v1188_v2 = vsel %vm559_vm3, %v1185_v30, %v1187_v31 }
  0xd1   :  { %1286 = vst.msk [vmem:[#allocation2 + $0x80] sm:$0xff] %vm664_vm4, %v1270_v55  ;;  %1287 = vst.msk [vmem:[#allocation2 + $0x88] sm:$0xff] %vm664_vm4, %v1271_v56  ;;  %v1190_v11 = vsel %vm559_vm3, %v1187_v31, %v1189_v26  ;;  %v3228_v8 = vmul.f32 %v2996_v36, %v103_v0  ;;  %v3231_v51 = vmul.f32 %v3001_v37, %v103_v0  ;;  %v247_v30 = vrot.slane %v3210_v53, 1 }
  0xd2   :  { %v3234_v14 = vmul.f32 %v3011_v39, %v103_v0  ;;  %v1127_v4 = vadd.f32 %v1082_v7, %v1021_v9  ;;  %v1128_v18 = vadd.f32 %v1084_v20, %v1022_v10  ;;  %v206_v45 = vmul.f32 %v2991_v35, %v98_v6  ;;  %v728_v9 = vpop.permute.xlu0 %727 }
  0xd3   :  { %v355_v61 = vrot.slane %v3228_v8, 2  ;;  %v463_v3 = vrot.slane %v3231_v51, 3  ;;  %v161_v22 = vmul.f32 %v3006_v38, %v98_v6  ;;  %v314_v23 = vmul.f32 %v2996_v36, %v98_v6 }
  0xd4   :  { %v1233_v62 = vadd.f32 %v1188_v2, %v1127_v4  ;;  %v1234_v1 = vadd.f32 %v1190_v11, %v1128_v18  ;;  %v245_v24 = vrot.slane %v206_v45, 1  ;;  %v422_v0 = vmul.f32 %v3001_v37, %v98_v6 }
  0xd5   :  { %v571_v25 = vrot.slane %v3234_v14, 4  ;;  %v353_v27 = vrot.slane %v314_v23, 2  ;;  %v530_v28 = vmul.f32 %v3011_v39, %v98_v6  ;;  %v3246_v29 = vmul.f32 %v2991_v35, %v733_v21 }
  0xd6   :  { %v1256_v31 = vadd.f32 %v3074_v42, %v1233_v62  ;;  %v1257_v33 = vadd.f32 %v3074_v42, %v1234_v1  ;;  %v246_v34 = vsel %vm235_vm0, %v243_v60, %v245_v24  ;;  %v248_v40 = vsel %vm235_vm0, %v245_v24, %v247_v30  ;;  %v113_v1 = vpop.permute.xlu1 %112 }
  0xd7   :  { %v289_v44 = vadd.f32 %v246_v34, %v3098_v59  ;;  %v290_v46 = vadd.f32 %v248_v40, %v161_v22  ;;  %v354_v47 = vsel %vm343_vm1, %v351_v12, %v353_v27  ;;  %v356_v49 = vsel %vm343_vm1, %v353_v27, %v355_v61 }
  0xd8   :  { %v1272_v55 = vmax.f32 %v1256_v31, 0.0  ;;  %v1273_v56 = vmax.f32 %v1257_v33, 0.0  ;;  %v461_v54 = vrot.slane %v422_v0, 3  ;;  %v569_v57 = vrot.slane %v530_v28, 4 }
  0xd9   :  { %v397_v60 = vadd.f32 %v354_v47, %v289_v44  ;;  %v398_v7 = vadd.f32 %v356_v49, %v290_v46  ;;  %v3264_v6 = vmul.f32 %v3006_v38, %v733_v21  ;;  %v3267_v59 = vmul.f32 %v2996_v36, %v733_v21 }
  0xda   :  { %1288 = vst.msk [vmem:[#allocation2 + $0x90] sm:$0xff] %vm664_vm4, %v1272_v55  ;;  %1289 = vst.msk [vmem:[#allocation2 + $0x98] sm:$0xff] %vm664_vm4, %v1273_v56  ;;  %v462_v58 = vsel %vm451_vm2, %v459_v15, %v461_v54  ;;  %v464_v12 = vsel %vm451_vm2, %v461_v54, %v463_v3  ;;  %v570_v10 = vsel %vm559_vm3, %v567_v16, %v569_v57  ;;  %v875_v20 = vrot.slane %v3246_v29, 1 }
  0xdb   :  { %v505_v2 = vadd.f32 %v462_v58, %v397_v60  ;;  %v506_v11 = vadd.f32 %v464_v12, %v398_v7  ;;  %v572_v4 = vsel %vm559_vm3, %v569_v57, %v571_v25  ;;  %v3285_v63 = vmul.f32 %v3001_v37, %v733_v21 }
  0xdc   :  { %v981_v15 = vrot.slane %v3267_v59, 2  ;;  %v3289_v18 = vmul.f32 %v3011_v39, %v733_v21  ;;  %v835_v5 = vmul.f32 %v2991_v35, %v728_v9  ;;  %v941_v16 = vmul.f32 %v2996_v36, %v728_v9 }
  0xdd   :  { %v613_v45 = vadd.f32 %v570_v10, %v505_v2  ;;  %v614_v22 = vadd.f32 %v572_v4, %v506_v11  ;;  %v791_v23 = vmul.f32 %v3006_v38, %v728_v9  ;;  %v1047_v62 = vmul.f32 %v3001_v37, %v728_v9 }
  0xde   :  { %v1087_v24 = vrot.slane %v3285_v63, 3  ;;  %v873_v0 = vrot.slane %v835_v5, 1  ;;  %v979_v27 = vrot.slane %v941_v16, 2  ;;  %v1153_v28 = vmul.f32 %v3011_v39, %v728_v9  ;;  %v108_v9 = vpop.permute.xlu0 %107  ;;  %v743_v5 = vpop.permute.xlu1 %742 }
  0xdf   :  { %v636_v21 = vadd.f32 %v3074_v42, %v613_v45  ;;  %v637_v31 = vadd.f32 %v3074_v42, %v614_v22  ;;  %v1193_v33 = vrot.slane %v3289_v18, 4  ;;  %v1085_v34 = vrot.slane %v1047_v62, 3 }
  0xe0   :  { %v874_v40 = vsel %vm235_vm0, %v871_v50, %v873_v0  ;;  %v876_v44 = vsel %vm235_vm0, %v873_v0, %v875_v20  ;;  %v980_v46 = vsel %vm343_vm1, %v977_v52, %v979_v27  ;;  %v3310_v47 = vmul.f32 %v3006_v38, %v113_v1 }
  0xe1   :  { %v652_v49 = vmax.f32 %v636_v21, 0.0  ;;  %v653_v55 = vmax.f32 %v637_v31, 0.0  ;;  %v917_v56 = vadd.f32 %v874_v40, %v3162_v41  ;;  %v918_v54 = vadd.f32 %v876_v44, %v791_v23 }
  0xe2   :  { %v982_v43 = vsel %vm343_vm1, %v979_v27, %v981_v15  ;;  %v1086_v50 = vsel %vm451_vm2, %v1083_v13, %v1085_v34  ;;  %v1191_v57 = vrot.slane %v1153_v28, 4  ;;  %v3320_v48 = vmul.f32 %v2991_v35, %v113_v1 }
  0xe3   :  { %669 = vst.msk [vmem:[#allocation2 + $0x20] sm:$0xff] %vm664_vm4, %v652_v49  ;;  %670 = vst.msk [vmem:[#allocation2 + $0x28] sm:$0xff] %vm664_vm4, %v653_v55  ;;  %v1023_v52 = vadd.f32 %v980_v46, %v917_v56  ;;  %v1024_v60 = vadd.f32 %v982_v43, %v918_v54  ;;  %v3325_v41 = vmul.f32 %v2996_v36, %v113_v1 }
  0xe4   :  { %v3328_v7 = vmul.f32 %v3001_v37, %v113_v1  ;;  %v1088_v17 = vsel %vm451_vm2, %v1085_v34, %v1087_v24  ;;  %v1192_v13 = vsel %vm559_vm3, %v1189_v26, %v1191_v57  ;;  %v1194_v58 = vsel %vm559_vm3, %v1191_v57, %v1193_v33 }
  0xe5   :  { %v3340_v12 = vmul.f32 %v3011_v39, %v113_v1  ;;  %v1129_v10 = vadd.f32 %v1086_v50, %v1023_v52  ;;  %v1130_v2 = vadd.f32 %v1088_v17, %v1024_v60  ;;  %v251_v11 = vrot.slane %v3320_v48, 1  ;;  %v738_v52 = vpop.permute.xlu0 %737 }
  0xe6   :  { %v359_v4 = vrot.slane %v3325_v41, 2  ;;  %v467_v16 = vrot.slane %v3328_v7, 3  ;;  %v208_v26 = vmul.f32 %v2991_v35, %v108_v9  ;;  %v316_v45 = vmul.f32 %v2996_v36, %v108_v9 }
  0xe7   :  { %v575_v19 = vrot.slane %v3340_v12, 4  ;;  %v1235_v22 = vadd.f32 %v1192_v13, %v1129_v10  ;;  %v1236_v23 = vadd.f32 %v1194_v58, %v1130_v2  ;;  %v424_v62 = vmul.f32 %v3001_v37, %v108_v9 }
  0xe8   :  { %v532_v1 = vmul.f32 %v3011_v39, %v108_v9  ;;  %v163_v0 = vmul.f32 %v3006_v38, %v108_v9  ;;  %v249_v27 = vrot.slane %v208_v26, 1  ;;  %v357_v28 = vrot.slane %v316_v45, 2 }
  0xe9   :  { %v3352_v21 = vmul.f32 %v3006_v38, %v743_v5  ;;  %v1258_v31 = vadd.f32 %v3074_v42, %v1235_v22  ;;  %v1259_v34 = vadd.f32 %v3074_v42, %v1236_v23  ;;  %v465_v40 = vrot.slane %v424_v62, 3 }
  0xea   :  { %v573_v44 = vrot.slane %v532_v1, 4  ;;  %v250_v46 = vsel %vm235_vm0, %v247_v30, %v249_v27  ;;  %v252_v49 = vsel %vm235_vm0, %v249_v27, %v251_v11  ;;  %v358_v55 = vsel %vm343_vm1, %v355_v61, %v357_v28 }
  0xeb   :  { %v3366_v56 = vmul.f32 %v2991_v35, %v743_v5  ;;  %v1274_v54 = vmax.f32 %v1258_v31, 0.0  ;;  %v1275_v43 = vmax.f32 %v1259_v34, 0.0  ;;  %v291_v50 = vadd.f32 %v250_v46, %v3199_v32 }
  0xec   :  { %v292_v57 = vadd.f32 %v252_v49, %v163_v0  ;;  %v360_v53 = vsel %vm343_vm1, %v357_v28, %v359_v4  ;;  %v466_v30 = vsel %vm451_vm2, %v463_v3, %v465_v40  ;;  %v468_v8 = vsel %vm451_vm2, %v465_v40, %v467_v16  ;;  %v123_v40 = vpop.permute.xlu1 %122 }
  0xed   :  { %v574_v61 = vsel %vm559_vm3, %v571_v25, %v573_v44  ;;  %1290 = vst.msk [vmem:[#allocation2 + $0xa0] sm:$0xff] %vm664_vm4, %v1274_v54  ;;  %1291 = vst.msk [vmem:[#allocation2 + $0xa8] sm:$0xff] %vm664_vm4, %v1275_v43  ;;  %v399_v32 = vadd.f32 %v358_v55, %v291_v50  ;;  %v576_v51 = vsel %vm559_vm3, %v573_v44, %v575_v19  ;;  %v879_v9 = vrot.slane %v3366_v56, 1 }
  0xee   :  { %v400_v60 = vadd.f32 %v360_v53, %v292_v57  ;;  %v3387_v3 = vmul.f32 %v2996_v36, %v743_v5  ;;  %v3391_v17 = vmul.f32 %v3001_v37, %v743_v5  ;;  %v3394_v14 = vmul.f32 %v3011_v39, %v743_v5  ;;  %v118_v53 = vpop.permute.xlu0 %117 }
  0xef   :  { %v837_v25 = vmul.f32 %v2991_v35, %v738_v52  ;;  %v507_v13 = vadd.f32 %v466_v30, %v399_v32  ;;  %v793_v10 = vmul.f32 %v3006_v38, %v738_v52  ;;  %v943_v2 = vmul.f32 %v2996_v36, %v738_v52 }
  0xf0   :  { %v508_v58 = vadd.f32 %v468_v8, %v400_v60  ;;  %v985_v26 = vrot.slane %v3387_v3, 2  ;;  %v1091_v45 = vrot.slane %v3391_v17, 3  ;;  %v1049_v23 = vmul.f32 %v3001_v37, %v738_v52 }
  0xf1   :  { %v877_v22 = vrot.slane %v837_v25, 1  ;;  %v615_v62 = vadd.f32 %v574_v61, %v507_v13  ;;  %v1197_v5 = vrot.slane %v3394_v14, 4  ;;  %v983_v0 = vrot.slane %v943_v2, 2 }
  0xf2   :  { %v616_v1 = vadd.f32 %v576_v51, %v508_v58  ;;  %v1089_v31 = vrot.slane %v1049_v23, 3  ;;  %v1155_v34 = vmul.f32 %v3011_v39, %v738_v52  ;;  %v3429_v30 = vmul.f32 %v2996_v36, %v123_v40  ;;  %v753_v58 = vpop.permute.xlu1 %752  ;;  %v748_v41 = vpop.permute.xlu0 %747 }
  0xf3   :  { %v878_v27 = vsel %vm235_vm0, %v875_v20, %v877_v22  ;;  %v880_v28 = vsel %vm235_vm0, %v877_v22, %v879_v9  ;;  %v638_v44 = vadd.f32 %v3074_v42, %v615_v62  ;;  %v984_v29 = vsel %vm343_vm1, %v981_v15, %v983_v0 }
  0xf4   :  { %v639_v46 = vadd.f32 %v3074_v42, %v616_v1  ;;  %v919_v49 = vadd.f32 %v878_v27, %v3264_v6  ;;  %v920_v55 = vadd.f32 %v880_v28, %v793_v10  ;;  %v986_v20 = vsel %vm343_vm1, %v983_v0, %v985_v26 }
  0xf5   :  { %v1090_v54 = vsel %vm451_vm2, %v1087_v24, %v1089_v31  ;;  %v1092_v43 = vsel %vm451_vm2, %v1089_v31, %v1091_v45  ;;  %v654_v50 = vmax.f32 %v638_v44, 0.0  ;;  %v1195_v59 = vrot.slane %v1155_v34, 4 }
  0xf6   :  { %v655_v57 = vmax.f32 %v639_v46, 0.0  ;;  %v1025_v6 = vadd.f32 %v984_v29, %v919_v49  ;;  %v1026_v52 = vadd.f32 %v986_v20, %v920_v55  ;;  %v3426_v15 = vmul.f32 %v2991_v35, %v123_v40 }
  0xf7   :  { %v3432_v63 = vmul.f32 %v3001_v37, %v123_v40  ;;  %671 = vst.msk [vmem:[#allocation2 + $0x30] sm:$0xff] %vm664_vm4, %v654_v50  ;;  %v3437_v61 = vmul.f32 %v3006_v38, %v123_v40  ;;  %v3440_v32 = vmul.f32 %v3011_v39, %v123_v40  ;;  %v1196_v60 = vsel %vm559_vm3, %v1193_v33, %v1195_v59 }
  0xf8   :  { %672 = vst.msk [vmem:[#allocation2 + $0x38] sm:$0xff] %vm664_vm4, %v655_v57  ;;  %v1131_v24 = vadd.f32 %v1090_v54, %v1025_v6  ;;  %v1132_v8 = vadd.f32 %v1092_v43, %v1026_v52  ;;  %v1198_v51 = vsel %vm559_vm3, %v1195_v59, %v1197_v5  ;;  %v255_v25 = vrot.slane %v3426_v15, 1 }
  0xf9   :  { %v165_v13 = vmul.f32 %v3006_v38, %v118_v53  ;;  %v363_v22 = vrot.slane %v3429_v30, 2  ;;  %v471_v23 = vrot.slane %v3432_v63, 3  ;;  %v210_v62 = vmul.f32 %v2991_v35, %v118_v53 }
  0xfa   :  { %v1237_v10 = vadd.f32 %v1196_v60, %v1131_v24  ;;  %v1238_v2 = vadd.f32 %v1198_v51, %v1132_v8  ;;  %v318_v18 = vmul.f32 %v2996_v36, %v118_v53  ;;  %v426_v33 = vmul.f32 %v3001_v37, %v118_v53 }
  0xfb   :  { %v534_v1 = vmul.f32 %v3011_v39, %v118_v53  ;;  %v579_v28 = vrot.slane %v3440_v32, 4  ;;  %v3460_v31 = vmul.f32 %v2991_v35, %v753_v58  ;;  %v253_v34 = vrot.slane %v210_v62, 1 }
  0xfc   :  { %v1260_v0 = vadd.f32 %v3074_v42, %v1237_v10  ;;  %v1261_v27 = vadd.f32 %v3074_v42, %v1238_v2  ;;  %v361_v40 = vrot.slane %v318_v18, 2  ;;  %v469_v44 = vrot.slane %v426_v33, 3  ;;  %v1334_v10 = vld [vmem:[#allocation2 + $0x1] ss:$2 sm:$0xff] }
  0xfd   :  { %v577_v46 = vrot.slane %v534_v1, 4  ;;  %v3463_v29 = vmul.f32 %v3006_v38, %v753_v58  ;;  %v3466_v20 = vmul.f32 %v2996_v36, %v753_v58  ;;  %v254_v54 = vsel %vm235_vm0, %v251_v11, %v253_v34  ;;  %v1304_v1 = vld [vmem:[#allocation2 + $0x10] ss:$2 sm:$0xff] }
  0xfe   :  { %v1276_v49 = vmax.f32 %v1260_v0, 0.0  ;;  %v1277_v55 = vmax.f32 %v1261_v27, 0.0  ;;  %v256_v43 = vsel %vm235_vm0, %v253_v34, %v255_v25  ;;  %v362_v50 = vsel %vm343_vm1, %v359_v4, %v361_v40 }
  0xff   :  { %v883_v57 = vrot.slane %v3460_v31, 1  ;;  %v293_v6 = vadd.f32 %v254_v54, %v3310_v47  ;;  %v294_v52 = vadd.f32 %v256_v43, %v165_v13  ;;  %v364_v48 = vsel %vm343_vm1, %v361_v40, %v363_v22  ;;  %v1302_v13 = vld [vmem:[#allocation2] ss:$2 sm:$0xff]  ;;  %v1352_v31 = vld [vmem:[#allocation2 + $0x91] ss:$2 sm:$0xff] }
 0x100   :  { %1292 = vst.msk [vmem:[#allocation2 + $0xb0] sm:$0xff] %vm664_vm4, %v1276_v49  ;;  %1293 = vst.msk [vmem:[#allocation2 + $0xb8] sm:$0xff] %vm664_vm4, %v1277_v55  ;;  %v470_v11 = vsel %vm451_vm2, %v467_v16, %v469_v44  ;;  %v472_v4 = vsel %vm451_vm2, %v469_v44, %v471_v23  ;;  %v578_v53 = vsel %vm559_vm3, %v575_v19, %v577_v46  ;;  %v989_v16 = vrot.slane %v3466_v20, 2 }
 0x101   :  { %v580_v47 = vsel %vm559_vm3, %v577_v46, %v579_v28  ;;  %v3497_v59 = vmul.f32 %v3001_v37, %v753_v58  ;;  %v401_v24 = vadd.f32 %v362_v50, %v293_v6  ;;  %v402_v7 = vadd.f32 %v364_v48, %v294_v52 }
 0x102   :  { %v3501_v8 = vmul.f32 %v3011_v39, %v753_v58  ;;  %v795_v60 = vmul.f32 %v3006_v38, %v748_v41  ;;  %v839_v12 = vmul.f32 %v2991_v35, %v748_v41  ;;  %v945_v19 = vmul.f32 %v2996_v36, %v748_v41  ;;  %v1336_v58 = vld [vmem:[#allocation2 + $0x11] ss:$2 sm:$0xff] }
 0x103   :  { %v1051_v51 = vmul.f32 %v3001_v37, %v748_v41  ;;  %v509_v2 = vadd.f32 %v470_v11, %v401_v24  ;;  %v510_v62 = vadd.f32 %v472_v4, %v402_v7  ;;  %v1095_v18 = vrot.slane %v3497_v59, 3  ;;  %v133_v4 = vpop.permute.xlu1 %132 }
 0x104   :  { %v1157_v33 = vmul.f32 %v3011_v39, %v748_v41  ;;  %v1201_v0 = vrot.slane %v3501_v8, 4  ;;  %v881_v27 = vrot.slane %v839_v12, 1  ;;  %v987_v34 = vrot.slane %v945_v19, 2 }
 0x105   :  { %v1093_v40 = vrot.slane %v1051_v51, 3  ;;  %v617_v44 = vadd.f32 %v578_v53, %v509_v2  ;;  %v618_v46 = vadd.f32 %v580_v47, %v510_v62  ;;  %v1365_v55 = vmax.f32 %v1302_v13, %v1334_v10  ;;  %v128_v62 = vpop.permute.xlu0 %127 }
 0x106   :  { %v1199_v49 = vrot.slane %v1157_v33, 4  ;;  %v882_v54 = vsel %vm235_vm0, %v879_v9, %v881_v27  ;;  %v884_v43 = vsel %vm235_vm0, %v881_v27, %v883_v57  ;;  %v988_v50 = vsel %vm343_vm1, %v985_v26, %v987_v34 }
 0x107   :  { %v1366_v6 = vmax.f32 %v1304_v1, %v1336_v58  ;;  %v640_v52 = vadd.f32 %v3074_v42, %v617_v44  ;;  %v641_v48 = vadd.f32 %v3074_v42, %v618_v46  ;;  %v921_v11 = vadd.f32 %v882_v54, %v3352_v21 }
 0x108   :  { %v922_v41 = vadd.f32 %v884_v43, %v795_v60  ;;  %v990_v56 = vsel %vm343_vm1, %v987_v34, %v989_v16  ;;  %v1094_v9 = vsel %vm451_vm2, %v1091_v45, %v1093_v40  ;;  %v1096_v3 = vsel %vm451_vm2, %v1093_v40, %v1095_v18 }
 0x109   :  { %v1200_v26 = vsel %vm559_vm3, %v1197_v5, %v1199_v49  ;;  %v656_v53 = vmax.f32 %v640_v52, 0.0  ;;  %v657_v21 = vmax.f32 %v641_v48, 0.0  ;;  %v1027_v47 = vadd.f32 %v988_v50, %v921_v11 }
 0x10a   :  { %v1028_v24 = vadd.f32 %v990_v56, %v922_v41  ;;  %v1202_v7 = vsel %vm559_vm3, %v1199_v49, %v1201_v0  ;;  %v1390_v60 = vrot.slane %v1365_v55, 7  ;;  %v3537_v17 = vrot.slane %v1366_v6, 7  ;;  %v763_v49 = vpop.permute.xlu1 %762 }
 0x10b   :  { %v3540_v45 = vmul.f32 %v2991_v35, %v133_v4  ;;  %673 = vst.msk [vmem:[#allocation2 + $0x40] sm:$0xff] %vm664_vm4, %v656_v53  ;;  %674 = vst.msk [vmem:[#allocation2 + $0x48] sm:$0xff] %vm664_vm4, %v657_v21  ;;  %v1133_v14 = vadd.f32 %v1094_v9, %v1027_v47  ;;  %v3545_v12 = vmul.f32 %v2996_v36, %v133_v4 }
 0x10c   :  { %v1134_v5 = vadd.f32 %v1096_v3, %v1028_v24  ;;  %v3548_v19 = vmul.f32 %v3001_v37, %v133_v4  ;;  %v3552_v51 = vsel %vm1389_vm5, %v1390_v60, %v3537_v17  ;;  %v3555_v13 = vsel %vm1389_vm5, 0.0, %v1390_v60 }
 0x10d   :  { %v3558_v10 = vmul.f32 %v3006_v38, %v133_v4  ;;  %v3561_v2 = vmul.f32 %v3011_v39, %v133_v4  ;;  %v1239_v33 = vadd.f32 %v1200_v26, %v1133_v14  ;;  %v1418_v58 = vrot.slane %v3555_v13, 1 }
 0x10e   :  { %v1240_v1 = vadd.f32 %v1202_v7, %v1134_v5  ;;  %v1419_v27 = vrot.slane %v3552_v51, 1  ;;  %v259_v34 = vrot.slane %v3540_v45, 1  ;;  %v367_v40 = vrot.slane %v3545_v12, 2 }
 0x10f   :  { %v475_v44 = vrot.slane %v3548_v19, 3  ;;  %v583_v46 = vrot.slane %v3561_v2, 4  ;;  %v1262_v55 = vadd.f32 %v3074_v42, %v1239_v33  ;;  %v212_v50 = vmul.f32 %v2991_v35, %v128_v62 }
 0x110   :  { %v1263_v54 = vadd.f32 %v3074_v42, %v1240_v1  ;;  %v1420_v43 = vsel %vm235_vm0, %v1418_v58, %v1419_v27  ;;  %v167_v6 = vmul.f32 %v3006_v38, %v128_v62  ;;  %v320_v52 = vmul.f32 %v2996_v36, %v128_v62 }
 0x111   :  { %1435 = vrot.lane.b32.xlu0 %v1420_v43, %s2819_s8  ;;  %v428_v48 = vmul.f32 %v3001_v37, %v128_v62  ;;  %v536_v11 = vmul.f32 %v3011_v39, %v128_v62  ;;  %v1278_v41 = vmax.f32 %v1262_v55, 0.0  ;;  %v257_v56 = vrot.slane %v212_v50, 1 }
 0x112   :  { %v1279_v4 = vmax.f32 %v1263_v54, 0.0  ;;  %v3581_v9 = vmul.f32 %v2991_v35, %v763_v49  ;;  %v365_v3 = vrot.slane %v320_v52, 2  ;;  %v3584_v21 = vmul.f32 %v2996_v36, %v763_v49  ;;  %v1318_v52 = vld [vmem:[#allocation2 + $0x80] ss:$2 sm:$0xff] }
 0x113   :  { %v473_v26 = vrot.slane %v428_v48, 3  ;;  %v581_v53 = vrot.slane %v536_v11, 4  ;;  %1294 = vst.msk [vmem:[#allocation2 + $0xc0] sm:$0xff] %vm664_vm4, %v1278_v41  ;;  %v258_v47 = vsel %vm235_vm0, %v255_v25, %v257_v56  ;;  %v260_v24 = vsel %vm235_vm0, %v257_v56, %v259_v34  ;;  %v758_v25 = vpop.permute.xlu0 %757  ;;  %v1350_v48 = vld [vmem:[#allocation2 + $0x81] ss:$2 sm:$0xff] }
 0x114   :  { %1295 = vst.msk [vmem:[#allocation2 + $0xc8] sm:$0xff] %vm664_vm4, %v1279_v4  ;;  %v3595_v7 = vmul.f32 %v3006_v38, %v763_v49  ;;  %v3598_v60 = vmul.f32 %v3001_v37, %v763_v49  ;;  %v295_v14 = vadd.f32 %v258_v47, %v3437_v61  ;;  %v296_v5 = vadd.f32 %v260_v24, %v167_v6  ;;  %v3633_v41 = vld [vmem:[%s4343_s1] ss:$0 sm:$0xff] }
 0x115   :  { %v366_v62 = vsel %vm343_vm1, %v363_v22, %v365_v3  ;;  %v887_v15 = vrot.slane %v3581_v9, 1  ;;  %v368_v33 = vsel %vm343_vm1, %v365_v3, %v367_v40  ;;  %v474_v38 = vsel %vm451_vm2, %v471_v23, %v473_v26 }
 0x116   :  { %v476_v61 = vsel %vm451_vm2, %v473_v26, %v475_v44  ;;  %v582_v30 = vsel %vm559_vm3, %v579_v28, %v581_v53  ;;  %v403_v22 = vadd.f32 %v366_v62, %v295_v14  ;;  %v404_v1 = vadd.f32 %v368_v33, %v296_v5  ;;  %v143_v33 = vpop.permute.xlu1 %142 }
 0x117   :  { %v584_v58 = vsel %vm559_vm3, %v581_v53, %v583_v46  ;;  %v993_v55 = vrot.slane %v3584_v21, 2  ;;  %v1099_v63 = vrot.slane %v3598_v60, 3  ;;  %v3623_v23 = vmul.f32 %v3011_v39, %v763_v49 }
 0x118   :  { %v841_v54 = vmul.f32 %v2991_v35, %v758_v25  ;;  %v947_v43 = vmul.f32 %v2996_v36, %v758_v25  ;;  %v511_v32 = vadd.f32 %v474_v38, %v403_v22  ;;  %v512_v50 = vadd.f32 %v476_v61, %v404_v1 }
 0x119   :  { %v1053_v28 = vmul.f32 %v3001_v37, %v758_v25  ;;  %v1159_v6 = vmul.f32 %v3011_v39, %v758_v25  ;;  %v1205_v11 = vrot.slane %v3623_v23, 4  ;;  %v797_v49 = vmul.f32 %v3633_v41, %v758_v25  ;;  %v1320_v25 = vld [vmem:[#allocation2 + $0x90] ss:$2 sm:$0xff] }
 0x11a   :  { %v885_v35 = vrot.slane %v841_v54, 1  ;;  %v991_v4 = vrot.slane %v947_v43, 2  ;;  %v619_v36 = vadd.f32 %v582_v30, %v511_v32  ;;  %v620_v56 = vadd.f32 %v584_v58, %v512_v50  ;;  %v3676_v43 = vld [vmem:[%s4343_s1 + $0x2] ss:$0 sm:$0xff]  ;;  %v3684_v50 = vld [vmem:[%s4343_s1 + $0x3] ss:$0 sm:$0xff] }
 0x11b   :  { %v1097_v3 = vrot.slane %v1053_v28, 3  ;;  %v1203_v26 = vrot.slane %v1159_v6, 4  ;;  %v1373_v47 = vmax.f32 %v1318_v52, %v1350_v48  ;;  %v1374_v58 = vmax.f32 %v1320_v25, %v1352_v31 }
 0x11c   :  { %v886_v37 = vsel %vm235_vm0, %v883_v57, %v885_v35  ;;  %v888_v39 = vsel %vm235_vm0, %v885_v35, %v887_v15  ;;  %v992_v53 = vsel %vm343_vm1, %v989_v16, %v991_v4  ;;  %v642_v24 = vadd.f32 %v3074_v42, %v619_v36 }
 0x11d   :  { %v643_v14 = vadd.f32 %v3074_v42, %v620_v56  ;;  %v923_v5 = vadd.f32 %v886_v37, %v3463_v29  ;;  %v924_v62 = vadd.f32 %v888_v39, %v797_v49  ;;  %v994_v57 = vsel %vm343_vm1, %v991_v4, %v993_v55  ;;  %v3700_v49 = vld [vmem:[%s4343_s1 + $0x4] ss:$0 sm:$0xff]  ;;  %v138_v4 = vpop.permute.xlu0 %137 }
 0x11e   :  { %v1098_v20 = vsel %vm451_vm2, %v1095_v18, %v1097_v3  ;;  %v1100_v16 = vsel %vm451_vm2, %v1097_v3, %v1099_v63  ;;  %v1204_v29 = vsel %vm559_vm3, %v1201_v0, %v1203_v26  ;;  %v658_v38 = vmax.f32 %v642_v24, 0.0  ;;  %v3666_v18 = vld [vmem:[%s4343_s1 + $0x1] ss:$0 sm:$0xff]  ;;  %s2820_s1 = smov 64  }
 0x11f   :  { %v659_v61 = vmax.f32 %v643_v14, 0.0  ;;  %v1029_v30 = vadd.f32 %v992_v53, %v923_v5  ;;  %v1030_v22 = vadd.f32 %v994_v57, %v924_v62  ;;  %v1206_v1 = vsel %vm559_vm3, %v1203_v26, %v1205_v11 }
 0x120   :  { %v1690_v59 = vrot.slane %v1373_v47, 7  ;;  %v3669_v54 = vmul.f32 %v3666_v18, %v143_v33  ;;  %675 = vst.msk [vmem:[#allocation2 + $0x50] sm:$0xff] %vm664_vm4, %v658_v38  ;;  %v3679_v32 = vmul.f32 %v3676_v43, %v143_v33  ;;  %v3687_v28 = vmul.f32 %v3684_v50, %v143_v33 }
 0x121   :  { %676 = vst.msk [vmem:[#allocation2 + $0x58] sm:$0xff] %vm664_vm4, %v659_v61  ;;  %v1135_v8 = vadd.f32 %v1098_v20, %v1029_v30  ;;  %v1136_v0 = vadd.f32 %v1100_v16, %v1030_v22  ;;  %v3689_v6 = vrot.slane %v1374_v58, 7  ;;  %v3695_v48 = vmul.f32 %v3633_v41, %v143_v33  ;;  %v1306_v20 = vld [vmem:[#allocation2 + $0x20] ss:$2 sm:$0xff]  ;;  %v1338_v16 = vld [vmem:[#allocation2 + $0x21] ss:$2 sm:$0xff] }
 0x122   :  { %v3692_v52 = vsel %vm1389_vm5, 0.0, %v1690_v59  ;;  %v3703_v35 = vmul.f32 %v3700_v49, %v143_v33  ;;  %v263_v26 = vrot.slane %v3669_v54, 1  ;;  %v371_v39 = vrot.slane %v3679_v32, 2 }
 0x123   :  { %v1241_v36 = vadd.f32 %v1204_v29, %v1135_v8  ;;  %v1242_v56 = vadd.f32 %v1206_v1, %v1136_v0  ;;  %v1718_v3 = vrot.slane %v3692_v52, 1  ;;  %v3709_v37 = vsel %vm1389_vm5, %v1690_v59, %v3689_v6 }
 0x124   :  { %v479_v53 = vrot.slane %v3687_v28, 3  ;;  %v587_v47 = vrot.slane %v3703_v35, 4  ;;  %v1719_v5 = vrot.slane %v3709_v37, 1  ;;  %v214_v62 = vmul.f32 %v3666_v18, %v138_v4 }
 0x125   :  { %v1264_v24 = vadd.f32 %v3074_v42, %v1241_v36  ;;  %v1265_v14 = vadd.f32 %v3074_v42, %v1242_v56  ;;  %v169_v25 = vmul.f32 %v3633_v41, %v138_v4  ;;  %v322_v31 = vmul.f32 %v3676_v43, %v138_v4 }
 0x126   :  { %v430_v33 = vmul.f32 %v3684_v50, %v138_v4  ;;  %v538_v57 = vmul.f32 %v3700_v49, %v138_v4  ;;  %v1720_v42 = vsel %vm235_vm0, %v1718_v3, %v1719_v5  ;;  %v261_v61 = vrot.slane %v214_v62, 1 }
 0x127   :  { %v1280_v29 = vmax.f32 %v1264_v24, 0.0  ;;  %v1281_v38 = vmax.f32 %v1265_v14, 0.0  ;;  %1735 = vrot.lane.b32.xlu1 %v1720_v42, %s2819_s8  ;;  %v369_v30 = vrot.slane %v322_v31, 2  ;;  %v1460_v58 = vrot.slane %v3552_v51, 2  ;;  %v3743_v24 = vpop.permute.xlu1 %772 }
 0x128   :  { %v477_v22 = vrot.slane %v430_v33, 3  ;;  %v585_v1 = vrot.slane %v538_v57, 4  ;;  %v262_v59 = vsel %vm235_vm0, %v259_v34, %v261_v61  ;;  %v264_v8 = vsel %vm235_vm0, %v261_v61, %v263_v26 }
 0x129   :  { %1296 = vst.msk [vmem:[#allocation2 + $0xd0] sm:$0xff] %vm664_vm4, %v1280_v29  ;;  %1297 = vst.msk [vmem:[#allocation2 + $0xd8] sm:$0xff] %vm664_vm4, %v1281_v38  ;;  %v1459_v0 = vrot.slane %v3555_v13, 2  ;;  %v1367_v4 = vmax.f32 %v1306_v20, %v1338_v16  ;;  %v297_v36 = vadd.f32 %v262_v59, %v3558_v10  ;;  %v298_v56 = vadd.f32 %v264_v8, %v169_v25 }
 0x12a   :  { %v370_v3 = vsel %vm343_vm1, %v367_v40, %v369_v30  ;;  %v372_v45 = vsel %vm343_vm1, %v369_v30, %v371_v39  ;;  %v478_v34 = vsel %vm451_vm2, %v475_v44, %v477_v22  ;;  %v480_v14 = vsel %vm451_vm2, %v477_v22, %v479_v53  ;;  %v768_v40 = vpop.permute.xlu0 %767 }
 0x12b   :  { %v586_v12 = vsel %vm559_vm3, %v583_v46, %v585_v1  ;;  %v588_v10 = vsel %vm559_vm3, %v585_v1, %v587_v47  ;;  %v405_v62 = vadd.f32 %v370_v3, %v297_v36  ;;  %v406_v25 = vadd.f32 %v372_v45, %v298_v56  ;;  %v3802_v56 = vld [vmem:[%s4344_s2] ss:$0 sm:$0xff]  ;;  %v193_v9 = vpop.permute.xlu1 %192 }
 0x12c   :  { %v1461_v19 = vsel %vm343_vm1, %v1459_v0, %v1460_v58  ;;  %v3760_v44 = vrot.slane %v1367_v4, 7  ;;  %v3765_v2 = vmul.f32 %v3666_v18, %v3743_v24  ;;  %v3769_v46 = vmul.f32 %v3676_v43, %v3743_v24 }
 0x12d   :  { %1476 = vrot.lane.b32.xlu1 %v1461_v19, %s2820_s1  ;;  %v3773_v31 = vmul.f32 %v3684_v50, %v3743_v24  ;;  %v3777_v33 = vmul.f32 %v3700_v49, %v3743_v24  ;;  %v513_v57 = vadd.f32 %v478_v34, %v405_v62  ;;  %v514_v20 = vadd.f32 %v480_v14, %v406_v25 }
 0x12e   :  { %v3782_v16 = vsel %vm1389_vm5, %v3537_v17, %v3760_v44  ;;  %v799_v29 = vmul.f32 %v3633_v41, %v768_v40  ;;  %v891_v42 = vrot.slane %v3765_v2, 1  ;;  %v997_v61 = vrot.slane %v3769_v46, 2 }
 0x12f   :  { %v1421_v38 = vrot.slane %v3782_v16, 1  ;;  %v1103_v30 = vrot.slane %v3773_v31, 3  ;;  %v621_v22 = vadd.f32 %v586_v12, %v513_v57  ;;  %v622_v1 = vadd.f32 %v588_v10, %v514_v20  ;;  %v1322_v20 = vld [vmem:[#allocation2 + $0xa0] ss:$2 sm:$0xff] }
 0x130   :  { %v1209_v59 = vrot.slane %v3777_v33, 4  ;;  %v843_v8 = vmul.f32 %v3666_v18, %v768_v40  ;;  %v949_v0 = vmul.f32 %v3676_v43, %v768_v40  ;;  %v1055_v4 = vmul.f32 %v3684_v50, %v768_v40 }
 0x131   :  { %v1422_v17 = vsel %vm235_vm0, %v1419_v27, %v1421_v38  ;;  %v1161_v36 = vmul.f32 %v3700_v49, %v768_v40  ;;  %v644_v3 = vadd.f32 %v3802_v56, %v621_v22  ;;  %v645_v45 = vadd.f32 %v3802_v56, %v622_v1  ;;  %v1354_v22 = vld [vmem:[#allocation2 + $0xa1] ss:$2 sm:$0xff] }
 0x132   :  { %1437 = vrot.lane.b32.xlu0 %v1422_v17, %s2819_s8  ;;  %v889_v34 = vrot.slane %v843_v8, 1  ;;  %v1759_v27 = vrot.slane %v3692_v52, 2  ;;  %v995_v14 = vrot.slane %v949_v0, 2  ;;  %v1101_v12 = vrot.slane %v1055_v4, 3 }
 0x133   :  { %v1207_v10 = vrot.slane %v1161_v36, 4  ;;  %v1760_v62 = vrot.slane %v3709_v37, 2  ;;  %v660_v40 = vmax.f32 %v644_v3, 0.0  ;;  %v661_v25 = vmax.f32 %v645_v45, 0.0 }
 0x134   :  { %v890_v19 = vsel %vm235_vm0, %v887_v15, %v889_v34  ;;  %v892_v57 = vsel %vm235_vm0, %v889_v34, %v891_v42  ;;  %v996_v17 = vsel %vm343_vm1, %v993_v55, %v995_v14  ;;  %v998_v0 = vsel %vm343_vm1, %v995_v14, %v997_v61 }
 0x135   :  { %v925_v1 = vadd.f32 %v890_v19, %v3595_v7  ;;  %v926_v8 = vadd.f32 %v892_v57, %v799_v29  ;;  %677 = vst.msk [vmem:[#allocation2 + $0x60] sm:$0xff] %vm664_vm4, %v660_v40  ;;  %678 = vst.msk [vmem:[#allocation2 + $0x68] sm:$0xff] %vm664_vm4, %v661_v25  ;;  %v1102_v15 = vsel %vm451_vm2, %v1099_v63, %v1101_v12  ;;  %v148_v29 = vpop.permute.xlu0 %147 }
 0x136   :  { %v1104_v7 = vsel %vm451_vm2, %v1101_v12, %v1103_v30  ;;  %v1208_v21 = vsel %vm559_vm3, %v1205_v11, %v1207_v10  ;;  %v1210_v55 = vsel %vm559_vm3, %v1207_v10, %v1209_v59  ;;  %v1761_v60 = vsel %vm343_vm1, %v1759_v27, %v1760_v62 }
 0x137   :  { %v1031_v4 = vadd.f32 %v996_v17, %v925_v1  ;;  %v1032_v36 = vadd.f32 %v998_v0, %v926_v8  ;;  %v1375_v63 = vmax.f32 %v1322_v20, %v1354_v22  ;;  %1776 = vrot.lane.b32.xlu1 %v1761_v60, %s2820_s1  ;;  %v217_v3 = vmul.f32 %v3666_v18, %v193_v9 }
 0x138   :  { %v325_v23 = vmul.f32 %v3676_v43, %v193_v9  ;;  %v433_v11 = vmul.f32 %v3684_v50, %v193_v9  ;;  %v541_v45 = vmul.f32 %v3700_v49, %v193_v9  ;;  %v171_v10 = vmul.f32 %v3633_v41, %v148_v29 }
 0x139   :  { %v1137_v34 = vadd.f32 %v1102_v15, %v1031_v4  ;;  %v1138_v14 = vadd.f32 %v1104_v7, %v1032_v36  ;;  %v3844_v12 = vrot.slane %v1375_v63, 7  ;;  %v267_v40 = vrot.slane %v217_v3, 1 }
 0x13a   :  { %v375_v25 = vrot.slane %v325_v23, 2  ;;  %v483_v27 = vrot.slane %v433_v11, 3  ;;  %v591_v19 = vrot.slane %v541_v45, 4  ;;  %v216_v1 = vmul.f32 %v3666_v18, %v148_v29 }
 0x13b   :  { %v1243_v57 = vadd.f32 %v1208_v21, %v1137_v34  ;;  %v1244_v20 = vadd.f32 %v1210_v55, %v1138_v14  ;;  %v3850_v22 = vsel %vm1389_vm5, %v3689_v6, %v3844_v12  ;;  %v324_v17 = vmul.f32 %v3676_v43, %v148_v29  ;;  %v822_v14 = vpop.permute.xlu1 %821 }
 0x13c   :  { %v1721_v8 = vrot.slane %v3850_v22, 1  ;;  %v432_v0 = vmul.f32 %v3684_v50, %v148_v29  ;;  %v540_v9 = vmul.f32 %v3700_v49, %v148_v29  ;;  %v265_v21 = vrot.slane %v216_v1, 1 }
 0x13d   :  { %v1266_v15 = vadd.f32 %v3802_v56, %v1243_v57  ;;  %v1267_v7 = vadd.f32 %v3802_v56, %v1244_v20  ;;  %v1762_v55 = vrot.slane %v3850_v22, 2  ;;  %v373_v4 = vrot.slane %v324_v17, 2  ;;  %v1324_v17 = vld [vmem:[#allocation2 + $0xb0] ss:$2 sm:$0xff] }
 0x13e   :  { %v1722_v6 = vsel %vm235_vm0, %v1719_v5, %v1721_v8  ;;  %v481_v36 = vrot.slane %v432_v0, 3  ;;  %v589_v60 = vrot.slane %v540_v9, 4  ;;  %v266_v29 = vsel %vm235_vm0, %v263_v26, %v265_v21  ;;  %v1356_v0 = vld [vmem:[#allocation2 + $0xb1] ss:$2 sm:$0xff] }
 0x13f   :  { %v1282_v63 = vmax.f32 %v1266_v15, 0.0  ;;  %v1283_v3 = vmax.f32 %v1267_v7, 0.0  ;;  %1737 = vrot.lane.b32.xlu0 %v1722_v6, %s2819_s8  ;;  %v268_v23 = vsel %vm235_vm0, %v265_v21, %v267_v40  ;;  %v800_v11 = vmul.f32 %v3633_v41, %v3743_v24 }
 0x140   :  { %v299_v45 = vadd.f32 %v266_v29, %v3695_v48  ;;  %v300_v34 = vadd.f32 %v268_v23, %v171_v10  ;;  %v374_v5 = vsel %vm343_vm1, %v371_v39, %v373_v4  ;;  %v376_v54 = vsel %vm343_vm1, %v373_v4, %v375_v25  ;;  %v778_v25 = vpop.permute.xlu0 %777 }
 0x141   :  { %1298 = vst.msk [vmem:[#allocation2 + $0xe0] sm:$0xff] %vm664_vm4, %v1282_v63  ;;  %1299 = vst.msk [vmem:[#allocation2 + $0xe8] sm:$0xff] %vm664_vm4, %v1283_v3  ;;  %v482_v26 = vsel %vm451_vm2, %v479_v53, %v481_v36  ;;  %v484_v24 = vsel %vm451_vm2, %v481_v36, %v483_v27  ;;  %v590_v48 = vsel %vm559_vm3, %v587_v47, %v589_v60  ;;  %v1462_v40 = vrot.slane %v3782_v16, 2  ;;  %v1308_v27 = vld [vmem:[#allocation2 + $0x30] ss:$2 sm:$0xff] }
 0x142   :  { %v407_v32 = vadd.f32 %v374_v5, %v299_v45  ;;  %v408_v10 = vadd.f32 %v376_v54, %v300_v34  ;;  %v1763_v39 = vsel %vm343_vm1, %v1760_v62, %v1762_v55  ;;  %v592_v28 = vsel %vm559_vm3, %v589_v60, %v591_v19  ;;  %v1340_v19 = vld [vmem:[#allocation2 + $0x31] ss:$2 sm:$0xff] }
 0x143   :  { %1778 = vrot.lane.b32.xlu1 %v1763_v39, %s2820_s1  ;;  %v846_v53 = vmul.f32 %v3666_v18, %v822_v14  ;;  %v952_v35 = vmul.f32 %v3676_v43, %v822_v14  ;;  %v1058_v47 = vmul.f32 %v3684_v50, %v822_v14  ;;  %v1463_v62 = vsel %vm343_vm1, %v1460_v58, %v1462_v40  ;;  %v1342_v39 = vld [vmem:[#allocation2 + $0x41] ss:$2 sm:$0xff] }
 0x144   :  { %v515_v57 = vadd.f32 %v482_v26, %v407_v32  ;;  %v516_v20 = vadd.f32 %v484_v24, %v408_v10  ;;  %v1164_v1 = vmul.f32 %v3700_v49, %v822_v14  ;;  %1478 = vrot.lane.b32.xlu0 %v1463_v62, %s2820_s1  ;;  %v801_v21 = vmul.f32 %v3633_v41, %v778_v25  ;;  %v1310_v10 = vld [vmem:[#allocation2 + $0x40] ss:$2 sm:$0xff] }
 0x145   :  { %v895_v9 = vrot.slane %v846_v53, 1  ;;  %v1001_v15 = vrot.slane %v952_v35, 2  ;;  %v1107_v7 = vrot.slane %v1058_v47, 3  ;;  %v845_v36 = vmul.f32 %v3666_v18, %v778_v25  ;;  %v1358_v53 = vld [vmem:[#allocation2 + $0xc1] ss:$2 sm:$0xff] }
 0x146   :  { %v623_v6 = vadd.f32 %v590_v48, %v515_v57  ;;  %v624_v4 = vadd.f32 %v592_v28, %v516_v20  ;;  %v951_v60 = vmul.f32 %v3676_v43, %v778_v25  ;;  %v1057_v58 = vmul.f32 %v3684_v50, %v778_v25  ;;  %v1312_v20 = vld [vmem:[#allocation2 + $0x50] ss:$2 sm:$0xff] }
 0x147   :  { %v1163_v63 = vmul.f32 %v3700_v49, %v778_v25  ;;  %v1368_v3 = vmax.f32 %v1308_v27, %v1340_v19  ;;  %v1376_v29 = vmax.f32 %v1324_v17, %v1356_v0  ;;  %v893_v34 = vrot.slane %v845_v36, 1  ;;  %v1344_v17 = vld [vmem:[#allocation2 + $0x51] ss:$2 sm:$0xff]  ;;  %v1328_v0 = vld [vmem:[#allocation2 + $0xd0] ss:$2 sm:$0xff] }
 0x148   :  { %v646_v23 = vadd.f32 %v3802_v56, %v623_v6  ;;  %v647_v45 = vadd.f32 %v3802_v56, %v624_v4  ;;  %v999_v5 = vrot.slane %v951_v60, 2  ;;  %v1105_v14 = vrot.slane %v1057_v58, 3  ;;  %v1314_v4 = vld [vmem:[#allocation2 + $0x60] ss:$2 sm:$0xff]  ;;  %v1346_v36 = vld [vmem:[#allocation2 + $0x61] ss:$2 sm:$0xff] }
 0x149   :  { %v1211_v41 = vrot.slane %v1163_v63, 4  ;;  %v1395_v54 = vrot.slane %v1368_v3, 7  ;;  %v1695_v26 = vrot.slane %v1376_v29, 7  ;;  %v894_v43 = vsel %vm235_vm0, %v891_v42, %v893_v34 }
 0x14a   :  { %v662_v24 = vmax.f32 %v646_v23, 0.0  ;;  %v663_v18 = vmax.f32 %v647_v45, 0.0  ;;  %v896_v50 = vsel %vm235_vm0, %v893_v34, %v895_v9  ;;  %v1213_v49 = vrot.slane %v1164_v1, 4  ;;  %v1360_v9 = vld [vmem:[#allocation2 + $0xd1] ss:$2 sm:$0xff] }
 0x14b   :  { %v927_v48 = vadd.f32 %v894_v43, %v800_v11  ;;  %v928_v32 = vadd.f32 %v896_v50, %v801_v21  ;;  %v1000_v25 = vsel %vm343_vm1, %v997_v61, %v999_v5  ;;  %v1002_v28 = vsel %vm343_vm1, %v999_v5, %v1001_v15  ;;  %v1326_v11 = vld [vmem:[#allocation2 + $0xc0] ss:$2 sm:$0xff] }
 0x14c   :  { %679 = vst.msk [vmem:[#allocation2 + $0x70] sm:$0xff] %vm664_vm4, %v662_v24  ;;  %680 = vst.msk [vmem:[#allocation2 + $0x78] sm:$0xff] %vm664_vm4, %v663_v18  ;;  %v1106_v2 = vsel %vm451_vm2, %v1103_v30, %v1105_v14  ;;  %v1108_v42 = vsel %vm451_vm2, %v1105_v14, %v1107_v7  ;;  %v3927_v27 = vsel %vm1389_vm5, %v3760_v44, %v1395_v54  ;;  %v1330_v14 = vld [vmem:[#allocation2 + $0xe0] ss:$2 sm:$0xff]  ;;  %v1362_v24 = vld [vmem:[#allocation2 + $0xe1] ss:$2 sm:$0xff] }
 0x14d   :  { %v1033_v35 = vadd.f32 %v1000_v25, %v927_v48  ;;  %v1034_v47 = vadd.f32 %v1002_v28, %v928_v32  ;;  %v3931_v46 = vsel %vm1389_vm5, %v3844_v12, %v1695_v26  ;;  %v1212_v31 = vsel %vm559_vm3, %v1209_v59, %v1211_v41  ;;  %v1518_v43 = vld [vmem:[#allocation6 + $0x8] sm:$0xff]  ;;  %v1519_v25 = vld [vmem:[#allocation6 + $0x10] sm:$0xff]  ;;  %v1520_v28 = vld [vmem:[#allocation6 + $0x18] sm:$0xff] }
 0x14e   :  { %v1423_v61 = vrot.slane %v3927_v27, 1  ;;  %v1723_v30 = vrot.slane %v3931_v46, 1  ;;  %v1369_v57 = vmax.f32 %v1310_v10, %v1342_v39  ;;  %v1214_v19 = vsel %vm559_vm3, %v1211_v41, %v1213_v49 }
 0x14f   :  { %v1139_v62 = vadd.f32 %v1106_v2, %v1033_v35  ;;  %v1140_v1 = vadd.f32 %v1108_v42, %v1034_v47  ;;  %v1377_v44 = vmax.f32 %v1326_v11, %v1358_v53  ;;  %v1464_v12 = vrot.slane %v3927_v27, 2  ;;  %v1522_v35 = vld [vmem:[#allocation6 + $0x28] sm:$0xff] }
 0x150   :  { %v1424_v33 = vsel %vm235_vm0, %v1421_v38, %v1423_v61  ;;  %v1724_v59 = vsel %vm235_vm0, %v1721_v8, %v1723_v30  ;;  %v1397_v15 = vrot.slane %v1369_v57, 7  ;;  %v1370_v38 = vmax.f32 %v1312_v20, %v1344_v17 }
 0x151   :  { %v1245_v7 = vadd.f32 %v1212_v31, %v1139_v62  ;;  %v1246_v21 = vadd.f32 %v1214_v19, %v1140_v1  ;;  %1439 = vrot.lane.b32.xlu0 %v1424_v33, %s2819_s8  ;;  %1739 = vrot.lane.b32.xlu1 %v1724_v59, %s2819_s8  ;;  %v1697_v6 = vrot.slane %v1377_v44, 7  ;;  %v1378_v58 = vmax.f32 %v1328_v0, %v1360_v9  ;;  %v1523_v1 = vld [vmem:[#allocation6 + $0x30] sm:$0xff]  ;;  %v1524_v0 = vld [vmem:[#allocation6 + $0x38] sm:$0xff] }
 0x152   :  { %v3949_v60 = vsel %vm1389_vm5, %v1395_v54, %v1397_v15  ;;  %v1465_v23 = vsel %vm343_vm1, %v1462_v40, %v1464_v12  ;;  %v1764_v45 = vrot.slane %v3931_v46, 2  ;;  %v1371_v5 = vmax.f32 %v1314_v4, %v1346_v36  ;;  %v1517_v40 = vld [vmem:[#allocation6] sm:$0xff] }
 0x153   :  { %v1268_v63 = vadd.f32 %v3802_v56, %v1245_v7  ;;  %v1269_v8 = vadd.f32 %v3802_v56, %v1246_v21  ;;  %v1425_v3 = vrot.slane %v3949_v60, 1  ;;  %v3955_v29 = vsel %vm1389_vm5, %v1695_v26, %v1697_v6  ;;  %v1316_v33 = vld [vmem:[#allocation2 + $0x70] ss:$2 sm:$0xff]  ;;  %v1348_v59 = vld [vmem:[#allocation2 + $0x71] ss:$2 sm:$0xff]  ;;  %v1525_v36 = vld [vmem:[#allocation6 + $0x40] sm:$0xff] }
 0x154   :  { %v1725_v34 = vrot.slane %v3955_v29, 1  ;;  %v1699_v26 = vrot.slane %v1378_v58, 7  ;;  %v1399_v18 = vrot.slane %v1370_v38, 7  ;;  %v1765_v48 = vsel %vm343_vm1, %v1762_v55, %v1764_v45  ;;  %v1521_v55 = vld [vmem:[#allocation6 + $0x20] sm:$0xff]  ;;  %v1526_v38 = vld [vmem:[#allocation6 + $0x48] sm:$0xff] }
 0x155   :  { %v1284_v41 = vmax.f32 %v1268_v63, 0.0  ;;  %v1285_v54 = vmax.f32 %v1269_v8, 0.0  ;;  %1480 = vrot.lane.b32.xlu1 %v1465_v23, %s2820_s1  ;;  %v1426_v56 = vsel %vm235_vm0, %v1423_v61, %v1425_v3  ;;  %v1766_v32 = vrot.slane %v3955_v29, 2 }
 0x156   :  { %1441 = vrot.lane.b32.xlu0 %v1426_v56, %s2819_s8  ;;  %v1726_v50 = vsel %vm235_vm0, %v1723_v30, %v1725_v34  ;;  %v3971_v49 = vsel %vm1389_vm5, %v1697_v6, %v1699_v26  ;;  %v3977_v10 = vrot.slane %v1371_v5, 7  ;;  %v1379_v39 = vmax.f32 %v1330_v14, %v1362_v24  ;;  %v1527_v5 = vld [vmem:[#allocation6 + $0x50] sm:$0xff]  ;;  %v1528_v14 = vld [vmem:[#allocation6 + $0x58] sm:$0xff] }
 0x157   :  { %1300 = vst.msk [vmem:[#allocation2 + $0xf0] sm:$0xff] %vm664_vm4, %v1284_v41  ;;  %1301 = vst.msk [vmem:[#allocation2 + $0xf8] sm:$0xff] %vm664_vm4, %v1285_v54  ;;  %v1466_v2 = vrot.slane %v3949_v60, 2  ;;  %v2610_v42 = vpack.c.bf16 %v1518_v43, %v1517_v40  ;;  %v3983_v11 = vsel %vm1389_vm5, %v1397_v15, %v1399_v18  ;;  %v1727_v53 = vrot.slane %v3971_v49, 1 }
 0x158   :  { %v2614_v47 = vpack.c.bf16 %v1520_v28, %v1519_v25  ;;  %v1767_v31 = vsel %vm343_vm1, %v1764_v45, %v1766_v32  ;;  %v3991_v61 = vsel %vm1389_vm5, %v1399_v18, %v3977_v10  ;;  %v1701_v30 = vrot.slane %v1379_v39, 7 }
 0x159   :  { %1780 = vrot.lane.b32.xlu1 %v1765_v48, %s2820_s1  ;;  %2611 = vmatprep.subr.bf16.mxu0 %v2610_v42  ;;  %v1467_v57 = vsel %vm343_vm1, %v1464_v12, %v1466_v2  ;;  %v1427_v20 = vrot.slane %v3983_v11, 1  ;;  %v2618_v62 = vpack.c.bf16 %v1522_v35, %v1521_v55  ;;  %v1728_v19 = vsel %vm235_vm0, %v1725_v34, %v1727_v53 }
 0x15a   :  { %1741 = vrot.lane.b32.xlu0 %v1726_v50, %s2819_s8  ;;  %2635 = vmatprep.subr.bf16.mxu1 %v2610_v42  ;;  %v1429_v9 = vrot.slane %v3991_v61, 1  ;;  %v1468_v12 = vrot.slane %v3983_v11, 2  ;;  %v4001_v7 = vsel %vm1389_vm5, %v1699_v26, %v1701_v30  ;;  %v2622_v6 = vpack.c.bf16 %v1524_v0, %v1523_v1 }
 0x15b   :  { %2613 = vmatpush3.bf16.msra.mxu0 %v2610_v42  ;;  %2637 = vmatpush3.bf16.msra.mxu1 %v2610_v42  ;;  %v1428_v21 = vsel %vm235_vm0, %v1425_v3, %v1427_v20  ;;  %v1372_v4 = vmax.f32 %v1316_v33, %v1348_v59  ;;  %v1729_v63 = vrot.slane %v4001_v7, 1  ;;  %v1768_v45 = vrot.slane %v3971_v49, 2 }
 0x15c   :  { %2615 = vmatprep.subr.bf16.mxu0 %v2614_v47  ;;  %2639 = vmatprep.subr.bf16.mxu1 %v2614_v47  ;;  %v1430_v58 = vsel %vm235_vm0, %v1427_v20, %v1429_v9  ;;  %v1469_v23 = vsel %vm343_vm1, %v1466_v2, %v1468_v12  ;;  %v2626_v3 = vpack.c.bf16 %v1526_v38, %v1525_v36  ;;  %v1770_v26 = vrot.slane %v4001_v7, 2 }
 0x15d   :  { %1782 = vrot.lane.b32.xlu1 %v1767_v31, %s2820_s1  ;;  %v1403_v34 = vrot.slane %v1372_v4, 7  ;;  %v1730_v41 = vsel %vm235_vm0, %v1727_v53, %v1729_v63  ;;  %v1769_v56 = vsel %vm343_vm1, %v1766_v32, %v1768_v45  ;;  %v1470_v24 = vrot.slane %v3991_v61, 2 }
 0x15e   :  { %1482 = vrot.lane.b32.xlu0 %v1467_v57, %s2820_s1  ;;  %v1332_v44 = vld [vmem:[#allocation2 + $0xf0] ss:$2 sm:$0xff]  ;;  %v1364_v17 = vld [vmem:[#allocation2 + $0xf1] ss:$2 sm:$0xff]  ;;  %v2630_v18 = vpack.c.bf16 %v1528_v14, %v1527_v5  ;;  %v1771_v50 = vsel %vm343_vm1, %v1768_v45, %v1770_v26 }
 0x15f   :  { %v1380_v15 = vmax.f32 %v1332_v44, %v1364_v17  ;;  %2617 = vmatpush3.bf16.msra.mxu0 %v2614_v47  ;;  %2641 = vmatpush3.bf16.msra.mxu1 %v2614_v47  ;;  %v4027_v40 = vsel %vm1389_vm5, %v3977_v10, %v1403_v34  ;;  %v1471_v48 = vsel %vm343_vm1, %v1468_v12, %v1470_v24  ;;  %v1415_v10 = vsel %vm1389_vm5, %v1403_v34, 0.0 }
 0x160   :  { %2619 = vmatprep.subr.bf16.mxu0 %v2618_v62  ;;  %2643 = vmatprep.subr.bf16.mxu1 %v2618_v62  ;;  %v1431_v32 = vrot.slane %v4027_v40, 1  ;;  %v1472_v25 = vrot.slane %v4027_v40, 2  ;;  %v1433_v2 = vrot.slane %v1415_v10, 1  ;;  %v1474_v20 = vrot.slane %v1415_v10, 2 }
 0x161   :  { %1743 = vrot.lane.b32.xlu1 %v1728_v19, %s2819_s8  ;;  %v1703_v8 = vrot.slane %v1380_v15, 7 }
 0x162   :  { %1443 = vrot.lane.b32.xlu0 %v1428_v21, %s2819_s8  ;;  %v1432_v28 = vsel %vm235_vm0, %v1429_v9, %v1431_v32  ;;  %v1473_v53 = vsel %vm343_vm1, %v1470_v24, %v1472_v25  ;;  %v1434_v35 = vsel %vm235_vm0, %v1431_v32, %v1433_v2  ;;  %v1475_v1 = vsel %vm343_vm1, %v1472_v25, %v1474_v20 }
 0x163   :  { %2621 = vmatpush3.bf16.msra.mxu0 %v2618_v62  ;;  %2645 = vmatpush3.bf16.msra.mxu1 %v2618_v62  ;;  %v4016_v54 = vsel %vm1389_vm5, %v1701_v30, %v1703_v8  ;;  %v1715_v42 = vsel %vm1389_vm5, %v1703_v8, 0.0 }
 0x164   :  { %2623 = vmatprep.subr.bf16.mxu0 %v2622_v6  ;;  %2647 = vmatprep.subr.bf16.mxu1 %v2622_v6  ;;  %v1731_v43 = vrot.slane %v4016_v54, 1  ;;  %v1772_v55 = vrot.slane %v4016_v54, 2  ;;  %v1733_v47 = vrot.slane %v1715_v42, 1  ;;  %v1774_v30 = vrot.slane %v1715_v42, 2 }
 0x165   :  { %1484 = vrot.lane.b32.xlu1 %v1469_v23, %s2820_s1 }
 0x166   :  { %1445 = vrot.lane.b32.xlu0 %v1430_v58, %s2819_s8  ;;  %v1732_v39 = vsel %vm235_vm0, %v1729_v63, %v1731_v43  ;;  %v1773_v31 = vsel %vm343_vm1, %v1770_v26, %v1772_v55  ;;  %v1734_v57 = vsel %vm235_vm0, %v1731_v43, %v1733_v47  ;;  %v1775_v62 = vsel %vm343_vm1, %v1772_v55, %v1774_v30 }
 0x167   :  { %2625 = vmatpush3.bf16.msra.mxu0 %v2622_v6  ;;  %2649 = vmatpush3.bf16.msra.mxu1 %v2622_v6 }
 0x168   :  { %2627 = vmatprep.subr.bf16.mxu0 %v2626_v3  ;;  %2651 = vmatprep.subr.bf16.mxu1 %v2626_v3 }
 0x169   :  { %1784 = vrot.lane.b32.xlu1 %v1769_v56, %s2820_s1 }
 0x16a   :  { %1745 = vrot.lane.b32.xlu0 %v1730_v41, %s2819_s8 }
 0x16b   :  { %2629 = vmatpush3.bf16.msra.mxu0 %v2626_v3  ;;  %2653 = vmatpush3.bf16.msra.mxu1 %v2626_v3 }
 0x16c   :  { %2631 = vmatprep.subr.bf16.mxu0 %v2630_v18  ;;  %2655 = vmatprep.subr.bf16.mxu1 %v2630_v18 }
 0x16d   :  { %1786 = vrot.lane.b32.xlu1 %v1771_v50, %s2820_s1 }
 0x16e   :  { %1486 = vrot.lane.b32.xlu0 %v1471_v48, %s2820_s1 }
 0x16f   :  { %2633 = vmatpush3.bf16.msra.mxu0 %v2630_v18  ;;  %2657 = vmatpush3.bf16.msra.mxu1 %v2630_v18 }
 0x171   :  { %1747 = vrot.lane.b32.xlu1 %v1732_v39, %s2819_s8 }
 0x172   :  { %1447 = vrot.lane.b32.xlu0 %v1432_v28, %s2819_s8 }
 0x175   :  { %1488 = vrot.lane.b32.xlu1 %v1473_v53, %s2820_s1 }
 0x176   :  { %1449 = vrot.lane.b32.xlu0 %v1434_v35, %s2819_s8 }
 0x179   :  { %1788 = vrot.lane.b32.xlu1 %v1773_v31, %s2820_s1 }
 0x17a   :  { %1749 = vrot.lane.b32.xlu0 %v1734_v57, %s2819_s8 }
 0x17d   :  { %1790 = vrot.lane.b32.xlu1 %v1775_v62, %s2820_s1 }
 0x17e   :  { %1490 = vrot.lane.b32.xlu0 %v1475_v1, %s2820_s1 }
 0x183   :  { %v1436_v44 = vpop.permute.xlu0 %1435 }
 0x184   :  { %v1500_v17 = vsel %vm664_vm4, %v3555_v13, %v1436_v44 }
 0x199   :  { %v1736_v19 = vpop.permute.xlu1 %1735 }
 0x19a   :  { %v1800_v33 = vsel %vm664_vm4, %v3692_v52, %v1736_v19 }
 0x19f   :  { %v1477_v0 = vpop.permute.xlu1 %1476 }
 0x1a0   :  { %v1509_v9 = vsel %vm1508_vm6, %v1500_v17, %v1477_v0  ;;  %v2821_v0 = vmov 0.0|0.0  }
 0x1a1   :  { %2562 = vmatprep.mubr.msk.f32.mxu0 %vm1536_vm7, %v1509_v9  ;;  %2658 = vmatprep.subr.bf16.mxu0 %v2821_v0 }
 0x1a2   :  { %2694 = vmatprep.subr.bf16.mxu1 %v2821_v0 }
 0x1a4   :  { %v1438_v15 = vpop.permute.xlu0 %1437 }
 0x1a5   :  { %v1501_v36 = vsel %vm664_vm4, %v3552_v51, %v1438_v15  ;;  %v2077_v15 = vld [vmem:[%s4347_s5 + $0x20] sm:$0xff] }
 0x1a9   :  { %v1777_v59 = vpop.permute.xlu1 %1776 }
 0x1aa   :  { %v1808_v12 = vsel %vm1508_vm6, %v1800_v33, %v1777_v59  ;;  %v2076_v33 = vld [vmem:[%s4347_s5 + $0x18] sm:$0xff] }
 0x1ab   :  { %2598 = vmatprep.mubr.msk.f32.mxu1 %vm1536_vm7, %v1808_v12  ;;  %v2078_v12 = vld [vmem:[%s4347_s5 + $0x28] sm:$0xff] }
 0x1b1   :  { %v1738_v21 = vpop.permute.xlu0 %1737 }
 0x1b2   :  { %v1801_v6 = vsel %vm664_vm4, %v3709_v37, %v1738_v21  ;;  %v2665_v21 = vpack.c.bf16 %v2078_v12, %v2077_v15 }
 0x1b5   :  { %v1779_v4 = vpop.permute.xlu1 %1778 }
 0x1b6   :  { %v1809_v13 = vsel %vm1508_vm6, %v1801_v6, %v1779_v4  ;;  %v1479_v38 = vpop.permute.xlu0 %1478  ;;  %v2079_v6 = vld [vmem:[%s4347_s5 + $0x30] sm:$0xff]  ;;  %v2080_v4 = vld [vmem:[%s4347_s5 + $0x38] sm:$0xff] }
 0x1b7   :  { %2599 = vmatmul.mubr.msk.f32.vlgmr.msra.gmra.mrb[0].mxu1 %vm1536_vm7, %v1809_v13  ;;  %v1510_v52 = vsel %vm1508_vm6, %v1501_v36, %v1479_v38  ;;  %v2668_v13 = vpack.c.bf16 %v2080_v4, %v2079_v6  ;;  %v2081_v36 = vld [vmem:[%s4347_s5 + $0x40] sm:$0xff]  ;;  %v2082_v38 = vld [vmem:[%s4347_s5 + $0x48] sm:$0xff] }
 0x1b8   :  { %2563 = vmatmul.mubr.msk.f32.vlgmr.msra.gmra.mrb[0].mxu0 %vm1536_vm7, %v1510_v52  ;;  %v2671_v52 = vpack.c.bf16 %v2082_v38, %v2081_v36 }
 0x1c3   :  { %v1740_v58 = vpop.permute.xlu1 %1739  ;;  %v1440_v63 = vpop.permute.xlu0 %1439 }
 0x1c4   :  { %v1502_v8 = vsel %vm664_vm4, %v3782_v16, %v1440_v63  ;;  %v1802_v51 = vsel %vm664_vm4, %v3850_v22, %v1740_v58  ;;  %v2083_v58 = vld [vmem:[%s4347_s5 + $0x50] sm:$0xff]  ;;  %v2084_v63 = vld [vmem:[%s4347_s5 + $0x58] sm:$0xff] }
 0x1c7   :  { %v1481_v23 = vpop.permute.xlu1 %1480 }
 0x1c8   :  { %v1511_v37 = vsel %vm1508_vm6, %v1502_v8, %v1481_v23  ;;  %v1442_v45 = vpop.permute.xlu0 %1441  ;;  %v2674_v8 = vpack.c.bf16 %v2084_v63, %v2083_v58  ;;  %v2085_v23 = vld [vmem:[%s4347_s5 + $0x60] sm:$0xff] }
 0x1c9   :  { %2565 = vmatprep.mubr.msk.f32.mxu0 %vm1536_vm7, %v1511_v37  ;;  %v1503_v16 = vsel %vm664_vm4, %v3927_v27, %v1442_v45  ;;  %v2086_v37 = vld [vmem:[%s4347_s5 + $0x68] sm:$0xff] }
 0x1ca   :  { %v2677_v45 = vpack.c.bf16 %v2086_v37, %v2085_v23 }
 0x1cb   :  { %v1781_v3 = vpop.permute.xlu1 %1780 }
 0x1cc   :  { %v1810_v34 = vsel %vm1508_vm6, %v1802_v51, %v1781_v3  ;;  %v1742_v5 = vpop.permute.xlu0 %1741  ;;  %v2087_v51 = vld [vmem:[%s4347_s5 + $0x70] sm:$0xff]  ;;  %v2088_v3 = vld [vmem:[%s4347_s5 + $0x78] sm:$0xff] }
 0x1cd   :  { %2601 = vmatprep.mubr.msk.f32.mxu1 %vm1536_vm7, %v1810_v34  ;;  %v1803_v14 = vsel %vm664_vm4, %v3931_v46, %v1742_v5  ;;  %v2680_v34 = vpack.c.bf16 %v2088_v3, %v2087_v51  ;;  %v2089_v5 = vld [vmem:[%s4347_s5 + $0x80] sm:$0xff] }
 0x1cf   :  { %v1783_v41 = vpop.permute.xlu1 %1782 }
 0x1d0   :  { %v1811_v56 = vsel %vm1508_vm6, %v1803_v14, %v1783_v41  ;;  %v1483_v26 = vpop.permute.xlu0 %1482  ;;  %v2090_v14 = vld [vmem:[%s4347_s5 + $0x88] sm:$0xff] }
 0x1d1   :  { %v1512_v24 = vsel %vm1508_vm6, %v1503_v16, %v1483_v26  ;;  %2602 = vmatmul.mubr.msk.f32.gmra.mrb[2].mxu1 %vm1536_vm7, %v1811_v56  ;;  %v2683_v41 = vpack.c.bf16 %v2090_v14, %v2089_v5  ;;  %v2091_v16 = vld [vmem:[%s4347_s5 + $0x90] sm:$0xff]  ;;  %v2092_v56 = vld [vmem:[%s4347_s5 + $0x98] sm:$0xff] }
 0x1d2   :  { %2566 = vmatmul.mubr.msk.f32.gmra.mrb[2].mxu0 %vm1536_vm7, %v1512_v24  ;;  %v2686_v26 = vpack.c.bf16 %v2092_v56, %v2091_v16  ;;  %v2093_v24 = vld [vmem:[%s4347_s5 + $0xa0] sm:$0xff] }
 0x1d3   :  { %v1744_v22 = vpop.permute.xlu1 %1743 }
 0x1d4   :  { %v1444_v18 = vpop.permute.xlu0 %1443  ;;  %v1804_v27 = vsel %vm664_vm4, %v3955_v29, %v1744_v22  ;;  %v2094_v22 = vld [vmem:[%s4347_s5 + $0xa8] sm:$0xff] }
 0x1d5   :  { %v1504_v43 = vsel %vm664_vm4, %v3949_v60, %v1444_v18  ;;  %v2689_v18 = vpack.c.bf16 %v2094_v22, %v2093_v24 }
 0x1d7   :  { %v1485_v50 = vpop.permute.xlu1 %1484 }
 0x1d8   :  { %v1513_v46 = vsel %vm1508_vm6, %v1504_v43, %v1485_v50  ;;  %v1446_v48 = vpop.permute.xlu0 %1445  ;;  %v4210_v43 = vld [vmem:[%s4346_s4] ss:$0 sm:$0xff] }
 0x1d9   :  { %2568 = vmatprep.mubr.msk.f32.mxu0 %vm1536_vm7, %v1513_v46  ;;  %v1505_v60 = vsel %vm664_vm4, %v3983_v11, %v1446_v48 }
 0x1db   :  { %v1785_v32 = vpop.permute.xlu1 %1784 }
 0x1dc   :  { %v1812_v39 = vsel %vm1508_vm6, %v1804_v27, %v1785_v32  ;;  %v1746_v10 = vpop.permute.xlu0 %1745 }
 0x1dd   :  { %2604 = vmatprep.mubr.msk.f32.mxu1 %vm1536_vm7, %v1812_v39  ;;  %v1805_v25 = vsel %vm664_vm4, %v3971_v49, %v1746_v10 }
 0x1df   :  { %v1787_v28 = vpop.permute.xlu1 %1786 }
 0x1e0   :  { %v1813_v2 = vsel %vm1508_vm6, %v1805_v25, %v1787_v28  ;;  %v1487_v42 = vpop.permute.xlu0 %1486 }
 0x1e1   :  { %v1514_v53 = vsel %vm1508_vm6, %v1505_v60, %v1487_v42  ;;  %2605 = vmatmul.mubr.msk.f32.gmra.mrb[4].mxu1 %vm1536_vm7, %v1813_v2 }
 0x1e2   :  { %2569 = vmatmul.mubr.msk.f32.gmra.mrb[4].mxu0 %vm1536_vm7, %v1514_v53 }
 0x1e3   :  { %v1748_v29 = vpop.permute.xlu1 %1747 }
 0x1e4   :  { %v1448_v55 = vpop.permute.xlu0 %1447  ;;  %v1806_v11 = vsel %vm664_vm4, %v4001_v7, %v1748_v29  ;;  %v2073_v7 = vld [vmem:[%s4347_s5] sm:$0xff] }
 0x1e5   :  { %v1506_v35 = vsel %vm664_vm4, %v3991_v61, %v1448_v55 }
 0x1e7   :  { %v1489_v47 = vpop.permute.xlu1 %1488 }
 0x1e8   :  { %v1515_v49 = vsel %vm1508_vm6, %v1506_v35, %v1489_v47  ;;  %v1450_v31 = vpop.permute.xlu0 %1449 }
 0x1e9   :  { %2571 = vmatprep.mubr.msk.f32.mxu0 %vm1536_vm7, %v1515_v49  ;;  %v1507_v61 = vsel %vm664_vm4, %v4027_v40, %v1450_v31  ;;  %v2075_v40 = vld [vmem:[%s4347_s5 + $0x10] sm:$0xff] }
 0x1ea   :  { %v2662_v59 = vpack.c.bf16 %v2076_v33, %v2075_v40 }
 0x1eb   :  { %v1789_v30 = vpop.permute.xlu1 %1788 }
 0x1ec   :  { %v1814_v57 = vsel %vm1508_vm6, %v1806_v11, %v1789_v30  ;;  %v1750_v20 = vpop.permute.xlu0 %1749 }
 0x1ed   :  { %2607 = vmatprep.mubr.msk.f32.mxu1 %vm1536_vm7, %v1814_v57  ;;  %v1807_v62 = vsel %vm664_vm4, %v4016_v54, %v1750_v20  ;;  %v2074_v54 = vld [vmem:[%s4347_s5 + $0x8] sm:$0xff] }
 0x1ee   :  { %v2659_v9 = vpack.c.bf16 %v2074_v54, %v2073_v7 }
 0x1ef   :  { %v1791_v1 = vpop.permute.xlu1 %1790 }
 0x1f0   :  { %v1815_v19 = vsel %vm1508_vm6, %v1807_v62, %v1791_v1  ;;  %v1491_v44 = vpop.permute.xlu0 %1490  ;;  %2660 = vmatpush1.bf16.msra.mxu0 %v2659_v9  ;;  %2696 = vmatpush1.bf16.msra.mxu1 %v2659_v9  ;;  %v2096_v9 = vld [vmem:[%s4347_s5 + $0xb8] sm:$0xff] }
 0x1f1   :  { %v1516_v17 = vsel %vm1508_vm6, %v1507_v61, %v1491_v44  ;;  %2608 = vmatmul.mubr.msk.f32.gmra.mrb[6].mxu1 %vm1536_vm7, %v1815_v19  ;;  %2661 = vmatprep.subr.bf16.mxu0 %v2821_v0 }
 0x1f2   :  { %2572 = vmatmul.mubr.msk.f32.gmra.mrb[6].mxu0 %vm1536_vm7, %v1516_v17  ;;  %2697 = vmatprep.subr.bf16.mxu1 %v2821_v0 }
 0x1f4   :  { %2663 = vmatpush1.bf16.msra.mxu0 %v2662_v59  ;;  %2699 = vmatpush1.bf16.msra.mxu1 %v2662_v59 }
 0x1f5   :  { %2664 = vmatprep.subr.bf16.mxu0 %v2821_v0  ;;  %2700 = vmatprep.subr.bf16.mxu1 %v2821_v0 }
 0x1f8   :  { %2666 = vmatpush1.bf16.msra.mxu0 %v2665_v21  ;;  %2702 = vmatpush1.bf16.msra.mxu1 %v2665_v21 }
 0x1f9   :  { %2667 = vmatprep.subr.bf16.mxu0 %v2821_v0  ;;  %2703 = vmatprep.subr.bf16.mxu1 %v2821_v0 }
 0x1fc   :  { %2669 = vmatpush1.bf16.msra.mxu0 %v2668_v13  ;;  %2705 = vmatpush1.bf16.msra.mxu1 %v2668_v13 }
 0x1fd   :  { %2670 = vmatprep.subr.bf16.mxu0 %v2821_v0  ;;  %2706 = vmatprep.subr.bf16.mxu1 %v2821_v0 }
 0x200   :  { %2672 = vmatpush1.bf16.msra.mxu0 %v2671_v52  ;;  %2708 = vmatpush1.bf16.msra.mxu1 %v2671_v52 }
 0x201   :  { %2673 = vmatprep.subr.bf16.mxu0 %v2821_v0  ;;  %2709 = vmatprep.subr.bf16.mxu1 %v2821_v0 }
 0x204   :  { %2675 = vmatpush1.bf16.msra.mxu0 %v2674_v8  ;;  %2711 = vmatpush1.bf16.msra.mxu1 %v2674_v8 }
 0x205   :  { %2676 = vmatprep.subr.bf16.mxu0 %v2821_v0  ;;  %2712 = vmatprep.subr.bf16.mxu1 %v2821_v0 }
 0x208   :  { %2678 = vmatpush1.bf16.msra.mxu0 %v2677_v45  ;;  %2714 = vmatpush1.bf16.msra.mxu1 %v2677_v45 }
 0x209   :  { %2679 = vmatprep.subr.bf16.mxu0 %v2821_v0  ;;  %2715 = vmatprep.subr.bf16.mxu1 %v2821_v0 }
 0x20c   :  { %2681 = vmatpush1.bf16.msra.mxu0 %v2680_v34  ;;  %2717 = vmatpush1.bf16.msra.mxu1 %v2680_v34 }
 0x20d   :  { %2682 = vmatprep.subr.bf16.mxu0 %v2821_v0  ;;  %2718 = vmatprep.subr.bf16.mxu1 %v2821_v0 }
 0x210   :  { %2684 = vmatpush1.bf16.msra.mxu0 %v2683_v41  ;;  %2720 = vmatpush1.bf16.msra.mxu1 %v2683_v41 }
 0x211   :  { %2685 = vmatprep.subr.bf16.mxu0 %v2821_v0  ;;  %2721 = vmatprep.subr.bf16.mxu1 %v2821_v0 }
 0x214   :  { %2687 = vmatpush1.bf16.msra.mxu0 %v2686_v26  ;;  %2723 = vmatpush1.bf16.msra.mxu1 %v2686_v26 }
 0x215   :  { %2688 = vmatprep.subr.bf16.mxu0 %v2821_v0  ;;  %2724 = vmatprep.subr.bf16.mxu1 %v2821_v0 }
 0x218   :  { %2690 = vmatpush1.bf16.msra.mxu0 %v2689_v18  ;;  %2726 = vmatpush1.bf16.msra.mxu1 %v2689_v18 }
 0x219   :  { %2691 = vmatprep.subr.bf16.mxu0 %v2821_v0  ;;  %2727 = vmatprep.subr.bf16.mxu1 %v2821_v0  ;;  %v2095_v0 = vld [vmem:[%s4347_s5 + $0xb0] sm:$0xff] }
 0x21a   :  { %v2692_v15 = vpack.c.bf16 %v2096_v9, %v2095_v0 }
 0x21c   :  { %2693 = vmatpush1.bf16.msra.mxu0 %v2692_v15  ;;  %2729 = vmatpush1.bf16.msra.mxu1 %v2692_v15 }
 0x28a   :  { %v2600_v50 = vpop.f32.mrb[0].mxu1 }
 0x28b   :  { %v1931_v46 = vadd.f32 %v2600_v50, %v4210_v43  ;;  %v1925_v48 = vpop.f32.mrb[1].mxu1  ;;  %v2564_v27 = vpop.f32.mrb[0].mxu0 }
 0x28c   :  { %v1926_v32 = vadd.f32 %v4210_v43, %v1925_v48  ;;  %v1633_v39 = vadd.f32 %v2564_v27, %v4210_v43  ;;  %v1627_v25 = vpop.f32.mrb[1].mxu0 }
 0x28d   :  { %v1965_v10 = vmax.f32 %v1931_v46, 0.0  ;;  %v1628_v28 = vadd.f32 %v4210_v43, %v1627_v25 }
 0x28e   :  { %v1964_v60 = vmax.f32 %v1926_v32, 0.0  ;;  %v1667_v2 = vmax.f32 %v1633_v39, 0.0 }
 0x28f   :  { %1973 = vst.msk [vmem:[#allocation3 + $0x48] sm:$0xff] %vm1508_vm6, %v1965_v10  ;;  %v1666_v42 = vmax.f32 %v1628_v28, 0.0 }
 0x290   :  { %1972 = vst.msk [vmem:[#allocation3 + $0x40] sm:$0xff] %vm1508_vm6, %v1964_v60  ;;  %1675 = vst.msk [vmem:[#allocation3 + $0x8] sm:$0xff] %vm1508_vm6, %v1667_v2 }
 0x291   :  { %1674 = vst.msk [vmem:[#allocation3] sm:$0xff] %vm1508_vm6, %v1666_v42 }
 0x297   :  { %v1988_v11 = vld [vmem:[#allocation3 + $0x40] ss:$2 sm:$0xff]  ;;  %v2004_v30 = vld [vmem:[#allocation3 + $0x41] ss:$2 sm:$0xff] }
 0x298   :  { %v1980_v62 = vld [vmem:[#allocation3] ss:$2 sm:$0xff]  ;;  %v1996_v1 = vld [vmem:[#allocation3 + $0x1] ss:$2 sm:$0xff]  ;;  %v2015_v7 = vmax.f32 %v1988_v11, %v2004_v30 }
 0x299   :  { %v2011_v17 = vmax.f32 %v1980_v62, %v1996_v1 }
 0x29a   :  { %v2209_v40 = vrot.slane %v2015_v7, 7 }
 0x29b   :  { %v2023_v54 = vrot.slane %v2011_v17, 7 }
 0x29c   :  { %v4240_v13 = vsel %vm1389_vm5, 0.0, %v2209_v40 }
 0x29d   :  { %v4237_v6 = vsel %vm1389_vm5, 0.0, %v2023_v54  ;;  %v2246_v45 = vrot.slane %v4240_v13, 2  ;;  %v2225_v27 = vrot.slane %v4240_v13, 1 }
 0x29e   :  { %v2060_v37 = vrot.slane %v4237_v6, 2  ;;  %v2039_v14 = vrot.slane %v4237_v6, 1 }
 0x2a4   :  { %v2603_v53 = vpop.f32.mrb[2].mxu1 }
 0x2a5   :  { %v2567_v29 = vpop.f32.mrb[2].mxu0  ;;  %v1941_v55 = vadd.f32 %v2603_v53, %v4210_v43  ;;  %v1935_v35 = vpop.f32.mrb[3].mxu1 }
 0x2a6   :  { %v1643_v47 = vadd.f32 %v2567_v29, %v4210_v43  ;;  %v1637_v49 = vpop.f32.mrb[3].mxu0  ;;  %v1936_v31 = vadd.f32 %v4210_v43, %v1935_v35 }
 0x2a7   :  { %v1967_v57 = vmax.f32 %v1941_v55, 0.0  ;;  %v1638_v20 = vadd.f32 %v4210_v43, %v1637_v49 }
 0x2a8   :  { %v1669_v61 = vmax.f32 %v1643_v47, 0.0  ;;  %v1966_v19 = vmax.f32 %v1936_v31, 0.0 }
 0x2a9   :  { %1975 = vst.msk [vmem:[#allocation3 + $0x58] sm:$0xff] %vm1508_vm6, %v1967_v57  ;;  %v1668_v44 = vmax.f32 %v1638_v20, 0.0 }
 0x2aa   :  { %1677 = vst.msk [vmem:[#allocation3 + $0x18] sm:$0xff] %vm1508_vm6, %v1669_v61  ;;  %1974 = vst.msk [vmem:[#allocation3 + $0x50] sm:$0xff] %vm1508_vm6, %v1966_v19 }
 0x2ab   :  { %1676 = vst.msk [vmem:[#allocation3 + $0x10] sm:$0xff] %vm1508_vm6, %v1668_v44 }
 0x2b1   :  { %v1990_v33 = vld [vmem:[#allocation3 + $0x50] ss:$2 sm:$0xff]  ;;  %v2006_v59 = vld [vmem:[#allocation3 + $0x51] ss:$2 sm:$0xff] }
 0x2b2   :  { %v1982_v12 = vld [vmem:[#allocation3 + $0x10] ss:$2 sm:$0xff]  ;;  %v1998_v21 = vld [vmem:[#allocation3 + $0x11] ss:$2 sm:$0xff]  ;;  %v2016_v4 = vmax.f32 %v1990_v33, %v2006_v59 }
 0x2b3   :  { %v2012_v36 = vmax.f32 %v1982_v12, %v1998_v21 }
 0x2b4   :  { %v2606_v38 = vpop.f32.mrb[4].mxu1  ;;  %v2210_v52 = vrot.slane %v2016_v4, 7 }
 0x2b5   :  { %v2570_v58 = vpop.f32.mrb[4].mxu0  ;;  %v1951_v63 = vadd.f32 %v2606_v38, %v4210_v43  ;;  %v1945_v8 = vpop.f32.mrb[5].mxu1  ;;  %v2024_v23 = vrot.slane %v2012_v36, 7 }
 0x2b6   :  { %v1653_v51 = vadd.f32 %v2570_v58, %v4210_v43  ;;  %v1647_v3 = vpop.f32.mrb[5].mxu0  ;;  %v1946_v34 = vadd.f32 %v4210_v43, %v1945_v8  ;;  %v4248_v5 = vsel %vm1389_vm5, %v2209_v40, %v2210_v52 }
 0x2b7   :  { %v1969_v41 = vmax.f32 %v1951_v63, 0.0  ;;  %v1648_v16 = vadd.f32 %v4210_v43, %v1647_v3  ;;  %v4253_v56 = vsel %vm1389_vm5, %v2023_v54, %v2024_v23  ;;  %v2247_v26 = vrot.slane %v4248_v5, 2 }
 0x2b8   :  { %v1671_v24 = vmax.f32 %v1653_v51, 0.0  ;;  %v1968_v22 = vmax.f32 %v1946_v34, 0.0  ;;  %v2061_v18 = vrot.slane %v4253_v56, 2  ;;  %v2040_v50 = vrot.slane %v4253_v56, 1 }
 0x2b9   :  { %1977 = vst.msk [vmem:[#allocation3 + $0x68] sm:$0xff] %vm1508_vm6, %v1969_v41  ;;  %v1670_v46 = vmax.f32 %v1648_v16, 0.0  ;;  %v2248_v48 = vsel %vm343_vm1, %v2246_v45, %v2247_v26  ;;  %v2226_v32 = vrot.slane %v4248_v5, 1 }
 0x2ba   :  { %1679 = vst.msk [vmem:[#allocation3 + $0x28] sm:$0xff] %vm1508_vm6, %v1671_v24  ;;  %1976 = vst.msk [vmem:[#allocation3 + $0x60] sm:$0xff] %vm1508_vm6, %v1968_v22  ;;  %v2062_v39 = vsel %vm343_vm1, %v2060_v37, %v2061_v18  ;;  %2494 = vmatprep.mubr.msk.f32.mxu1 %vm1508_vm6, %v2248_v48  ;;  %v2041_v10 = vsel %vm235_vm0, %v2039_v14, %v2040_v50 }
 0x2bb   :  { %1678 = vst.msk [vmem:[#allocation3 + $0x20] sm:$0xff] %vm1508_vm6, %v1670_v46  ;;  %2489 = vmatprep.mubr.msk.f32.mxu0 %vm1508_vm6, %v2062_v39  ;;  %v2227_v25 = vsel %vm235_vm0, %v2225_v27, %v2226_v32 }
 0x2bc   :  { %v2740_v28 = vpack.i.bf16 %v2227_v25, %v2041_v10 }
 0x2be   :  { %2741 = vrot.lane.b32.xlu0 %v2740_v28, %s2820_s1 }
 0x2c1   :  { %v1992_v60 = vld [vmem:[#allocation3 + $0x60] ss:$2 sm:$0xff]  ;;  %v2008_v2 = vld [vmem:[#allocation3 + $0x61] ss:$2 sm:$0xff] }
 0x2c2   :  { %v1984_v42 = vld [vmem:[#allocation3 + $0x20] ss:$2 sm:$0xff]  ;;  %v2000_v53 = vld [vmem:[#allocation3 + $0x21] ss:$2 sm:$0xff]  ;;  %v2017_v29 = vmax.f32 %v1992_v60, %v2008_v2 }
 0x2c3   :  { %v2013_v55 = vmax.f32 %v1984_v42, %v2000_v53 }
 0x2c4   :  { %v2609_v35 = vpop.f32.mrb[6].mxu1  ;;  %v2212_v47 = vrot.slane %v2017_v29, 7 }
 0x2c5   :  { %v2573_v49 = vpop.f32.mrb[6].mxu0  ;;  %v1961_v31 = vadd.f32 %v2609_v35, %v4210_v43  ;;  %v1955_v11 = vpop.f32.mrb[7].mxu1  ;;  %v2026_v30 = vrot.slane %v2013_v55, 7 }
 0x2c6   :  { %v1663_v57 = vadd.f32 %v2573_v49, %v4210_v43  ;;  %v1657_v20 = vpop.f32.mrb[7].mxu0  ;;  %v1956_v62 = vadd.f32 %v4210_v43, %v1955_v11  ;;  %v4279_v1 = vsel %vm1389_vm5, %v2210_v52, %v2212_v47 }
 0x2c7   :  { %v1971_v61 = vmax.f32 %v1961_v31, 0.0  ;;  %v1658_v19 = vadd.f32 %v4210_v43, %v1657_v20  ;;  %v4283_v44 = vsel %vm1389_vm5, %v2024_v23, %v2026_v30  ;;  %v2228_v17 = vrot.slane %v4279_v1, 1 }
 0x2c8   :  { %v1673_v7 = vmax.f32 %v1663_v57, 0.0  ;;  %v1970_v54 = vmax.f32 %v1956_v62, 0.0  ;;  %v2042_v40 = vrot.slane %v4283_v44, 1  ;;  %v2063_v46 = vrot.slane %v4283_v44, 2 }
 0x2c9   :  { %1979 = vst.msk [vmem:[#allocation3 + $0x78] sm:$0xff] %vm1508_vm6, %v1971_v61  ;;  %v1672_v0 = vmax.f32 %v1658_v19, 0.0  ;;  %v2229_v9 = vsel %vm235_vm0, %v2226_v32, %v2228_v17  ;;  %v2249_v48 = vrot.slane %v4279_v1, 2 }
 0x2ca   :  { %1681 = vst.msk [vmem:[#allocation3 + $0x38] sm:$0xff] %vm1508_vm6, %v1673_v7  ;;  %1978 = vst.msk [vmem:[#allocation3 + $0x70] sm:$0xff] %vm1508_vm6, %v1970_v54  ;;  %v2043_v43 = vsel %vm235_vm0, %v2040_v50, %v2042_v40  ;;  %v2064_v25 = vsel %vm343_vm1, %v2061_v18, %v2063_v46 }
 0x2cb   :  { %1680 = vst.msk [vmem:[#allocation3 + $0x30] sm:$0xff] %vm1508_vm6, %v1672_v0  ;;  %v2745_v33 = vpack.i.bf16 %v2229_v9, %v2043_v43  ;;  %v2250_v28 = vsel %vm343_vm1, %v2247_v26, %v2249_v48 }
 0x2cd   :  { %2746 = vrot.lane.b32.xlu1 %v2745_v33, %s2820_s1 }
 0x2d1   :  { %v1994_v59 = vld [vmem:[#allocation3 + $0x70] ss:$2 sm:$0xff]  ;;  %v2010_v15 = vld [vmem:[#allocation3 + $0x71] ss:$2 sm:$0xff] }
 0x2d2   :  { %v1986_v12 = vld [vmem:[#allocation3 + $0x30] ss:$2 sm:$0xff]  ;;  %v2002_v21 = vld [vmem:[#allocation3 + $0x31] ss:$2 sm:$0xff]  ;;  %v2018_v4 = vmax.f32 %v1994_v59, %v2010_v15 }
 0x2d3   :  { %v2014_v36 = vmax.f32 %v1986_v12, %v2002_v21 }
 0x2d4   :  { %v2214_v38 = vrot.slane %v2018_v4, 7 }
 0x2d5   :  { %v2028_v52 = vrot.slane %v2014_v36, 7 }
 0x2d6   :  { %v2215_v58 = vsel %vm1389_vm5, %v2212_v47, %v2214_v38  ;;  %v2222_v63 = vsel %vm1389_vm5, %v2214_v38, 0.0 }
 0x2d7   :  { %v2029_v8 = vsel %vm1389_vm5, %v2026_v30, %v2028_v52  ;;  %v2036_v23 = vsel %vm1389_vm5, %v2028_v52, 0.0  ;;  %v2230_v37 = vrot.slane %v2215_v58, 1  ;;  %v2232_v45 = vrot.slane %v2222_v63, 1 }
 0x2d8   :  { %v2044_v51 = vrot.slane %v2029_v8, 1  ;;  %v2046_v3 = vrot.slane %v2036_v23, 1  ;;  %v2065_v2 = vrot.slane %v2029_v8, 2  ;;  %v2067_v47 = vrot.slane %v2036_v23, 2 }
 0x2d9   :  { %v2233_v34 = vsel %vm235_vm0, %v2230_v37, %v2232_v45  ;;  %v2231_v14 = vsel %vm235_vm0, %v2228_v17, %v2230_v37  ;;  %v2253_v49 = vrot.slane %v2222_v63, 2 }
 0x2da   :  { %v2047_v41 = vsel %vm235_vm0, %v2044_v51, %v2046_v3  ;;  %v2045_v16 = vsel %vm235_vm0, %v2042_v40, %v2044_v51  ;;  %v2066_v18 = vsel %vm343_vm1, %v2063_v46, %v2065_v2  ;;  %v2068_v20 = vsel %vm343_vm1, %v2065_v2, %v2067_v47 }
 0x2db   :  { %v2755_v24 = vpack.i.bf16 %v2233_v34, %v2047_v41  ;;  %v2750_v22 = vpack.i.bf16 %v2231_v14, %v2045_v16 }
 0x2dd   :  { %2756 = vrot.lane.b32.xlu1 %v2755_v24, %s2820_s1  ;;  %2751 = vrot.lane.b32.xlu0 %v2750_v22, %s2820_s1 }
 0x330   :  { %v2742_v50 = vpop.permute.xlu0 %2741 }
 0x331   :  { %v2744_v27 = vunpack.i.h.bf16 %v2742_v50  ;;  %v2743_v32 = vunpack.i.l.bf16 %v2742_v50 }
 0x333   :  { %v2069_v39 = vsel %vm1508_vm6, %v4237_v6, %v2743_v32  ;;  %v2255_v10 = vsel %vm1508_vm6, %v4240_v13, %v2744_v27  ;;  %v2251_v6 = vrot.slane %v2215_v58, 2 }
 0x334   :  { %2177 = vmatmul.mubr.f32.vlgmr.msra.gmra.mrb[8].mxu0 %v2069_v39  ;;  %2363 = vmatmul.mubr.f32.vlgmr.msra.gmra.mrb[8].mxu1 %v2255_v10 }
 0x335   :  { %2490 = vmatprep.mubr.msk.f32.mxu0 %vm1508_vm6, %v2064_v25  ;;  %2495 = vmatprep.mubr.msk.f32.mxu1 %vm1508_vm6, %v2250_v28  ;;  %v2252_v26 = vsel %vm343_vm1, %v2249_v48, %v2251_v6  ;;  %v2254_v62 = vsel %vm343_vm1, %v2251_v6, %v2253_v49 }
 0x33f   :  { %v2747_v60 = vpop.permute.xlu1 %2746 }
 0x340   :  { %v2749_v42 = vunpack.i.h.bf16 %v2747_v60  ;;  %v2748_v53 = vunpack.i.l.bf16 %v2747_v60 }
 0x342   :  { %v2070_v13 = vsel %vm1508_vm6, %v4253_v56, %v2748_v53  ;;  %v2256_v29 = vsel %vm1508_vm6, %v4248_v5, %v2749_v42 }
 0x343   :  { %2182 = vmatmul.mubr.f32.gmra.mrb[10].mxu0 %v2070_v13  ;;  %2368 = vmatmul.mubr.f32.gmra.mrb[10].mxu1 %v2256_v29 }
 0x344   :  { %2491 = vmatprep.mubr.msk.f32.mxu0 %vm1508_vm6, %v2066_v18  ;;  %2496 = vmatprep.mubr.msk.f32.mxu1 %vm1508_vm6, %v2252_v26 }
 0x34f   :  { %v2757_v55 = vpop.permute.xlu1 %2756  ;;  %v2752_v35 = vpop.permute.xlu0 %2751 }
 0x350   :  { %v2754_v31 = vunpack.i.h.bf16 %v2752_v35  ;;  %v2753_v11 = vunpack.i.l.bf16 %v2752_v35  ;;  %v2759_v56 = vunpack.i.h.bf16 %v2757_v55  ;;  %v2758_v30 = vunpack.i.l.bf16 %v2757_v55 }
 0x352   :  { %v2071_v5 = vsel %vm1508_vm6, %v4283_v44, %v2753_v11  ;;  %v2257_v57 = vsel %vm1508_vm6, %v4279_v1, %v2754_v31  ;;  %v2072_v61 = vsel %vm1508_vm6, %v2029_v8, %v2758_v30  ;;  %v2258_v19 = vsel %vm1508_vm6, %v2215_v58, %v2759_v56  ;;  %v2488_v44 = vld [vmem:[#allocation8] ss:$0 sm:$0xff] }
 0x353   :  { %2187 = vmatmul.mubr.f32.gmra.mrb[12].mxu0 %v2071_v5  ;;  %2373 = vmatmul.mubr.f32.gmra.mrb[12].mxu1 %v2257_v57 }
 0x354   :  { %2492 = vmatprep.mubr.msk.f32.mxu0 %vm1508_vm6, %v2068_v20  ;;  %2497 = vmatprep.mubr.msk.f32.mxu1 %vm1508_vm6, %v2254_v62 }
 0x357   :  { %2192 = vmatmul.mubr.f32.gmra.mrb[14].mxu0 %v2072_v61  ;;  %2378 = vmatmul.mubr.f32.gmra.mrb[14].mxu1 %v2258_v19 }
 0x407   :  { %v2178_v17 = vpop.f32.mrb[8].mxu0  ;;  %v2364_v7 = vpop.f32.mrb[8].mxu1 }
 0x408   :  { %v2179_v1 = vadd.f32 %v2488_v44, %v2178_v17  ;;  %v2365_v54 = vadd.f32 %v2488_v44, %v2364_v7  ;;  %v2180_v40 = vpop.f32.mrb[9].mxu0  ;;  %v2366_v0 = vpop.f32.mrb[9].mxu1 }
 0x40a   :  { %v2197_v9 = vmax.f32 %v2179_v1, 0.0  ;;  %v2383_v43 = vmax.f32 %v2365_v54, 0.0 }
 0x40c   :  { %2201 = vst [vmem:[#allocation4] sm:$0xff] %v2197_v9  ;;  %2387 = vst [vmem:[#allocation4 + $0x20] sm:$0xff] %v2383_v43 }
 0x416   :  { %v2183_v33 = vpop.f32.mrb[10].mxu0  ;;  %v2369_v59 = vpop.f32.mrb[10].mxu1 }
 0x417   :  { %v2184_v15 = vadd.f32 %v2488_v44, %v2183_v33  ;;  %v2370_v12 = vadd.f32 %v2488_v44, %v2369_v59  ;;  %v2185_v21 = vpop.f32.mrb[11].mxu0  ;;  %v2371_v4 = vpop.f32.mrb[11].mxu1 }
 0x419   :  { %v2198_v36 = vmax.f32 %v2184_v15, 0.0  ;;  %v2384_v38 = vmax.f32 %v2370_v12, 0.0 }
 0x41b   :  { %2202 = vst [vmem:[#allocation4 + $0x8] sm:$0xff] %v2198_v36  ;;  %2388 = vst [vmem:[#allocation4 + $0x28] sm:$0xff] %v2384_v38 }
 0x422   :  { %v2391_v52 = vld [vmem:[#allocation4] ss:$2 sm:$0xff]  ;;  %v2399_v58 = vld [vmem:[#allocation4 + $0x1] ss:$2 sm:$0xff] }
 0x423   :  { %v2395_v63 = vld [vmem:[#allocation4 + $0x20] ss:$2 sm:$0xff]  ;;  %v2406_v8 = vmax.f32 %v2391_v52, %v2399_v58  ;;  %v2403_v23 = vld [vmem:[#allocation4 + $0x21] ss:$2 sm:$0xff] }
 0x424   :  { %v2408_v37 = vmax.f32 %v2395_v63, %v2403_v23 }
 0x425   :  { %2410 = vst [vmem:[#allocation5] sm:$0xff] %v2406_v8 }
 0x426   :  { %2412 = vst [vmem:[#allocation5 + $0x10] sm:$0xff] %v2408_v37  ;;  %v2188_v45 = vpop.f32.mrb[12].mxu0  ;;  %v2374_v51 = vpop.f32.mrb[12].mxu1 }
 0x427   :  { %v2189_v3 = vadd.f32 %v2488_v44, %v2188_v45  ;;  %v2375_v34 = vadd.f32 %v2488_v44, %v2374_v51  ;;  %v2190_v14 = vpop.f32.mrb[13].mxu0  ;;  %v2376_v41 = vpop.f32.mrb[13].mxu1 }
 0x429   :  { %v2199_v16 = vmax.f32 %v2189_v3, 0.0  ;;  %v2385_v24 = vmax.f32 %v2375_v34, 0.0 }
 0x42a   :  { %v2193_v22 = vpop.f32.mrb[14].mxu0  ;;  %v2379_v50 = vpop.f32.mrb[14].mxu1 }
 0x42b   :  { %2203 = vst [vmem:[#allocation4 + $0x10] sm:$0xff] %v2199_v16  ;;  %2389 = vst [vmem:[#allocation4 + $0x30] sm:$0xff] %v2385_v24  ;;  %v2194_v46 = vadd.f32 %v2488_v44, %v2193_v22  ;;  %v2380_v48 = vadd.f32 %v2488_v44, %v2379_v50  ;;  %v2195_v27 = vpop.f32.mrb[15].mxu0  ;;  %v2381_v32 = vpop.f32.mrb[15].mxu1 }
 0x42d   :  { %v2200_v39 = vmax.f32 %v2194_v46, 0.0  ;;  %v2386_v10 = vmax.f32 %v2380_v48, 0.0 }
 0x42f   :  { %2204 = vst [vmem:[#allocation4 + $0x18] sm:$0xff] %v2200_v39  ;;  %2390 = vst [vmem:[#allocation4 + $0x38] sm:$0xff] %v2386_v10 }
 0x436   :  { %v2393_v25 = vld [vmem:[#allocation4 + $0x10] ss:$2 sm:$0xff]  ;;  %v2401_v28 = vld [vmem:[#allocation4 + $0x11] ss:$2 sm:$0xff] }
 0x437   :  { %v2397_v60 = vld [vmem:[#allocation4 + $0x30] ss:$2 sm:$0xff]  ;;  %v2407_v2 = vmax.f32 %v2393_v25, %v2401_v28  ;;  %v2405_v6 = vld [vmem:[#allocation4 + $0x31] ss:$2 sm:$0xff] }
 0x438   :  { %v2409_v42 = vmax.f32 %v2397_v60, %v2405_v6 }
 0x439   :  { %2411 = vst [vmem:[#allocation5 + $0x8] sm:$0xff] %v2407_v2 }
 0x43a   :  { %2413 = vst [vmem:[#allocation5 + $0x18] sm:$0xff] %v2409_v42 }
 0x440   :  { %v2414_v53 = vld [vmem:[#allocation5] ss:$2 sm:$0xff]  ;;  %v2418_v13 = vld [vmem:[#allocation5 + $0x1] ss:$2 sm:$0xff] }
 0x441   :  { %v2421_v29 = vadd.f32 %v2418_v13, %v2414_v53  ;;  %v2416_v18 = vld [vmem:[#allocation5 + $0x10] ss:$2 sm:$0xff]  ;;  %v2420_v26 = vld [vmem:[#allocation5 + $0x11] ss:$2 sm:$0xff] }
 0x442   :  { %v2422_v55 = vadd.f32 %v2420_v26, %v2416_v18 }
 0x443   :  { %v2423_v35 = vmul.f32 0.5, %v2421_v29 }
 0x444   :  { %v2424_v47 = vmul.f32 0.5, %v2422_v55 }
 0x445   :  { %2425 = vst [vmem:[%s4349_s7] sm:$0xff] %v2423_v35 }
 0x446   :  { %2426 = vst [vmem:[%s4349_s7 + $0x8] sm:$0xff] %v2424_v47 }
 0x447   :  { %2431 = vsyncpa [#allocation7], 1 }
 0x448   :  { %2432 = vsyncpa [#allocation9], 1 }

// kernel: _lambda_.5
= control target key start
LH: loop header
LB: loop body
LE: loop exit
PB: predicated region body
PF: predicated region fallthrough
CT: control target
= control target key end

     0   :  { %s5445_s0 = inlined_call_operand.vmem [shape: f32[16,64], index: 0, kind: input, shape index: {}]   ;;  %s5446_s1 = inlined_call_operand.vmem [shape: f32[4,64,16], index: 1, kind: input, shape index: {}]   ;;  %s5447_s2 = inlined_call_operand.hbm [shape: f32[4,1,16], index: 2, kind: input, shape index: {}]   ;;  %s5448_s3 = inlined_call_operand.vmem [shape: f32[4,64,16], index: 3, kind: input, shape index: {}]   ;;  %s5449_s4 = inlined_call_operand.hbm [shape: f32[4,1,16], index: 4, kind: input, shape index: {}]   ;;  %s5450_s5 = inlined_call_operand.vmem [shape: f32[4,64,16], index: 5, kind: input, shape index: {}]   ;;  %s5451_s6 = inlined_call_operand.hbm [shape: f32[4,1,16], index: 6, kind: input, shape index: {}]   ;;  %s5452_s7 = inlined_call_operand.hbm [shape: f32[4,16,64], index: 7, kind: input, shape index: {}]   ;;  %s5453_s8 = inlined_call_operand.vmem [shape: f32[1,64], index: 8, kind: input, shape index: {}]   ;;  %s5454_s9 = inlined_call_operand.vmem [shape: f32[1,64], index: 9, kind: input, shape index: {}]   ;;  %s5455_s10 = inlined_call_operand.vmem [shape: f32[1,64], index: 10, kind: input, shape index: {}]   ;;  %s5456_s11 = inlined_call_operand.vmem [shape: f32[64,256], index: 11, kind: input, shape index: {}]   ;;  %s5457_s12 = inlined_call_operand.hbm [shape: f32[1,256], index: 12, kind: input, shape index: {}]   ;;  %s5458_s13 = inlined_call_operand.vmem [shape: f32[256,128], index: 13, kind: input, shape index: {}]   ;;  %s5459_s14 = inlined_call_operand.hbm [shape: f32[1,128], index: 14, kind: input, shape index: {}]   ;;  %s5460_s15 = inlined_call_operand.vmem [shape: f32[128,5], index: 15, kind: input, shape index: {}]   ;;  %s5461_s16 = inlined_call_operand.hbm [shape: f32[1,5], index: 16, kind: input, shape index: {}]   ;;  %s5462_s17 = inlined_call_operand.hbm [shape: f32[2,5], index: 17, kind: output, shape index: {}]  }
   0x1   :  { %5469 = sst [smem:[#allocation20_spill]] %s5445_s0 }
   0x2   :  { %5470 = sst [smem:[#allocation21_spill]] %s5446_s1 }
   0x3   :  { %22 = vsyncpa [#allocation3], 0 }
   0x4   :  { %23 = vsyncpa [#allocation6], 0 }
   0x5   :  { %24 = vsyncpa [#allocation9], 0 }
   0x6   :  { %25 = vsyncpa [#allocation12], 0 }
   0x7   :  { %26 = vsyncpa [#allocation4], 0  ;;  %s4546_s24 = smov [#allocation5]   ;;  %s4547_s26 = smov [#allocation8]  }
   0x8   :  { %s50_s25 = sshll.u32 %s4546_s24, 4  ;;  %s76_s27 = sshll.u32 %s4547_s26, 4  ;;  %s51_s25 = int_to_ptr.vmem [resolvable:$true] %s50_s25  ;;  %s4651_s27 = int_to_ptr.vmem [resolvable:$true] %s76_s27 }
   0x9   :  { %s4360_s0 = scalar_lea.hbm %s5449_s4, 64 }
   0xa   :  { %p4361_p0 = scmp.ne.s32.totalorder %s5449_s4, %s4360_s0  ;;  %p4364_p1 = scmp.lt.u32.totalorder %s4360_s0, %s5449_s4 }
   0xc   :  { %p4366_p2 = pnand %p4364_p1, %p4361_p0 }
   0xe   :  { %4369 = shalt.err (!%p4366_p2)
}
   0xf   :  { %s4370_s20 = scalar_lea.vmem %s51_s25, 64  ;;  %p4375_p4 = scmp.lt.s32.totalorder %s51_s25, %s51_s25 }
  0x10   :  { %p4371_p3 = scmp.ne.s32.totalorder %s51_s25, %s4370_s20  ;;  %p4376_p5 = scmp.lt.s32.totalorder %s4370_s20, %s4370_s20 }
  0x12   :  { %p4377_p6 = por %p4376_p5, %p4375_p4 }
  0x14   :  { %p4378_p7 = pnand %p4377_p6, %p4371_p3 }
  0x16   :  { %4381 = shalt.err (!%p4378_p7)
}
  0x17   :  { %s5465_s21 = smov 16   ;;  %s5467_s22 = smov 1  }
  0x18   :  { %56 = dma.hbm_to_vmem [thread:$0]  %s5449_s4, 64, %s51_s25, [#allocation6], %s5465_s21, %s5465_s21, %s5467_s22  }
  0x19   :  { %s4382_s29 = scalar_lea.hbm %s5452_s7, 1024 }
  0x1a   :  { %p4383_p8 = scmp.ne.s32.totalorder %s5452_s7, %s4382_s29  ;;  %p4386_p9 = scmp.lt.u32.totalorder %s4382_s29, %s5452_s7 }
  0x1c   :  { %p4388_p10 = pnand %p4386_p9, %p4383_p8 }
  0x1e   :  { %4391 = shalt.err (!%p4388_p10)
}
  0x1f   :  { %s4392_s1 = scalar_lea.vmem %s4651_s27, 1024  ;;  %p4397_p12 = scmp.lt.s32.totalorder %s4651_s27, %s4651_s27 }
  0x20   :  { %p4393_p11 = scmp.ne.s32.totalorder %s4651_s27, %s4392_s1  ;;  %p4398_p13 = scmp.lt.s32.totalorder %s4392_s1, %s4392_s1 }
  0x22   :  { %p4399_p0 = por %p4398_p13, %p4397_p12 }
  0x24   :  { %p4400_p1 = pnand %p4399_p0, %p4393_p11 }
  0x26   :  { %4403 = shalt.err (!%p4400_p1)
}
  0x27   :  { %s4550_s4 = smov 128   ;;  %s4551_s25 = smov 8  }
  0x28   :  { %82 = dma.hbm_to_vmem [thread:$0]  %s5452_s7, 1024, %s4651_s27, [#allocation9], %s4550_s4, %s4550_s4, %s4551_s25  }
  0x29   :  { %s4552_s24 = smov [#allocation11]   ;;  %s4553_s28 = smov [#allocation2]  }
  0x2a   :  { %s109_s26 = sshll.u32 %s4552_s24, 4  ;;  %s36_s29 = sshll.u32 %s4553_s28, 4  ;;  %s110_s26 = int_to_ptr.vmem [resolvable:$true] %s109_s26  ;;  %s4685_s29 = int_to_ptr.vmem [resolvable:$true] %s36_s29 }
  0x2b   :  { %s4404_s18 = scalar_lea.hbm %s5459_s14, 16 }
  0x2c   :  { %p4405_p2 = scmp.ne.s32.totalorder %s5459_s14, %s4404_s18  ;;  %p4408_p3 = scmp.lt.u32.totalorder %s4404_s18, %s5459_s14 }
  0x2e   :  { %p4410_p4 = pnand %p4408_p3, %p4405_p2 }
  0x30   :  { %4413 = shalt.err (!%p4410_p4)
}
  0x31   :  { %s4414_s7 = scalar_lea.vmem %s110_s26, 16  ;;  %s4418_s27 = scalar_lea.vmem %s110_s26, 32 }
  0x32   :  { %p4415_p5 = scmp.ne.s32.totalorder %s110_s26, %s4414_s7  ;;  %p4419_p6 = scmp.lt.s32.totalorder %s110_s26, %s110_s26 }
  0x33   :  { %p4420_p7 = scmp.lt.s32.totalorder %s4418_s27, %s4414_s7 }
  0x35   :  { %p4421_p8 = por %p4420_p7, %p4419_p6 }
  0x37   :  { %p4422_p9 = pnand %p4421_p8, %p4415_p5 }
  0x39   :  { %4425 = shalt.err (!%p4422_p9)
}
  0x3a   :  { %112 = dma.hbm_to_vmem [thread:$0]  %s5459_s14, 16, %s110_s26, [#allocation12]  }
  0x3b   :  { %s4426_s24 = scalar_lea.hbm %s5447_s2, 64 }
  0x3c   :  { %p4427_p10 = scmp.ne.s32.totalorder %s5447_s2, %s4426_s24  ;;  %p4430_p11 = scmp.lt.u32.totalorder %s4426_s24, %s5447_s2 }
  0x3e   :  { %p4432_p12 = pnand %p4430_p11, %p4427_p10 }
  0x40   :  { %4435 = shalt.err (!%p4432_p12)
}
  0x41   :  { %s4436_s30 = scalar_lea.vmem %s4685_s29, 64  ;;  %p4441_p0 = scmp.lt.s32.totalorder %s4685_s29, %s4685_s29 }
  0x42   :  { %p4437_p13 = scmp.ne.s32.totalorder %s4685_s29, %s4436_s30  ;;  %p4442_p1 = scmp.lt.s32.totalorder %s4436_s30, %s4436_s30 }
  0x44   :  { %p4443_p2 = por %p4442_p1, %p4441_p0 }
  0x46   :  { %p4444_p3 = pnand %p4443_p2, %p4437_p13 }
  0x48   :  { %4447 = shalt.err (!%p4444_p3)
}
  0x49   :  { %s5471_s14 = smov 1   ;;  %s5472_s26 = smov 16  }
  0x4a   :  { %42 = dma.hbm_to_vmem [thread:$0]  %s5447_s2, 64, %s4685_s29, [#allocation3], %s5472_s26, %s5472_s26, %s5471_s14  }
  0x4b   :  { %s4554_s1 = smov [#allocation7]   ;;  %s4555_s27 = smov [#allocation10]  }
  0x4c   :  { %s64_s7 = sshll.u32 %s4554_s1, 4  ;;  %s97_s4 = sshll.u32 %s4555_s27, 4  ;;  %s65_s7 = int_to_ptr.vmem [resolvable:$true] %s64_s7  ;;  %s98_s4 = int_to_ptr.vmem [resolvable:$true] %s97_s4 }
  0x4d   :  { %s4448_s23 = scalar_lea.hbm %s5451_s6, 64 }
  0x4e   :  { %p4449_p4 = scmp.ne.s32.totalorder %s5451_s6, %s4448_s23  ;;  %p4452_p5 = scmp.lt.u32.totalorder %s4448_s23, %s5451_s6 }
  0x50   :  { %p4454_p6 = pnand %p4452_p5, %p4449_p4 }
  0x52   :  { %4457 = shalt.err (!%p4454_p6)
}
  0x53   :  { %s4458_s2 = scalar_lea.vmem %s65_s7, 64  ;;  %p4463_p8 = scmp.lt.s32.totalorder %s65_s7, %s65_s7 }
  0x54   :  { %p4459_p7 = scmp.ne.s32.totalorder %s65_s7, %s4458_s2  ;;  %p4464_p9 = scmp.lt.s32.totalorder %s4458_s2, %s4458_s2 }
  0x56   :  { %p4465_p10 = por %p4464_p9, %p4463_p8 }
  0x58   :  { %p4466_p11 = pnand %p4465_p10, %p4459_p7 }
  0x5a   :  { %4469 = shalt.err (!%p4466_p11)
}
  0x5b   :  { %70 = dma.hbm_to_vmem [thread:$0]  %s5451_s6, 64, %s65_s7, [#allocation6], %s5472_s26, %s5472_s26, %s5471_s14  }
  0x5c   :  { %s4470_s19 = scalar_lea.hbm %s5457_s12, 32 }
  0x5d   :  { %p4471_p12 = scmp.ne.s32.totalorder %s5457_s12, %s4470_s19  ;;  %p4474_p13 = scmp.lt.u32.totalorder %s4470_s19, %s5457_s12 }
  0x5f   :  { %p4476_p0 = pnand %p4474_p13, %p4471_p12 }
  0x61   :  { %4479 = shalt.err (!%p4476_p0)
}
  0x62   :  { %s4480_s23 = scalar_lea.vmem %s98_s4, 32  ;;  %p4485_p2 = scmp.lt.s32.totalorder %s98_s4, %s98_s4 }
  0x63   :  { %p4481_p1 = scmp.ne.s32.totalorder %s98_s4, %s4480_s23  ;;  %p4486_p3 = scmp.lt.s32.totalorder %s4480_s23, %s4480_s23 }
  0x65   :  { %p4487_p4 = por %p4486_p3, %p4485_p2 }
  0x67   :  { %p4488_p5 = pnand %p4487_p4, %p4481_p1 }
  0x69   :  { %4491 = shalt.err (!%p4488_p5)
}
  0x6a   :  { %100 = dma.hbm_to_vmem [thread:$0]  %s5457_s12, 32, %s98_s4, [#allocation9]  }
  0x6b   :  { %s4556_s26 = smov [#allocation13]   ;;  %s4492_s22 = scalar_lea.hbm %s5461_s16, 16 }
  0x6c   :  { %s121_s7 = sshll.u32 %s4556_s26, 4  ;;  %p4493_p6 = scmp.ne.s32.totalorder %s5461_s16, %s4492_s22  ;;  %s122_s7 = int_to_ptr.vmem [resolvable:$true] %s121_s7 }
  0x6d   :  { %p4496_p7 = scmp.lt.u32.totalorder %s4492_s22, %s5461_s16 }
  0x6f   :  { %p4498_p8 = pnand %p4496_p7, %p4493_p6 }
  0x71   :  { %4501 = shalt.err (!%p4498_p8)
}
  0x72   :  { %s4502_s30 = scalar_lea.vmem %s122_s7, 16  ;;  %s4506_s12 = scalar_lea.vmem %s122_s7, 32 }
  0x73   :  { %p4503_p9 = scmp.ne.s32.totalorder %s122_s7, %s4502_s30  ;;  %p4507_p10 = scmp.lt.s32.totalorder %s122_s7, %s122_s7 }
  0x74   :  { %p4508_p11 = scmp.lt.s32.totalorder %s4506_s12, %s4502_s30 }
  0x76   :  { %p4509_p12 = por %p4508_p11, %p4507_p10 }
  0x78   :  { %p4510_p13 = pnand %p4509_p12, %p4503_p9 }
  0x7a   :  { %4513 = shalt.err (!%p4510_p13)
}
  0x7b   :  { %124 = dma.hbm_to_vmem [thread:$0]  %s5461_s16, 16, %s122_s7, [#allocation12]  }
  0x7c   :  { %4536 = dma.done.wait [#allocation3], 64  }
  0x7d   :  { %4537 = vsyncadd [#allocation3], 4294967232 }
  0x7e   :  { %4538 = dma.done.wait [#allocation6], 128  }
  0x7f   :  { %4539 = vsyncadd [#allocation6], 4294967168 }
  0x80   :  { %4540 = dma.done.wait [#allocation9], 1056  }
  0x81   :  { %4541 = vsyncadd [#allocation9], 4294966240 }
  0x82   :  { %4542 = dma.done.wait [#allocation12], 32  }
  0x83   :  { %4543 = vsyncadd [#allocation12], 4294967264  ;;  %v245_v0 = vld [vmem:[%s5448_s3] sm:$0xff]  ;;  %v246_v1 = vld [vmem:[%s5448_s3 + $0x8] sm:$0xff]  ;;  %s5473_s6 = sld [smem:[#allocation21_spill]]  ;;  %vm163_vm0 = vcmask 523264  }
  0x84   :  { %v4037_v3 = vpack.c.bf16 %v246_v1, %v245_v0  ;;  %v247_v5 = vld [vmem:[%s5448_s3 + $0x10] sm:$0xff]  ;;  %v248_v6 = vld [vmem:[%s5448_s3 + $0x18] sm:$0xff]  ;;  %v249_v11 = vld [vmem:[%s5448_s3 + $0x20] sm:$0xff]  ;;  %s5474_s23 = sld [smem:[#allocation20_spill]]  ;;  %v4557_v38 = vmov 0.0   ;;  %vm4558_vm1 = vmmov 0  }
  0x85   :  { %v4041_v8 = vpack.c.bf16 %v248_v6, %v247_v5  ;;  %v250_v13 = vld [vmem:[%s5448_s3 + $0x28] sm:$0xff]  ;;  %v251_v19 = vld [vmem:[%s5448_s3 + $0x30] sm:$0xff]  ;;  %v252_v20 = vld [vmem:[%s5448_s3 + $0x38] sm:$0xff]  ;;  %vm425_vm2 = vcmask 130048   ;;  %vm503_vm3 = vcmask 64512   ;;  %vm2955_vm4 = vcmask 1040384  }
  0x86   :  { %4038 = vmatprep.subr.bf16.mxu1 %v4037_v3  ;;  %v4045_v16 = vpack.c.bf16 %v250_v13, %v249_v11  ;;  %v4049_v23 = vpack.c.bf16 %v252_v20, %v251_v19  ;;  %v335_v25 = vld [vmem:[%s5450_s5] sm:$0xff]  ;;  %v336_v26 = vld [vmem:[%s5450_s5 + $0x8] sm:$0xff]  ;;  %v337_v28 = vld [vmem:[%s5450_s5 + $0x10] sm:$0xff]  ;;  %s4560_s0 = smov [#allocation14]   ;;  %vm3264_vm5 = vcmask 33792  }
  0x87   :  { %4040 = vmatpush3.bf16.msra.mxu1 %v4037_v3  ;;  %v4053_v27 = vpack.c.bf16 %v336_v26, %v335_v25  ;;  %v338_v29 = vld [vmem:[%s5450_s5 + $0x18] sm:$0xff]  ;;  %v339_v32 = vld [vmem:[%s5450_s5 + $0x20] sm:$0xff]  ;;  %v340_v33 = vld [vmem:[%s5450_s5 + $0x28] sm:$0xff]  ;;  %s3272_s30 = sshll.u32 %s4560_s0, 4  ;;  %s3273_s30 = int_to_ptr.vmem [resolvable:$true] %s3272_s30 }
  0x88   :  { %4042 = vmatprep.subr.bf16.mxu1 %v4041_v8  ;;  %v4057_v31 = vpack.c.bf16 %v338_v29, %v337_v28  ;;  %v4061_v34 = vpack.c.bf16 %v340_v33, %v339_v32  ;;  %v341_v35 = vld [vmem:[%s5450_s5 + $0x30] sm:$0xff]  ;;  %v342_v36 = vld [vmem:[%s5450_s5 + $0x38] sm:$0xff]  ;;  %v3287_v39 = vld [vmem:[#allocation5] ss:$0 sm:$0xff]  ;;  %p4519_p1 = scmp.lt.s32.totalorder %s3273_s30, %s3273_s30 }
  0x89   :  { %v148_v2 = vld [vmem:[%s5473_s6] sm:$0xff]  ;;  %v149_v4 = vld [vmem:[%s5473_s6 + $0x8] sm:$0xff]  ;;  %v150_v9 = vld [vmem:[%s5473_s6 + $0x10] sm:$0xff]  ;;  %v4065_v37 = vpack.c.bf16 %v342_v36, %v341_v35 }
  0x8a   :  { %v4021_v7 = vpack.c.bf16 %v149_v4, %v148_v2  ;;  %v151_v10 = vld [vmem:[%s5473_s6 + $0x18] sm:$0xff]  ;;  %v152_v14 = vld [vmem:[%s5473_s6 + $0x20] sm:$0xff]  ;;  %v153_v15 = vld [vmem:[%s5473_s6 + $0x28] sm:$0xff] }
  0x8b   :  { %v4025_v12 = vpack.c.bf16 %v151_v10, %v150_v9  ;;  %v4797_v17 = vld [vmem:[%s5474_s23] sm:$0xff]  ;;  %v4029_v18 = vpack.c.bf16 %v153_v15, %v152_v14  ;;  %v154_v21 = vld [vmem:[%s5473_s6 + $0x30] sm:$0xff]  ;;  %v155_v22 = vld [vmem:[%s5473_s6 + $0x38] sm:$0xff]  ;;  %4044 = vmatpush3.bf16.msra.mxu1 %v4041_v8 }
  0x8c   :  { %4022 = vmatprep.subr.bf16.mxu0 %v4021_v7  ;;  %3685 = vmatprep.mubr.msk.f32.mxu1 %vm163_vm0, %v4797_v17  ;;  %v4033_v24 = vpack.c.bf16 %v155_v22, %v154_v21  ;;  %v4830_v30 = vld [vmem:[%s5474_s23 + $0x8] sm:$0xff]  ;;  %v3284_v40 = vld [vmem:[#allocation2] ss:$0 sm:$0xff]  ;;  %v3301_v20 = vld [vmem:[%s5473_s6 + $0x50] sm:$0xff] }
  0x8d   :  { %4024 = vmatpush3.bf16.msra.mxu0 %v4021_v7  ;;  %3666 = vmatprep.mubr.msk.f32.mxu0 %vm163_vm0, %v4797_v17  ;;  %v3290_v49 = vld [vmem:[#allocation7] ss:$0 sm:$0xff]  ;;  %v3310_v13 = vld [vmem:[%s5448_s3 + $0x40] sm:$0xff]  ;;  %v3302_v21 = vld [vmem:[%s5473_s6 + $0x58] sm:$0xff] }
  0x8e   :  { %4026 = vmatprep.subr.bf16.mxu0 %v4025_v12  ;;  %4046 = vmatprep.subr.bf16.mxu1 %v4045_v16  ;;  %v3311_v14 = vld [vmem:[%s5448_s3 + $0x48] sm:$0xff]  ;;  %v4073_v22 = vpack.c.bf16 %v3302_v21, %v3301_v20  ;;  %v3305_v26 = vld [vmem:[%s5473_s6 + $0x70] sm:$0xff]  ;;  %v3313_v32 = vld [vmem:[%s5448_s3 + $0x58] sm:$0xff] }
  0x8f   :  { %4048 = vmatpush3.bf16.msra.mxu1 %v4045_v16  ;;  %v4085_v15 = vpack.c.bf16 %v3311_v14, %v3310_v13  ;;  %v3299_v16 = vld [vmem:[%s5473_s6 + $0x40] sm:$0xff]  ;;  %v3329_v14 = vld [vmem:[#allocation7 + $0x1] ss:$0 sm:$0xff] }
  0x90   :  { %4050 = vmatprep.subr.bf16.mxu1 %v4049_v23  ;;  %v3314_v36 = vld [vmem:[%s5448_s3 + $0x60] sm:$0xff] }
  0x91   :  { %4028 = vmatpush3.bf16.msra.mxu0 %v4025_v12 }
  0x92   :  { %4030 = vmatprep.subr.bf16.mxu0 %v4029_v18 }
  0x93   :  { %4052 = vmatpush3.bf16.msra.mxu1 %v4049_v23  ;;  %v3303_v23 = vld [vmem:[%s5473_s6 + $0x60] sm:$0xff] }
  0x94   :  { %3712 = vmatprep.subr.mxu1 %v4557_v38 }
  0x95   :  { %4032 = vmatpush3.bf16.msra.mxu0 %v4029_v18  ;;  %v3300_v18 = vld [vmem:[%s5473_s6 + $0x48] sm:$0xff] }
  0x96   :  { %4034 = vmatprep.subr.bf16.mxu0 %v4033_v24  ;;  %3686 = vmatmul.mubr.msk.f32.vlgmr.msra.gmra.mrb[0].mxu1 %vm163_vm0, %v4830_v30  ;;  %v4069_v19 = vpack.c.bf16 %v3300_v18, %v3299_v16 }
  0x97   :  { %3714 = vmatprep.mubr.msk.f32.mxu1 %vm4558_vm1, %v4557_v38 }
  0x99   :  { %4036 = vmatpush3.bf16.msra.mxu0 %v4033_v24  ;;  %v3304_v24 = vld [vmem:[%s5473_s6 + $0x68] sm:$0xff] }
  0x9a   :  { %4054 = vmatprep.subr.bf16.mxu0 %v4053_v27  ;;  %v4077_v25 = vpack.c.bf16 %v3304_v24, %v3303_v23 }
  0x9c   :  { %3667 = vmatmul.mubr.msk.f32.vlgmr.msra.gmra.mrb[0].mxu0 %vm163_vm0, %v4830_v30 }
  0x9d   :  { %4056 = vmatpush3.bf16.msra.mxu0 %v4053_v27  ;;  %3704 = vmatprep.mubr.msk.f32.mxu0 %vm163_vm0, %v4797_v17  ;;  %v3306_v27 = vld [vmem:[%s5473_s6 + $0x78] sm:$0xff] }
  0x9e   :  { %4058 = vmatprep.subr.bf16.mxu0 %v4057_v31  ;;  %v4081_v28 = vpack.c.bf16 %v3306_v27, %v3305_v26 }
  0xa1   :  { %4060 = vmatpush3.bf16.msra.mxu0 %v4057_v31  ;;  %v3312_v31 = vld [vmem:[%s5448_s3 + $0x50] sm:$0xff] }
  0xa2   :  { %4062 = vmatprep.subr.bf16.mxu0 %v4061_v34  ;;  %v4089_v35 = vpack.c.bf16 %v3313_v32, %v3312_v31 }
  0xa5   :  { %4064 = vmatpush3.bf16.msra.mxu0 %v4061_v34 }
  0xa6   :  { %4066 = vmatprep.subr.bf16.mxu0 %v4065_v37 }
  0xa9   :  { %4068 = vmatpush3.bf16.msra.mxu0 %v4065_v37  ;;  %v3315_v37 = vld [vmem:[%s5448_s3 + $0x68] sm:$0xff] }
  0xaa   :  { %3707 = vmatprep.subr.mxu0 %v4557_v38 }
  0xac   :  { %3705 = vmatmul.mubr.msk.f32.vlgmr.msra.gmra.mrb[2].mxu0 %vm163_vm0, %v4830_v30 }
  0xad   :  { %3709 = vmatprep.mubr.msk.f32.mxu0 %vm4558_vm1, %v4557_v38 }
 0x169   :  { %v3687_v41 = vpop.f32.mrb[0].mxu1 }
 0x16a   :  { %v332_v42 = vadd.f32 %v3687_v41, %v3287_v39  ;;  %v326_v43 = vpop.f32.mrb[1].mxu1  ;;  %v3317_v41 = vld [vmem:[%s5448_s3 + $0x78] sm:$0xff] }
 0x16b   :  { %v327_v45 = vadd.f32 %v3287_v39, %v326_v43  ;;  %v4093_v39 = vpack.c.bf16 %v3315_v37, %v3314_v36 }
 0x16d   :  { %3708 = vmatpush3.xpose.msk.msra.mxu0 %vm425_vm2, %v327_v45 }
 0x16e   :  { %4070 = vmatprep.subr.bf16.mxu0 %v4069_v19 }
 0x16f   :  { %v3668_v44 = vpop.f32.mrb[0].mxu0 }
 0x170   :  { %v242_v46 = vadd.f32 %v3668_v44, %v3284_v40  ;;  %v236_v47 = vpop.f32.mrb[1].mxu0  ;;  %v3307_v44 = vld [vmem:[#allocation2 + $0x1] ss:$0 sm:$0xff] }
 0x171   :  { %v237_v48 = vadd.f32 %v3284_v40, %v236_v47  ;;  %v3316_v40 = vld [vmem:[%s5448_s3 + $0x70] sm:$0xff] }
 0x173   :  { %3710 = vmatmul.mubr.msk.f32.vlgmr.msra.gmra.mrb[4].mxu0 %vm425_vm2, %v237_v48 }
 0x174   :  { %3743 = vmatprep.mubr.msk.f32.mxu0 %vm163_vm0, %v4797_v17  ;;  %4072 = vmatpush3.bf16.msra.mxu0 %v4069_v19 }
 0x175   :  { %4074 = vmatprep.subr.bf16.mxu0 %v4073_v22 }
 0x178   :  { %4076 = vmatpush3.bf16.msra.mxu0 %v4073_v22 }
 0x179   :  { %4078 = vmatprep.subr.bf16.mxu0 %v4077_v25 }
 0x17c   :  { %4080 = vmatpush3.bf16.msra.mxu0 %v4077_v25 }
 0x17d   :  { %4082 = vmatprep.subr.bf16.mxu0 %v4081_v28 }
 0x17f   :  { %v3706_v50 = vpop.f32.mrb[2].mxu0 }
 0x180   :  { %v422_v51 = vadd.f32 %v3706_v50, %v3290_v49  ;;  %v416_v52 = vpop.f32.mrb[3].mxu0  ;;  %4084 = vmatpush3.bf16.msra.mxu0 %v4081_v28 }
 0x181   :  { %v417_v53 = vadd.f32 %v3290_v49, %v416_v52  ;;  %v3318_v49 = vld [vmem:[#allocation5 + $0x1] ss:$0 sm:$0xff] }
 0x183   :  { %3713 = vmatpush3.msra.mxu1 %v417_v53  ;;  %3744 = vmatmul.mubr.msk.f32.vlgmr.msra.gmra.mrb[6].mxu0 %vm163_vm0, %v4830_v30 }
 0x184   :  { %3717 = vmatprep.subr.mxu1 %v4557_v38  ;;  %3781 = vmatprep.mubr.msk.f32.mxu0 %vm163_vm0, %v4797_v17 }
 0x246   :  { %v498_v54 = vpop.f32.mrb[4].mxu0 }
 0x247   :  { %v502_v55 = vmul.f32 0.25, %v498_v54  ;;  %v3711_v56 = vpop.f32.mrb[5].mxu0 }
 0x248   :  { %v3322_v56 = vld [vmem:[%s5450_s5 + $0x48] sm:$0xff] }
 0x249   :  { %v504_v57 = vsel %vm503_vm3, %v502_v55, -inf }
 0x24a   :  { %505 = vmax.xlane.f32.xlu0 %v504_v57  ;;  %v3323_v57 = vld [vmem:[%s5450_s5 + $0x50] sm:$0xff] }
 0x256   :  { %v3745_v43 = vpop.f32.mrb[6].mxu0 }
 0x257   :  { %v840_v45 = vadd.f32 %v3745_v43, %v3307_v44 }
 0x2d7   :  { %v506_v58 = vpop.xlane.xlu0 %505 }
 0x2d8   :  { %v507_v59 = vsub.f32 %v502_v55, %v506_v58  ;;  %v3321_v55 = vld [vmem:[%s5450_s5 + $0x40] sm:$0xff] }
 0x2d9   :  { %v4101_v58 = vpack.c.bf16 %v3322_v56, %v3321_v55  ;;  %v3349_v55 = vld [vmem:[%s5473_s6 + $0xb8] sm:$0xff] }
 0x2da   :  { %v508_v60 = vmul.f32 1.442695, %v507_v59  ;;  %v3324_v59 = vld [vmem:[%s5450_s5 + $0x58] sm:$0xff] }
 0x2db   :  { %4102 = vmatprep.subr.bf16.mxu0 %v4101_v58 }
 0x2dc   :  { %4322 = vpow2.f32 %v508_v60  ;;  %v4105_v60 = vpack.c.bf16 %v3324_v59, %v3323_v57  ;;  %4104 = vmatpush3.bf16.msra.mxu0 %v4101_v58  ;;  %v3353_v57 = vld [vmem:[%s5448_s3 + $0x80] sm:$0xff]  ;;  %v3354_v58 = vld [vmem:[%s5448_s3 + $0x88] sm:$0xff] }
 0x2dd   :  { %v4141_v59 = vpack.c.bf16 %v3354_v58, %v3353_v57 }
 0x2de   :  { %4106 = vmatprep.subr.bf16.mxu0 %v4105_v60 }
 0x2e0   :  { %4108 = vmatpush3.bf16.msra.mxu0 %v4105_v60 }
 0x2e6   :  { %v4323_v61 = vpop.eup %4322 }
 0x2e7   :  { %v510_v62 = vsel %vm503_vm3, %v4323_v61, 0.0 }
 0x2e8   :  { %511 = vadd.xlane.f32.xlu0 %v510_v62  ;;  %v3326_v62 = vld [vmem:[%s5450_s5 + $0x68] sm:$0xff] }
 0x375   :  { %v512_v63 = vpop.xlane.xlu0 %511 }
 0x376   :  { %4324 = vrcp.f32 %v512_v63 }
 0x380   :  { %v4325_v0 = vpop.eup %4324 }
 0x381   :  { %v514_v1 = vmul.f32 %v4325_v0, %v4323_v61  ;;  %v3325_v61 = vld [vmem:[%s5450_s5 + $0x60] sm:$0xff]  ;;  %v3327_v0 = vld [vmem:[%s5450_s5 + $0x70] sm:$0xff] }
 0x382   :  { %v4109_v63 = vpack.c.bf16 %v3326_v62, %v3325_v61  ;;  %v3355_v62 = vld [vmem:[%s5448_s3 + $0x90] sm:$0xff] }
 0x383   :  { %3715 = vmatmul.mubr.msk.f32.vlgmr.msra.gmra.mrb[2].mxu1 %vm503_vm3, %v514_v1  ;;  %v3328_v1 = vld [vmem:[%s5450_s5 + $0x78] sm:$0xff] }
 0x384   :  { %3718 = vmatpush3.xpose.msk.msra.mxu1 %vm425_vm2, %v332_v42  ;;  %3719 = vmatprep.mubr.msk.f32.mxu1 %vm4558_vm1, %v4557_v38  ;;  %v4097_v42 = vpack.c.bf16 %v3317_v41, %v3316_v40  ;;  %v749_v41 = vld [vmem:[#allocation8] sm:$0xff] }
 0x385   :  { %3722 = vmatprep.subr.mxu1 %v4557_v38  ;;  %4110 = vmatprep.subr.bf16.mxu0 %v4109_v63 }
 0x386   :  { %4112 = vmatpush3.bf16.msra.mxu0 %v4109_v63  ;;  %v3356_v63 = vld [vmem:[%s5448_s3 + $0x98] sm:$0xff] }
 0x387   :  { %3720 = vmatmul.mubr.msk.f32.vlgmr.msra.gmra.mrb[4].mxu1 %vm425_vm2, %v242_v46  ;;  %v834_v46 = vpop.f32.mrb[7].mxu0 }
 0x388   :  { %3723 = vmatpush3.msra.mxu1 %v422_v51  ;;  %3724 = vmatprep.mubr.msk.f32.mxu1 %vm4558_vm1, %v4557_v38  ;;  %v835_v54 = vadd.f32 %v3307_v44, %v834_v46  ;;  %v3342_v44 = vld [vmem:[%s5473_s6 + $0x80] sm:$0xff] }
 0x389   :  { %4086 = vmatprep.subr.bf16.mxu1 %v4085_v15 }
 0x456   :  { %v4873_v2 = vpop.f32.mrb[2].mxu1 }
 0x457   :  { %v3716_v3 = vpop.f32.mrb[3].mxu1 }
 0x458   :  { %v4113_v3 = vpack.c.bf16 %v3328_v1, %v3327_v0  ;;  %v4145_v0 = vpack.c.bf16 %v3356_v63, %v3355_v62  ;;  %v3357_v1 = vld [vmem:[%s5448_s3 + $0xa0] sm:$0xff] }
 0x45a   :  { %v660_v4 = vpop.f32.mrb[4].mxu1  ;;  %4114 = vmatprep.subr.bf16.mxu0 %v4113_v3 }
 0x45b   :  { %v664_v5 = vmul.f32 0.25, %v660_v4  ;;  %v3721_v6 = vpop.f32.mrb[5].mxu1  ;;  %4116 = vmatpush3.bf16.msra.mxu0 %v4113_v3  ;;  %v3358_v3 = vld [vmem:[%s5448_s3 + $0xa8] sm:$0xff] }
 0x45d   :  { %v665_v7 = vsel %vm503_vm3, %v664_v5, -inf }
 0x45e   :  { %666 = vmax.xlane.f32.xlu1 %v665_v7  ;;  %3782 = vmatmul.mubr.msk.f32.vlgmr.msra.gmra.mrb[8].mxu0 %vm163_vm0, %v4830_v30 }
 0x4eb   :  { %v667_v8 = vpop.xlane.xlu1 %666 }
 0x4ec   :  { %v668_v9 = vsub.f32 %v664_v5, %v667_v8 }
 0x4ee   :  { %v669_v10 = vmul.f32 1.442695, %v668_v9 }
 0x4f0   :  { %4326 = vpow2.f32 %v669_v10 }
 0x4fa   :  { %v4327_v11 = vpop.eup %4326 }
 0x4fb   :  { %v671_v12 = vsel %vm503_vm3, %v4327_v11, 0.0 }
 0x4fc   :  { %672 = vadd.xlane.f32.xlu1 %v671_v12 }
 0x531   :  { %v3783_v13 = vpop.f32.mrb[8].mxu0 }
 0x532   :  { %v1024_v16 = vadd.f32 %v3783_v13, %v3329_v14 }
 0x589   :  { %v673_v29 = vpop.xlane.xlu1 %672 }
 0x58a   :  { %4328 = vrcp.f32 %v673_v29 }
 0x594   :  { %v4329_v33 = vpop.eup %4328 }
 0x595   :  { %v675_v34 = vmul.f32 %v4329_v33, %v4327_v11 }
 0x597   :  { %3725 = vmatmul.mubr.msk.f32.vlgmr.msra.gmra.mrb[6].mxu1 %vm503_vm3, %v675_v34  ;;  %v1350_v34 = vld [vmem:[#allocation8 + $0x10] sm:$0xff] }
 0x598   :  { %4088 = vmatpush3.bf16.msra.mxu1 %v4085_v15  ;;  %3762 = vmatprep.mubr.msk.f32.mxu1 %vm163_vm0, %v4797_v17  ;;  %v1018_v15 = vpop.f32.mrb[9].mxu0 }
 0x599   :  { %4090 = vmatprep.subr.bf16.mxu1 %v4089_v35  ;;  %v1019_v18 = vadd.f32 %v3329_v14, %v1018_v15 }
 0x59c   :  { %4092 = vmatpush3.bf16.msra.mxu1 %v4089_v35  ;;  %v1351_v35 = vld [vmem:[#allocation8 + $0x18] sm:$0xff] }
 0x59d   :  { %4094 = vmatprep.subr.bf16.mxu1 %v4093_v39  ;;  %v4117_v36 = vpack.c.bf16 %v1351_v35, %v1350_v34 }
 0x59f   :  { %4118 = vmatprep.subr.bf16.mxu0 %v4117_v36 }
 0x5a0   :  { %4096 = vmatpush3.bf16.msra.mxu1 %v4093_v39  ;;  %4120 = vmatpush3.bf16.msra.mxu0 %v4117_v36 }
 0x5a1   :  { %4098 = vmatprep.subr.bf16.mxu1 %v4097_v42 }
 0x5a4   :  { %4100 = vmatpush3.bf16.msra.mxu1 %v4097_v42  ;;  %v750_v42 = vld [vmem:[#allocation8 + $0x8] sm:$0xff] }
 0x5a5   :  { %3784 = vmatprep.subr.mxu1 %v4557_v38  ;;  %v4121_v43 = vpack.c.bf16 %v750_v42, %v749_v41  ;;  %v3372_v41 = vld [vmem:[#allocation7 + $0x2] ss:$0 sm:$0xff] }
 0x5a7   :  { %3763 = vmatmul.mubr.msk.f32.vlgmr.msra.gmra.mrb[8].mxu1 %vm163_vm0, %v4830_v30  ;;  %4122 = vmatprep.subr.bf16.mxu0 %v4121_v43 }
 0x5a8   :  { %3786 = vmatprep.mubr.msk.f32.mxu1 %vm4558_vm1, %v4557_v38 }
 0x66a   :  { %v4937_v47 = vpop.f32.mrb[6].mxu1 }
 0x66b   :  { %v3726_v48 = vpop.f32.mrb[7].mxu1 }
 0x66c   :  { %v3344_v48 = vld [vmem:[%s5473_s6 + $0x90] sm:$0xff] }
 0x67a   :  { %v3764_v50 = vpop.f32.mrb[8].mxu1 }
 0x67b   :  { %v932_v51 = vadd.f32 %v3764_v50, %v3318_v49  ;;  %v926_v52 = vpop.f32.mrb[9].mxu1 }
 0x67c   :  { %v927_v53 = vadd.f32 %v3318_v49, %v926_v52  ;;  %v3345_v49 = vld [vmem:[%s5473_s6 + $0x98] sm:$0xff]  ;;  %v3347_v52 = vld [vmem:[%s5473_s6 + $0xa8] sm:$0xff] }
 0x67d   :  { %v4129_v50 = vpack.c.bf16 %v3345_v49, %v3344_v48 }
 0x67e   :  { %3785 = vmatpush3.xpose.msk.msra.mxu1 %vm425_vm2, %v927_v53 }
 0x67f   :  { %3789 = vmatprep.subr.mxu1 %v4557_v38 }
 0x681   :  { %3787 = vmatmul.mubr.msk.f32.vlgmr.msra.gmra.mrb[10].mxu1 %vm425_vm2, %v835_v54  ;;  %v3348_v54 = vld [vmem:[%s5473_s6 + $0xb0] sm:$0xff] }
 0x682   :  { %3791 = vmatprep.mubr.msk.f32.mxu1 %vm4558_vm1, %v4557_v38  ;;  %3790 = vmatpush3.msra.mxu1 %v1019_v18  ;;  %v4137_v56 = vpack.c.bf16 %v3349_v55, %v3348_v54  ;;  %v3365_v18 = vld [vmem:[%s5450_s5 + $0x88] sm:$0xff] }
 0x683   :  { %3794 = vmatprep.subr.mxu1 %v4557_v38 }
 0x754   :  { %v1099_v4 = vpop.f32.mrb[10].mxu1 }
 0x755   :  { %v1103_v5 = vmul.f32 0.25, %v1099_v4  ;;  %v3788_v6 = vpop.f32.mrb[11].mxu1  ;;  %v3359_v4 = vld [vmem:[%s5448_s3 + $0xb0] sm:$0xff] }
 0x757   :  { %v1104_v7 = vsel %vm503_vm3, %v1103_v5, -inf }
 0x758   :  { %1105 = vmax.xlane.f32.xlu0 %v1104_v7  ;;  %v3350_v7 = vld [vmem:[#allocation2 + $0x2] ss:$0 sm:$0xff] }
 0x7e5   :  { %v1106_v8 = vpop.xlane.xlu0 %1105 }
 0x7e6   :  { %v1107_v9 = vsub.f32 %v1103_v5, %v1106_v8  ;;  %v3360_v5 = vld [vmem:[%s5448_s3 + $0xb8] sm:$0xff] }
 0x7e7   :  { %v4153_v6 = vpack.c.bf16 %v3360_v5, %v3359_v4  ;;  %v3383_v5 = vld [vmem:[%s5473_s6 + $0xc0] sm:$0xff] }
 0x7e8   :  { %v1108_v10 = vmul.f32 1.442695, %v1107_v9 }
 0x7ea   :  { %4330 = vpow2.f32 %v1108_v10  ;;  %v3361_v10 = vld [vmem:[#allocation5 + $0x2] ss:$0 sm:$0xff] }
 0x7f4   :  { %v4331_v11 = vpop.eup %4330 }
 0x7f5   :  { %v1110_v12 = vsel %vm503_vm3, %v4331_v11, 0.0 }
 0x7f6   :  { %1111 = vadd.xlane.f32.xlu1 %v1110_v12 }
 0x883   :  { %v1112_v19 = vpop.xlane.xlu1 %1111 }
 0x884   :  { %4332 = vrcp.f32 %v1112_v19  ;;  %v3366_v19 = vld [vmem:[%s5450_s5 + $0x90] sm:$0xff] }
 0x88e   :  { %v4333_v20 = vpop.eup %4332 }
 0x88f   :  { %v1114_v21 = vmul.f32 %v4333_v20, %v4331_v11 }
 0x891   :  { %3792 = vmatmul.mubr.msk.f32.vlgmr.msra.gmra.mrb[12].mxu1 %vm503_vm3, %v1114_v21  ;;  %v3367_v21 = vld [vmem:[%s5450_s5 + $0x98] sm:$0xff] }
 0x892   :  { %3795 = vmatpush3.xpose.msk.msra.mxu1 %vm425_vm2, %v932_v51  ;;  %3796 = vmatprep.mubr.msk.f32.mxu1 %vm4558_vm1, %v4557_v38  ;;  %v3346_v51 = vld [vmem:[%s5473_s6 + $0xa0] sm:$0xff] }
 0x893   :  { %3799 = vmatprep.subr.mxu1 %v4557_v38  ;;  %v4133_v53 = vpack.c.bf16 %v3347_v52, %v3346_v51 }
 0x895   :  { %3797 = vmatmul.mubr.msk.f32.vlgmr.msra.gmra.mrb[14].mxu1 %vm425_vm2, %v840_v45  ;;  %v3343_v45 = vld [vmem:[%s5473_s6 + $0x88] sm:$0xff] }
 0x896   :  { %3800 = vmatpush3.msra.mxu1 %v1024_v16  ;;  %3801 = vmatprep.mubr.msk.f32.mxu1 %vm4558_vm1, %v4557_v38  ;;  %v4125_v46 = vpack.c.bf16 %v3343_v45, %v3342_v44  ;;  %v3364_v16 = vld [vmem:[%s5450_s5 + $0x80] sm:$0xff] }
 0x897   :  { %v4157_v20 = vpack.c.bf16 %v3365_v18, %v3364_v16  ;;  %v3396_v16 = vld [vmem:[%s5448_s3 + $0xd0] sm:$0xff]  ;;  %v3397_v18 = vld [vmem:[%s5448_s3 + $0xd8] sm:$0xff] }
 0x898   :  { %4126 = vmatprep.subr.bf16.mxu1 %v4125_v46 }
 0x964   :  { %v1184_v22 = vpop.f32.mrb[12].mxu1 }
 0x965   :  { %v3793_v23 = vpop.f32.mrb[13].mxu1  ;;  %3808 = vmatprep.mubr.msk.f32.mxu0 %vm425_vm2, %v1184_v22  ;;  %v4161_v22 = vpack.c.bf16 %v3367_v21, %v3366_v19  ;;  %v4197_v19 = vpack.c.bf16 %v3397_v18, %v3396_v16  ;;  %v3398_v21 = vld [vmem:[%s5448_s3 + $0xe0] sm:$0xff] }
 0x966   :  { %v3368_v23 = vld [vmem:[%s5450_s5 + $0xa0] sm:$0xff] }
 0x968   :  { %v1260_v24 = vpop.f32.mrb[14].mxu1 }
 0x969   :  { %v1264_v25 = vmul.f32 0.25, %v1260_v24  ;;  %v3798_v26 = vpop.f32.mrb[15].mxu1  ;;  %v3369_v24 = vld [vmem:[%s5450_s5 + $0xa8] sm:$0xff] }
 0x96a   :  { %v3370_v26 = vld [vmem:[%s5450_s5 + $0xb0] sm:$0xff] }
 0x96b   :  { %v1265_v27 = vsel %vm503_vm3, %v1264_v25, -inf }
 0x96c   :  { %1266 = vmax.xlane.f32.xlu0 %v1265_v27  ;;  %v3371_v27 = vld [vmem:[%s5450_s5 + $0xb8] sm:$0xff] }
 0x9f9   :  { %v1267_v28 = vpop.xlane.xlu0 %1266 }
 0x9fa   :  { %v1268_v29 = vsub.f32 %v1264_v25, %v1267_v28  ;;  %v4165_v25 = vpack.c.bf16 %v3369_v24, %v3368_v23  ;;  %v4169_v28 = vpack.c.bf16 %v3371_v27, %v3370_v26  ;;  %v3401_v26 = vld [vmem:[%s5448_s3 + $0xf8] sm:$0xff] }
 0x9fc   :  { %v1269_v31 = vmul.f32 1.442695, %v1268_v29 }
 0x9fe   :  { %4334 = vpow2.f32 %v1269_v31 }
 0xa08   :  { %v4335_v32 = vpop.eup %4334 }
 0xa09   :  { %v1271_v33 = vsel %vm503_vm3, %v4335_v32, 0.0 }
 0xa0a   :  { %1272 = vadd.xlane.f32.xlu1 %v1271_v33 }
 0xa97   :  { %v1273_v37 = vpop.xlane.xlu1 %1272 }
 0xa98   :  { %4336 = vrcp.f32 %v1273_v37 }
 0xaa2   :  { %v4337_v39 = vpop.eup %4336 }
 0xaa3   :  { %v1275_v40 = vmul.f32 %v4337_v39, %v4335_v32 }
 0xaa5   :  { %3802 = vmatmul.mubr.msk.f32.vlgmr.msra.gmra.mrb[16].mxu1 %vm503_vm3, %v1275_v40 }
 0xaa6   :  { %3834 = vmatprep.mubr.msk.f32.mxu1 %vm163_vm0, %v4797_v17  ;;  %4128 = vmatpush3.bf16.msra.mxu1 %v4125_v46 }
 0xaa7   :  { %4130 = vmatprep.subr.bf16.mxu1 %v4129_v50 }
 0xaaa   :  { %4132 = vmatpush3.bf16.msra.mxu1 %v4129_v50 }
 0xaab   :  { %4134 = vmatprep.subr.bf16.mxu1 %v4133_v53 }
 0xaae   :  { %4136 = vmatpush3.bf16.msra.mxu1 %v4133_v53 }
 0xaaf   :  { %4138 = vmatprep.subr.bf16.mxu1 %v4137_v56 }
 0xab2   :  { %4140 = vmatpush3.bf16.msra.mxu1 %v4137_v56 }
 0xab3   :  { %4158 = vmatprep.subr.bf16.mxu1 %v4157_v20 }
 0xab5   :  { %3835 = vmatmul.mubr.msk.f32.vlgmr.msra.gmra.mrb[18].mxu1 %vm163_vm0, %v4830_v30 }
 0xab6   :  { %3872 = vmatprep.mubr.msk.f32.mxu1 %vm163_vm0, %v4797_v17  ;;  %4160 = vmatpush3.bf16.msra.mxu1 %v4157_v20 }
 0xab7   :  { %4162 = vmatprep.subr.bf16.mxu1 %v4161_v22 }
 0xaba   :  { %4164 = vmatpush3.bf16.msra.mxu1 %v4161_v22  ;;  %v3399_v22 = vld [vmem:[%s5448_s3 + $0xe8] sm:$0xff] }
 0xabb   :  { %4166 = vmatprep.subr.bf16.mxu1 %v4165_v25  ;;  %v4201_v24 = vpack.c.bf16 %v3399_v22, %v3398_v21 }
 0xabe   :  { %4168 = vmatpush3.bf16.msra.mxu1 %v4165_v25  ;;  %v3400_v25 = vld [vmem:[%s5448_s3 + $0xf0] sm:$0xff] }
 0xabf   :  { %4170 = vmatprep.subr.bf16.mxu1 %v4169_v28  ;;  %v4205_v27 = vpack.c.bf16 %v3401_v26, %v3400_v25 }
 0xac2   :  { %4172 = vmatpush3.bf16.msra.mxu1 %v4169_v28  ;;  %v3391_v28 = vld [vmem:[#allocation2 + $0x3] ss:$0 sm:$0xff] }
 0xac3   :  { %3890 = vmatprep.subr.mxu1 %v4557_v38 }
 0xac5   :  { %3873 = vmatmul.mubr.msk.f32.vlgmr.msra.gmra.mrb[20].mxu1 %vm163_vm0, %v4830_v30 }
 0xac6   :  { %3892 = vmatprep.mubr.msk.f32.mxu1 %vm4558_vm1, %v4557_v38 }
 0xb78   :  { %v1345_v60 = vpop.f32.mrb[16].mxu1 }
 0xb79   :  { %v3803_v61 = vpop.f32.mrb[17].mxu1  ;;  %3809 = vmatmul.mubr.msk.f32.vlgmr.msra.gmra.mrb[10].mxu0 %vm425_vm2, %v1345_v60  ;;  %v2113_v60 = vld [vmem:[#allocation8 + $0x20] sm:$0xff] }
 0xb7a   :  { %4124 = vmatpush3.bf16.msra.mxu0 %v4121_v43  ;;  %3815 = vmatprep.mubr.msk.f32.mxu0 %vm425_vm2, %v4873_v2  ;;  %v4149_v2 = vpack.c.bf16 %v3358_v3, %v3357_v1  ;;  %v2114_v61 = vld [vmem:[#allocation8 + $0x28] sm:$0xff]  ;;  %v3394_v3 = vld [vmem:[%s5448_s3 + $0xc0] sm:$0xff] }
 0xb7b   :  { %4142 = vmatprep.subr.bf16.mxu0 %v4141_v59  ;;  %v4173_v62 = vpack.c.bf16 %v2114_v61, %v2113_v60 }
 0xb81   :  { %3816 = vmatmul.mubr.msk.f32.vlgmr.msra.gmra.mrb[10].mxu0 %vm425_vm2, %v4937_v47 }
 0xb82   :  { %4144 = vmatpush3.bf16.msra.mxu0 %v4141_v59  ;;  %3853 = vmatprep.mubr.msk.f32.mxu0 %vm163_vm0, %v4797_v17 }
 0xb83   :  { %4146 = vmatprep.subr.bf16.mxu0 %v4145_v0 }
 0xb86   :  { %4148 = vmatpush3.bf16.msra.mxu0 %v4145_v0 }
 0xb87   :  { %4150 = vmatprep.subr.bf16.mxu0 %v4149_v2 }
 0xb88   :  { %v3836_v47 = vpop.f32.mrb[18].mxu1 }
 0xb89   :  { %v1603_v8 = vadd.f32 %v3836_v47, %v3350_v7  ;;  %v1597_v9 = vpop.f32.mrb[19].mxu1 }
 0xb8a   :  { %4152 = vmatpush3.bf16.msra.mxu0 %v4149_v2  ;;  %v1598_v15 = vadd.f32 %v3350_v7, %v1597_v9  ;;  %v3395_v2 = vld [vmem:[%s5448_s3 + $0xc8] sm:$0xff]  ;;  %v3385_v7 = vld [vmem:[%s5473_s6 + $0xd0] sm:$0xff] }
 0xb8b   :  { %4154 = vmatprep.subr.bf16.mxu0 %v4153_v6  ;;  %v4193_v4 = vpack.c.bf16 %v3395_v2, %v3394_v3 }
 0xb8e   :  { %4156 = vmatpush3.bf16.msra.mxu0 %v4153_v6  ;;  %v3384_v6 = vld [vmem:[%s5473_s6 + $0xc8] sm:$0xff] }
 0xb8f   :  { %3875 = vmatprep.subr.mxu0 %v4557_v38  ;;  %v4177_v47 = vpack.c.bf16 %v3384_v6, %v3383_v5 }
 0xb91   :  { %3854 = vmatmul.mubr.msk.f32.vlgmr.msra.gmra.mrb[12].mxu0 %vm163_vm0, %v4830_v30 }
 0xb92   :  { %3877 = vmatprep.mubr.msk.f32.mxu0 %vm4558_vm1, %v4557_v38 }
 0xb98   :  { %v3874_v40 = vpop.f32.mrb[20].mxu1 }
 0xb99   :  { %v1781_v42 = vpop.f32.mrb[21].mxu1  ;;  %v1787_v43 = vadd.f32 %v3874_v40, %v3372_v41  ;;  %v3406_v40 = vld [vmem:[%s5450_s5 + $0xc8] sm:$0xff] }
 0xb9a   :  { %v1782_v44 = vadd.f32 %v3372_v41, %v1781_v42  ;;  %v3407_v41 = vld [vmem:[%s5450_s5 + $0xd0] sm:$0xff] }
 0xb9b   :  { %3891 = vmatpush3.msra.mxu1 %v1787_v43  ;;  %v3408_v43 = vld [vmem:[%s5450_s5 + $0xd8] sm:$0xff] }
 0xb9c   :  { %4178 = vmatprep.subr.bf16.mxu1 %v4177_v47 }
 0xc64   :  { %v3855_v11 = vpop.f32.mrb[12].mxu0 }
 0xc65   :  { %v1695_v12 = vadd.f32 %v3855_v11, %v3361_v10  ;;  %v1689_v13 = vpop.f32.mrb[13].mxu0  ;;  %v3388_v11 = vld [vmem:[%s5473_s6 + $0xe8] sm:$0xff] }
 0xc66   :  { %v1690_v14 = vadd.f32 %v3361_v10, %v1689_v13  ;;  %v3387_v10 = vld [vmem:[%s5473_s6 + $0xe0] sm:$0xff]  ;;  %v3389_v13 = vld [vmem:[%s5473_s6 + $0xf0] sm:$0xff] }
 0xc68   :  { %3876 = vmatpush3.xpose.msk.msra.mxu0 %vm425_vm2, %v1690_v14  ;;  %v3390_v14 = vld [vmem:[%s5473_s6 + $0xf8] sm:$0xff] }
 0xc69   :  { %3880 = vmatprep.subr.mxu0 %v4557_v38 }
 0xc6b   :  { %3878 = vmatmul.mubr.msk.f32.vlgmr.msra.gmra.mrb[14].mxu0 %vm425_vm2, %v1598_v15  ;;  %v4189_v15 = vpack.c.bf16 %v3390_v14, %v3389_v13  ;;  %v2797_v14 = vld [vmem:[#allocation8 + $0x30] sm:$0xff] }
 0xc6c   :  { %3882 = vmatprep.mubr.msk.f32.mxu0 %vm4558_vm1, %v4557_v38  ;;  %3881 = vmatpush3.msra.mxu0 %v1782_v44  ;;  %v4213_v44 = vpack.c.bf16 %v3408_v43, %v3407_v41 }
 0xc6d   :  { %3885 = vmatprep.subr.mxu0 %v4557_v38 }
 0xd3e   :  { %v1862_v29 = vpop.f32.mrb[14].mxu0 }
 0xd3f   :  { %v1866_v31 = vmul.f32 0.25, %v1862_v29  ;;  %v3879_v32 = vpop.f32.mrb[15].mxu0 }
 0xd40   :  { %v3402_v32 = vld [vmem:[#allocation5 + $0x3] ss:$0 sm:$0xff] }
 0xd41   :  { %v1867_v33 = vsel %vm503_vm3, %v1866_v31, -inf }
 0xd42   :  { %1868 = vmax.xlane.f32.xlu0 %v1867_v33 }
 0xdcf   :  { %v1869_v34 = vpop.xlane.xlu0 %1868 }
 0xdd0   :  { %v1870_v35 = vsub.f32 %v1866_v31, %v1869_v34 }
 0xdd2   :  { %v1871_v36 = vmul.f32 1.442695, %v1870_v35 }
 0xdd4   :  { %4338 = vpow2.f32 %v1871_v36 }
 0xdde   :  { %v4339_v37 = vpop.eup %4338 }
 0xddf   :  { %v1873_v39 = vsel %vm503_vm3, %v4339_v37, 0.0 }
 0xde0   :  { %1874 = vadd.xlane.f32.xlu1 %v1873_v39  ;;  %v3405_v39 = vld [vmem:[%s5450_s5 + $0xc0] sm:$0xff] }
 0xde1   :  { %v4209_v42 = vpack.c.bf16 %v3406_v40, %v3405_v39 }
 0xe6d   :  { %v1875_v45 = vpop.xlane.xlu1 %1874 }
 0xe6e   :  { %4340 = vrcp.f32 %v1875_v45  ;;  %v3409_v45 = vld [vmem:[%s5450_s5 + $0xe0] sm:$0xff] }
 0xe78   :  { %v4341_v46 = vpop.eup %4340 }
 0xe79   :  { %v1877_v48 = vmul.f32 %v4341_v46, %v4339_v37  ;;  %v3410_v46 = vld [vmem:[%s5450_s5 + $0xe8] sm:$0xff] }
 0xe7b   :  { %3883 = vmatmul.mubr.msk.f32.vlgmr.msra.gmra.mrb[16].mxu0 %vm503_vm3, %v1877_v48  ;;  %v4217_v48 = vpack.c.bf16 %v3410_v46, %v3409_v45  ;;  %v2958_v45 = vld [vmem:[%s5456_s11 + $0x8] sm:$0xff]  ;;  %v2960_v46 = vld [vmem:[%s5456_s11 + $0x18] sm:$0xff] }
 0xe7c   :  { %3886 = vmatpush3.xpose.msk.msra.mxu0 %vm425_vm2, %v1695_v12  ;;  %3887 = vmatprep.mubr.msk.f32.mxu0 %vm4558_vm1, %v4557_v38  ;;  %v4185_v12 = vpack.c.bf16 %v3388_v11, %v3387_v10 }
 0xe7d   :  { %4174 = vmatprep.subr.bf16.mxu0 %v4173_v62 }
 0xe7f   :  { %3888 = vmatmul.mubr.msk.f32.vlgmr.msra.gmra.mrb[18].mxu0 %vm425_vm2, %v1603_v8  ;;  %v3386_v8 = vld [vmem:[%s5473_s6 + $0xd8] sm:$0xff] }
 0xe80   :  { %4176 = vmatpush3.bf16.msra.mxu0 %v4173_v62  ;;  %v4181_v9 = vpack.c.bf16 %v3386_v8, %v3385_v7  ;;  %v3413_v62 = vld [vmem:[#allocation7 + $0x3] ss:$0 sm:$0xff] }
 0xe81   :  { %4194 = vmatprep.subr.bf16.mxu0 %v4193_v4 }
 0xf4e   :  { %v1947_v49 = vpop.f32.mrb[16].mxu0 }
 0xf4f   :  { %v3884_v50 = vpop.f32.mrb[17].mxu0  ;;  %3899 = vmatprep.mubr.msk.f32.mxu0 %vm425_vm2, %v1947_v49  ;;  %v3411_v49 = vld [vmem:[%s5450_s5 + $0xf0] sm:$0xff] }
 0xf50   :  { %v3412_v50 = vld [vmem:[%s5450_s5 + $0xf8] sm:$0xff] }
 0xf52   :  { %v2023_v51 = vpop.f32.mrb[18].mxu0 }
 0xf53   :  { %v2027_v52 = vmul.f32 0.25, %v2023_v51  ;;  %v3889_v53 = vpop.f32.mrb[19].mxu0  ;;  %v4221_v51 = vpack.c.bf16 %v3412_v50, %v3411_v49  ;;  %v4229_v49 = vpack.c.bf16 %v2960_v46, %v2958_v45  ;;  %v2959_v50 = vld [vmem:[%s5456_s11 + $0x10] sm:$0xff] }
 0xf55   :  { %v2028_v54 = vsel %vm503_vm3, %v2027_v52, -inf }
 0xf56   :  { %2029 = vmax.xlane.f32.xlu0 %v2028_v54 }
 0xfe3   :  { %v2030_v55 = vpop.xlane.xlu0 %2029 }
 0xfe4   :  { %v2031_v56 = vsub.f32 %v2027_v52, %v2030_v55 }
 0xfe6   :  { %v2032_v57 = vmul.f32 1.442695, %v2031_v56 }
 0xfe8   :  { %4342 = vpow2.f32 %v2032_v57 }
 0xff2   :  { %v4343_v58 = vpop.eup %4342 }
 0xff3   :  { %v2034_v59 = vsel %vm503_vm3, %v4343_v58, 0.0 }
 0xff4   :  { %2035 = vadd.xlane.f32.xlu1 %v2034_v59 }
0x1081   :  { %v2036_v63 = vpop.xlane.xlu1 %2035 }
0x1082   :  { %4344 = vrcp.f32 %v2036_v63 }
0x108c   :  { %v4345_v0 = vpop.eup %4344 }
0x108d   :  { %v2038_v1 = vmul.f32 %v4345_v0, %v4343_v58 }
0x108f   :  { %3893 = vmatmul.mubr.msk.f32.vlgmr.msra.gmra.mrb[22].mxu1 %vm503_vm3, %v2038_v1 }
0x1090   :  { %3918 = vmatprep.mubr.msk.f32.mxu1 %vm163_vm0, %v4797_v17  ;;  %4180 = vmatpush3.bf16.msra.mxu1 %v4177_v47 }
0x1091   :  { %4182 = vmatprep.subr.bf16.mxu1 %v4181_v9 }
0x1094   :  { %4184 = vmatpush3.bf16.msra.mxu1 %v4181_v9 }
0x1095   :  { %4186 = vmatprep.subr.bf16.mxu1 %v4185_v12 }
0x1098   :  { %4188 = vmatpush3.bf16.msra.mxu1 %v4185_v12 }
0x1099   :  { %4190 = vmatprep.subr.bf16.mxu1 %v4189_v15 }
0x109c   :  { %4192 = vmatpush3.bf16.msra.mxu1 %v4189_v15  ;;  %v2798_v15 = vld [vmem:[#allocation8 + $0x38] sm:$0xff] }
0x109d   :  { %4210 = vmatprep.subr.bf16.mxu1 %v4209_v42  ;;  %v4225_v16 = vpack.c.bf16 %v2798_v15, %v2797_v14  ;;  %v3064_v14 = vld [vmem:[%s5458_s13 + $0x18] sm:$0xff]  ;;  %v3081_v15 = vld [vmem:[%s5458_s13 + $0xa0] sm:$0xff] }
0x109f   :  { %3919 = vmatmul.mubr.msk.f32.vlgmr.msra.gmra.mrb[24].mxu1 %vm163_vm0, %v4830_v30 }
0x10a0   :  { %3956 = vmatprep.mubr.msk.f32.mxu1 %vm163_vm0, %v4797_v17  ;;  %4212 = vmatpush3.bf16.msra.mxu1 %v4209_v42 }
0x10a1   :  { %4214 = vmatprep.subr.bf16.mxu1 %v4213_v44 }
0x10a4   :  { %4216 = vmatpush3.bf16.msra.mxu1 %v4213_v44 }
0x10a5   :  { %4218 = vmatprep.subr.bf16.mxu1 %v4217_v48 }
0x10a8   :  { %4220 = vmatpush3.bf16.msra.mxu1 %v4217_v48  ;;  %v2957_v48 = vld [vmem:[%s5456_s11] sm:$0xff] }
0x10a9   :  { %4222 = vmatprep.subr.bf16.mxu1 %v4221_v51 }
0x10ac   :  { %4224 = vmatpush3.bf16.msra.mxu1 %v4221_v51  ;;  %v2962_v51 = vld [vmem:[%s5456_s11 + $0x28] sm:$0xff] }
0x10ad   :  { %4230 = vmatprep.subr.bf16.mxu1 %v4229_v49 }
0x10af   :  { %3957 = vmatmul.mubr.msk.f32.vlgmr.msra.gmra.mrb[26].mxu1 %vm163_vm0, %v4830_v30 }
0x10b0   :  { %3052 = vmatprep.mubr.f32.mxu1 %v4557_v38 }
0x1162   :  { %v2108_v20 = vpop.f32.mrb[22].mxu1 }
0x1163   :  { %v3894_v23 = vpop.f32.mrb[23].mxu1  ;;  %3900 = vmatmul.mubr.msk.f32.vlgmr.msra.gmra.mrb[10].mxu0 %vm425_vm2, %v2108_v20 }
0x1164   :  { %4196 = vmatpush3.bf16.msra.mxu0 %v4193_v4  ;;  %3937 = vmatprep.mubr.msk.f32.mxu0 %vm163_vm0, %v4797_v17  ;;  %v3424_v23 = vld [vmem:[%s5453_s8] ss:$0 sm:$0xff]  ;;  %s4514_s8 = scalar_lea.vmem %s3273_s30, 32 }
0x1165   :  { %4198 = vmatprep.subr.bf16.mxu0 %v4197_v19  ;;  %p4515_p0 = scmp.ne.s32.totalorder %s3273_s30, %s4514_s8  ;;  %p4520_p2 = scmp.lt.s32.totalorder %s4514_s8, %s4514_s8 }
0x1167   :  { %p4521_p3 = por %p4520_p2, %p4519_p1 }
0x1168   :  { %4200 = vmatpush3.bf16.msra.mxu0 %v4197_v19 }
0x1169   :  { %4202 = vmatprep.subr.bf16.mxu0 %v4201_v24  ;;  %p4522_p4 = pnand %p4521_p3, %p4515_p0 }
0x116c   :  { %4204 = vmatpush3.bf16.msra.mxu0 %v4201_v24 }
0x116d   :  { %4206 = vmatprep.subr.bf16.mxu0 %v4205_v27 }
0x1170   :  { %4208 = vmatpush3.bf16.msra.mxu0 %v4205_v27 }
0x1171   :  { %3959 = vmatprep.subr.mxu0 %v4557_v38 }
0x1172   :  { %v3920_v17 = vpop.f32.mrb[24].mxu1 }
0x1173   :  { %3938 = vmatmul.mubr.msk.f32.vlgmr.msra.gmra.mrb[20].mxu0 %vm163_vm0, %v4830_v30  ;;  %v2287_v29 = vadd.f32 %v3920_v17, %v3391_v28  ;;  %v2281_v31 = vpop.f32.mrb[25].mxu1  ;;  %v4358_v17 = vld [vmem:[%s5474_s23 + $0x8] sm:$0xff] }
0x1174   :  { %3961 = vmatprep.mubr.msk.f32.mxu0 %vm4558_vm1, %v4557_v38  ;;  %v2282_v37 = vadd.f32 %v3391_v28, %v2281_v31 }
0x1182   :  { %v3958_v61 = vpop.f32.mrb[26].mxu1 }
0x1183   :  { %v2465_v63 = vpop.f32.mrb[27].mxu1  ;;  %v2471_v30 = vadd.f32 %v3958_v61, %v3413_v62  ;;  %v2965_v61 = vld [vmem:[%s5456_s11 + $0x40] sm:$0xff] }
0x1184   :  { %v2466_v0 = vadd.f32 %v3413_v62, %v2465_v63  ;;  %v2967_v62 = vld [vmem:[%s5456_s11 + $0x50] sm:$0xff]  ;;  %v2970_v63 = vld [vmem:[%s5456_s11 + $0x68] sm:$0xff] }
0x1246   :  { %v3939_v33 = vpop.f32.mrb[20].mxu0 }
0x1247   :  { %v2379_v34 = vadd.f32 %v3939_v33, %v3402_v32  ;;  %v2373_v35 = vpop.f32.mrb[21].mxu0 }
0x1248   :  { %v2374_v36 = vadd.f32 %v3402_v32, %v2373_v35 }
0x124a   :  { %3960 = vmatpush3.xpose.msk.msra.mxu0 %vm425_vm2, %v2374_v36 }
0x124b   :  { %3964 = vmatprep.subr.mxu0 %v4557_v38 }
0x124d   :  { %3962 = vmatmul.mubr.msk.f32.vlgmr.msra.gmra.mrb[22].mxu0 %vm425_vm2, %v2282_v37 }
0x124e   :  { %3966 = vmatprep.mubr.msk.f32.mxu0 %vm4558_vm1, %v4557_v38  ;;  %3965 = vmatpush3.msra.mxu0 %v2466_v0  ;;  %v4239_v0 = vpack.c.bf16 %v2967_v62, %v2965_v61 }
0x124f   :  { %3969 = vmatprep.subr.mxu0 %v4557_v38 }
0x1320   :  { %v2546_v52 = vpop.f32.mrb[22].mxu0 }
0x1321   :  { %v2550_v53 = vmul.f32 0.25, %v2546_v52  ;;  %v3963_v54 = vpop.f32.mrb[23].mxu0  ;;  %v2964_v52 = vld [vmem:[%s5456_s11 + $0x38] sm:$0xff] }
0x1322   :  { %v4233_v54 = vpack.c.bf16 %v2964_v52, %v2962_v51 }
0x1323   :  { %v2551_v55 = vsel %vm503_vm3, %v2550_v53, -inf }
0x1324   :  { %2552 = vmax.xlane.f32.xlu0 %v2551_v55  ;;  %v2961_v55 = vld [vmem:[%s5456_s11 + $0x20] sm:$0xff] }
0x13b1   :  { %v2553_v56 = vpop.xlane.xlu0 %2552 }
0x13b2   :  { %v2554_v57 = vsub.f32 %v2550_v53, %v2553_v56  ;;  %v4231_v53 = vpack.c.bf16 %v2959_v50, %v2957_v48  ;;  %v2963_v56 = vld [vmem:[%s5456_s11 + $0x30] sm:$0xff] }
0x13b4   :  { %v2555_v58 = vmul.f32 1.442695, %v2554_v57  ;;  %v2966_v57 = vld [vmem:[%s5456_s11 + $0x48] sm:$0xff]  ;;  %4232 = vmatpush1.bf16.msra.mxu1 %v4231_v53 }
0x13b5   :  { %4234 = vmatprep.subr.bf16.mxu1 %v4233_v54 }
0x13b6   :  { %4346 = vpow2.f32 %v2555_v58  ;;  %v2968_v58 = vld [vmem:[%s5456_s11 + $0x58] sm:$0xff] }
0x13c0   :  { %v4347_v59 = vpop.eup %4346 }
0x13c1   :  { %v2557_v60 = vsel %vm503_vm3, %v4347_v59, 0.0 }
0x13c2   :  { %2558 = vadd.xlane.f32.xlu1 %v2557_v60  ;;  %v4237_v60 = vpack.c.bf16 %v2968_v58, %v2966_v57  ;;  %v3426_v58 = vld [vmem:[%s5455_s10] ss:$0 sm:$0xff] }
0x144f   :  { %v2559_v1 = vpop.xlane.xlu1 %2558 }
0x1450   :  { %4348 = vrcp.f32 %v2559_v1 }
0x145a   :  { %v4349_v3 = vpop.eup %4348 }
0x145b   :  { %v2561_v2 = vmul.f32 %v4349_v3, %v4347_v59  ;;  %v4235_v59 = vpack.c.bf16 %v2963_v56, %v2961_v55  ;;  %v2969_v3 = vld [vmem:[%s5456_s11 + $0x60] sm:$0xff] }
0x145c   :  { %v3425_v55 = vld [vmem:[%s5454_s9] ss:$0 sm:$0xff] }
0x145d   :  { %3967 = vmatmul.mubr.msk.f32.vlgmr.msra.gmra.mrb[24].mxu0 %vm503_vm3, %v2561_v2  ;;  %4236 = vmatpush1.bf16.msra.mxu1 %v4235_v59  ;;  %v2971_v2 = vld [vmem:[%s5456_s11 + $0x70] sm:$0xff] }
0x145e   :  { %3970 = vmatpush3.xpose.msk.msra.mxu0 %vm425_vm2, %v2379_v34  ;;  %3971 = vmatprep.mubr.msk.f32.mxu0 %vm4558_vm1, %v4557_v38 }
0x145f   :  { %3974 = vmatprep.subr.mxu0 %v4557_v38  ;;  %4238 = vmatprep.subr.bf16.mxu1 %v4237_v60 }
0x1461   :  { %3972 = vmatmul.mubr.msk.f32.vlgmr.msra.gmra.mrb[26].mxu0 %vm425_vm2, %v2287_v29  ;;  %v4359_v29 = vld [vmem:[%s5474_s23] sm:$0xff]  ;;  %4240 = vmatpush1.bf16.msra.mxu1 %v4239_v0 }
0x1462   :  { %3975 = vmatpush3.msra.mxu0 %v2471_v30  ;;  %3976 = vmatprep.mubr.msk.f32.mxu0 %vm4558_vm1, %v4557_v38  ;;  %v2972_v30 = vld [vmem:[%s5456_s11 + $0x78] sm:$0xff] }
0x1463   :  { %4226 = vmatprep.subr.bf16.mxu0 %v4225_v16  ;;  %v4241_v1 = vpack.c.bf16 %v2972_v30, %v2970_v63 }
0x1465   :  { %4242 = vmatprep.subr.bf16.mxu1 %v4241_v1 }
0x1530   :  { %v2631_v4 = vpop.f32.mrb[24].mxu0 }
0x1531   :  { %v3968_v5 = vpop.f32.mrb[25].mxu0 }
0x1532   :  { %v3077_v5 = vld [vmem:[%s5458_s13 + $0x80] sm:$0xff] }
0x1534   :  { %v2707_v6 = vpop.f32.mrb[26].mxu0 }
0x1535   :  { %v2711_v47 = vmul.f32 0.25, %v2707_v6  ;;  %v3973_v7 = vpop.f32.mrb[27].mxu0  ;;  %v3078_v6 = vld [vmem:[%s5458_s13 + $0x88] sm:$0xff] }
0x1536   :  { %v4245_v7 = vpack.c.bf16 %v3078_v6, %v3077_v5 }
0x1537   :  { %v2712_v8 = vsel %vm503_vm3, %v2711_v47, -inf }
0x1538   :  { %2713 = vmax.xlane.f32.xlu0 %v2712_v8  ;;  %v3062_v8 = vld [vmem:[%s5458_s13 + $0x8] sm:$0xff] }
0x15c5   :  { %v2714_v9 = vpop.xlane.xlu0 %2713 }
0x15c6   :  { %v2715_v10 = vsub.f32 %v2711_v47, %v2714_v9  ;;  %v3061_v47 = vld [vmem:[%s5458_s13] sm:$0xff]  ;;  %v3079_v9 = vld [vmem:[%s5458_s13 + $0x90] sm:$0xff] }
0x15c8   :  { %v2716_v11 = vmul.f32 1.442695, %v2715_v10  ;;  %v3080_v10 = vld [vmem:[%s5458_s13 + $0x98] sm:$0xff] }
0x15ca   :  { %4350 = vpow2.f32 %v2716_v11  ;;  %v4247_v11 = vpack.c.bf16 %v3062_v8, %v3061_v47 }
0x15d4   :  { %v4351_v12 = vpop.eup %4350 }
0x15d5   :  { %v2718_v13 = vsel %vm503_vm3, %v4351_v12, 0.0 }
0x15d6   :  { %2719 = vadd.xlane.f32.xlu1 %v2718_v13  ;;  %v3063_v13 = vld [vmem:[%s5458_s13 + $0x10] sm:$0xff] }
0x1663   :  { %v2720_v18 = vpop.xlane.xlu1 %2719 }
0x1664   :  { %4352 = vrcp.f32 %v2720_v18  ;;  %v4251_v18 = vpack.c.bf16 %v3064_v14, %v3063_v13  ;;  %v3073_v13 = vld [vmem:[%s5458_s13 + $0x60] sm:$0xff]  ;;  %v3074_v14 = vld [vmem:[%s5458_s13 + $0x68] sm:$0xff] }
0x166e   :  { %v4353_v19 = vpop.eup %4352 }
0x166f   :  { %v2722_v20 = vmul.f32 %v4353_v19, %v4351_v12  ;;  %v4249_v12 = vpack.c.bf16 %v3080_v10, %v3079_v9 }
0x1671   :  { %3977 = vmatmul.mubr.msk.f32.vlgmr.msra.gmra.mrb[28].mxu0 %vm503_vm3, %v2722_v20  ;;  %v3065_v20 = vld [vmem:[%s5458_s13 + $0x20] sm:$0xff] }
0x1672   :  { %3983 = vmatprep.mubr.msk.f32.mxu0 %vm425_vm2, %v2631_v4  ;;  %4228 = vmatpush3.bf16.msra.mxu0 %v4225_v16  ;;  %v4243_v4 = vpack.c.bf16 %v2971_v2, %v2969_v3  ;;  %v3082_v16 = vld [vmem:[%s5458_s13 + $0xa8] sm:$0xff] }
0x1673   :  { %4246 = vmatprep.subr.bf16.mxu0 %v4245_v7  ;;  %v4253_v19 = vpack.c.bf16 %v3082_v16, %v3081_v15  ;;  %v4271_v15 = vpack.c.bf16 %v3074_v14, %v3073_v13  ;;  %v3091_v16 = vld [vmem:[%s5458_s13 + $0xf0] sm:$0xff] }
0x1674   :  { %4244 = vmatpush1.bf16.msra.mxu1 %v4243_v4 }
0x1744   :  { %v2792_v21 = vpop.f32.mrb[28].mxu0 }
0x1745   :  { %v3978_v22 = vpop.f32.mrb[29].mxu0  ;;  %3984 = vmatmul.mubr.msk.f32.vlgmr.msra.gmra.mrb[10].mxu0 %vm425_vm2, %v2792_v21  ;;  %v3066_v21 = vld [vmem:[%s5458_s13 + $0x28] sm:$0xff] }
0x1746   :  { %4248 = vmatpush3.bf16.msra.mxu0 %v4247_v11  ;;  %v3083_v22 = vld [vmem:[%s5458_s13 + $0xb0] sm:$0xff] }
0x1747   :  { %4250 = vmatprep.subr.bf16.mxu0 %v4249_v12 }
0x174a   :  { %4252 = vmatpush3.bf16.msra.mxu0 %v4251_v18  ;;  %v3092_v18 = vld [vmem:[%s5458_s13 + $0xf8] sm:$0xff] }
0x174b   :  { %4254 = vmatprep.subr.bf16.mxu0 %v4253_v19  ;;  %v4273_v19 = vpack.c.bf16 %v3092_v18, %v3091_v16 }
0x1818   :  { %v3985_v24 = vpop.f32.mrb[10].mxu0 }
0x1819   :  { %v2890_v25 = vadd.f32 %v3985_v24, %v3424_v23  ;;  %v2871_v26 = vpop.f32.mrb[11].mxu0  ;;  %v4255_v24 = vpack.c.bf16 %v3066_v21, %v3065_v20  ;;  %v3076_v20 = vld [vmem:[%s5458_s13 + $0x78] sm:$0xff] }
0x181a   :  { %v2889_v27 = vadd.f32 %v3424_v23, %v2871_v26  ;;  %v3084_v23 = vld [vmem:[%s5458_s13 + $0xb8] sm:$0xff]  ;;  %v3067_v26 = vld [vmem:[%s5458_s13 + $0x30] sm:$0xff] }
0x181b   :  { %v2892_v28 = vadd.f32 %v4358_v17, %v2890_v25  ;;  %v4257_v25 = vpack.c.bf16 %v3084_v23, %v3083_v22  ;;  %v3085_v17 = vld [vmem:[%s5458_s13 + $0xc0] sm:$0xff]  ;;  %4256 = vmatpush3.bf16.msra.mxu0 %v4255_v24  ;;  %v3172_v23 = vld [vmem:[%s5460_s15 + $0x8] sm:$0xff]  ;;  %v3173_v24 = vld [vmem:[%s5460_s15 + $0x10] sm:$0xff] }
0x181c   :  { %v2891_v31 = vadd.f32 %v4359_v29, %v2889_v27  ;;  %v3068_v27 = vld [vmem:[%s5458_s13 + $0x38] sm:$0xff]  ;;  %v3171_v22 = vld [vmem:[%s5460_s15] sm:$0xff] }
0x181d   :  { %v2896_v32 = vsel %vm163_vm0, %v2892_v28, 0.0  ;;  %v4259_v29 = vpack.c.bf16 %v3068_v27, %v3067_v26  ;;  %4258 = vmatprep.subr.bf16.mxu0 %v4257_v25  ;;  %v4559_v25 = vmov 0.0|0.0   ;;  %v4278_v26 = vpack.c.bf16 %v3172_v23, %v3171_v22  ;;  %v3174_v27 = vld [vmem:[%s5460_s15 + $0x18] sm:$0xff] }
0x181e   :  { %2897 = vadd.xlane.f32.xlu1 %v2896_v32  ;;  %v2893_v33 = vsel %vm163_vm0, %v2891_v31, 0.0  ;;  %v3069_v32 = vld [vmem:[%s5458_s13 + $0x40] sm:$0xff]  ;;  %4277 = vmatprep.subr.bf16.mxu1 %v4559_v25 }
0x181f   :  { %2894 = vadd.xlane.f32.xlu0 %v2893_v33  ;;  %v3070_v33 = vld [vmem:[%s5458_s13 + $0x48] sm:$0xff]  ;;  %4260 = vmatpush3.bf16.msra.mxu0 %v4259_v29 }
0x1820   :  { %v3176_v29 = vld [vmem:[%s5460_s15 + $0x28] sm:$0xff] }
0x18ab   :  { %v2898_v34 = vpop.xlane.xlu1 %2897 }
0x18ac   :  { %v2901_v35 = vmul.f32 0.015625, %v2898_v34  ;;  %v2895_v36 = vpop.xlane.xlu0 %2894  ;;  %v3087_v34 = vld [vmem:[%s5458_s13 + $0xd0] sm:$0xff] }
0x18ad   :  { %v2900_v37 = vmul.f32 0.015625, %v2895_v36  ;;  %v4263_v36 = vpack.c.bf16 %v3070_v33, %v3069_v32  ;;  %v3177_v32 = vld [vmem:[%s5460_s15 + $0x30] sm:$0xff]  ;;  %v3178_v33 = vld [vmem:[%s5460_s15 + $0x38] sm:$0xff] }
0x18ae   :  { %v5218_v39 = vsub.f32 %v2892_v28, %v2901_v35  ;;  %v3086_v28 = vld [vmem:[%s5458_s13 + $0xc8] sm:$0xff]  ;;  %v3088_v35 = vld [vmem:[%s5458_s13 + $0xd8] sm:$0xff] }
0x18af   :  { %v5220_v40 = vsub.f32 %v2891_v31, %v2900_v37  ;;  %v4261_v31 = vpack.c.bf16 %v3086_v28, %v3085_v17  ;;  %v4265_v37 = vpack.c.bf16 %v3088_v35, %v3087_v34  ;;  %v4281_v17 = vpack.c.bf16 %v3174_v27, %v3173_v24  ;;  %v3175_v28 = vld [vmem:[%s5460_s15 + $0x20] sm:$0xff] }
0x18b0   :  { %v2905_v41 = vmul.f32 %v5218_v39, %v5218_v39  ;;  %v4287_v34 = vpack.c.bf16 %v3178_v33, %v3177_v32  ;;  %v3179_v35 = vld [vmem:[%s5460_s15 + $0x40] sm:$0xff] }
0x18b1   :  { %v2904_v42 = vmul.f32 %v5220_v40, %v5220_v40  ;;  %4262 = vmatprep.subr.bf16.mxu0 %v4261_v31  ;;  %v4284_v31 = vpack.c.bf16 %v3176_v29, %v3175_v28 }
0x18b2   :  { %v2909_v43 = vsel %vm163_vm0, %v2905_v41, 0.0  ;;  %v3071_v41 = vld [vmem:[%s5458_s13 + $0x50] sm:$0xff]  ;;  %4264 = vmatpush3.bf16.msra.mxu0 %v4263_v36  ;;  %v3180_v36 = vld [vmem:[%s5460_s15 + $0x48] sm:$0xff] }
0x18b3   :  { %2910 = vadd.xlane.f32.xlu1 %v2909_v43  ;;  %v2906_v44 = vsel %vm163_vm0, %v2904_v42, 0.0  ;;  %v3072_v42 = vld [vmem:[%s5458_s13 + $0x58] sm:$0xff]  ;;  %v3089_v43 = vld [vmem:[%s5458_s13 + $0xe0] sm:$0xff]  ;;  %4266 = vmatprep.subr.bf16.mxu0 %v4265_v37  ;;  %v4290_v37 = vpack.c.bf16 %v3180_v36, %v3179_v35 }
0x18b4   :  { %2907 = vadd.xlane.f32.xlu0 %v2906_v44  ;;  %v3090_v44 = vld [vmem:[%s5458_s13 + $0xe8] sm:$0xff]  ;;  %v4267_v45 = vpack.c.bf16 %v3072_v42, %v3071_v41  ;;  %v3181_v41 = vld [vmem:[%s5460_s15 + $0x50] sm:$0xff]  ;;  %v3182_v42 = vld [vmem:[%s5460_s15 + $0x58] sm:$0xff] }
0x18b5   :  { %v4269_v46 = vpack.c.bf16 %v3090_v44, %v3089_v43  ;;  %v4293_v43 = vpack.c.bf16 %v3182_v42, %v3181_v41  ;;  %v2975_v44 = vlaneseq }
0x18b6   :  { %4268 = vmatpush3.bf16.msra.mxu0 %v4267_v45 }
0x18b7   :  { %4270 = vmatprep.subr.bf16.mxu0 %v4269_v46  ;;  %v2976_v45 = vshrl.u32 %v2975_v44, 7 }
0x18b9   :  { %v2977_v46 = vsub.s32 0, %v2976_v45 }
0x18ba   :  { %4272 = vmatpush3.bf16.msra.mxu0 %v4271_v15 }
0x18bb   :  { %4274 = vmatprep.subr.bf16.mxu0 %v4273_v19 }
0x1940   :  { %v2911_v48 = vpop.xlane.xlu1 %2910 }
0x1941   :  { %v2913_v49 = vmul.f32 0.015625, %v2911_v48  ;;  %v2908_v50 = vpop.xlane.xlu0 %2907  ;;  %v2973_v48 = vld [vmem:[#allocation10] sm:$0x3] }
0x1942   :  { %v2912_v51 = vmul.f32 0.015625, %v2908_v50  ;;  %v2978_v50 = vrot.slane %v2973_v48, %v2977_v46 }
0x1943   :  { %v2915_v52 = vadd.f32 1e-05, %v2913_v49  ;;  %v2981_v49 = vsub.s32 1, %v2976_v45 }
0x1944   :  { %v2914_v53 = vadd.f32 1e-05, %v2912_v51 }
0x1945   :  { %4354 = vrsqrt.f32 %v2915_v52  ;;  %v2982_v51 = vrot.slane %v2973_v48, %v2981_v49 }
0x1946   :  { %4356 = vrsqrt.f32 %v2914_v53 }
0x194f   :  { %v4355_v54 = vpop.eup %4354 }
0x1950   :  { %v4357_v56 = vpop.eup %4356  ;;  %v2919_v57 = vmul.f32 %v4355_v54, %v5218_v39 }
0x1951   :  { %v2918_v59 = vmul.f32 %v4357_v56, %v5220_v40 }
0x1952   :  { %v2928_v60 = vmul.f32 %v3425_v55, %v2919_v57 }
0x1953   :  { %v2927_v61 = vmul.f32 %v3425_v55, %v2918_v59  ;;  %v3184_v59 = vld [vmem:[%s5460_s15 + $0x68] sm:$0xff] }
0x1954   :  { %v2937_v62 = vadd.f32 %v3426_v58, %v2928_v60 }
0x1955   :  { %v2936_v63 = vadd.f32 %v3426_v58, %v2927_v61  ;;  %v3183_v58 = vld [vmem:[%s5460_s15 + $0x60] sm:$0xff]  ;;  %v3185_v61 = vld [vmem:[%s5460_s15 + $0x70] sm:$0xff] }
0x1956   :  { %v2947_v30 = vsel %vm163_vm0, %v2937_v62, 0.0  ;;  %v4296_v60 = vpack.c.bf16 %v3184_v59, %v3183_v58  ;;  %v3186_v62 = vld [vmem:[%s5460_s15 + $0x78] sm:$0xff] }
0x1957   :  { %v2938_v0 = vsel %vm163_vm0, %v2936_v63, 0.0  ;;  %v2948_v1 = vrot.slane %v2947_v30, 4  ;;  %v4299_v63 = vpack.c.bf16 %v3186_v62, %v3185_v61 }
0x1958   :  { %v2939_v3 = vrot.slane %v2938_v0, 4 }
0x1959   :  { %v2949_v2 = vadd.f32 %v2948_v1, %v2947_v30 }
0x195a   :  { %v2940_v4 = vadd.f32 %v2939_v3, %v2938_v0  ;;  %v3428_v0 = vld [vmem:[#allocation11] ss:$0 sm:$0xff] }
0x195b   :  { %v2950_v5 = vrot.slane %v2949_v2, 2 }
0x195c   :  { %v2941_v39 = vrot.slane %v2940_v4, 2 }
0x195d   :  { %v2951_v6 = vadd.f32 %v2950_v5, %v2949_v2  ;;  %v3429_v5 = vld [vmem:[#allocation13] ss:$0 sm:$0xff] }
0x195e   :  { %v2942_v47 = vadd.f32 %v2941_v39, %v2940_v4 }
0x195f   :  { %v2952_v7 = vrot.slane %v2951_v6, 1 }
0x1960   :  { %v2943_v8 = vrot.slane %v2942_v47, 1 }
0x1961   :  { %v2953_v9 = vadd.f32 %v2952_v7, %v2951_v6 }
0x1962   :  { %v2944_v40 = vadd.f32 %v2943_v8, %v2942_v47 }
0x1963   :  { %v2954_v10 = vmul.f32 0.125, %v2953_v9 }
0x1964   :  { %v2946_v11 = vmul.f32 0.125, %v2944_v40 }
0x1966   :  { %v2956_v12 = vsel %vm2955_vm4, %v2946_v11, %v2954_v10 }
0x1967   :  { %3427 = vmatmul.mubr.msk.f32.vlgmr.msra.gmra.mrb[28].mxu1 %vm163_vm0, %v2956_v12 }
0x1968   :  { %4018 = vmatprep.mubr.msk.f32.mxu1 %vm4558_vm1, %v4557_v38  ;;  %v3075_v38 = vld [vmem:[%s5458_s13 + $0x70] sm:$0xff]  ;;  %4279 = vmatpush3.bf16.msra.mxu1 %v4278_v26 }
0x1969   :  { %v4275_v21 = vpack.c.bf16 %v3076_v20, %v3075_v38  ;;  %4280 = vmatprep.subr.bf16.mxu1 %v4559_v25 }
0x196b   :  { %4276 = vmatpush3.bf16.msra.mxu0 %v4275_v21 }
0x196c   :  { %4282 = vmatpush3.bf16.msra.mxu1 %v4281_v17 }
0x196d   :  { %4283 = vmatprep.subr.bf16.mxu1 %v4559_v25 }
0x1970   :  { %4285 = vmatpush3.bf16.msra.mxu1 %v4284_v31 }
0x1971   :  { %4286 = vmatprep.subr.bf16.mxu1 %v4559_v25 }
0x1974   :  { %4288 = vmatpush3.bf16.msra.mxu1 %v4287_v34 }
0x1975   :  { %4289 = vmatprep.subr.bf16.mxu1 %v4559_v25 }
0x1978   :  { %4291 = vmatpush3.bf16.msra.mxu1 %v4290_v37 }
0x1979   :  { %4292 = vmatprep.subr.bf16.mxu1 %v4559_v25 }
0x197c   :  { %4294 = vmatpush3.bf16.msra.mxu1 %v4293_v43 }
0x197d   :  { %4295 = vmatprep.subr.bf16.mxu1 %v4559_v25 }
0x1980   :  { %4297 = vmatpush3.bf16.msra.mxu1 %v4296_v60 }
0x1981   :  { %4298 = vmatprep.subr.bf16.mxu1 %v4559_v25 }
0x1984   :  { %4300 = vmatpush3.bf16.msra.mxu1 %v4299_v63 }
0x1a3a   :  { %v3054_v52 = vpop.f32.mrb[28].mxu1 }
0x1a3b   :  { %v3055_v53 = vadd.f32 %v3054_v52, %v2978_v50  ;;  %v3056_v54 = vpop.f32.mrb[29].mxu1 }
0x1a3c   :  { %v3057_v55 = vadd.f32 %v3056_v54, %v2982_v51 }
0x1a3d   :  { %v3059_v57 = vmax.f32 %v3055_v53, 0.0 }
0x1a3e   :  { %v3060_v56 = vmax.f32 %v3057_v55, 0.0 }
0x1a40   :  { %3164 = vmatprep.mubr.f32.mxu0 %v3060_v56 }
0x1a41   :  { %3165 = vmatmul.mubr.f32.vlgmr.msra.gmra.mrb[30].mxu0 %v3059_v57 }
0x1b14   :  { %v3630_v30 = vpop.f32.mrb[30].mxu0 }
0x1b15   :  { %v3631_v1 = vpop.f32.mrb[31].mxu0 }
0x1b16   :  { %v3632_v3 = vadd.f32 %v3631_v1, %v3630_v30 }
0x1b18   :  { %v3167_v2 = vadd.f32 %v3632_v3, %v3428_v0 }
0x1b1a   :  { %v3170_v4 = vmax.f32 %v3167_v2, 0.0 }
0x1b1c   :  { %4019 = vmatmul.mubr.f32.vlgmr.msra.gmra.mrb[30].mxu1 %v3170_v4 }
0x1bef   :  { %v3260_v39 = vpop.f32.mrb[30].mxu1 }
0x1bf0   :  { %v3261_v6 = vadd.f32 %v3429_v5, %v3260_v39  ;;  %v4020_v47 = vpop.f32.mrb[31].mxu1 }
0x1bf2   :  { %3265 = vst.msk [vmem:[#allocation14] sm:$0x3] %vm3264_vm5, %v3261_v6 }
0x1bf3   :  { %4525 = shalt.err (!%p4522_p4)
}
0x1bf4   :  { %s4526_s13 = scalar_lea.hbm %s5462_s17, 32 }
0x1bf5   :  { %p4527_p5 = scmp.ne.s32.totalorder %s5462_s17, %s4526_s13  ;;  %p4530_p6 = scmp.lt.u32.totalorder %s4526_s13, %s5462_s17 }
0x1bf7   :  { %p4532_p7 = pnand %p4530_p6, %p4527_p5 }
0x1bf9   :  { %4535 = shalt.err (!%p4532_p7)
}
0x1bfa   :  { %3275 = dma.vmem_to_hbm [thread:$0]  %s3273_s30, 32, %s5462_s17, [#allocation4]  }
0x1bfb   :  { %4544 = dma.done.wait [#allocation4], 32  }
0x1bfc   :  { %4545 = vsyncadd [#allocation4], 4294967264 }
0x1bfd   :  { %3279 = vsyncpa [#allocation3], 1 }
0x1bfe   :  { %3280 = vsyncpa [#allocation6], 1 }
0x1bff   :  { %3281 = vsyncpa [#allocation9], 1 }
0x1c00   :  { %3282 = vsyncpa [#allocation12], 1 }
0x1c01   :  { %3283 = vsyncpa [#allocation4], 1 }

</bundles_post_ra>
